<compile_context>
chip_gen: v6e
topology: v6e:2x2x1
jax: 0.10.0
libtpu: 0.0.40
codegen_flags: <defaults>
</compile_context>

<pallas_src>
import functools

import jax
import jax.numpy as jnp
from jax import lax
from jax.experimental import pallas as pl
from jax.experimental.pallas import tpu as pltpu


def _round_up(v, m):
    return (v + m - 1) // m * m


_VMEM_LIMIT_CACHE = [None]


def _vmem_limit():
    """Scoped-VMEM budget: <= 3/4 of physical VMEM, capped at 96 MiB."""
    if _VMEM_LIMIT_CACHE[0] is None:
        try:
            cap = pltpu.get_tpu_info().vmem_capacity_bytes
        except Exception:  # pragma: no cover - conservative fallback
            cap = 128 * 1024 * 1024
        _VMEM_LIMIT_CACHE[0] = int(min(cap * 3 // 4, 96 * 1024 * 1024))
    return _VMEM_LIMIT_CACHE[0]


# ---------------------------------------------------------------------------
# Pallas kernel 1: fused 3x3 conv + bias (+ ReLU), NCHW, bf16 MXU, f32 acc.
# Grid = (batch, output-row tiles).  One K = n_src*9*Cin dot per output row.
# ---------------------------------------------------------------------------
def _conv3x3_kernel(*refs, n_src, taps, th, rows_in, w_out, relu):
    """refs = (src_0..src_{n_src-1}, w, b, out)

    src_s : (1, G, Cin, Hs, Ws) bf16   full padded per-batch source (resident
                                       across the row-tile grid axis)
    w     : (Npad, n_src*9*Cin) bf16   tap-major / source / channel packed
    b     : (Npad, 1) f32
    out   : (1, Npad, TH, Wout)
    """
    x_refs = refs[:n_src]
    w_ref, b_ref, o_ref = refs[n_src], refs[n_src + 1], refs[n_src + 2]

    rt = pl.program_id(1)
    r0 = pl.multiple_of(rt * th, th)            # sublane-aligned row window

    # One dynamic (sublane) row-window load per (source, phase group), then at
    # most 3 static lane shifts per group - not 9 arbitrary lane rotates.
    groups = sorted({g for (g, _, _) in taps})
    wins = {}
    for s in range(n_src):
        for g in groups:
            wins[(s, g)] = x_refs[s][0, g, :, pl.ds(r0, rows_in), :]
    shifted = {}
    for (g, _, dc) in taps:
        for s in range(n_src):
            if (s, g, dc) not in shifted:
                shifted[(s, g, dc)] = wins[(s, g)][:, :, dc:dc + w_out]

    wmat = w_ref[...]
    bias = b_ref[...]
    for r in range(th):                         # static unroll over output rows
        # im2col slab for this output row: (n_src*9*Cin, Wout) bf16
        slab = jnp.concatenate(
            [shifted[(s, g, dc)][:, r + dr, :]
             for (g, dr, dc) in taps for s in range(n_src)], axis=0)
        acc = jnp.dot(wmat, slab, preferred_element_type=jnp.float32)
        acc = acc + bias
        if relu:
            acc = jnp.maximum(acc, 0.0)
        o_ref[0, :, r, :] = acc.astype(o_ref.dtype)


def _batch_src_map(b, rt, *, off):
    return (b + off, 0, 0, 0, 0)


def _conv3x3_call(srcs, batch_offsets, wt, bt, *, grid_b, th, n_rt, rows_in,
                  w_out, taps, relu, out_dtype):
    n_src = len(srcs)
    _, g, cin, hs, ws = srcs[0].shape
    npad, k = wt.shape
    in_specs = [pl.BlockSpec((1, g, cin, hs, ws),
                             functools.partial(_batch_src_map, off=off))
                for off in batch_offsets]
    in_specs += [pl.BlockSpec((npad, k), lambda b, rt: (0, 0)),
                 pl.BlockSpec((npad, 1), lambda b, rt: (0, 0))]
    return pl.pallas_call(
        functools.partial(_conv3x3_kernel, n_src=n_src, taps=taps, th=th,
                          rows_in=rows_in, w_out=w_out, relu=relu),
        out_shape=jax.ShapeDtypeStruct((grid_b, npad, n_rt * th, w_out),
                                       out_dtype),
        grid=(grid_b, n_rt),
        in_specs=in_specs,
        out_specs=pl.BlockSpec((1, npad, th, w_out),
                               lambda b, rt: (b, 0, rt, 0)),
        compiler_params=pltpu.CompilerParams(
            dimension_semantics=("parallel", "arbitrary"),
            vmem_limit_bytes=_vmem_limit()),
    )(*srcs, wt, bt)


def conv3x3_stride2_relu(x, w, b, *, row_tile=8):
    """3x3 stride-2 conv + bias + ReLU, NCHW.  Output keeps the zero-padded
    Cout channels (Npad = round_up(Cout, 16) for bf16 sublane packing) and is
    emitted in bf16 so the next conv consumes it without any trim/cast pass."""
    Bn, Cin, H, W = x.shape
    assert H % 2 == 0 and W % 2 == 0
    Cout = w.shape[0]
    Npad = _round_up(Cout, 16)
    Ho, Wo = H // 2, W // 2
    th = min(row_tile, Ho)
    n_rt = pl.cdiv(Ho, th)
    Ho_pad = n_rt * th

    # tap-major packed weight: wt[co, (di*3+dj)*Cin + ci] = w[co, ci, di, dj]
    wt = jnp.transpose(w, (0, 2, 3, 1)).reshape(Cout, 9 * Cin)
    wt = jnp.pad(wt, ((0, Npad - Cout), (0, 0))).astype(jnp.bfloat16)
    bt = jnp.pad(b, (0, Npad - Cout)).reshape(Npad, 1).astype(jnp.float32)

    # stride-2 source: pad 1 on each border + space-to-depth phase split so the
    # stride-2 taps become (<=1 row, <=1 lane) shifted slices of 4 phase planes.
    xp = jnp.pad(x, ((0, 0), (0, 0), (1, 1), (1, 1)))
    phases = [xp[:, :, pr::2, pc::2] for pr in (0, 1) for pc in (0, 1)]
    src = jnp.stack(phases, axis=1)                # (B, 4, Cin, Ho+1, Wo+1)
    if Ho_pad > Ho:
        src = jnp.pad(src, ((0, 0), (0, 0), (0, 0), (0, Ho_pad - Ho), (0, 0)))
    src = src.astype(jnp.bfloat16)

    taps = tuple(((di % 2) * 2 + (dj % 2), di // 2, dj // 2)
                 for di in range(3) for dj in range(3))
    out = _conv3x3_call([src], [0], wt, bt, grid_b=Bn, th=th, n_rt=n_rt,
                        rows_in=th + 1, w_out=Wo, taps=taps, relu=True,
                        out_dtype=jnp.bfloat16)
    if Ho_pad > Ho:
        out = out[:, :, :Ho, :]
    return out                                     # (B, Npad, Ho, Wo) bf16


def conv3x3_stride1_offset(feat, b_half, w, b, fpn, *, row_tile=8):
    """3x3 stride-1 conv over cat([feat[:b_half], feat[b_half:]], channel)
    WITHOUT materializing the concat: warp / fix halves are two views of the
    same (padded-channel, bf16) pyramid output."""
    B2, Cin_pad, Hf, Wf = feat.shape
    Cout = w.shape[0]
    Npad = _round_up(Cout, 8)
    Ho, Wo = Hf, Wf
    th = min(row_tile, Ho)
    n_rt = pl.cdiv(Ho, th)
    Ho_pad = n_rt * th

    def _pack_half(wh):                            # wh: (Cout, fpn, 3, 3)
        wk = jnp.transpose(wh, (0, 2, 3, 1))       # (Cout, 3, 3, fpn)
        return jnp.pad(wk, ((0, 0), (0, 0), (0, 0), (0, Cin_pad - wh.shape[1])))

    wk = jnp.concatenate([_pack_half(w[:, :fpn]), _pack_half(w[:, fpn:])],
                         axis=-1)                  # (Cout, 3, 3, 2*Cin_pad)
    wt = wk.reshape(Cout, 9 * 2 * Cin_pad)
    wt = jnp.pad(wt, ((0, Npad - Cout), (0, 0))).astype(jnp.bfloat16)
    bt = jnp.pad(b, (0, Npad - Cout)).reshape(Npad, 1).astype(jnp.float32)

    featp = jnp.pad(feat, ((0, 0), (0, 0), (1, Ho_pad - Hf + 1), (1, 1)))
    src = featp.reshape(B2, 1, Cin_pad, Ho_pad + 2, Wf + 2)

    taps = tuple((0, di, dj) for di in range(3) for dj in range(3))
    out = _conv3x3_call([src, src], [0, b_half], wt, bt, grid_b=b_half, th=th,
                        n_rt=n_rt, rows_in=th + 2, w_out=Wo, taps=taps,
                        relu=False, out_dtype=jnp.float32)
    return out[:, :Cout, :Ho, :]                   # (B, Cout, Ho, Wo) f32


# ---------------------------------------------------------------------------
# Pallas kernel 2: 2x bilinear upsample (align_corners=False), channel-first.
# Grid over the B*C slices (parallel); two small MXU dots per slice.
# ---------------------------------------------------------------------------
def _upsample2x_kernel(x_ref, uh_ref, uwt_ref, o_ref):
    t = jnp.dot(uh_ref[...], x_ref[0], preferred_element_type=jnp.float32)
    o_ref[0] = jnp.dot(t, uwt_ref[...], preferred_element_type=jnp.float32)


def _upsample_matrix(n_in, scale=2):
    n_out = n_in * scale
    dst = jnp.arange(n_out, dtype=jnp.float32)
    # PyTorch area_pixel_compute_source_index (align_corners=False)
    src = jnp.maximum((dst + 0.5) / scale - 0.5, 0.0)
    i0 = jnp.floor(src).astype(jnp.int32)
    frac = src - i0.astype(jnp.float32)
    i1 = jnp.minimum(i0 + 1, n_in - 1)
    rows = jnp.arange(n_out)
    u = jnp.zeros((n_out, n_in), jnp.float32)
    u = u.at[rows, i0].add(1.0 - frac)
    u = u.at[rows, i1].add(frac)
    return u


def upsample2x_bilinear_cf(x_cf):                  # (B, C, h, w) -> (B, C, 2h, 2w)
    B, C, h, w = x_cf.shape
    N = B * C
    X = x_cf.reshape(N, h, w).astype(jnp.float32)  # metadata-only reshape
    uh = _upsample_matrix(h)                       # (2h, h)
    uwt = _upsample_matrix(w).T                    # (w, 2w)
    out = pl.pallas_call(
        _upsample2x_kernel,
        out_shape=jax.ShapeDtypeStruct((N, 2 * h, 2 * w), jnp.float32),
        grid=(N,),
        in_specs=[pl.BlockSpec((1, h, w), lambda n: (n, 0, 0)),
                  pl.BlockSpec((2 * h, h), lambda n: (0, 0)),
                  pl.BlockSpec((w, 2 * w), lambda n: (0, 0))],
        out_specs=pl.BlockSpec((1, 2 * h, 2 * w), lambda n: (n, 0, 0)),
        compiler_params=pltpu.CompilerParams(
            dimension_semantics=("parallel",),
            vmem_limit_bytes=_vmem_limit()),
    )(X, uh, uwt)
    return out.reshape(B, C, 2 * h, 2 * w)


# ---------------------------------------------------------------------------
# Pallas kernel 3: grid_sample (bilinear, border, align_corners=False).
# Separable selection: columns mixed on the MXU (bf16), rows applied as a VPU
# blend + sublane reduction.  Tiled over (batch, 256-pixel tiles).
# ---------------------------------------------------------------------------
def _grid_sample_kernel(lf_ref, img_ref, o_ref, *, c, hin, win):
    gx = lf_ref[0, 0:1, :]                         # (1, TP) normalized x
    gy = lf_ref[0, 1:2, :]                         # (1, TP) normalized y
    # align_corners=False unnormalization + border clamp (PyTorch 'border').
    ix = jnp.clip((gx + 1.0) * (win * 0.5) - 0.5, 0.0, win - 1.0)
    iy = jnp.clip((gy + 1.0) * (hin * 0.5) - 0.5, 0.0, hin - 1.0)
    x0 = jnp.floor(ix)
    y0 = jnp.floor(iy)
    fx = ix - x0
    fy = iy - y0
    x0i = x0.astype(jnp.int32)
    y0i = y0.astype(jnp.int32)
    x1i = jnp.minimum(x0i + 1, win - 1)
    y1i = jnp.minimum(y0i + 1, hin - 1)

    tp = gx.shape[1]
    wcols = lax.broadcasted_iota(jnp.int32, (win, tp), 0)
    cx = (jnp.where(wcols == x0i, 1.0 - fx, 0.0)
          + jnp.where(wcols == x1i, fx, 0.0))      # (Win, TP) column weights
    hrows = lax.broadcasted_iota(jnp.int32, (hin, tp), 0)
    ry = (jnp.where(hrows == y0i, 1.0 - fy, 0.0)
          + jnp.where(hrows == y1i, fy, 0.0))      # (Hin, TP) row weights

    a = jnp.dot(img_ref[0], cx.astype(jnp.bfloat16),
                preferred_element_type=jnp.float32)  # (C*Hin, TP) f32
    rows_out = []
    for ci in range(c):                            # small static channel loop
        blk = a[ci * hin:(ci + 1) * hin, :] * ry
        rows_out.append(jnp.sum(blk, axis=0, keepdims=True))
    o_ref[0] = jnp.concatenate(rows_out, axis=0)   # (C, TP), already NCHW order


def grid_sample_bilinear_border(img_nchw, last_flow_cf, *, pix_tile=256):
    # img: (>=B, C, Hin, Win) NCHW; last_flow_cf: (B, 2, Hout, Wout), ch0=x, ch1=y
    B = last_flow_cf.shape[0]
    C, Hin, Win = img_nchw.shape[1:]
    Hout, Wout = last_flow_cf.shape[2:]
    P = Hout * Wout
    tile = min(pix_tile, _round_up(P, 128))
    P_pad = _round_up(P, tile)

    img2 = img_nchw[:B].reshape(B, C * Hin, Win).astype(jnp.bfloat16)
    lf = last_flow_cf.reshape(B, 2, P).astype(jnp.float32)
    if P_pad > P:
        lf = jnp.pad(lf, ((0, 0), (0, 0), (0, P_pad - P)))

    out = pl.pallas_call(
        functools.partial(_grid_sample_kernel, c=C, hin=Hin, win=Win),
        out_shape=jax.ShapeDtypeStruct((B, C, P_pad), jnp.float32),
        grid=(B, P_pad // tile),
        in_specs=[pl.BlockSpec((1, 2, tile), lambda b, t: (b, 0, t)),
                  pl.BlockSpec((1, C * Hin, Win), lambda b, t: (b, 0, 0))],
        out_specs=pl.BlockSpec((1, C, tile), lambda b, t: (b, 0, t)),
        compiler_params=pltpu.CompilerParams(
            dimension_semantics=("parallel", "arbitrary"),
            vmem_limit_bytes=_vmem_limit()),
    )(lf, img2)
    if P_pad > P:
        out = out[:, :, :P]
    return out.reshape(B, C, Hout, Wout)


# ---------------------------------------------------------------------------
# apply_offset (PF-AFN style) -> channel-first normalized grid (tiny XLA glue)
# ---------------------------------------------------------------------------
def apply_offset_cf(offset):                       # (B, 2, h, w) pixel offsets
    B, _, H, W = offset.shape
    ys, xs = jnp.meshgrid(jnp.arange(H, dtype=jnp.float32),
                          jnp.arange(W, dtype=jnp.float32), indexing="ij")
    gx = xs[None, ...] + offset[:, 0]
    gy = ys[None, ...] + offset[:, 1]
    # PF-AFN normalization ((size-1)/2); the grid_sample kernel then uses the
    # PyTorch-default align_corners=False unnormalization, like PF-AFN itself.
    gx = gx / ((W - 1.0) / 2.0) - 1.0
    gy = gy / ((H - 1.0) / 2.0) - 1.0
    return jnp.stack([gx, gy], axis=1)             # (B, 2, h, w), ch0=x, ch1=y


# ---------------------------------------------------------------------------
# _Baseline.forward (symmetry=True path), NCHW end-to-end
# ---------------------------------------------------------------------------
def baseline_forward(x, params):
    B = x.shape[0] // 2
    fpn = params["w_off"].shape[1] // 2

    # Shared pyramid (symmetry=True): Conv3x3 stride 2 + ReLU on both halves.
    feat = conv3x3_stride2_relu(x, params["w_pyr"], params["b_pyr"])

    # Offset head on cat([feature_warp[0], feature_fix[0]], dim=1), consumed as
    # two views of `feat` (no XLA concat / channel-trim pass in between).
    flow = conv3x3_stride1_offset(feat, B, params["w_off"], params["b_off"], fpn)
    delta_list = [flow]

    grid_cf = apply_offset_cf(flow)                # (B, 2, h, w) normalized
    last_flow = upsample2x_bilinear_cf(grid_cf)    # (B, 2, H, W)

    x_warp = grid_sample_bilinear_border(x, last_flow)   # warps x[:B]
    return x_warp, last_flow, delta_list


if __name__ == "__main__":
    # small shapes: pairs of B=2 images -> x has batch 2*B = 4, C=4, 16x16
    B, C, H, W = 2, 4, 16, 16
    FPN = 8  # fpn_dim

    key = jax.random.PRNGKey(0)
    kx, k1, k2, k3, k4 = jax.random.split(key, 5)
    x = jax.random.normal(kx, (2 * B, C, H, W), jnp.float32)

    params = {
        "w_pyr": 0.1 * jax.random.normal(k1, (FPN, C, 3, 3), jnp.float32),
        "b_pyr": 0.05 * jax.random.normal(k2, (FPN,), jnp.float32),
        "w_off": 0.1 * jax.random.normal(k3, (2, 2 * FPN, 3, 3), jnp.float32),
        "b_off": 0.05 * jax.random.normal(k4, (2,), jnp.float32),
    }

    fwd = jax.jit(baseline_forward)
    x_warp, last_flow, delta_list = fwd(x, params)
    jax.block_until_ready((x_warp, last_flow, delta_list))

    assert x_warp.shape == (B, C, H, W)
    assert last_flow.shape == (B, 2, H, W)
    assert delta_list[0].shape == (B, 2, H // 2, W // 2)
    assert bool(jnp.isfinite(x_warp).all())
    assert bool(jnp.isfinite(last_flow).all())
    assert bool(jnp.isfinite(delta_list[0]).all())

    print("KERNEL_OK")
</pallas_src>

<mosaic_0001>
module attributes {stable_mosaic.version = 11 : i64} {
  func.func private @main(%arg0: i32) attributes {dimension_semantics = [#tpu.dimension_semantics<core_parallel>], iteration_bounds = array<i64: 2>, tpu.core_type = #tpu.core_type<sc_scalar_subcore>, window_params = []} {
    return
  }
}

module attributes {stable_mosaic.version = 11 : i64} {
  func.func private @main(%arg0: i32) attributes {dimension_semantics = [#tpu.dimension_semantics<core_parallel>], iteration_bounds = array<i64: 2>, tpu.core_type = #tpu.core_type<sc_scalar_subcore>, window_params = []} {
    return
  }
}

module attributes {stable_mosaic.version = 11 : i64} {
  func.func @_conv3x3_kernel(%arg0: i32, %arg1: i32, %arg2: memref<1x4x4x9x9xbf16, #tpu.memory_space<vmem>>, %arg3: memref<16x36xbf16, #tpu.memory_space<vmem>>, %arg4: memref<16x1xf32, #tpu.memory_space<vmem>>, %arg5: memref<1x16x8x8xbf16, #tpu.memory_space<vmem>>) attributes {dimension_semantics = [#tpu.dimension_semantics<parallel>, #tpu.dimension_semantics<arbitrary>], iteration_bounds = array<i64: 4, 1>, scalar_prefetch = 0 : i64, scratch_operands = 0 : i64, tpu.core_type = #tpu.core_type<tc>, window_params = [{transform_indices = @transform_0, window_bounds = array<i64: 1, 4, 4, 9, 9>}, {pipeline_mode = #tpu.pipeline_mode<synchronous>, transform_indices = @transform_1, window_bounds = array<i64: 16, 36>}, {pipeline_mode = #tpu.pipeline_mode<synchronous>, transform_indices = @transform_2, window_bounds = array<i64: 16, 1>}, {transform_indices = @transform_3, window_bounds = array<i64: 1, 16, 8, 8>}]} {
    %c8_i32 = arith.constant 8 : i32
    %0 = arith.muli %arg1, %c8_i32 : i32
    %1 = tpu.assume_multiple %0, 8 : i32
    %c0 = arith.constant 0 : index
    %c0_0 = arith.constant 0 : index
    %c0_1 = arith.constant 0 : index
    %2 = arith.index_cast %1 : i32 to index
    %c0_2 = arith.constant 0 : index
    %3 = vector.load %arg2[%c0, %c0_0, %c0_1, %2, %c0_2] : memref<1x4x4x9x9xbf16, #tpu.memory_space<vmem>>, vector<1x1x4x9x9xbf16>
    %4 = vector.shape_cast %3 : vector<1x1x4x9x9xbf16> to vector<4x9x9xbf16>
    %c0_3 = arith.constant 0 : index
    %c1 = arith.constant 1 : index
    %c0_4 = arith.constant 0 : index
    %5 = arith.index_cast %1 : i32 to index
    %c0_5 = arith.constant 0 : index
    %6 = vector.load %arg2[%c0_3, %c1, %c0_4, %5, %c0_5] : memref<1x4x4x9x9xbf16, #tpu.memory_space<vmem>>, vector<1x1x4x9x9xbf16>
    %7 = vector.shape_cast %6 : vector<1x1x4x9x9xbf16> to vector<4x9x9xbf16>
    %c0_6 = arith.constant 0 : index
    %c2 = arith.constant 2 : index
    %c0_7 = arith.constant 0 : index
    %8 = arith.index_cast %1 : i32 to index
    %c0_8 = arith.constant 0 : index
    %9 = vector.load %arg2[%c0_6, %c2, %c0_7, %8, %c0_8] : memref<1x4x4x9x9xbf16, #tpu.memory_space<vmem>>, vector<1x1x4x9x9xbf16>
    %10 = vector.shape_cast %9 : vector<1x1x4x9x9xbf16> to vector<4x9x9xbf16>
    %c0_9 = arith.constant 0 : index
    %c3 = arith.constant 3 : index
    %c0_10 = arith.constant 0 : index
    %11 = arith.index_cast %1 : i32 to index
    %c0_11 = arith.constant 0 : index
    %12 = vector.load %arg2[%c0_9, %c3, %c0_10, %11, %c0_11] : memref<1x4x4x9x9xbf16, #tpu.memory_space<vmem>>, vector<1x1x4x9x9xbf16>
    %13 = vector.shape_cast %12 : vector<1x1x4x9x9xbf16> to vector<4x9x9xbf16>
    %14 = vector.extract_strided_slice %4 {offsets = [0, 0, 0], sizes = [4, 9, 8], strides = [1, 1, 1]} : vector<4x9x9xbf16> to vector<4x9x8xbf16>
    %15 = vector.extract_strided_slice %7 {offsets = [0, 0, 0], sizes = [4, 9, 8], strides = [1, 1, 1]} : vector<4x9x9xbf16> to vector<4x9x8xbf16>
    %16 = vector.extract_strided_slice %4 {offsets = [0, 0, 1], sizes = [4, 9, 8], strides = [1, 1, 1]} : vector<4x9x9xbf16> to vector<4x9x8xbf16>
    %17 = vector.extract_strided_slice %10 {offsets = [0, 0, 0], sizes = [4, 9, 8], strides = [1, 1, 1]} : vector<4x9x9xbf16> to vector<4x9x8xbf16>
    %18 = vector.extract_strided_slice %13 {offsets = [0, 0, 0], sizes = [4, 9, 8], strides = [1, 1, 1]} : vector<4x9x9xbf16> to vector<4x9x8xbf16>
    %19 = vector.extract_strided_slice %10 {offsets = [0, 0, 1], sizes = [4, 9, 8], strides = [1, 1, 1]} : vector<4x9x9xbf16> to vector<4x9x8xbf16>
    %c0_12 = arith.constant 0 : index
    %c0_13 = arith.constant 0 : index
    %20 = vector.load %arg3[%c0_12, %c0_13] : memref<16x36xbf16, #tpu.memory_space<vmem>>, vector<16x36xbf16>
    %c0_14 = arith.constant 0 : index
    %c0_15 = arith.constant 0 : index
    %21 = vector.load %arg4[%c0_14, %c0_15] : memref<16x1xf32, #tpu.memory_space<vmem>>, vector<16x1xf32>
    %22 = vector.extract_strided_slice %14 {offsets = [0, 0, 0], sizes = [4, 1, 8], strides = [1, 1, 1]} : vector<4x9x8xbf16> to vector<4x1x8xbf16>
    %23 = vector.shape_cast %22 : vector<4x1x8xbf16> to vector<4x8xbf16>
    %24 = vector.extract_strided_slice %15 {offsets = [0, 0, 0], sizes = [4, 1, 8], strides = [1, 1, 1]} : vector<4x9x8xbf16> to vector<4x1x8xbf16>
    %25 = vector.shape_cast %24 : vector<4x1x8xbf16> to vector<4x8xbf16>
    %26 = vector.extract_strided_slice %16 {offsets = [0, 0, 0], sizes = [4, 1, 8], strides = [1, 1, 1]} : vector<4x9x8xbf16> to vector<4x1x8xbf16>
    %27 = vector.shape_cast %26 : vector<4x1x8xbf16> to vector<4x8xbf16>
    %28 = vector.extract_strided_slice %17 {offsets = [0, 0, 0], sizes = [4, 1, 8], strides = [1, 1, 1]} : vector<4x9x8xbf16> to vector<4x1x8xbf16>
    %29 = vector.shape_cast %28 : vector<4x1x8xbf16> to vector<4x8xbf16>
    %30 = vector.extract_strided_slice %18 {offsets = [0, 0, 0], sizes = [4, 1, 8], strides = [1, 1, 1]} : vector<4x9x8xbf16> to vector<4x1x8xbf16>
    %31 = vector.shape_cast %30 : vector<4x1x8xbf16> to vector<4x8xbf16>
    %32 = vector.extract_strided_slice %19 {offsets = [0, 0, 0], sizes = [4, 1, 8], strides = [1, 1, 1]} : vector<4x9x8xbf16> to vector<4x1x8xbf16>
    %33 = vector.shape_cast %32 : vector<4x1x8xbf16> to vector<4x8xbf16>
    %34 = vector.extract_strided_slice %14 {offsets = [0, 1, 0], sizes = [4, 1, 8], strides = [1, 1, 1]} : vector<4x9x8xbf16> to vector<4x1x8xbf16>
    %35 = vector.shape_cast %34 : vector<4x1x8xbf16> to vector<4x8xbf16>
    %36 = vector.extract_strided_slice %15 {offsets = [0, 1, 0], sizes = [4, 1, 8], strides = [1, 1, 1]} : vector<4x9x8xbf16> to vector<4x1x8xbf16>
    %37 = vector.shape_cast %36 : vector<4x1x8xbf16> to vector<4x8xbf16>
    %38 = vector.extract_strided_slice %16 {offsets = [0, 1, 0], sizes = [4, 1, 8], strides = [1, 1, 1]} : vector<4x9x8xbf16> to vector<4x1x8xbf16>
    %39 = vector.shape_cast %38 : vector<4x1x8xbf16> to vector<4x8xbf16>
    %40 = tpu.concatenate %23, %25, %27, %29, %31, %33, %35, %37, %39 in 0 : vector<4x8xbf16>, vector<4x8xbf16>, vector<4x8xbf16>, vector<4x8xbf16>, vector<4x8xbf16>, vector<4x8xbf16>, vector<4x8xbf16>, vector<4x8xbf16>, vector<4x8xbf16> -> vector<36x8xbf16>
    %cst = arith.constant dense<0.000000e+00> : vector<16x8xf32>
    %41 = tpu.matmul %20, %40, %cst {dimension_numbers = #tpu.dot_dimension_numbers<[1], [0], [0], [1], [0, 0, 1, 1], [], []>} : vector<16x36xbf16>, vector<36x8xbf16>, vector<16x8xf32> -> vector<16x8xf32>
    %42 = vector.broadcast %21 : vector<16x1xf32> to vector<16x8xf32>
    %43 = arith.addf %41, %42 : vector<16x8xf32>
    %cst_16 = arith.constant 0.000000e+00 : f32
    %44 = vector.broadcast %cst_16 : f32 to vector<16x8xf32>
    %45 = arith.maximumf %43, %44 : vector<16x8xf32>
    %46 = arith.truncf %45 : vector<16x8xf32> to vector<16x8xbf16>
    %c0_17 = arith.constant 0 : index
    %c0_18 = arith.constant 0 : index
    %c0_19 = arith.constant 0 : index
    %c0_20 = arith.constant 0 : index
    %47 = vector.load %arg5[%c0_17, %c0_18, %c0_19, %c0_20] : memref<1x16x8x8xbf16, #tpu.memory_space<vmem>>, vector<1x16x1x8xbf16>
    %48 = vector.shape_cast %47 : vector<1x16x1x8xbf16> to vector<16x8xbf16>
    %49 = vector.shape_cast %46 : vector<16x8xbf16> to vector<1x16x1x8xbf16>
    tpu.vector_store %arg5[%c0_17, %c0_18, %c0_19, %c0_20], %49 {strides = array<i32>} : memref<1x16x8x8xbf16, #tpu.memory_space<vmem>>, vector<1x16x1x8xbf16>,
    %50 = vector.extract_strided_slice %14 {offsets = [0, 1, 0], sizes = [4, 1, 8], strides = [1, 1, 1]} : vector<4x9x8xbf16> to vector<4x1x8xbf16>
    %51 = vector.shape_cast %50 : vector<4x1x8xbf16> to vector<4x8xbf16>
    %52 = vector.extract_strided_slice %15 {offsets = [0, 1, 0], sizes = [4, 1, 8], strides = [1, 1, 1]} : vector<4x9x8xbf16> to vector<4x1x8xbf16>
    %53 = vector.shape_cast %52 : vector<4x1x8xbf16> to vector<4x8xbf16>
    %54 = vector.extract_strided_slice %16 {offsets = [0, 1, 0], sizes = [4, 1, 8], strides = [1, 1, 1]} : vector<4x9x8xbf16> to vector<4x1x8xbf16>
    %55 = vector.shape_cast %54 : vector<4x1x8xbf16> to vector<4x8xbf16>
    %56 = vector.extract_strided_slice %17 {offsets = [0, 1, 0], sizes = [4, 1, 8], strides = [1, 1, 1]} : vector<4x9x8xbf16> to vector<4x1x8xbf16>
    %57 = vector.shape_cast %56 : vector<4x1x8xbf16> to vector<4x8xbf16>
    %58 = vector.extract_strided_slice %18 {offsets = [0, 1, 0], sizes = [4, 1, 8], strides = [1, 1, 1]} : vector<4x9x8xbf16> to vector<4x1x8xbf16>
    %59 = vector.shape_cast %58 : vector<4x1x8xbf16> to vector<4x8xbf16>
    %60 = vector.extract_strided_slice %19 {offsets = [0, 1, 0], sizes = [4, 1, 8], strides = [1, 1, 1]} : vector<4x9x8xbf16> to vector<4x1x8xbf16>
    %61 = vector.shape_cast %60 : vector<4x1x8xbf16> to vector<4x8xbf16>
    %62 = vector.extract_strided_slice %14 {offsets = [0, 2, 0], sizes = [4, 1, 8], strides = [1, 1, 1]} : vector<4x9x8xbf16> to vector<4x1x8xbf16>
    %63 = vector.shape_cast %62 : vector<4x1x8xbf16> to vector<4x8xbf16>
    %64 = vector.extract_strided_slice %15 {offsets = [0, 2, 0], sizes = [4, 1, 8], strides = [1, 1, 1]} : vector<4x9x8xbf16> to vector<4x1x8xbf16>
    %65 = vector.shape_cast %64 : vector<4x1x8xbf16> to vector<4x8xbf16>
    %66 = vector.extract_strided_slice %16 {offsets = [0, 2, 0], sizes = [4, 1, 8], strides = [1, 1, 1]} : vector<4x9x8xbf16> to vector<4x1x8xbf16>
    %67 = vector.shape_cast %66 : vector<4x1x8xbf16> to vector<4x8xbf16>
    %68 = tpu.concatenate %51, %53, %55, %57, %59, %61, %63, %65, %67 in 0 : vector<4x8xbf16>, vector<4x8xbf16>, vector<4x8xbf16>, vector<4x8xbf16>, vector<4x8xbf16>, vector<4x8xbf16>, vector<4x8xbf16>, vector<4x8xbf16>, vector<4x8xbf16> -> vector<36x8xbf16>
    %cst_21 = arith.constant dense<0.000000e+00> : vector<16x8xf32>
    %69 = tpu.matmul %20, %68, %cst_21 {dimension_numbers = #tpu.dot_dimension_numbers<[1], [0], [0], [1], [0, 0, 1, 1], [], []>} : vector<16x36xbf16>, vector<36x8xbf16>, vector<16x8xf32> -> vector<16x8xf32>
    %70 = vector.broadcast %21 : vector<16x1xf32> to vector<16x8xf32>
    %71 = arith.addf %69, %70 : vector<16x8xf32>
    %cst_22 = arith.constant 0.000000e+00 : f32
    %72 = vector.broadcast %cst_22 : f32 to vector<16x8xf32>
    %73 = arith.maximumf %71, %72 : vector<16x8xf32>
    %74 = arith.truncf %73 : vector<16x8xf32> to vector<16x8xbf16>
    %c0_23 = arith.constant 0 : index
    %c0_24 = arith.constant 0 : index
    %c1_25 = arith.constant 1 : index
    %c0_26 = arith.constant 0 : index
    %75 = vector.load %arg5[%c0_23, %c0_24, %c1_25, %c0_26] : memref<1x16x8x8xbf16, #tpu.memory_space<vmem>>, vector<1x16x1x8xbf16>
    %76 = vector.shape_cast %75 : vector<1x16x1x8xbf16> to vector<16x8xbf16>
    %77 = vector.shape_cast %74 : vector<16x8xbf16> to vector<1x16x1x8xbf16>
    tpu.vector_store %arg5[%c0_23, %c0_24, %c1_25, %c0_26], %77 {strides = array<i32>} : memref<1x16x8x8xbf16, #tpu.memory_space<vmem>>, vector<1x16x1x8xbf16>,
    %78 = vector.extract_strided_slice %14 {offsets = [0, 2, 0], sizes = [4, 1, 8], strides = [1, 1, 1]} : vector<4x9x8xbf16> to vector<4x1x8xbf16>
    %79 = vector.shape_cast %78 : vector<4x1x8xbf16> to vector<4x8xbf16>
    %80 = vector.extract_strided_slice %15 {offsets = [0, 2, 0], sizes = [4, 1, 8], strides = [1, 1, 1]} : vector<4x9x8xbf16> to vector<4x1x8xbf16>
    %81 = vector.shape_cast %80 : vector<4x1x8xbf16> to vector<4x8xbf16>
    %82 = vector.extract_strided_slice %16 {offsets = [0, 2, 0], sizes = [4, 1, 8], strides = [1, 1, 1]} : vector<4x9x8xbf16> to vector<4x1x8xbf16>
    %83 = vector.shape_cast %82 : vector<4x1x8xbf16> to vector<4x8xbf16>
    %84 = vector.extract_strided_slice %17 {offsets = [0, 2, 0], sizes = [4, 1, 8], strides = [1, 1, 1]} : vector<4x9x8xbf16> to vector<4x1x8xbf16>
    %85 = vector.shape_cast %84 : vector<4x1x8xbf16> to vector<4x8xbf16>
    %86 = vector.extract_strided_slice %18 {offsets = [0, 2, 0], sizes = [4, 1, 8], strides = [1, 1, 1]} : vector<4x9x8xbf16> to vector<4x1x8xbf16>
    %87 = vector.shape_cast %86 : vector<4x1x8xbf16> to vector<4x8xbf16>
    %88 = vector.extract_strided_slice %19 {offsets = [0, 2, 0], sizes = [4, 1, 8], strides = [1, 1, 1]} : vector<4x9x8xbf16> to vector<4x1x8xbf16>
    %89 = vector.shape_cast %88 : vector<4x1x8xbf16> to vector<4x8xbf16>
    %90 = vector.extract_strided_slice %14 {offsets = [0, 3, 0], sizes = [4, 1, 8], strides = [1, 1, 1]} : vector<4x9x8xbf16> to vector<4x1x8xbf16>
    %91 = vector.shape_cast %90 : vector<4x1x8xbf16> to vector<4x8xbf16>
    %92 = vector.extract_strided_slice %15 {offsets = [0, 3, 0], sizes = [4, 1, 8], strides = [1, 1, 1]} : vector<4x9x8xbf16> to vector<4x1x8xbf16>
    %93 = vector.shape_cast %92 : vector<4x1x8xbf16> to vector<4x8xbf16>
    %94 = vector.extract_strided_slice %16 {offsets = [0, 3, 0], sizes = [4, 1, 8], strides = [1, 1, 1]} : vector<4x9x8xbf16> to vector<4x1x8xbf16>
    %95 = vector.shape_cast %94 : vector<4x1x8xbf16> to vector<4x8xbf16>
    %96 = tpu.concatenate %79, %81, %83, %85, %87, %89, %91, %93, %95 in 0 : vector<4x8xbf16>, vector<4x8xbf16>, vector<4x8xbf16>, vector<4x8xbf16>, vector<4x8xbf16>, vector<4x8xbf16>, vector<4x8xbf16>, vector<4x8xbf16>, vector<4x8xbf16> -> vector<36x8xbf16>
    %cst_27 = arith.constant dense<0.000000e+00> : vector<16x8xf32>
    %97 = tpu.matmul %20, %96, %cst_27 {dimension_numbers = #tpu.dot_dimension_numbers<[1], [0], [0], [1], [0, 0, 1, 1], [], []>} : vector<16x36xbf16>, vector<36x8xbf16>, vector<16x8xf32> -> vector<16x8xf32>
    %98 = vector.broadcast %21 : vector<16x1xf32> to vector<16x8xf32>
    %99 = arith.addf %97, %98 : vector<16x8xf32>
    %cst_28 = arith.constant 0.000000e+00 : f32
    %100 = vector.broadcast %cst_28 : f32 to vector<16x8xf32>
    %101 = arith.maximumf %99, %100 : vector<16x8xf32>
    %102 = arith.truncf %101 : vector<16x8xf32> to vector<16x8xbf16>
    %c0_29 = arith.constant 0 : index
    %c0_30 = arith.constant 0 : index
    %c2_31 = arith.constant 2 : index
    %c0_32 = arith.constant 0 : index
    %103 = vector.load %arg5[%c0_29, %c0_30, %c2_31, %c0_32] : memref<1x16x8x8xbf16, #tpu.memory_space<vmem>>, vector<1x16x1x8xbf16>
    %104 = vector.shape_cast %103 : vector<1x16x1x8xbf16> to vector<16x8xbf16>
    %105 = vector.shape_cast %102 : vector<16x8xbf16> to vector<1x16x1x8xbf16>
    tpu.vector_store %arg5[%c0_29, %c0_30, %c2_31, %c0_32], %105 {strides = array<i32>} : memref<1x16x8x8xbf16, #tpu.memory_space<vmem>>, vector<1x16x1x8xbf16>,
    %106 = vector.extract_strided_slice %14 {offsets = [0, 3, 0], sizes = [4, 1, 8], strides = [1, 1, 1]} : vector<4x9x8xbf16> to vector<4x1x8xbf16>
    %107 = vector.shape_cast %106 : vector<4x1x8xbf16> to vector<4x8xbf16>
    %108 = vector.extract_strided_slice %15 {offsets = [0, 3, 0], sizes = [4, 1, 8], strides = [1, 1, 1]} : vector<4x9x8xbf16> to vector<4x1x8xbf16>
    %109 = vector.shape_cast %108 : vector<4x1x8xbf16> to vector<4x8xbf16>
    %110 = vector.extract_strided_slice %16 {offsets = [0, 3, 0], sizes = [4, 1, 8], strides = [1, 1, 1]} : vector<4x9x8xbf16> to vector<4x1x8xbf16>
    %111 = vector.shape_cast %110 : vector<4x1x8xbf16> to vector<4x8xbf16>
    %112 = vector.extract_strided_slice %17 {offsets = [0, 3, 0], sizes = [4, 1, 8], strides = [1, 1, 1]} : vector<4x9x8xbf16> to vector<4x1x8xbf16>
    %113 = vector.shape_cast %112 : vector<4x1x8xbf16> to vector<4x8xbf16>
    %114 = vector.extract_strided_slice %18 {offsets = [0, 3, 0], sizes = [4, 1, 8], strides = [1, 1, 1]} : vector<4x9x8xbf16> to vector<4x1x8xbf16>
    %115 = vector.shape_cast %114 : vector<4x1x8xbf16> to vector<4x8xbf16>
    %116 = vector.extract_strided_slice %19 {offsets = [0, 3, 0], sizes = [4, 1, 8], strides = [1, 1, 1]} : vector<4x9x8xbf16> to vector<4x1x8xbf16>
    %117 = vector.shape_cast %116 : vector<4x1x8xbf16> to vector<4x8xbf16>
    %118 = vector.extract_strided_slice %14 {offsets = [0, 4, 0], sizes = [4, 1, 8], strides = [1, 1, 1]} : vector<4x9x8xbf16> to vector<4x1x8xbf16>
    %119 = vector.shape_cast %118 : vector<4x1x8xbf16> to vector<4x8xbf16>
    %120 = vector.extract_strided_slice %15 {offsets = [0, 4, 0], sizes = [4, 1, 8], strides = [1, 1, 1]} : vector<4x9x8xbf16> to vector<4x1x8xbf16>
    %121 = vector.shape_cast %120 : vector<4x1x8xbf16> to vector<4x8xbf16>
    %122 = vector.extract_strided_slice %16 {offsets = [0, 4, 0], sizes = [4, 1, 8], strides = [1, 1, 1]} : vector<4x9x8xbf16> to vector<4x1x8xbf16>
    %123 = vector.shape_cast %122 : vector<4x1x8xbf16> to vector<4x8xbf16>
    %124 = tpu.concatenate %107, %109, %111, %113, %115, %117, %119, %121, %123 in 0 : vector<4x8xbf16>, vector<4x8xbf16>, vector<4x8xbf16>, vector<4x8xbf16>, vector<4x8xbf16>, vector<4x8xbf16>, vector<4x8xbf16>, vector<4x8xbf16>, vector<4x8xbf16> -> vector<36x8xbf16>
    %cst_33 = arith.constant dense<0.000000e+00> : vector<16x8xf32>
    %125 = tpu.matmul %20, %124, %cst_33 {dimension_numbers = #tpu.dot_dimension_numbers<[1], [0], [0], [1], [0, 0, 1, 1], [], []>} : vector<16x36xbf16>, vector<36x8xbf16>, vector<16x8xf32> -> vector<16x8xf32>
    %126 = vector.broadcast %21 : vector<16x1xf32> to vector<16x8xf32>
    %127 = arith.addf %125, %126 : vector<16x8xf32>
    %cst_34 = arith.constant 0.000000e+00 : f32
    %128 = vector.broadcast %cst_34 : f32 to vector<16x8xf32>
    %129 = arith.maximumf %127, %128 : vector<16x8xf32>
    %130 = arith.truncf %129 : vector<16x8xf32> to vector<16x8xbf16>
    %c0_35 = arith.constant 0 : index
    %c0_36 = arith.constant 0 : index
    %c3_37 = arith.constant 3 : index
    %c0_38 = arith.constant 0 : index
    %131 = vector.load %arg5[%c0_35, %c0_36, %c3_37, %c0_38] : memref<1x16x8x8xbf16, #tpu.memory_space<vmem>>, vector<1x16x1x8xbf16>
    %132 = vector.shape_cast %131 : vector<1x16x1x8xbf16> to vector<16x8xbf16>
    %133 = vector.shape_cast %130 : vector<16x8xbf16> to vector<1x16x1x8xbf16>
    tpu.vector_store %arg5[%c0_35, %c0_36, %c3_37, %c0_38], %133 {strides = array<i32>} : memref<1x16x8x8xbf16, #tpu.memory_space<vmem>>, vector<1x16x1x8xbf16>,
    %134 = vector.extract_strided_slice %14 {offsets = [0, 4, 0], sizes = [4, 1, 8], strides = [1, 1, 1]} : vector<4x9x8xbf16> to vector<4x1x8xbf16>
    %135 = vector.shape_cast %134 : vector<4x1x8xbf16> to vector<4x8xbf16>
    %136 = vector.extract_strided_slice %15 {offsets = [0, 4, 0], sizes = [4, 1, 8], strides = [1, 1, 1]} : vector<4x9x8xbf16> to vector<4x1x8xbf16>
    %137 = vector.shape_cast %136 : vector<4x1x8xbf16> to vector<4x8xbf16>
    %138 = vector.extract_strided_slice %16 {offsets = [0, 4, 0], sizes = [4, 1, 8], strides = [1, 1, 1]} : vector<4x9x8xbf16> to vector<4x1x8xbf16>
    %139 = vector.shape_cast %138 : vector<4x1x8xbf16> to vector<4x8xbf16>
    %140 = vector.extract_strided_slice %17 {offsets = [0, 4, 0], sizes = [4, 1, 8], strides = [1, 1, 1]} : vector<4x9x8xbf16> to vector<4x1x8xbf16>
    %141 = vector.shape_cast %140 : vector<4x1x8xbf16> to vector<4x8xbf16>
    %142 = vector.extract_strided_slice %18 {offsets = [0, 4, 0], sizes = [4, 1, 8], strides = [1, 1, 1]} : vector<4x9x8xbf16> to vector<4x1x8xbf16>
    %143 = vector.shape_cast %142 : vector<4x1x8xbf16> to vector<4x8xbf16>
    %144 = vector.extract_strided_slice %19 {offsets = [0, 4, 0], sizes = [4, 1, 8], strides = [1, 1, 1]} : vector<4x9x8xbf16> to vector<4x1x8xbf16>
    %145 = vector.shape_cast %144 : vector<4x1x8xbf16> to vector<4x8xbf16>
    %146 = vector.extract_strided_slice %14 {offsets = [0, 5, 0], sizes = [4, 1, 8], strides = [1, 1, 1]} : vector<4x9x8xbf16> to vector<4x1x8xbf16>
    %147 = vector.shape_cast %146 : vector<4x1x8xbf16> to vector<4x8xbf16>
    %148 = vector.extract_strided_slice %15 {offsets = [0, 5, 0], sizes = [4, 1, 8], strides = [1, 1, 1]} : vector<4x9x8xbf16> to vector<4x1x8xbf16>
    %149 = vector.shape_cast %148 : vector<4x1x8xbf16> to vector<4x8xbf16>
    %150 = vector.extract_strided_slice %16 {offsets = [0, 5, 0], sizes = [4, 1, 8], strides = [1, 1, 1]} : vector<4x9x8xbf16> to vector<4x1x8xbf16>
    %151 = vector.shape_cast %150 : vector<4x1x8xbf16> to vector<4x8xbf16>
    %152 = tpu.concatenate %135, %137, %139, %141, %143, %145, %147, %149, %151 in 0 : vector<4x8xbf16>, vector<4x8xbf16>, vector<4x8xbf16>, vector<4x8xbf16>, vector<4x8xbf16>, vector<4x8xbf16>, vector<4x8xbf16>, vector<4x8xbf16>, vector<4x8xbf16> -> vector<36x8xbf16>
    %cst_39 = arith.constant dense<0.000000e+00> : vector<16x8xf32>
    %153 = tpu.matmul %20, %152, %cst_39 {dimension_numbers = #tpu.dot_dimension_numbers<[1], [0], [0], [1], [0, 0, 1, 1], [], []>} : vector<16x36xbf16>, vector<36x8xbf16>, vector<16x8xf32> -> vector<16x8xf32>
    %154 = vector.broadcast %21 : vector<16x1xf32> to vector<16x8xf32>
    %155 = arith.addf %153, %154 : vector<16x8xf32>
    %cst_40 = arith.constant 0.000000e+00 : f32
    %156 = vector.broadcast %cst_40 : f32 to vector<16x8xf32>
    %157 = arith.maximumf %155, %156 : vector<16x8xf32>
    %158 = arith.truncf %157 : vector<16x8xf32> to vector<16x8xbf16>
    %c0_41 = arith.constant 0 : index
    %c0_42 = arith.constant 0 : index
    %c4 = arith.constant 4 : index
    %c0_43 = arith.constant 0 : index
    %159 = vector.load %arg5[%c0_41, %c0_42, %c4, %c0_43] : memref<1x16x8x8xbf16, #tpu.memory_space<vmem>>, vector<1x16x1x8xbf16>
    %160 = vector.shape_cast %159 : vector<1x16x1x8xbf16> to vector<16x8xbf16>
    %161 = vector.shape_cast %158 : vector<16x8xbf16> to vector<1x16x1x8xbf16>
    tpu.vector_store %arg5[%c0_41, %c0_42, %c4, %c0_43], %161 {strides = array<i32>} : memref<1x16x8x8xbf16, #tpu.memory_space<vmem>>, vector<1x16x1x8xbf16>,
    %162 = vector.extract_strided_slice %14 {offsets = [0, 5, 0], sizes = [4, 1, 8], strides = [1, 1, 1]} : vector<4x9x8xbf16> to vector<4x1x8xbf16>
    %163 = vector.shape_cast %162 : vector<4x1x8xbf16> to vector<4x8xbf16>
    %164 = vector.extract_strided_slice %15 {offsets = [0, 5, 0], sizes = [4, 1, 8], strides = [1, 1, 1]} : vector<4x9x8xbf16> to vector<4x1x8xbf16>
    %165 = vector.shape_cast %164 : vector<4x1x8xbf16> to vector<4x8xbf16>
    %166 = vector.extract_strided_slice %16 {offsets = [0, 5, 0], sizes = [4, 1, 8], strides = [1, 1, 1]} : vector<4x9x8xbf16> to vector<4x1x8xbf16>
    %167 = vector.shape_cast %166 : vector<4x1x8xbf16> to vector<4x8xbf16>
    %168 = vector.extract_strided_slice %17 {offsets = [0, 5, 0], sizes = [4, 1, 8], strides = [1, 1, 1]} : vector<4x9x8xbf16> to vector<4x1x8xbf16>
    %169 = vector.shape_cast %168 : vector<4x1x8xbf16> to vector<4x8xbf16>
    %170 = vector.extract_strided_slice %18 {offsets = [0, 5, 0], sizes = [4, 1, 8], strides = [1, 1, 1]} : vector<4x9x8xbf16> to vector<4x1x8xbf16>
    %171 = vector.shape_cast %170 : vector<4x1x8xbf16> to vector<4x8xbf16>
    %172 = vector.extract_strided_slice %19 {offsets = [0, 5, 0], sizes = [4, 1, 8], strides = [1, 1, 1]} : vector<4x9x8xbf16> to vector<4x1x8xbf16>
    %173 = vector.shape_cast %172 : vector<4x1x8xbf16> to vector<4x8xbf16>
    %174 = vector.extract_strided_slice %14 {offsets = [0, 6, 0], sizes = [4, 1, 8], strides = [1, 1, 1]} : vector<4x9x8xbf16> to vector<4x1x8xbf16>
    %175 = vector.shape_cast %174 : vector<4x1x8xbf16> to vector<4x8xbf16>
    %176 = vector.extract_strided_slice %15 {offsets = [0, 6, 0], sizes = [4, 1, 8], strides = [1, 1, 1]} : vector<4x9x8xbf16> to vector<4x1x8xbf16>
    %177 = vector.shape_cast %176 : vector<4x1x8xbf16> to vector<4x8xbf16>
    %178 = vector.extract_strided_slice %16 {offsets = [0, 6, 0], sizes = [4, 1, 8], strides = [1, 1, 1]} : vector<4x9x8xbf16> to vector<4x1x8xbf16>
    %179 = vector.shape_cast %178 : vector<4x1x8xbf16> to vector<4x8xbf16>
    %180 = tpu.concatenate %163, %165, %167, %169, %171, %173, %175, %177, %179 in 0 : vector<4x8xbf16>, vector<4x8xbf16>, vector<4x8xbf16>, vector<4x8xbf16>, vector<4x8xbf16>, vector<4x8xbf16>, vector<4x8xbf16>, vector<4x8xbf16>, vector<4x8xbf16> -> vector<36x8xbf16>
    %cst_44 = arith.constant dense<0.000000e+00> : vector<16x8xf32>
    %181 = tpu.matmul %20, %180, %cst_44 {dimension_numbers = #tpu.dot_dimension_numbers<[1], [0], [0], [1], [0, 0, 1, 1], [], []>} : vector<16x36xbf16>, vector<36x8xbf16>, vector<16x8xf32> -> vector<16x8xf32>
    %182 = vector.broadcast %21 : vector<16x1xf32> to vector<16x8xf32>
    %183 = arith.addf %181, %182 : vector<16x8xf32>
    %cst_45 = arith.constant 0.000000e+00 : f32
    %184 = vector.broadcast %cst_45 : f32 to vector<16x8xf32>
    %185 = arith.maximumf %183, %184 : vector<16x8xf32>
    %186 = arith.truncf %185 : vector<16x8xf32> to vector<16x8xbf16>
    %c0_46 = arith.constant 0 : index
    %c0_47 = arith.constant 0 : index
    %c5 = arith.constant 5 : index
    %c0_48 = arith.constant 0 : index
    %187 = vector.load %arg5[%c0_46, %c0_47, %c5, %c0_48] : memref<1x16x8x8xbf16, #tpu.memory_space<vmem>>, vector<1x16x1x8xbf16>
    %188 = vector.shape_cast %187 : vector<1x16x1x8xbf16> to vector<16x8xbf16>
    %189 = vector.shape_cast %186 : vector<16x8xbf16> to vector<1x16x1x8xbf16>
    tpu.vector_store %arg5[%c0_46, %c0_47, %c5, %c0_48], %189 {strides = array<i32>} : memref<1x16x8x8xbf16, #tpu.memory_space<vmem>>, vector<1x16x1x8xbf16>,
    %190 = vector.extract_strided_slice %14 {offsets = [0, 6, 0], sizes = [4, 1, 8], strides = [1, 1, 1]} : vector<4x9x8xbf16> to vector<4x1x8xbf16>
    %191 = vector.shape_cast %190 : vector<4x1x8xbf16> to vector<4x8xbf16>
    %192 = vector.extract_strided_slice %15 {offsets = [0, 6, 0], sizes = [4, 1, 8], strides = [1, 1, 1]} : vector<4x9x8xbf16> to vector<4x1x8xbf16>
    %193 = vector.shape_cast %192 : vector<4x1x8xbf16> to vector<4x8xbf16>
    %194 = vector.extract_strided_slice %16 {offsets = [0, 6, 0], sizes = [4, 1, 8], strides = [1, 1, 1]} : vector<4x9x8xbf16> to vector<4x1x8xbf16>
    %195 = vector.shape_cast %194 : vector<4x1x8xbf16> to vector<4x8xbf16>
    %196 = vector.extract_strided_slice %17 {offsets = [0, 6, 0], sizes = [4, 1, 8], strides = [1, 1, 1]} : vector<4x9x8xbf16> to vector<4x1x8xbf16>
    %197 = vector.shape_cast %196 : vector<4x1x8xbf16> to vector<4x8xbf16>
    %198 = vector.extract_strided_slice %18 {offsets = [0, 6, 0], sizes = [4, 1, 8], strides = [1, 1, 1]} : vector<4x9x8xbf16> to vector<4x1x8xbf16>
    %199 = vector.shape_cast %198 : vector<4x1x8xbf16> to vector<4x8xbf16>
    %200 = vector.extract_strided_slice %19 {offsets = [0, 6, 0], sizes = [4, 1, 8], strides = [1, 1, 1]} : vector<4x9x8xbf16> to vector<4x1x8xbf16>
    %201 = vector.shape_cast %200 : vector<4x1x8xbf16> to vector<4x8xbf16>
    %202 = vector.extract_strided_slice %14 {offsets = [0, 7, 0], sizes = [4, 1, 8], strides = [1, 1, 1]} : vector<4x9x8xbf16> to vector<4x1x8xbf16>
    %203 = vector.shape_cast %202 : vector<4x1x8xbf16> to vector<4x8xbf16>
    %204 = vector.extract_strided_slice %15 {offsets = [0, 7, 0], sizes = [4, 1, 8], strides = [1, 1, 1]} : vector<4x9x8xbf16> to vector<4x1x8xbf16>
    %205 = vector.shape_cast %204 : vector<4x1x8xbf16> to vector<4x8xbf16>
    %206 = vector.extract_strided_slice %16 {offsets = [0, 7, 0], sizes = [4, 1, 8], strides = [1, 1, 1]} : vector<4x9x8xbf16> to vector<4x1x8xbf16>
    %207 = vector.shape_cast %206 : vector<4x1x8xbf16> to vector<4x8xbf16>
    %208 = tpu.concatenate %191, %193, %195, %197, %199, %201, %203, %205, %207 in 0 : vector<4x8xbf16>, vector<4x8xbf16>, vector<4x8xbf16>, vector<4x8xbf16>, vector<4x8xbf16>, vector<4x8xbf16>, vector<4x8xbf16>, vector<4x8xbf16>, vector<4x8xbf16> -> vector<36x8xbf16>
    %cst_49 = arith.constant dense<0.000000e+00> : vector<16x8xf32>
    %209 = tpu.matmul %20, %208, %cst_49 {dimension_numbers = #tpu.dot_dimension_numbers<[1], [0], [0], [1], [0, 0, 1, 1], [], []>} : vector<16x36xbf16>, vector<36x8xbf16>, vector<16x8xf32> -> vector<16x8xf32>
    %210 = vector.broadcast %21 : vector<16x1xf32> to vector<16x8xf32>
    %211 = arith.addf %209, %210 : vector<16x8xf32>
    %cst_50 = arith.constant 0.000000e+00 : f32
    %212 = vector.broadcast %cst_50 : f32 to vector<16x8xf32>
    %213 = arith.maximumf %211, %212 : vector<16x8xf32>
    %214 = arith.truncf %213 : vector<16x8xf32> to vector<16x8xbf16>
    %c0_51 = arith.constant 0 : index
    %c0_52 = arith.constant 0 : index
    %c6 = arith.constant 6 : index
    %c0_53 = arith.constant 0 : index
    %215 = vector.load %arg5[%c0_51, %c0_52, %c6, %c0_53] : memref<1x16x8x8xbf16, #tpu.memory_space<vmem>>, vector<1x16x1x8xbf16>
    %216 = vector.shape_cast %215 : vector<1x16x1x8xbf16> to vector<16x8xbf16>
    %217 = vector.shape_cast %214 : vector<16x8xbf16> to vector<1x16x1x8xbf16>
    tpu.vector_store %arg5[%c0_51, %c0_52, %c6, %c0_53], %217 {strides = array<i32>} : memref<1x16x8x8xbf16, #tpu.memory_space<vmem>>, vector<1x16x1x8xbf16>,
    %218 = vector.extract_strided_slice %14 {offsets = [0, 7, 0], sizes = [4, 1, 8], strides = [1, 1, 1]} : vector<4x9x8xbf16> to vector<4x1x8xbf16>
    %219 = vector.shape_cast %218 : vector<4x1x8xbf16> to vector<4x8xbf16>
    %220 = vector.extract_strided_slice %15 {offsets = [0, 7, 0], sizes = [4, 1, 8], strides = [1, 1, 1]} : vector<4x9x8xbf16> to vector<4x1x8xbf16>
    %221 = vector.shape_cast %220 : vector<4x1x8xbf16> to vector<4x8xbf16>
    %222 = vector.extract_strided_slice %16 {offsets = [0, 7, 0], sizes = [4, 1, 8], strides = [1, 1, 1]} : vector<4x9x8xbf16> to vector<4x1x8xbf16>
    %223 = vector.shape_cast %222 : vector<4x1x8xbf16> to vector<4x8xbf16>
    %224 = vector.extract_strided_slice %17 {offsets = [0, 7, 0], sizes = [4, 1, 8], strides = [1, 1, 1]} : vector<4x9x8xbf16> to vector<4x1x8xbf16>
    %225 = vector.shape_cast %224 : vector<4x1x8xbf16> to vector<4x8xbf16>
    %226 = vector.extract_strided_slice %18 {offsets = [0, 7, 0], sizes = [4, 1, 8], strides = [1, 1, 1]} : vector<4x9x8xbf16> to vector<4x1x8xbf16>
    %227 = vector.shape_cast %226 : vector<4x1x8xbf16> to vector<4x8xbf16>
    %228 = vector.extract_strided_slice %19 {offsets = [0, 7, 0], sizes = [4, 1, 8], strides = [1, 1, 1]} : vector<4x9x8xbf16> to vector<4x1x8xbf16>
    %229 = vector.shape_cast %228 : vector<4x1x8xbf16> to vector<4x8xbf16>
    %230 = vector.extract_strided_slice %14 {offsets = [0, 8, 0], sizes = [4, 1, 8], strides = [1, 1, 1]} : vector<4x9x8xbf16> to vector<4x1x8xbf16>
    %231 = vector.shape_cast %230 : vector<4x1x8xbf16> to vector<4x8xbf16>
    %232 = vector.extract_strided_slice %15 {offsets = [0, 8, 0], sizes = [4, 1, 8], strides = [1, 1, 1]} : vector<4x9x8xbf16> to vector<4x1x8xbf16>
    %233 = vector.shape_cast %232 : vector<4x1x8xbf16> to vector<4x8xbf16>
    %234 = vector.extract_strided_slice %16 {offsets = [0, 8, 0], sizes = [4, 1, 8], strides = [1, 1, 1]} : vector<4x9x8xbf16> to vector<4x1x8xbf16>
    %235 = vector.shape_cast %234 : vector<4x1x8xbf16> to vector<4x8xbf16>
    %236 = tpu.concatenate %219, %221, %223, %225, %227, %229, %231, %233, %235 in 0 : vector<4x8xbf16>, vector<4x8xbf16>, vector<4x8xbf16>, vector<4x8xbf16>, vector<4x8xbf16>, vector<4x8xbf16>, vector<4x8xbf16>, vector<4x8xbf16>, vector<4x8xbf16> -> vector<36x8xbf16>
    %cst_54 = arith.constant dense<0.000000e+00> : vector<16x8xf32>
    %237 = tpu.matmul %20, %236, %cst_54 {dimension_numbers = #tpu.dot_dimension_numbers<[1], [0], [0], [1], [0, 0, 1, 1], [], []>} : vector<16x36xbf16>, vector<36x8xbf16>, vector<16x8xf32> -> vector<16x8xf32>
    %238 = vector.broadcast %21 : vector<16x1xf32> to vector<16x8xf32>
    %239 = arith.addf %237, %238 : vector<16x8xf32>
    %cst_55 = arith.constant 0.000000e+00 : f32
    %240 = vector.broadcast %cst_55 : f32 to vector<16x8xf32>
    %241 = arith.maximumf %239, %240 : vector<16x8xf32>
    %242 = arith.truncf %241 : vector<16x8xf32> to vector<16x8xbf16>
    %c0_56 = arith.constant 0 : index
    %c0_57 = arith.constant 0 : index
    %c7 = arith.constant 7 : index
    %c0_58 = arith.constant 0 : index
    %243 = vector.load %arg5[%c0_56, %c0_57, %c7, %c0_58] : memref<1x16x8x8xbf16, #tpu.memory_space<vmem>>, vector<1x16x1x8xbf16>
    %244 = vector.shape_cast %243 : vector<1x16x1x8xbf16> to vector<16x8xbf16>
    %245 = vector.shape_cast %242 : vector<16x8xbf16> to vector<1x16x1x8xbf16>
    tpu.vector_store %arg5[%c0_56, %c0_57, %c7, %c0_58], %245 {strides = array<i32>} : memref<1x16x8x8xbf16, #tpu.memory_space<vmem>>, vector<1x16x1x8xbf16>,
    return
  }
  func.func @transform_0(%arg0: i32, %arg1: i32) -> (i32, i32, i32, i32, i32) {
    %c0_i32 = arith.constant 0 : i32
    %0 = arith.addi %arg0, %c0_i32 : i32
    %c0_i32_0 = arith.constant 0 : i32
    %c0_i32_1 = arith.constant 0 : i32
    %c0_i32_2 = arith.constant 0 : i32
    %c0_i32_3 = arith.constant 0 : i32
    %c0_i32_4 = arith.constant 0 : i32
    return %0, %c0_i32_0, %c0_i32_1, %c0_i32_2, %c0_i32_3 : i32, i32, i32, i32, i32
  }
  func.func @transform_1(%arg0: i32, %arg1: i32) -> (i32, i32) {
    %c0_i32 = arith.constant 0 : i32
    %c0_i32_0 = arith.constant 0 : i32
    %c0_i32_1 = arith.constant 0 : i32
    return %c0_i32, %c0_i32_0 : i32, i32
  }
  func.func @transform_2(%arg0: i32, %arg1: i32) -> (i32, i32) {
    %c0_i32 = arith.constant 0 : i32
    %c0_i32_0 = arith.constant 0 : i32
    %c0_i32_1 = arith.constant 0 : i32
    return %c0_i32, %c0_i32_0 : i32, i32
  }
  func.func @transform_3(%arg0: i32, %arg1: i32) -> (i32, i32, i32, i32) {
    %c0_i32 = arith.constant 0 : i32
    %c0_i32_0 = arith.constant 0 : i32
    %c0_i32_1 = arith.constant 0 : i32
    return %arg0, %c0_i32, %arg1, %c0_i32_0 : i32, i32, i32, i32
  }
}

module attributes {stable_mosaic.version = 11 : i64} {
  func.func @_upsample2x_kernel(%arg0: i32, %arg1: memref<1x8x8xf32, #tpu.memory_space<vmem>>, %arg2: memref<16x8xf32, #tpu.memory_space<vmem>>, %arg3: memref<8x16xf32, #tpu.memory_space<vmem>>, %arg4: memref<1x16x16xf32, #tpu.memory_space<vmem>>) attributes {dimension_semantics = [#tpu.dimension_semantics<parallel>], iteration_bounds = array<i64: 4>, scalar_prefetch = 0 : i64, scratch_operands = 0 : i64, tpu.core_type = #tpu.core_type<tc>, window_params = [{transform_indices = @transform_0, window_bounds = array<i64: 1, 8, 8>}, {pipeline_mode = #tpu.pipeline_mode<synchronous>, transform_indices = @transform_1, window_bounds = array<i64: 16, 8>}, {pipeline_mode = #tpu.pipeline_mode<synchronous>, transform_indices = @transform_2, window_bounds = array<i64: 8, 16>}, {transform_indices = @transform_3, window_bounds = array<i64: 1, 16, 16>}]} {
    %c0 = arith.constant 0 : index
    %c0_0 = arith.constant 0 : index
    %0 = vector.load %arg2[%c0, %c0_0] : memref<16x8xf32, #tpu.memory_space<vmem>>, vector<16x8xf32>
    %c0_1 = arith.constant 0 : index
    %c0_2 = arith.constant 0 : index
    %c0_3 = arith.constant 0 : index
    %1 = vector.load %arg1[%c0_1, %c0_2, %c0_3] : memref<1x8x8xf32, #tpu.memory_space<vmem>>, vector<1x8x8xf32>
    %2 = vector.shape_cast %1 : vector<1x8x8xf32> to vector<8x8xf32>
    %cst = arith.constant dense<0.000000e+00> : vector<16x8xf32>
    %3 = tpu.matmul %0, %2, %cst {dimension_numbers = #tpu.dot_dimension_numbers<[1], [0], [0], [1], [0, 0, 1, 1], [], []>} : vector<16x8xf32>, vector<8x8xf32>, vector<16x8xf32> -> vector<16x8xf32>
    %c0_4 = arith.constant 0 : index
    %c0_5 = arith.constant 0 : index
    %4 = vector.load %arg3[%c0_4, %c0_5] : memref<8x16xf32, #tpu.memory_space<vmem>>, vector<8x16xf32>
    %cst_6 = arith.constant dense<0.000000e+00> : vector<16x16xf32>
    %5 = tpu.matmul %3, %4, %cst_6 {dimension_numbers = #tpu.dot_dimension_numbers<[1], [0], [0], [1], [0, 0, 1, 1], [], []>} : vector<16x8xf32>, vector<8x16xf32>, vector<16x16xf32> -> vector<16x16xf32>
    %c0_7 = arith.constant 0 : index
    %c0_8 = arith.constant 0 : index
    %c0_9 = arith.constant 0 : index
    %6 = vector.load %arg4[%c0_7, %c0_8, %c0_9] : memref<1x16x16xf32, #tpu.memory_space<vmem>>, vector<1x16x16xf32>
    %7 = vector.shape_cast %6 : vector<1x16x16xf32> to vector<16x16xf32>
    %8 = vector.shape_cast %5 : vector<16x16xf32> to vector<1x16x16xf32>
    tpu.vector_store %arg4[%c0_7, %c0_8, %c0_9], %8 {strides = array<i32>} : memref<1x16x16xf32, #tpu.memory_space<vmem>>, vector<1x16x16xf32>,
    return
  }
  func.func @transform_0(%arg0: i32) -> (i32, i32, i32) {
    %c0_i32 = arith.constant 0 : i32
    %c0_i32_0 = arith.constant 0 : i32
    %c0_i32_1 = arith.constant 0 : i32
    return %arg0, %c0_i32, %c0_i32_0 : i32, i32, i32
  }
  func.func @transform_1(%arg0: i32) -> (i32, i32) {
    %c0_i32 = arith.constant 0 : i32
    %c0_i32_0 = arith.constant 0 : i32
    %c0_i32_1 = arith.constant 0 : i32
    return %c0_i32, %c0_i32_0 : i32, i32
  }
  func.func @transform_2(%arg0: i32) -> (i32, i32) {
    %c0_i32 = arith.constant 0 : i32
    %c0_i32_0 = arith.constant 0 : i32
    %c0_i32_1 = arith.constant 0 : i32
    return %c0_i32, %c0_i32_0 : i32, i32
  }
  func.func @transform_3(%arg0: i32) -> (i32, i32, i32) {
    %c0_i32 = arith.constant 0 : i32
    %c0_i32_0 = arith.constant 0 : i32
    %c0_i32_1 = arith.constant 0 : i32
    return %arg0, %c0_i32, %c0_i32_0 : i32, i32, i32
  }
}

module attributes {stable_mosaic.version = 11 : i64} {
  func.func @_conv3x3_kernel(%arg0: i32, %arg1: i32, %arg2: memref<1x1x16x10x10xbf16, #tpu.memory_space<vmem>>, %arg3: memref<1x1x16x10x10xbf16, #tpu.memory_space<vmem>>, %arg4: memref<8x288xbf16, #tpu.memory_space<vmem>>, %arg5: memref<8x1xf32, #tpu.memory_space<vmem>>, %arg6: memref<1x8x8x8xf32, #tpu.memory_space<vmem>>) attributes {dimension_semantics = [#tpu.dimension_semantics<parallel>, #tpu.dimension_semantics<arbitrary>], iteration_bounds = array<i64: 2, 1>, scalar_prefetch = 0 : i64, scratch_operands = 0 : i64, tpu.core_type = #tpu.core_type<tc>, window_params = [{transform_indices = @transform_0, window_bounds = array<i64: 1, 1, 16, 10, 10>}, {transform_indices = @transform_1, window_bounds = array<i64: 1, 1, 16, 10, 10>}, {pipeline_mode = #tpu.pipeline_mode<synchronous>, transform_indices = @transform_2, window_bounds = array<i64: 8, 288>}, {pipeline_mode = #tpu.pipeline_mode<synchronous>, transform_indices = @transform_3, window_bounds = array<i64: 8, 1>}, {transform_indices = @transform_4, window_bounds = array<i64: 1, 8, 8, 8>}]} {
    %c8_i32 = arith.constant 8 : i32
    %0 = arith.muli %arg1, %c8_i32 : i32
    %1 = tpu.assume_multiple %0, 8 : i32
    %c0 = arith.constant 0 : index
    %c0_0 = arith.constant 0 : index
    %c0_1 = arith.constant 0 : index
    %2 = arith.index_cast %1 : i32 to index
    %c0_2 = arith.constant 0 : index
    %3 = vector.load %arg2[%c0, %c0_0, %c0_1, %2, %c0_2] : memref<1x1x16x10x10xbf16, #tpu.memory_space<vmem>>, vector<1x1x16x10x10xbf16>
    %4 = vector.shape_cast %3 : vector<1x1x16x10x10xbf16> to vector<16x10x10xbf16>
    %c0_3 = arith.constant 0 : index
    %c0_4 = arith.constant 0 : index
    %c0_5 = arith.constant 0 : index
    %5 = arith.index_cast %1 : i32 to index
    %c0_6 = arith.constant 0 : index
    %6 = vector.load %arg3[%c0_3, %c0_4, %c0_5, %5, %c0_6] : memref<1x1x16x10x10xbf16, #tpu.memory_space<vmem>>, vector<1x1x16x10x10xbf16>
    %7 = vector.shape_cast %6 : vector<1x1x16x10x10xbf16> to vector<16x10x10xbf16>
    %8 = vector.extract_strided_slice %4 {offsets = [0, 0, 0], sizes = [16, 10, 8], strides = [1, 1, 1]} : vector<16x10x10xbf16> to vector<16x10x8xbf16>
    %9 = vector.extract_strided_slice %7 {offsets = [0, 0, 0], sizes = [16, 10, 8], strides = [1, 1, 1]} : vector<16x10x10xbf16> to vector<16x10x8xbf16>
    %10 = vector.extract_strided_slice %4 {offsets = [0, 0, 1], sizes = [16, 10, 8], strides = [1, 1, 1]} : vector<16x10x10xbf16> to vector<16x10x8xbf16>
    %11 = vector.extract_strided_slice %7 {offsets = [0, 0, 1], sizes = [16, 10, 8], strides = [1, 1, 1]} : vector<16x10x10xbf16> to vector<16x10x8xbf16>
    %12 = vector.extract_strided_slice %4 {offsets = [0, 0, 2], sizes = [16, 10, 8], strides = [1, 1, 1]} : vector<16x10x10xbf16> to vector<16x10x8xbf16>
    %13 = vector.extract_strided_slice %7 {offsets = [0, 0, 2], sizes = [16, 10, 8], strides = [1, 1, 1]} : vector<16x10x10xbf16> to vector<16x10x8xbf16>
    %c0_7 = arith.constant 0 : index
    %c0_8 = arith.constant 0 : index
    %14 = vector.load %arg4[%c0_7, %c0_8] : memref<8x288xbf16, #tpu.memory_space<vmem>>, vector<8x288xbf16>
    %c0_9 = arith.constant 0 : index
    %c0_10 = arith.constant 0 : index
    %15 = vector.load %arg5[%c0_9, %c0_10] : memref<8x1xf32, #tpu.memory_space<vmem>>, vector<8x1xf32>
    %16 = vector.extract_strided_slice %8 {offsets = [0, 0, 0], sizes = [16, 1, 8], strides = [1, 1, 1]} : vector<16x10x8xbf16> to vector<16x1x8xbf16>
    %17 = vector.shape_cast %16 : vector<16x1x8xbf16> to vector<16x8xbf16>
    %18 = vector.extract_strided_slice %9 {offsets = [0, 0, 0], sizes = [16, 1, 8], strides = [1, 1, 1]} : vector<16x10x8xbf16> to vector<16x1x8xbf16>
    %19 = vector.shape_cast %18 : vector<16x1x8xbf16> to vector<16x8xbf16>
    %20 = vector.extract_strided_slice %10 {offsets = [0, 0, 0], sizes = [16, 1, 8], strides = [1, 1, 1]} : vector<16x10x8xbf16> to vector<16x1x8xbf16>
    %21 = vector.shape_cast %20 : vector<16x1x8xbf16> to vector<16x8xbf16>
    %22 = vector.extract_strided_slice %11 {offsets = [0, 0, 0], sizes = [16, 1, 8], strides = [1, 1, 1]} : vector<16x10x8xbf16> to vector<16x1x8xbf16>
    %23 = vector.shape_cast %22 : vector<16x1x8xbf16> to vector<16x8xbf16>
    %24 = vector.extract_strided_slice %12 {offsets = [0, 0, 0], sizes = [16, 1, 8], strides = [1, 1, 1]} : vector<16x10x8xbf16> to vector<16x1x8xbf16>
    %25 = vector.shape_cast %24 : vector<16x1x8xbf16> to vector<16x8xbf16>
    %26 = vector.extract_strided_slice %13 {offsets = [0, 0, 0], sizes = [16, 1, 8], strides = [1, 1, 1]} : vector<16x10x8xbf16> to vector<16x1x8xbf16>
    %27 = vector.shape_cast %26 : vector<16x1x8xbf16> to vector<16x8xbf16>
    %28 = vector.extract_strided_slice %8 {offsets = [0, 1, 0], sizes = [16, 1, 8], strides = [1, 1, 1]} : vector<16x10x8xbf16> to vector<16x1x8xbf16>
    %29 = vector.shape_cast %28 : vector<16x1x8xbf16> to vector<16x8xbf16>
    %30 = vector.extract_strided_slice %9 {offsets = [0, 1, 0], sizes = [16, 1, 8], strides = [1, 1, 1]} : vector<16x10x8xbf16> to vector<16x1x8xbf16>
    %31 = vector.shape_cast %30 : vector<16x1x8xbf16> to vector<16x8xbf16>
    %32 = vector.extract_strided_slice %10 {offsets = [0, 1, 0], sizes = [16, 1, 8], strides = [1, 1, 1]} : vector<16x10x8xbf16> to vector<16x1x8xbf16>
    %33 = vector.shape_cast %32 : vector<16x1x8xbf16> to vector<16x8xbf16>
    %34 = vector.extract_strided_slice %11 {offsets = [0, 1, 0], sizes = [16, 1, 8], strides = [1, 1, 1]} : vector<16x10x8xbf16> to vector<16x1x8xbf16>
    %35 = vector.shape_cast %34 : vector<16x1x8xbf16> to vector<16x8xbf16>
    %36 = vector.extract_strided_slice %12 {offsets = [0, 1, 0], sizes = [16, 1, 8], strides = [1, 1, 1]} : vector<16x10x8xbf16> to vector<16x1x8xbf16>
    %37 = vector.shape_cast %36 : vector<16x1x8xbf16> to vector<16x8xbf16>
    %38 = vector.extract_strided_slice %13 {offsets = [0, 1, 0], sizes = [16, 1, 8], strides = [1, 1, 1]} : vector<16x10x8xbf16> to vector<16x1x8xbf16>
    %39 = vector.shape_cast %38 : vector<16x1x8xbf16> to vector<16x8xbf16>
    %40 = vector.extract_strided_slice %8 {offsets = [0, 2, 0], sizes = [16, 1, 8], strides = [1, 1, 1]} : vector<16x10x8xbf16> to vector<16x1x8xbf16>
    %41 = vector.shape_cast %40 : vector<16x1x8xbf16> to vector<16x8xbf16>
    %42 = vector.extract_strided_slice %9 {offsets = [0, 2, 0], sizes = [16, 1, 8], strides = [1, 1, 1]} : vector<16x10x8xbf16> to vector<16x1x8xbf16>
    %43 = vector.shape_cast %42 : vector<16x1x8xbf16> to vector<16x8xbf16>
    %44 = vector.extract_strided_slice %10 {offsets = [0, 2, 0], sizes = [16, 1, 8], strides = [1, 1, 1]} : vector<16x10x8xbf16> to vector<16x1x8xbf16>
    %45 = vector.shape_cast %44 : vector<16x1x8xbf16> to vector<16x8xbf16>
    %46 = vector.extract_strided_slice %11 {offsets = [0, 2, 0], sizes = [16, 1, 8], strides = [1, 1, 1]} : vector<16x10x8xbf16> to vector<16x1x8xbf16>
    %47 = vector.shape_cast %46 : vector<16x1x8xbf16> to vector<16x8xbf16>
    %48 = vector.extract_strided_slice %12 {offsets = [0, 2, 0], sizes = [16, 1, 8], strides = [1, 1, 1]} : vector<16x10x8xbf16> to vector<16x1x8xbf16>
    %49 = vector.shape_cast %48 : vector<16x1x8xbf16> to vector<16x8xbf16>
    %50 = vector.extract_strided_slice %13 {offsets = [0, 2, 0], sizes = [16, 1, 8], strides = [1, 1, 1]} : vector<16x10x8xbf16> to vector<16x1x8xbf16>
    %51 = vector.shape_cast %50 : vector<16x1x8xbf16> to vector<16x8xbf16>
    %52 = tpu.concatenate %17, %19, %21, %23, %25, %27, %29, %31, %33, %35, %37, %39, %41, %43, %45, %47 in 0 : vector<16x8xbf16>, vector<16x8xbf16>, vector<16x8xbf16>, vector<16x8xbf16>, vector<16x8xbf16>, vector<16x8xbf16>, vector<16x8xbf16>, vector<16x8xbf16>, vector<16x8xbf16>, vector<16x8xbf16>, vector<16x8xbf16>, vector<16x8xbf16>, vector<16x8xbf16>, vector<16x8xbf16>, vector<16x8xbf16>, vector<16x8xbf16> -> vector<256x8xbf16>
    %53 = tpu.concatenate %49, %51 in 0 : vector<16x8xbf16>, vector<16x8xbf16> -> vector<32x8xbf16>
    %54 = tpu.concatenate %52, %53 in 0 : vector<256x8xbf16>, vector<32x8xbf16> -> vector<288x8xbf16>
    %cst = arith.constant dense<0.000000e+00> : vector<8x8xf32>
    %55 = tpu.matmul %14, %54, %cst {dimension_numbers = #tpu.dot_dimension_numbers<[1], [0], [0], [1], [0, 0, 1, 1], [], []>} : vector<8x288xbf16>, vector<288x8xbf16>, vector<8x8xf32> -> vector<8x8xf32>
    %56 = vector.broadcast %15 : vector<8x1xf32> to vector<8x8xf32>
    %57 = arith.addf %55, %56 : vector<8x8xf32>
    %c0_11 = arith.constant 0 : index
    %c0_12 = arith.constant 0 : index
    %c0_13 = arith.constant 0 : index
    %c0_14 = arith.constant 0 : index
    %58 = vector.load %arg6[%c0_11, %c0_12, %c0_13, %c0_14] : memref<1x8x8x8xf32, #tpu.memory_space<vmem>>, vector<1x8x1x8xf32>
    %59 = vector.shape_cast %58 : vector<1x8x1x8xf32> to vector<8x8xf32>
    %60 = vector.shape_cast %57 : vector<8x8xf32> to vector<1x8x1x8xf32>
    tpu.vector_store %arg6[%c0_11, %c0_12, %c0_13, %c0_14], %60 {strides = array<i32>} : memref<1x8x8x8xf32, #tpu.memory_space<vmem>>, vector<1x8x1x8xf32>,
    %61 = vector.extract_strided_slice %8 {offsets = [0, 1, 0], sizes = [16, 1, 8], strides = [1, 1, 1]} : vector<16x10x8xbf16> to vector<16x1x8xbf16>
    %62 = vector.shape_cast %61 : vector<16x1x8xbf16> to vector<16x8xbf16>
    %63 = vector.extract_strided_slice %9 {offsets = [0, 1, 0], sizes = [16, 1, 8], strides = [1, 1, 1]} : vector<16x10x8xbf16> to vector<16x1x8xbf16>
    %64 = vector.shape_cast %63 : vector<16x1x8xbf16> to vector<16x8xbf16>
    %65 = vector.extract_strided_slice %10 {offsets = [0, 1, 0], sizes = [16, 1, 8], strides = [1, 1, 1]} : vector<16x10x8xbf16> to vector<16x1x8xbf16>
    %66 = vector.shape_cast %65 : vector<16x1x8xbf16> to vector<16x8xbf16>
    %67 = vector.extract_strided_slice %11 {offsets = [0, 1, 0], sizes = [16, 1, 8], strides = [1, 1, 1]} : vector<16x10x8xbf16> to vector<16x1x8xbf16>
    %68 = vector.shape_cast %67 : vector<16x1x8xbf16> to vector<16x8xbf16>
    %69 = vector.extract_strided_slice %12 {offsets = [0, 1, 0], sizes = [16, 1, 8], strides = [1, 1, 1]} : vector<16x10x8xbf16> to vector<16x1x8xbf16>
    %70 = vector.shape_cast %69 : vector<16x1x8xbf16> to vector<16x8xbf16>
    %71 = vector.extract_strided_slice %13 {offsets = [0, 1, 0], sizes = [16, 1, 8], strides = [1, 1, 1]} : vector<16x10x8xbf16> to vector<16x1x8xbf16>
    %72 = vector.shape_cast %71 : vector<16x1x8xbf16> to vector<16x8xbf16>
    %73 = vector.extract_strided_slice %8 {offsets = [0, 2, 0], sizes = [16, 1, 8], strides = [1, 1, 1]} : vector<16x10x8xbf16> to vector<16x1x8xbf16>
    %74 = vector.shape_cast %73 : vector<16x1x8xbf16> to vector<16x8xbf16>
    %75 = vector.extract_strided_slice %9 {offsets = [0, 2, 0], sizes = [16, 1, 8], strides = [1, 1, 1]} : vector<16x10x8xbf16> to vector<16x1x8xbf16>
    %76 = vector.shape_cast %75 : vector<16x1x8xbf16> to vector<16x8xbf16>
    %77 = vector.extract_strided_slice %10 {offsets = [0, 2, 0], sizes = [16, 1, 8], strides = [1, 1, 1]} : vector<16x10x8xbf16> to vector<16x1x8xbf16>
    %78 = vector.shape_cast %77 : vector<16x1x8xbf16> to vector<16x8xbf16>
    %79 = vector.extract_strided_slice %11 {offsets = [0, 2, 0], sizes = [16, 1, 8], strides = [1, 1, 1]} : vector<16x10x8xbf16> to vector<16x1x8xbf16>
    %80 = vector.shape_cast %79 : vector<16x1x8xbf16> to vector<16x8xbf16>
    %81 = vector.extract_strided_slice %12 {offsets = [0, 2, 0], sizes = [16, 1, 8], strides = [1, 1, 1]} : vector<16x10x8xbf16> to vector<16x1x8xbf16>
    %82 = vector.shape_cast %81 : vector<16x1x8xbf16> to vector<16x8xbf16>
    %83 = vector.extract_strided_slice %13 {offsets = [0, 2, 0], sizes = [16, 1, 8], strides = [1, 1, 1]} : vector<16x10x8xbf16> to vector<16x1x8xbf16>
    %84 = vector.shape_cast %83 : vector<16x1x8xbf16> to vector<16x8xbf16>
    %85 = vector.extract_strided_slice %8 {offsets = [0, 3, 0], sizes = [16, 1, 8], strides = [1, 1, 1]} : vector<16x10x8xbf16> to vector<16x1x8xbf16>
    %86 = vector.shape_cast %85 : vector<16x1x8xbf16> to vector<16x8xbf16>
    %87 = vector.extract_strided_slice %9 {offsets = [0, 3, 0], sizes = [16, 1, 8], strides = [1, 1, 1]} : vector<16x10x8xbf16> to vector<16x1x8xbf16>
    %88 = vector.shape_cast %87 : vector<16x1x8xbf16> to vector<16x8xbf16>
    %89 = vector.extract_strided_slice %10 {offsets = [0, 3, 0], sizes = [16, 1, 8], strides = [1, 1, 1]} : vector<16x10x8xbf16> to vector<16x1x8xbf16>
    %90 = vector.shape_cast %89 : vector<16x1x8xbf16> to vector<16x8xbf16>
    %91 = vector.extract_strided_slice %11 {offsets = [0, 3, 0], sizes = [16, 1, 8], strides = [1, 1, 1]} : vector<16x10x8xbf16> to vector<16x1x8xbf16>
    %92 = vector.shape_cast %91 : vector<16x1x8xbf16> to vector<16x8xbf16>
    %93 = vector.extract_strided_slice %12 {offsets = [0, 3, 0], sizes = [16, 1, 8], strides = [1, 1, 1]} : vector<16x10x8xbf16> to vector<16x1x8xbf16>
    %94 = vector.shape_cast %93 : vector<16x1x8xbf16> to vector<16x8xbf16>
    %95 = vector.extract_strided_slice %13 {offsets = [0, 3, 0], sizes = [16, 1, 8], strides = [1, 1, 1]} : vector<16x10x8xbf16> to vector<16x1x8xbf16>
    %96 = vector.shape_cast %95 : vector<16x1x8xbf16> to vector<16x8xbf16>
    %97 = tpu.concatenate %62, %64, %66, %68, %70, %72, %74, %76, %78, %80, %82, %84, %86, %88, %90, %92 in 0 : vector<16x8xbf16>, vector<16x8xbf16>, vector<16x8xbf16>, vector<16x8xbf16>, vector<16x8xbf16>, vector<16x8xbf16>, vector<16x8xbf16>, vector<16x8xbf16>, vector<16x8xbf16>, vector<16x8xbf16>, vector<16x8xbf16>, vector<16x8xbf16>, vector<16x8xbf16>, vector<16x8xbf16>, vector<16x8xbf16>, vector<16x8xbf16> -> vector<256x8xbf16>
    %98 = tpu.concatenate %94, %96 in 0 : vector<16x8xbf16>, vector<16x8xbf16> -> vector<32x8xbf16>
    %99 = tpu.concatenate %97, %98 in 0 : vector<256x8xbf16>, vector<32x8xbf16> -> vector<288x8xbf16>
    %cst_15 = arith.constant dense<0.000000e+00> : vector<8x8xf32>
    %100 = tpu.matmul %14, %99, %cst_15 {dimension_numbers = #tpu.dot_dimension_numbers<[1], [0], [0], [1], [0, 0, 1, 1], [], []>} : vector<8x288xbf16>, vector<288x8xbf16>, vector<8x8xf32> -> vector<8x8xf32>
    %101 = vector.broadcast %15 : vector<8x1xf32> to vector<8x8xf32>
    %102 = arith.addf %100, %101 : vector<8x8xf32>
    %c0_16 = arith.constant 0 : index
    %c0_17 = arith.constant 0 : index
    %c1 = arith.constant 1 : index
    %c0_18 = arith.constant 0 : index
    %103 = vector.load %arg6[%c0_16, %c0_17, %c1, %c0_18] : memref<1x8x8x8xf32, #tpu.memory_space<vmem>>, vector<1x8x1x8xf32>
    %104 = vector.shape_cast %103 : vector<1x8x1x8xf32> to vector<8x8xf32>
    %105 = vector.shape_cast %102 : vector<8x8xf32> to vector<1x8x1x8xf32>
    tpu.vector_store %arg6[%c0_16, %c0_17, %c1, %c0_18], %105 {strides = array<i32>} : memref<1x8x8x8xf32, #tpu.memory_space<vmem>>, vector<1x8x1x8xf32>,
    %106 = vector.extract_strided_slice %8 {offsets = [0, 2, 0], sizes = [16, 1, 8], strides = [1, 1, 1]} : vector<16x10x8xbf16> to vector<16x1x8xbf16>
    %107 = vector.shape_cast %106 : vector<16x1x8xbf16> to vector<16x8xbf16>
    %108 = vector.extract_strided_slice %9 {offsets = [0, 2, 0], sizes = [16, 1, 8], strides = [1, 1, 1]} : vector<16x10x8xbf16> to vector<16x1x8xbf16>
    %109 = vector.shape_cast %108 : vector<16x1x8xbf16> to vector<16x8xbf16>
    %110 = vector.extract_strided_slice %10 {offsets = [0, 2, 0], sizes = [16, 1, 8], strides = [1, 1, 1]} : vector<16x10x8xbf16> to vector<16x1x8xbf16>
    %111 = vector.shape_cast %110 : vector<16x1x8xbf16> to vector<16x8xbf16>
    %112 = vector.extract_strided_slice %11 {offsets = [0, 2, 0], sizes = [16, 1, 8], strides = [1, 1, 1]} : vector<16x10x8xbf16> to vector<16x1x8xbf16>
    %113 = vector.shape_cast %112 : vector<16x1x8xbf16> to vector<16x8xbf16>
    %114 = vector.extract_strided_slice %12 {offsets = [0, 2, 0], sizes = [16, 1, 8], strides = [1, 1, 1]} : vector<16x10x8xbf16> to vector<16x1x8xbf16>
    %115 = vector.shape_cast %114 : vector<16x1x8xbf16> to vector<16x8xbf16>
    %116 = vector.extract_strided_slice %13 {offsets = [0, 2, 0], sizes = [16, 1, 8], strides = [1, 1, 1]} : vector<16x10x8xbf16> to vector<16x1x8xbf16>
    %117 = vector.shape_cast %116 : vector<16x1x8xbf16> to vector<16x8xbf16>
    %118 = vector.extract_strided_slice %8 {offsets = [0, 3, 0], sizes = [16, 1, 8], strides = [1, 1, 1]} : vector<16x10x8xbf16> to vector<16x1x8xbf16>
    %119 = vector.shape_cast %118 : vector<16x1x8xbf16> to vector<16x8xbf16>
    %120 = vector.extract_strided_slice %9 {offsets = [0, 3, 0], sizes = [16, 1, 8], strides = [1, 1, 1]} : vector<16x10x8xbf16> to vector<16x1x8xbf16>
    %121 = vector.shape_cast %120 : vector<16x1x8xbf16> to vector<16x8xbf16>
    %122 = vector.extract_strided_slice %10 {offsets = [0, 3, 0], sizes = [16, 1, 8], strides = [1, 1, 1]} : vector<16x10x8xbf16> to vector<16x1x8xbf16>
    %123 = vector.shape_cast %122 : vector<16x1x8xbf16> to vector<16x8xbf16>
    %124 = vector.extract_strided_slice %11 {offsets = [0, 3, 0], sizes = [16, 1, 8], strides = [1, 1, 1]} : vector<16x10x8xbf16> to vector<16x1x8xbf16>
    %125 = vector.shape_cast %124 : vector<16x1x8xbf16> to vector<16x8xbf16>
    %126 = vector.extract_strided_slice %12 {offsets = [0, 3, 0], sizes = [16, 1, 8], strides = [1, 1, 1]} : vector<16x10x8xbf16> to vector<16x1x8xbf16>
    %127 = vector.shape_cast %126 : vector<16x1x8xbf16> to vector<16x8xbf16>
    %128 = vector.extract_strided_slice %13 {offsets = [0, 3, 0], sizes = [16, 1, 8], strides = [1, 1, 1]} : vector<16x10x8xbf16> to vector<16x1x8xbf16>
    %129 = vector.shape_cast %128 : vector<16x1x8xbf16> to vector<16x8xbf16>
    %130 = vector.extract_strided_slice %8 {offsets = [0, 4, 0], sizes = [16, 1, 8], strides = [1, 1, 1]} : vector<16x10x8xbf16> to vector<16x1x8xbf16>
    %131 = vector.shape_cast %130 : vector<16x1x8xbf16> to vector<16x8xbf16>
    %132 = vector.extract_strided_slice %9 {offsets = [0, 4, 0], sizes = [16, 1, 8], strides = [1, 1, 1]} : vector<16x10x8xbf16> to vector<16x1x8xbf16>
    %133 = vector.shape_cast %132 : vector<16x1x8xbf16> to vector<16x8xbf16>
    %134 = vector.extract_strided_slice %10 {offsets = [0, 4, 0], sizes = [16, 1, 8], strides = [1, 1, 1]} : vector<16x10x8xbf16> to vector<16x1x8xbf16>
    %135 = vector.shape_cast %134 : vector<16x1x8xbf16> to vector<16x8xbf16>
    %136 = vector.extract_strided_slice %11 {offsets = [0, 4, 0], sizes = [16, 1, 8], strides = [1, 1, 1]} : vector<16x10x8xbf16> to vector<16x1x8xbf16>
    %137 = vector.shape_cast %136 : vector<16x1x8xbf16> to vector<16x8xbf16>
    %138 = vector.extract_strided_slice %12 {offsets = [0, 4, 0], sizes = [16, 1, 8], strides = [1, 1, 1]} : vector<16x10x8xbf16> to vector<16x1x8xbf16>
    %139 = vector.shape_cast %138 : vector<16x1x8xbf16> to vector<16x8xbf16>
    %140 = vector.extract_strided_slice %13 {offsets = [0, 4, 0], sizes = [16, 1, 8], strides = [1, 1, 1]} : vector<16x10x8xbf16> to vector<16x1x8xbf16>
    %141 = vector.shape_cast %140 : vector<16x1x8xbf16> to vector<16x8xbf16>
    %142 = tpu.concatenate %107, %109, %111, %113, %115, %117, %119, %121, %123, %125, %127, %129, %131, %133, %135, %137 in 0 : vector<16x8xbf16>, vector<16x8xbf16>, vector<16x8xbf16>, vector<16x8xbf16>, vector<16x8xbf16>, vector<16x8xbf16>, vector<16x8xbf16>, vector<16x8xbf16>, vector<16x8xbf16>, vector<16x8xbf16>, vector<16x8xbf16>, vector<16x8xbf16>, vector<16x8xbf16>, vector<16x8xbf16>, vector<16x8xbf16>, vector<16x8xbf16> -> vector<256x8xbf16>
    %143 = tpu.concatenate %139, %141 in 0 : vector<16x8xbf16>, vector<16x8xbf16> -> vector<32x8xbf16>
    %144 = tpu.concatenate %142, %143 in 0 : vector<256x8xbf16>, vector<32x8xbf16> -> vector<288x8xbf16>
    %cst_19 = arith.constant dense<0.000000e+00> : vector<8x8xf32>
    %145 = tpu.matmul %14, %144, %cst_19 {dimension_numbers = #tpu.dot_dimension_numbers<[1], [0], [0], [1], [0, 0, 1, 1], [], []>} : vector<8x288xbf16>, vector<288x8xbf16>, vector<8x8xf32> -> vector<8x8xf32>
    %146 = vector.broadcast %15 : vector<8x1xf32> to vector<8x8xf32>
    %147 = arith.addf %145, %146 : vector<8x8xf32>
    %c0_20 = arith.constant 0 : index
    %c0_21 = arith.constant 0 : index
    %c2 = arith.constant 2 : index
    %c0_22 = arith.constant 0 : index
    %148 = vector.load %arg6[%c0_20, %c0_21, %c2, %c0_22] : memref<1x8x8x8xf32, #tpu.memory_space<vmem>>, vector<1x8x1x8xf32>
    %149 = vector.shape_cast %148 : vector<1x8x1x8xf32> to vector<8x8xf32>
    %150 = vector.shape_cast %147 : vector<8x8xf32> to vector<1x8x1x8xf32>
    tpu.vector_store %arg6[%c0_20, %c0_21, %c2, %c0_22], %150 {strides = array<i32>} : memref<1x8x8x8xf32, #tpu.memory_space<vmem>>, vector<1x8x1x8xf32>,
    %151 = vector.extract_strided_slice %8 {offsets = [0, 3, 0], sizes = [16, 1, 8], strides = [1, 1, 1]} : vector<16x10x8xbf16> to vector<16x1x8xbf16>
    %152 = vector.shape_cast %151 : vector<16x1x8xbf16> to vector<16x8xbf16>
    %153 = vector.extract_strided_slice %9 {offsets = [0, 3, 0], sizes = [16, 1, 8], strides = [1, 1, 1]} : vector<16x10x8xbf16> to vector<16x1x8xbf16>
    %154 = vector.shape_cast %153 : vector<16x1x8xbf16> to vector<16x8xbf16>
    %155 = vector.extract_strided_slice %10 {offsets = [0, 3, 0], sizes = [16, 1, 8], strides = [1, 1, 1]} : vector<16x10x8xbf16> to vector<16x1x8xbf16>
    %156 = vector.shape_cast %155 : vector<16x1x8xbf16> to vector<16x8xbf16>
    %157 = vector.extract_strided_slice %11 {offsets = [0, 3, 0], sizes = [16, 1, 8], strides = [1, 1, 1]} : vector<16x10x8xbf16> to vector<16x1x8xbf16>
    %158 = vector.shape_cast %157 : vector<16x1x8xbf16> to vector<16x8xbf16>
    %159 = vector.extract_strided_slice %12 {offsets = [0, 3, 0], sizes = [16, 1, 8], strides = [1, 1, 1]} : vector<16x10x8xbf16> to vector<16x1x8xbf16>
    %160 = vector.shape_cast %159 : vector<16x1x8xbf16> to vector<16x8xbf16>
    %161 = vector.extract_strided_slice %13 {offsets = [0, 3, 0], sizes = [16, 1, 8], strides = [1, 1, 1]} : vector<16x10x8xbf16> to vector<16x1x8xbf16>
    %162 = vector.shape_cast %161 : vector<16x1x8xbf16> to vector<16x8xbf16>
    %163 = vector.extract_strided_slice %8 {offsets = [0, 4, 0], sizes = [16, 1, 8], strides = [1, 1, 1]} : vector<16x10x8xbf16> to vector<16x1x8xbf16>
    %164 = vector.shape_cast %163 : vector<16x1x8xbf16> to vector<16x8xbf16>
    %165 = vector.extract_strided_slice %9 {offsets = [0, 4, 0], sizes = [16, 1, 8], strides = [1, 1, 1]} : vector<16x10x8xbf16> to vector<16x1x8xbf16>
    %166 = vector.shape_cast %165 : vector<16x1x8xbf16> to vector<16x8xbf16>
    %167 = vector.extract_strided_slice %10 {offsets = [0, 4, 0], sizes = [16, 1, 8], strides = [1, 1, 1]} : vector<16x10x8xbf16> to vector<16x1x8xbf16>
    %168 = vector.shape_cast %167 : vector<16x1x8xbf16> to vector<16x8xbf16>
    %169 = vector.extract_strided_slice %11 {offsets = [0, 4, 0], sizes = [16, 1, 8], strides = [1, 1, 1]} : vector<16x10x8xbf16> to vector<16x1x8xbf16>
    %170 = vector.shape_cast %169 : vector<16x1x8xbf16> to vector<16x8xbf16>
    %171 = vector.extract_strided_slice %12 {offsets = [0, 4, 0], sizes = [16, 1, 8], strides = [1, 1, 1]} : vector<16x10x8xbf16> to vector<16x1x8xbf16>
    %172 = vector.shape_cast %171 : vector<16x1x8xbf16> to vector<16x8xbf16>
    %173 = vector.extract_strided_slice %13 {offsets = [0, 4, 0], sizes = [16, 1, 8], strides = [1, 1, 1]} : vector<16x10x8xbf16> to vector<16x1x8xbf16>
    %174 = vector.shape_cast %173 : vector<16x1x8xbf16> to vector<16x8xbf16>
    %175 = vector.extract_strided_slice %8 {offsets = [0, 5, 0], sizes = [16, 1, 8], strides = [1, 1, 1]} : vector<16x10x8xbf16> to vector<16x1x8xbf16>
    %176 = vector.shape_cast %175 : vector<16x1x8xbf16> to vector<16x8xbf16>
    %177 = vector.extract_strided_slice %9 {offsets = [0, 5, 0], sizes = [16, 1, 8], strides = [1, 1, 1]} : vector<16x10x8xbf16> to vector<16x1x8xbf16>
    %178 = vector.shape_cast %177 : vector<16x1x8xbf16> to vector<16x8xbf16>
    %179 = vector.extract_strided_slice %10 {offsets = [0, 5, 0], sizes = [16, 1, 8], strides = [1, 1, 1]} : vector<16x10x8xbf16> to vector<16x1x8xbf16>
    %180 = vector.shape_cast %179 : vector<16x1x8xbf16> to vector<16x8xbf16>
    %181 = vector.extract_strided_slice %11 {offsets = [0, 5, 0], sizes = [16, 1, 8], strides = [1, 1, 1]} : vector<16x10x8xbf16> to vector<16x1x8xbf16>
    %182 = vector.shape_cast %181 : vector<16x1x8xbf16> to vector<16x8xbf16>
    %183 = vector.extract_strided_slice %12 {offsets = [0, 5, 0], sizes = [16, 1, 8], strides = [1, 1, 1]} : vector<16x10x8xbf16> to vector<16x1x8xbf16>
    %184 = vector.shape_cast %183 : vector<16x1x8xbf16> to vector<16x8xbf16>
    %185 = vector.extract_strided_slice %13 {offsets = [0, 5, 0], sizes = [16, 1, 8], strides = [1, 1, 1]} : vector<16x10x8xbf16> to vector<16x1x8xbf16>
    %186 = vector.shape_cast %185 : vector<16x1x8xbf16> to vector<16x8xbf16>
    %187 = tpu.concatenate %152, %154, %156, %158, %160, %162, %164, %166, %168, %170, %172, %174, %176, %178, %180, %182 in 0 : vector<16x8xbf16>, vector<16x8xbf16>, vector<16x8xbf16>, vector<16x8xbf16>, vector<16x8xbf16>, vector<16x8xbf16>, vector<16x8xbf16>, vector<16x8xbf16>, vector<16x8xbf16>, vector<16x8xbf16>, vector<16x8xbf16>, vector<16x8xbf16>, vector<16x8xbf16>, vector<16x8xbf16>, vector<16x8xbf16>, vector<16x8xbf16> -> vector<256x8xbf16>
    %188 = tpu.concatenate %184, %186 in 0 : vector<16x8xbf16>, vector<16x8xbf16> -> vector<32x8xbf16>
    %189 = tpu.concatenate %187, %188 in 0 : vector<256x8xbf16>, vector<32x8xbf16> -> vector<288x8xbf16>
    %cst_23 = arith.constant dense<0.000000e+00> : vector<8x8xf32>
    %190 = tpu.matmul %14, %189, %cst_23 {dimension_numbers = #tpu.dot_dimension_numbers<[1], [0], [0], [1], [0, 0, 1, 1], [], []>} : vector<8x288xbf16>, vector<288x8xbf16>, vector<8x8xf32> -> vector<8x8xf32>
    %191 = vector.broadcast %15 : vector<8x1xf32> to vector<8x8xf32>
    %192 = arith.addf %190, %191 : vector<8x8xf32>
    %c0_24 = arith.constant 0 : index
    %c0_25 = arith.constant 0 : index
    %c3 = arith.constant 3 : index
    %c0_26 = arith.constant 0 : index
    %193 = vector.load %arg6[%c0_24, %c0_25, %c3, %c0_26] : memref<1x8x8x8xf32, #tpu.memory_space<vmem>>, vector<1x8x1x8xf32>
    %194 = vector.shape_cast %193 : vector<1x8x1x8xf32> to vector<8x8xf32>
    %195 = vector.shape_cast %192 : vector<8x8xf32> to vector<1x8x1x8xf32>
    tpu.vector_store %arg6[%c0_24, %c0_25, %c3, %c0_26], %195 {strides = array<i32>} : memref<1x8x8x8xf32, #tpu.memory_space<vmem>>, vector<1x8x1x8xf32>,
    %196 = vector.extract_strided_slice %8 {offsets = [0, 4, 0], sizes = [16, 1, 8], strides = [1, 1, 1]} : vector<16x10x8xbf16> to vector<16x1x8xbf16>
    %197 = vector.shape_cast %196 : vector<16x1x8xbf16> to vector<16x8xbf16>
    %198 = vector.extract_strided_slice %9 {offsets = [0, 4, 0], sizes = [16, 1, 8], strides = [1, 1, 1]} : vector<16x10x8xbf16> to vector<16x1x8xbf16>
    %199 = vector.shape_cast %198 : vector<16x1x8xbf16> to vector<16x8xbf16>
    %200 = vector.extract_strided_slice %10 {offsets = [0, 4, 0], sizes = [16, 1, 8], strides = [1, 1, 1]} : vector<16x10x8xbf16> to vector<16x1x8xbf16>
    %201 = vector.shape_cast %200 : vector<16x1x8xbf16> to vector<16x8xbf16>
    %202 = vector.extract_strided_slice %11 {offsets = [0, 4, 0], sizes = [16, 1, 8], strides = [1, 1, 1]} : vector<16x10x8xbf16> to vector<16x1x8xbf16>
    %203 = vector.shape_cast %202 : vector<16x1x8xbf16> to vector<16x8xbf16>
    %204 = vector.extract_strided_slice %12 {offsets = [0, 4, 0], sizes = [16, 1, 8], strides = [1, 1, 1]} : vector<16x10x8xbf16> to vector<16x1x8xbf16>
    %205 = vector.shape_cast %204 : vector<16x1x8xbf16> to vector<16x8xbf16>
    %206 = vector.extract_strided_slice %13 {offsets = [0, 4, 0], sizes = [16, 1, 8], strides = [1, 1, 1]} : vector<16x10x8xbf16> to vector<16x1x8xbf16>
    %207 = vector.shape_cast %206 : vector<16x1x8xbf16> to vector<16x8xbf16>
    %208 = vector.extract_strided_slice %8 {offsets = [0, 5, 0], sizes = [16, 1, 8], strides = [1, 1, 1]} : vector<16x10x8xbf16> to vector<16x1x8xbf16>
    %209 = vector.shape_cast %208 : vector<16x1x8xbf16> to vector<16x8xbf16>
    %210 = vector.extract_strided_slice %9 {offsets = [0, 5, 0], sizes = [16, 1, 8], strides = [1, 1, 1]} : vector<16x10x8xbf16> to vector<16x1x8xbf16>
    %211 = vector.shape_cast %210 : vector<16x1x8xbf16> to vector<16x8xbf16>
    %212 = vector.extract_strided_slice %10 {offsets = [0, 5, 0], sizes = [16, 1, 8], strides = [1, 1, 1]} : vector<16x10x8xbf16> to vector<16x1x8xbf16>
    %213 = vector.shape_cast %212 : vector<16x1x8xbf16> to vector<16x8xbf16>
    %214 = vector.extract_strided_slice %11 {offsets = [0, 5, 0], sizes = [16, 1, 8], strides = [1, 1, 1]} : vector<16x10x8xbf16> to vector<16x1x8xbf16>
    %215 = vector.shape_cast %214 : vector<16x1x8xbf16> to vector<16x8xbf16>
    %216 = vector.extract_strided_slice %12 {offsets = [0, 5, 0], sizes = [16, 1, 8], strides = [1, 1, 1]} : vector<16x10x8xbf16> to vector<16x1x8xbf16>
    %217 = vector.shape_cast %216 : vector<16x1x8xbf16> to vector<16x8xbf16>
    %218 = vector.extract_strided_slice %13 {offsets = [0, 5, 0], sizes = [16, 1, 8], strides = [1, 1, 1]} : vector<16x10x8xbf16> to vector<16x1x8xbf16>
    %219 = vector.shape_cast %218 : vector<16x1x8xbf16> to vector<16x8xbf16>
    %220 = vector.extract_strided_slice %8 {offsets = [0, 6, 0], sizes = [16, 1, 8], strides = [1, 1, 1]} : vector<16x10x8xbf16> to vector<16x1x8xbf16>
    %221 = vector.shape_cast %220 : vector<16x1x8xbf16> to vector<16x8xbf16>
    %222 = vector.extract_strided_slice %9 {offsets = [0, 6, 0], sizes = [16, 1, 8], strides = [1, 1, 1]} : vector<16x10x8xbf16> to vector<16x1x8xbf16>
    %223 = vector.shape_cast %222 : vector<16x1x8xbf16> to vector<16x8xbf16>
    %224 = vector.extract_strided_slice %10 {offsets = [0, 6, 0], sizes = [16, 1, 8], strides = [1, 1, 1]} : vector<16x10x8xbf16> to vector<16x1x8xbf16>
    %225 = vector.shape_cast %224 : vector<16x1x8xbf16> to vector<16x8xbf16>
    %226 = vector.extract_strided_slice %11 {offsets = [0, 6, 0], sizes = [16, 1, 8], strides = [1, 1, 1]} : vector<16x10x8xbf16> to vector<16x1x8xbf16>
    %227 = vector.shape_cast %226 : vector<16x1x8xbf16> to vector<16x8xbf16>
    %228 = vector.extract_strided_slice %12 {offsets = [0, 6, 0], sizes = [16, 1, 8], strides = [1, 1, 1]} : vector<16x10x8xbf16> to vector<16x1x8xbf16>
    %229 = vector.shape_cast %228 : vector<16x1x8xbf16> to vector<16x8xbf16>
    %230 = vector.extract_strided_slice %13 {offsets = [0, 6, 0], sizes = [16, 1, 8], strides = [1, 1, 1]} : vector<16x10x8xbf16> to vector<16x1x8xbf16>
    %231 = vector.shape_cast %230 : vector<16x1x8xbf16> to vector<16x8xbf16>
    %232 = tpu.concatenate %197, %199, %201, %203, %205, %207, %209, %211, %213, %215, %217, %219, %221, %223, %225, %227 in 0 : vector<16x8xbf16>, vector<16x8xbf16>, vector<16x8xbf16>, vector<16x8xbf16>, vector<16x8xbf16>, vector<16x8xbf16>, vector<16x8xbf16>, vector<16x8xbf16>, vector<16x8xbf16>, vector<16x8xbf16>, vector<16x8xbf16>, vector<16x8xbf16>, vector<16x8xbf16>, vector<16x8xbf16>, vector<16x8xbf16>, vector<16x8xbf16> -> vector<256x8xbf16>
    %233 = tpu.concatenate %229, %231 in 0 : vector<16x8xbf16>, vector<16x8xbf16> -> vector<32x8xbf16>
    %234 = tpu.concatenate %232, %233 in 0 : vector<256x8xbf16>, vector<32x8xbf16> -> vector<288x8xbf16>
    %cst_27 = arith.constant dense<0.000000e+00> : vector<8x8xf32>
    %235 = tpu.matmul %14, %234, %cst_27 {dimension_numbers = #tpu.dot_dimension_numbers<[1], [0], [0], [1], [0, 0, 1, 1], [], []>} : vector<8x288xbf16>, vector<288x8xbf16>, vector<8x8xf32> -> vector<8x8xf32>
    %236 = vector.broadcast %15 : vector<8x1xf32> to vector<8x8xf32>
    %237 = arith.addf %235, %236 : vector<8x8xf32>
    %c0_28 = arith.constant 0 : index
    %c0_29 = arith.constant 0 : index
    %c4 = arith.constant 4 : index
    %c0_30 = arith.constant 0 : index
    %238 = vector.load %arg6[%c0_28, %c0_29, %c4, %c0_30] : memref<1x8x8x8xf32, #tpu.memory_space<vmem>>, vector<1x8x1x8xf32>
    %239 = vector.shape_cast %238 : vector<1x8x1x8xf32> to vector<8x8xf32>
    %240 = vector.shape_cast %237 : vector<8x8xf32> to vector<1x8x1x8xf32>
    tpu.vector_store %arg6[%c0_28, %c0_29, %c4, %c0_30], %240 {strides = array<i32>} : memref<1x8x8x8xf32, #tpu.memory_space<vmem>>, vector<1x8x1x8xf32>,
    %241 = vector.extract_strided_slice %8 {offsets = [0, 5, 0], sizes = [16, 1, 8], strides = [1, 1, 1]} : vector<16x10x8xbf16> to vector<16x1x8xbf16>
    %242 = vector.shape_cast %241 : vector<16x1x8xbf16> to vector<16x8xbf16>
    %243 = vector.extract_strided_slice %9 {offsets = [0, 5, 0], sizes = [16, 1, 8], strides = [1, 1, 1]} : vector<16x10x8xbf16> to vector<16x1x8xbf16>
    %244 = vector.shape_cast %243 : vector<16x1x8xbf16> to vector<16x8xbf16>
    %245 = vector.extract_strided_slice %10 {offsets = [0, 5, 0], sizes = [16, 1, 8], strides = [1, 1, 1]} : vector<16x10x8xbf16> to vector<16x1x8xbf16>
    %246 = vector.shape_cast %245 : vector<16x1x8xbf16> to vector<16x8xbf16>
    %247 = vector.extract_strided_slice %11 {offsets = [0, 5, 0], sizes = [16, 1, 8], strides = [1, 1, 1]} : vector<16x10x8xbf16> to vector<16x1x8xbf16>
    %248 = vector.shape_cast %247 : vector<16x1x8xbf16> to vector<16x8xbf16>
    %249 = vector.extract_strided_slice %12 {offsets = [0, 5, 0], sizes = [16, 1, 8], strides = [1, 1, 1]} : vector<16x10x8xbf16> to vector<16x1x8xbf16>
    %250 = vector.shape_cast %249 : vector<16x1x8xbf16> to vector<16x8xbf16>
    %251 = vector.extract_strided_slice %13 {offsets = [0, 5, 0], sizes = [16, 1, 8], strides = [1, 1, 1]} : vector<16x10x8xbf16> to vector<16x1x8xbf16>
    %252 = vector.shape_cast %251 : vector<16x1x8xbf16> to vector<16x8xbf16>
    %253 = vector.extract_strided_slice %8 {offsets = [0, 6, 0], sizes = [16, 1, 8], strides = [1, 1, 1]} : vector<16x10x8xbf16> to vector<16x1x8xbf16>
    %254 = vector.shape_cast %253 : vector<16x1x8xbf16> to vector<16x8xbf16>
    %255 = vector.extract_strided_slice %9 {offsets = [0, 6, 0], sizes = [16, 1, 8], strides = [1, 1, 1]} : vector<16x10x8xbf16> to vector<16x1x8xbf16>
    %256 = vector.shape_cast %255 : vector<16x1x8xbf16> to vector<16x8xbf16>
    %257 = vector.extract_strided_slice %10 {offsets = [0, 6, 0], sizes = [16, 1, 8], strides = [1, 1, 1]} : vector<16x10x8xbf16> to vector<16x1x8xbf16>
    %258 = vector.shape_cast %257 : vector<16x1x8xbf16> to vector<16x8xbf16>
    %259 = vector.extract_strided_slice %11 {offsets = [0, 6, 0], sizes = [16, 1, 8], strides = [1, 1, 1]} : vector<16x10x8xbf16> to vector<16x1x8xbf16>
    %260 = vector.shape_cast %259 : vector<16x1x8xbf16> to vector<16x8xbf16>
    %261 = vector.extract_strided_slice %12 {offsets = [0, 6, 0], sizes = [16, 1, 8], strides = [1, 1, 1]} : vector<16x10x8xbf16> to vector<16x1x8xbf16>
    %262 = vector.shape_cast %261 : vector<16x1x8xbf16> to vector<16x8xbf16>
    %263 = vector.extract_strided_slice %13 {offsets = [0, 6, 0], sizes = [16, 1, 8], strides = [1, 1, 1]} : vector<16x10x8xbf16> to vector<16x1x8xbf16>
    %264 = vector.shape_cast %263 : vector<16x1x8xbf16> to vector<16x8xbf16>
    %265 = vector.extract_strided_slice %8 {offsets = [0, 7, 0], sizes = [16, 1, 8], strides = [1, 1, 1]} : vector<16x10x8xbf16> to vector<16x1x8xbf16>
    %266 = vector.shape_cast %265 : vector<16x1x8xbf16> to vector<16x8xbf16>
    %267 = vector.extract_strided_slice %9 {offsets = [0, 7, 0], sizes = [16, 1, 8], strides = [1, 1, 1]} : vector<16x10x8xbf16> to vector<16x1x8xbf16>
    %268 = vector.shape_cast %267 : vector<16x1x8xbf16> to vector<16x8xbf16>
    %269 = vector.extract_strided_slice %10 {offsets = [0, 7, 0], sizes = [16, 1, 8], strides = [1, 1, 1]} : vector<16x10x8xbf16> to vector<16x1x8xbf16>
    %270 = vector.shape_cast %269 : vector<16x1x8xbf16> to vector<16x8xbf16>
    %271 = vector.extract_strided_slice %11 {offsets = [0, 7, 0], sizes = [16, 1, 8], strides = [1, 1, 1]} : vector<16x10x8xbf16> to vector<16x1x8xbf16>
    %272 = vector.shape_cast %271 : vector<16x1x8xbf16> to vector<16x8xbf16>
    %273 = vector.extract_strided_slice %12 {offsets = [0, 7, 0], sizes = [16, 1, 8], strides = [1, 1, 1]} : vector<16x10x8xbf16> to vector<16x1x8xbf16>
    %274 = vector.shape_cast %273 : vector<16x1x8xbf16> to vector<16x8xbf16>
    %275 = vector.extract_strided_slice %13 {offsets = [0, 7, 0], sizes = [16, 1, 8], strides = [1, 1, 1]} : vector<16x10x8xbf16> to vector<16x1x8xbf16>
    %276 = vector.shape_cast %275 : vector<16x1x8xbf16> to vector<16x8xbf16>
    %277 = tpu.concatenate %242, %244, %246, %248, %250, %252, %254, %256, %258, %260, %262, %264, %266, %268, %270, %272 in 0 : vector<16x8xbf16>, vector<16x8xbf16>, vector<16x8xbf16>, vector<16x8xbf16>, vector<16x8xbf16>, vector<16x8xbf16>, vector<16x8xbf16>, vector<16x8xbf16>, vector<16x8xbf16>, vector<16x8xbf16>, vector<16x8xbf16>, vector<16x8xbf16>, vector<16x8xbf16>, vector<16x8xbf16>, vector<16x8xbf16>, vector<16x8xbf16> -> vector<256x8xbf16>
    %278 = tpu.concatenate %274, %276 in 0 : vector<16x8xbf16>, vector<16x8xbf16> -> vector<32x8xbf16>
    %279 = tpu.concatenate %277, %278 in 0 : vector<256x8xbf16>, vector<32x8xbf16> -> vector<288x8xbf16>
    %cst_31 = arith.constant dense<0.000000e+00> : vector<8x8xf32>
    %280 = tpu.matmul %14, %279, %cst_31 {dimension_numbers = #tpu.dot_dimension_numbers<[1], [0], [0], [1], [0, 0, 1, 1], [], []>} : vector<8x288xbf16>, vector<288x8xbf16>, vector<8x8xf32> -> vector<8x8xf32>
    %281 = vector.broadcast %15 : vector<8x1xf32> to vector<8x8xf32>
    %282 = arith.addf %280, %281 : vector<8x8xf32>
    %c0_32 = arith.constant 0 : index
    %c0_33 = arith.constant 0 : index
    %c5 = arith.constant 5 : index
    %c0_34 = arith.constant 0 : index
    %283 = vector.load %arg6[%c0_32, %c0_33, %c5, %c0_34] : memref<1x8x8x8xf32, #tpu.memory_space<vmem>>, vector<1x8x1x8xf32>
    %284 = vector.shape_cast %283 : vector<1x8x1x8xf32> to vector<8x8xf32>
    %285 = vector.shape_cast %282 : vector<8x8xf32> to vector<1x8x1x8xf32>
    tpu.vector_store %arg6[%c0_32, %c0_33, %c5, %c0_34], %285 {strides = array<i32>} : memref<1x8x8x8xf32, #tpu.memory_space<vmem>>, vector<1x8x1x8xf32>,
    %286 = vector.extract_strided_slice %8 {offsets = [0, 6, 0], sizes = [16, 1, 8], strides = [1, 1, 1]} : vector<16x10x8xbf16> to vector<16x1x8xbf16>
    %287 = vector.shape_cast %286 : vector<16x1x8xbf16> to vector<16x8xbf16>
    %288 = vector.extract_strided_slice %9 {offsets = [0, 6, 0], sizes = [16, 1, 8], strides = [1, 1, 1]} : vector<16x10x8xbf16> to vector<16x1x8xbf16>
    %289 = vector.shape_cast %288 : vector<16x1x8xbf16> to vector<16x8xbf16>
    %290 = vector.extract_strided_slice %10 {offsets = [0, 6, 0], sizes = [16, 1, 8], strides = [1, 1, 1]} : vector<16x10x8xbf16> to vector<16x1x8xbf16>
    %291 = vector.shape_cast %290 : vector<16x1x8xbf16> to vector<16x8xbf16>
    %292 = vector.extract_strided_slice %11 {offsets = [0, 6, 0], sizes = [16, 1, 8], strides = [1, 1, 1]} : vector<16x10x8xbf16> to vector<16x1x8xbf16>
    %293 = vector.shape_cast %292 : vector<16x1x8xbf16> to vector<16x8xbf16>
    %294 = vector.extract_strided_slice %12 {offsets = [0, 6, 0], sizes = [16, 1, 8], strides = [1, 1, 1]} : vector<16x10x8xbf16> to vector<16x1x8xbf16>
    %295 = vector.shape_cast %294 : vector<16x1x8xbf16> to vector<16x8xbf16>
    %296 = vector.extract_strided_slice %13 {offsets = [0, 6, 0], sizes = [16, 1, 8], strides = [1, 1, 1]} : vector<16x10x8xbf16> to vector<16x1x8xbf16>
    %297 = vector.shape_cast %296 : vector<16x1x8xbf16> to vector<16x8xbf16>
    %298 = vector.extract_strided_slice %8 {offsets = [0, 7, 0], sizes = [16, 1, 8], strides = [1, 1, 1]} : vector<16x10x8xbf16> to vector<16x1x8xbf16>
    %299 = vector.shape_cast %298 : vector<16x1x8xbf16> to vector<16x8xbf16>
    %300 = vector.extract_strided_slice %9 {offsets = [0, 7, 0], sizes = [16, 1, 8], strides = [1, 1, 1]} : vector<16x10x8xbf16> to vector<16x1x8xbf16>
    %301 = vector.shape_cast %300 : vector<16x1x8xbf16> to vector<16x8xbf16>
    %302 = vector.extract_strided_slice %10 {offsets = [0, 7, 0], sizes = [16, 1, 8], strides = [1, 1, 1]} : vector<16x10x8xbf16> to vector<16x1x8xbf16>
    %303 = vector.shape_cast %302 : vector<16x1x8xbf16> to vector<16x8xbf16>
    %304 = vector.extract_strided_slice %11 {offsets = [0, 7, 0], sizes = [16, 1, 8], strides = [1, 1, 1]} : vector<16x10x8xbf16> to vector<16x1x8xbf16>
    %305 = vector.shape_cast %304 : vector<16x1x8xbf16> to vector<16x8xbf16>
    %306 = vector.extract_strided_slice %12 {offsets = [0, 7, 0], sizes = [16, 1, 8], strides = [1, 1, 1]} : vector<16x10x8xbf16> to vector<16x1x8xbf16>
    %307 = vector.shape_cast %306 : vector<16x1x8xbf16> to vector<16x8xbf16>
    %308 = vector.extract_strided_slice %13 {offsets = [0, 7, 0], sizes = [16, 1, 8], strides = [1, 1, 1]} : vector<16x10x8xbf16> to vector<16x1x8xbf16>
    %309 = vector.shape_cast %308 : vector<16x1x8xbf16> to vector<16x8xbf16>
    %310 = vector.extract_strided_slice %8 {offsets = [0, 8, 0], sizes = [16, 1, 8], strides = [1, 1, 1]} : vector<16x10x8xbf16> to vector<16x1x8xbf16>
    %311 = vector.shape_cast %310 : vector<16x1x8xbf16> to vector<16x8xbf16>
    %312 = vector.extract_strided_slice %9 {offsets = [0, 8, 0], sizes = [16, 1, 8], strides = [1, 1, 1]} : vector<16x10x8xbf16> to vector<16x1x8xbf16>
    %313 = vector.shape_cast %312 : vector<16x1x8xbf16> to vector<16x8xbf16>
    %314 = vector.extract_strided_slice %10 {offsets = [0, 8, 0], sizes = [16, 1, 8], strides = [1, 1, 1]} : vector<16x10x8xbf16> to vector<16x1x8xbf16>
    %315 = vector.shape_cast %314 : vector<16x1x8xbf16> to vector<16x8xbf16>
    %316 = vector.extract_strided_slice %11 {offsets = [0, 8, 0], sizes = [16, 1, 8], strides = [1, 1, 1]} : vector<16x10x8xbf16> to vector<16x1x8xbf16>
    %317 = vector.shape_cast %316 : vector<16x1x8xbf16> to vector<16x8xbf16>
    %318 = vector.extract_strided_slice %12 {offsets = [0, 8, 0], sizes = [16, 1, 8], strides = [1, 1, 1]} : vector<16x10x8xbf16> to vector<16x1x8xbf16>
    %319 = vector.shape_cast %318 : vector<16x1x8xbf16> to vector<16x8xbf16>
    %320 = vector.extract_strided_slice %13 {offsets = [0, 8, 0], sizes = [16, 1, 8], strides = [1, 1, 1]} : vector<16x10x8xbf16> to vector<16x1x8xbf16>
    %321 = vector.shape_cast %320 : vector<16x1x8xbf16> to vector<16x8xbf16>
    %322 = tpu.concatenate %287, %289, %291, %293, %295, %297, %299, %301, %303, %305, %307, %309, %311, %313, %315, %317 in 0 : vector<16x8xbf16>, vector<16x8xbf16>, vector<16x8xbf16>, vector<16x8xbf16>, vector<16x8xbf16>, vector<16x8xbf16>, vector<16x8xbf16>, vector<16x8xbf16>, vector<16x8xbf16>, vector<16x8xbf16>, vector<16x8xbf16>, vector<16x8xbf16>, vector<16x8xbf16>, vector<16x8xbf16>, vector<16x8xbf16>, vector<16x8xbf16> -> vector<256x8xbf16>
    %323 = tpu.concatenate %319, %321 in 0 : vector<16x8xbf16>, vector<16x8xbf16> -> vector<32x8xbf16>
    %324 = tpu.concatenate %322, %323 in 0 : vector<256x8xbf16>, vector<32x8xbf16> -> vector<288x8xbf16>
    %cst_35 = arith.constant dense<0.000000e+00> : vector<8x8xf32>
    %325 = tpu.matmul %14, %324, %cst_35 {dimension_numbers = #tpu.dot_dimension_numbers<[1], [0], [0], [1], [0, 0, 1, 1], [], []>} : vector<8x288xbf16>, vector<288x8xbf16>, vector<8x8xf32> -> vector<8x8xf32>
    %326 = vector.broadcast %15 : vector<8x1xf32> to vector<8x8xf32>
    %327 = arith.addf %325, %326 : vector<8x8xf32>
    %c0_36 = arith.constant 0 : index
    %c0_37 = arith.constant 0 : index
    %c6 = arith.constant 6 : index
    %c0_38 = arith.constant 0 : index
    %328 = vector.load %arg6[%c0_36, %c0_37, %c6, %c0_38] : memref<1x8x8x8xf32, #tpu.memory_space<vmem>>, vector<1x8x1x8xf32>
    %329 = vector.shape_cast %328 : vector<1x8x1x8xf32> to vector<8x8xf32>
    %330 = vector.shape_cast %327 : vector<8x8xf32> to vector<1x8x1x8xf32>
    tpu.vector_store %arg6[%c0_36, %c0_37, %c6, %c0_38], %330 {strides = array<i32>} : memref<1x8x8x8xf32, #tpu.memory_space<vmem>>, vector<1x8x1x8xf32>,
    %331 = vector.extract_strided_slice %8 {offsets = [0, 7, 0], sizes = [16, 1, 8], strides = [1, 1, 1]} : vector<16x10x8xbf16> to vector<16x1x8xbf16>
    %332 = vector.shape_cast %331 : vector<16x1x8xbf16> to vector<16x8xbf16>
    %333 = vector.extract_strided_slice %9 {offsets = [0, 7, 0], sizes = [16, 1, 8], strides = [1, 1, 1]} : vector<16x10x8xbf16> to vector<16x1x8xbf16>
    %334 = vector.shape_cast %333 : vector<16x1x8xbf16> to vector<16x8xbf16>
    %335 = vector.extract_strided_slice %10 {offsets = [0, 7, 0], sizes = [16, 1, 8], strides = [1, 1, 1]} : vector<16x10x8xbf16> to vector<16x1x8xbf16>
    %336 = vector.shape_cast %335 : vector<16x1x8xbf16> to vector<16x8xbf16>
    %337 = vector.extract_strided_slice %11 {offsets = [0, 7, 0], sizes = [16, 1, 8], strides = [1, 1, 1]} : vector<16x10x8xbf16> to vector<16x1x8xbf16>
    %338 = vector.shape_cast %337 : vector<16x1x8xbf16> to vector<16x8xbf16>
    %339 = vector.extract_strided_slice %12 {offsets = [0, 7, 0], sizes = [16, 1, 8], strides = [1, 1, 1]} : vector<16x10x8xbf16> to vector<16x1x8xbf16>
    %340 = vector.shape_cast %339 : vector<16x1x8xbf16> to vector<16x8xbf16>
    %341 = vector.extract_strided_slice %13 {offsets = [0, 7, 0], sizes = [16, 1, 8], strides = [1, 1, 1]} : vector<16x10x8xbf16> to vector<16x1x8xbf16>
    %342 = vector.shape_cast %341 : vector<16x1x8xbf16> to vector<16x8xbf16>
    %343 = vector.extract_strided_slice %8 {offsets = [0, 8, 0], sizes = [16, 1, 8], strides = [1, 1, 1]} : vector<16x10x8xbf16> to vector<16x1x8xbf16>
    %344 = vector.shape_cast %343 : vector<16x1x8xbf16> to vector<16x8xbf16>
    %345 = vector.extract_strided_slice %9 {offsets = [0, 8, 0], sizes = [16, 1, 8], strides = [1, 1, 1]} : vector<16x10x8xbf16> to vector<16x1x8xbf16>
    %346 = vector.shape_cast %345 : vector<16x1x8xbf16> to vector<16x8xbf16>
    %347 = vector.extract_strided_slice %10 {offsets = [0, 8, 0], sizes = [16, 1, 8], strides = [1, 1, 1]} : vector<16x10x8xbf16> to vector<16x1x8xbf16>
    %348 = vector.shape_cast %347 : vector<16x1x8xbf16> to vector<16x8xbf16>
    %349 = vector.extract_strided_slice %11 {offsets = [0, 8, 0], sizes = [16, 1, 8], strides = [1, 1, 1]} : vector<16x10x8xbf16> to vector<16x1x8xbf16>
    %350 = vector.shape_cast %349 : vector<16x1x8xbf16> to vector<16x8xbf16>
    %351 = vector.extract_strided_slice %12 {offsets = [0, 8, 0], sizes = [16, 1, 8], strides = [1, 1, 1]} : vector<16x10x8xbf16> to vector<16x1x8xbf16>
    %352 = vector.shape_cast %351 : vector<16x1x8xbf16> to vector<16x8xbf16>
    %353 = vector.extract_strided_slice %13 {offsets = [0, 8, 0], sizes = [16, 1, 8], strides = [1, 1, 1]} : vector<16x10x8xbf16> to vector<16x1x8xbf16>
    %354 = vector.shape_cast %353 : vector<16x1x8xbf16> to vector<16x8xbf16>
    %355 = vector.extract_strided_slice %8 {offsets = [0, 9, 0], sizes = [16, 1, 8], strides = [1, 1, 1]} : vector<16x10x8xbf16> to vector<16x1x8xbf16>
    %356 = vector.shape_cast %355 : vector<16x1x8xbf16> to vector<16x8xbf16>
    %357 = vector.extract_strided_slice %9 {offsets = [0, 9, 0], sizes = [16, 1, 8], strides = [1, 1, 1]} : vector<16x10x8xbf16> to vector<16x1x8xbf16>
    %358 = vector.shape_cast %357 : vector<16x1x8xbf16> to vector<16x8xbf16>
    %359 = vector.extract_strided_slice %10 {offsets = [0, 9, 0], sizes = [16, 1, 8], strides = [1, 1, 1]} : vector<16x10x8xbf16> to vector<16x1x8xbf16>
    %360 = vector.shape_cast %359 : vector<16x1x8xbf16> to vector<16x8xbf16>
    %361 = vector.extract_strided_slice %11 {offsets = [0, 9, 0], sizes = [16, 1, 8], strides = [1, 1, 1]} : vector<16x10x8xbf16> to vector<16x1x8xbf16>
    %362 = vector.shape_cast %361 : vector<16x1x8xbf16> to vector<16x8xbf16>
    %363 = vector.extract_strided_slice %12 {offsets = [0, 9, 0], sizes = [16, 1, 8], strides = [1, 1, 1]} : vector<16x10x8xbf16> to vector<16x1x8xbf16>
    %364 = vector.shape_cast %363 : vector<16x1x8xbf16> to vector<16x8xbf16>
    %365 = vector.extract_strided_slice %13 {offsets = [0, 9, 0], sizes = [16, 1, 8], strides = [1, 1, 1]} : vector<16x10x8xbf16> to vector<16x1x8xbf16>
    %366 = vector.shape_cast %365 : vector<16x1x8xbf16> to vector<16x8xbf16>
    %367 = tpu.concatenate %332, %334, %336, %338, %340, %342, %344, %346, %348, %350, %352, %354, %356, %358, %360, %362 in 0 : vector<16x8xbf16>, vector<16x8xbf16>, vector<16x8xbf16>, vector<16x8xbf16>, vector<16x8xbf16>, vector<16x8xbf16>, vector<16x8xbf16>, vector<16x8xbf16>, vector<16x8xbf16>, vector<16x8xbf16>, vector<16x8xbf16>, vector<16x8xbf16>, vector<16x8xbf16>, vector<16x8xbf16>, vector<16x8xbf16>, vector<16x8xbf16> -> vector<256x8xbf16>
    %368 = tpu.concatenate %364, %366 in 0 : vector<16x8xbf16>, vector<16x8xbf16> -> vector<32x8xbf16>
    %369 = tpu.concatenate %367, %368 in 0 : vector<256x8xbf16>, vector<32x8xbf16> -> vector<288x8xbf16>
    %cst_39 = arith.constant dense<0.000000e+00> : vector<8x8xf32>
    %370 = tpu.matmul %14, %369, %cst_39 {dimension_numbers = #tpu.dot_dimension_numbers<[1], [0], [0], [1], [0, 0, 1, 1], [], []>} : vector<8x288xbf16>, vector<288x8xbf16>, vector<8x8xf32> -> vector<8x8xf32>
    %371 = vector.broadcast %15 : vector<8x1xf32> to vector<8x8xf32>
    %372 = arith.addf %370, %371 : vector<8x8xf32>
    %c0_40 = arith.constant 0 : index
    %c0_41 = arith.constant 0 : index
    %c7 = arith.constant 7 : index
    %c0_42 = arith.constant 0 : index
    %373 = vector.load %arg6[%c0_40, %c0_41, %c7, %c0_42] : memref<1x8x8x8xf32, #tpu.memory_space<vmem>>, vector<1x8x1x8xf32>
    %374 = vector.shape_cast %373 : vector<1x8x1x8xf32> to vector<8x8xf32>
    %375 = vector.shape_cast %372 : vector<8x8xf32> to vector<1x8x1x8xf32>
    tpu.vector_store %arg6[%c0_40, %c0_41, %c7, %c0_42], %375 {strides = array<i32>} : memref<1x8x8x8xf32, #tpu.memory_space<vmem>>, vector<1x8x1x8xf32>,
    return
  }
  func.func @transform_0(%arg0: i32, %arg1: i32) -> (i32, i32, i32, i32, i32) {
    %c0_i32 = arith.constant 0 : i32
    %0 = arith.addi %arg0, %c0_i32 : i32
    %c0_i32_0 = arith.constant 0 : i32
    %c0_i32_1 = arith.constant 0 : i32
    %c0_i32_2 = arith.constant 0 : i32
    %c0_i32_3 = arith.constant 0 : i32
    %c0_i32_4 = arith.constant 0 : i32
    return %0, %c0_i32_0, %c0_i32_1, %c0_i32_2, %c0_i32_3 : i32, i32, i32, i32, i32
  }
  func.func @transform_1(%arg0: i32, %arg1: i32) -> (i32, i32, i32, i32, i32) {
    %c2_i32 = arith.constant 2 : i32
    %0 = arith.addi %arg0, %c2_i32 : i32
    %c0_i32 = arith.constant 0 : i32
    %c0_i32_0 = arith.constant 0 : i32
    %c0_i32_1 = arith.constant 0 : i32
    %c0_i32_2 = arith.constant 0 : i32
    %c0_i32_3 = arith.constant 0 : i32
    return %0, %c0_i32, %c0_i32_0, %c0_i32_1, %c0_i32_2 : i32, i32, i32, i32, i32
  }
  func.func @transform_2(%arg0: i32, %arg1: i32) -> (i32, i32) {
    %c0_i32 = arith.constant 0 : i32
    %c0_i32_0 = arith.constant 0 : i32
    %c0_i32_1 = arith.constant 0 : i32
    return %c0_i32, %c0_i32_0 : i32, i32
  }
  func.func @transform_3(%arg0: i32, %arg1: i32) -> (i32, i32) {
    %c0_i32 = arith.constant 0 : i32
    %c0_i32_0 = arith.constant 0 : i32
    %c0_i32_1 = arith.constant 0 : i32
    return %c0_i32, %c0_i32_0 : i32, i32
  }
  func.func @transform_4(%arg0: i32, %arg1: i32) -> (i32, i32, i32, i32) {
    %c0_i32 = arith.constant 0 : i32
    %c0_i32_0 = arith.constant 0 : i32
    %c0_i32_1 = arith.constant 0 : i32
    return %arg0, %c0_i32, %arg1, %c0_i32_0 : i32, i32, i32, i32
  }
}

module attributes {stable_mosaic.version = 11 : i64} {
  func.func @_grid_sample_kernel(%arg0: i32, %arg1: i32, %arg2: memref<1x2x256xf32, #tpu.memory_space<vmem>>, %arg3: memref<1x64x16xbf16, #tpu.memory_space<vmem>>, %arg4: memref<1x4x256xf32, #tpu.memory_space<vmem>>) attributes {dimension_semantics = [#tpu.dimension_semantics<parallel>, #tpu.dimension_semantics<arbitrary>], iteration_bounds = array<i64: 2, 1>, scalar_prefetch = 0 : i64, scratch_operands = 0 : i64, tpu.core_type = #tpu.core_type<tc>, window_params = [{transform_indices = @transform_0, window_bounds = array<i64: 1, 2, 256>}, {transform_indices = @transform_1, window_bounds = array<i64: 1, 64, 16>}, {transform_indices = @transform_2, window_bounds = array<i64: 1, 4, 256>}]} {
    %c0 = arith.constant 0 : index
    %c0_0 = arith.constant 0 : index
    %c0_1 = arith.constant 0 : index
    %0 = vector.load %arg2[%c0, %c0_0, %c0_1] : memref<1x2x256xf32, #tpu.memory_space<vmem>>, vector<1x1x256xf32>
    %1 = vector.shape_cast %0 : vector<1x1x256xf32> to vector<1x256xf32>
    %c0_2 = arith.constant 0 : index
    %c1 = arith.constant 1 : index
    %c0_3 = arith.constant 0 : index
    %2 = vector.load %arg2[%c0_2, %c1, %c0_3] : memref<1x2x256xf32, #tpu.memory_space<vmem>>, vector<1x1x256xf32>
    %3 = vector.shape_cast %2 : vector<1x1x256xf32> to vector<1x256xf32>
    %cst = arith.constant 1.000000e+00 : f32
    %4 = vector.broadcast %cst : f32 to vector<1x256xf32>
    %5 = arith.addf %1, %4 : vector<1x256xf32>
    %cst_4 = arith.constant 8.000000e+00 : f32
    %6 = vector.broadcast %cst_4 : f32 to vector<1x256xf32>
    %7 = arith.mulf %5, %6 : vector<1x256xf32>
    %cst_5 = arith.constant 5.000000e-01 : f32
    %8 = vector.broadcast %cst_5 : f32 to vector<1x256xf32>
    %9 = arith.subf %7, %8 : vector<1x256xf32>
    %cst_6 = arith.constant 0.000000e+00 : f32
    %cst_7 = arith.constant 1.500000e+01 : f32
    %10 = vector.broadcast %cst_6 : f32 to vector<1x256xf32>
    %11 = arith.maximumf %10, %9 : vector<1x256xf32>
    %12 = vector.broadcast %cst_7 : f32 to vector<1x256xf32>
    %13 = arith.minimumf %12, %11 : vector<1x256xf32>
    %cst_8 = arith.constant 1.000000e+00 : f32
    %14 = vector.broadcast %cst_8 : f32 to vector<1x256xf32>
    %15 = arith.addf %3, %14 : vector<1x256xf32>
    %cst_9 = arith.constant 8.000000e+00 : f32
    %16 = vector.broadcast %cst_9 : f32 to vector<1x256xf32>
    %17 = arith.mulf %15, %16 : vector<1x256xf32>
    %cst_10 = arith.constant 5.000000e-01 : f32
    %18 = vector.broadcast %cst_10 : f32 to vector<1x256xf32>
    %19 = arith.subf %17, %18 : vector<1x256xf32>
    %cst_11 = arith.constant 0.000000e+00 : f32
    %cst_12 = arith.constant 1.500000e+01 : f32
    %20 = vector.broadcast %cst_11 : f32 to vector<1x256xf32>
    %21 = arith.maximumf %20, %19 : vector<1x256xf32>
    %22 = vector.broadcast %cst_12 : f32 to vector<1x256xf32>
    %23 = arith.minimumf %22, %21 : vector<1x256xf32>
    %24 = math.floor %13 : vector<1x256xf32>
    %25 = math.floor %23 : vector<1x256xf32>
    %26 = arith.subf %13, %24 : vector<1x256xf32>
    %27 = arith.subf %23, %25 : vector<1x256xf32>
    %28 = arith.fptosi %24 : vector<1x256xf32> to vector<1x256xi32>
    %29 = arith.fptosi %25 : vector<1x256xf32> to vector<1x256xi32>
    %c1_i32 = arith.constant 1 : i32
    %30 = vector.broadcast %c1_i32 : i32 to vector<1x256xi32>
    %31 = arith.addi %28, %30 : vector<1x256xi32>
    %c15_i32 = arith.constant 15 : i32
    %32 = vector.broadcast %c15_i32 : i32 to vector<1x256xi32>
    %33 = arith.minsi %31, %32 : vector<1x256xi32>
    %c1_i32_13 = arith.constant 1 : i32
    %34 = vector.broadcast %c1_i32_13 : i32 to vector<1x256xi32>
    %35 = arith.addi %29, %34 : vector<1x256xi32>
    %c15_i32_14 = arith.constant 15 : i32
    %36 = vector.broadcast %c15_i32_14 : i32 to vector<1x256xi32>
    %37 = arith.minsi %35, %36 : vector<1x256xi32>
    %38 = tpu.iota {dimensions = array<i32: 0>} : vector<16x256xi32>
    %39 = vector.broadcast %28 : vector<1x256xi32> to vector<16x256xi32>
    %40 = arith.cmpi eq, %38, %39 : vector<16x256xi32>
    %cst_15 = arith.constant 1.000000e+00 : f32
    %41 = vector.broadcast %cst_15 : f32 to vector<1x256xf32>
    %42 = arith.subf %41, %26 : vector<1x256xf32>
    %cst_16 = arith.constant 0.000000e+00 : f32
    %43 = vector.shape_cast %42 : vector<1x256xf32> to vector<1x256xf32>
    %44 = vector.broadcast %43 : vector<1x256xf32> to vector<16x256xf32>
    %45 = vector.broadcast %cst_16 : f32 to vector<16x256xf32>
    %46 = arith.select %40, %44, %45 : vector<16x256xi1>, vector<16x256xf32>
    %47 = vector.broadcast %33 : vector<1x256xi32> to vector<16x256xi32>
    %48 = arith.cmpi eq, %38, %47 : vector<16x256xi32>
    %cst_17 = arith.constant 0.000000e+00 : f32
    %49 = vector.shape_cast %26 : vector<1x256xf32> to vector<1x256xf32>
    %50 = vector.broadcast %49 : vector<1x256xf32> to vector<16x256xf32>
    %51 = vector.broadcast %cst_17 : f32 to vector<16x256xf32>
    %52 = arith.select %48, %50, %51 : vector<16x256xi1>, vector<16x256xf32>
    %53 = arith.addf %46, %52 : vector<16x256xf32>
    %54 = tpu.iota {dimensions = array<i32: 0>} : vector<16x256xi32>
    %55 = vector.broadcast %29 : vector<1x256xi32> to vector<16x256xi32>
    %56 = arith.cmpi eq, %54, %55 : vector<16x256xi32>
    %cst_18 = arith.constant 1.000000e+00 : f32
    %57 = vector.broadcast %cst_18 : f32 to vector<1x256xf32>
    %58 = arith.subf %57, %27 : vector<1x256xf32>
    %cst_19 = arith.constant 0.000000e+00 : f32
    %59 = vector.shape_cast %58 : vector<1x256xf32> to vector<1x256xf32>
    %60 = vector.broadcast %59 : vector<1x256xf32> to vector<16x256xf32>
    %61 = vector.broadcast %cst_19 : f32 to vector<16x256xf32>
    %62 = arith.select %56, %60, %61 : vector<16x256xi1>, vector<16x256xf32>
    %63 = vector.broadcast %37 : vector<1x256xi32> to vector<16x256xi32>
    %64 = arith.cmpi eq, %54, %63 : vector<16x256xi32>
    %cst_20 = arith.constant 0.000000e+00 : f32
    %65 = vector.shape_cast %27 : vector<1x256xf32> to vector<1x256xf32>
    %66 = vector.broadcast %65 : vector<1x256xf32> to vector<16x256xf32>
    %67 = vector.broadcast %cst_20 : f32 to vector<16x256xf32>
    %68 = arith.select %64, %66, %67 : vector<16x256xi1>, vector<16x256xf32>
    %69 = arith.addf %62, %68 : vector<16x256xf32>
    %c0_21 = arith.constant 0 : index
    %c0_22 = arith.constant 0 : index
    %c0_23 = arith.constant 0 : index
    %70 = vector.load %arg3[%c0_21, %c0_22, %c0_23] : memref<1x64x16xbf16, #tpu.memory_space<vmem>>, vector<1x64x16xbf16>
    %71 = vector.shape_cast %70 : vector<1x64x16xbf16> to vector<64x16xbf16>
    %72 = arith.truncf %53 : vector<16x256xf32> to vector<16x256xbf16>
    %cst_24 = arith.constant dense<0.000000e+00> : vector<64x256xf32>
    %73 = tpu.matmul %71, %72, %cst_24 {dimension_numbers = #tpu.dot_dimension_numbers<[1], [0], [0], [1], [0, 0, 1, 1], [], []>} : vector<64x16xbf16>, vector<16x256xbf16>, vector<64x256xf32> -> vector<64x256xf32>
    %74 = vector.extract_strided_slice %73 {offsets = [0, 0], sizes = [16, 256], strides = [1, 1]} : vector<64x256xf32> to vector<16x256xf32>
    %75 = arith.mulf %74, %69 : vector<16x256xf32>
    %cst_25 = arith.constant dense<0.000000e+00> : vector<256xf32>
    %76 = vector.multi_reduction <add>, %75, %cst_25 [0] : vector<16x256xf32> to vector<256xf32>
    %77 = vector.shape_cast %76 : vector<256xf32> to vector<1x256xf32>
    %78 = vector.extract_strided_slice %73 {offsets = [16, 0], sizes = [16, 256], strides = [1, 1]} : vector<64x256xf32> to vector<16x256xf32>
    %79 = arith.mulf %78, %69 : vector<16x256xf32>
    %cst_26 = arith.constant dense<0.000000e+00> : vector<256xf32>
    %80 = vector.multi_reduction <add>, %79, %cst_26 [0] : vector<16x256xf32> to vector<256xf32>
    %81 = vector.shape_cast %80 : vector<256xf32> to vector<1x256xf32>
    %82 = vector.extract_strided_slice %73 {offsets = [32, 0], sizes = [16, 256], strides = [1, 1]} : vector<64x256xf32> to vector<16x256xf32>
    %83 = arith.mulf %82, %69 : vector<16x256xf32>
    %cst_27 = arith.constant dense<0.000000e+00> : vector<256xf32>
    %84 = vector.multi_reduction <add>, %83, %cst_27 [0] : vector<16x256xf32> to vector<256xf32>
    %85 = vector.shape_cast %84 : vector<256xf32> to vector<1x256xf32>
    %86 = vector.extract_strided_slice %73 {offsets = [48, 0], sizes = [16, 256], strides = [1, 1]} : vector<64x256xf32> to vector<16x256xf32>
    %87 = arith.mulf %86, %69 : vector<16x256xf32>
    %cst_28 = arith.constant dense<0.000000e+00> : vector<256xf32>
    %88 = vector.multi_reduction <add>, %87, %cst_28 [0] : vector<16x256xf32> to vector<256xf32>
    %89 = vector.shape_cast %88 : vector<256xf32> to vector<1x256xf32>
    %90 = tpu.concatenate %77, %81, %85, %89 in 0 : vector<1x256xf32>, vector<1x256xf32>, vector<1x256xf32>, vector<1x256xf32> -> vector<4x256xf32>
    %c0_29 = arith.constant 0 : index
    %c0_30 = arith.constant 0 : index
    %c0_31 = arith.constant 0 : index
    %91 = vector.load %arg4[%c0_29, %c0_30, %c0_31] : memref<1x4x256xf32, #tpu.memory_space<vmem>>, vector<1x4x256xf32>
    %92 = vector.shape_cast %91 : vector<1x4x256xf32> to vector<4x256xf32>
    %93 = vector.shape_cast %90 : vector<4x256xf32> to vector<1x4x256xf32>
    tpu.vector_store %arg4[%c0_29, %c0_30, %c0_31], %93 {strides = array<i32>} : memref<1x4x256xf32, #tpu.memory_space<vmem>>, vector<1x4x256xf32>,
    return
  }
  func.func @transform_0(%arg0: i32, %arg1: i32) -> (i32, i32, i32) {
    %c0_i32 = arith.constant 0 : i32
    %c0_i32_0 = arith.constant 0 : i32
    return %arg0, %c0_i32, %arg1 : i32, i32, i32
  }
  func.func @transform_1(%arg0: i32, %arg1: i32) -> (i32, i32, i32) {
    %c0_i32 = arith.constant 0 : i32
    %c0_i32_0 = arith.constant 0 : i32
    %c0_i32_1 = arith.constant 0 : i32
    return %arg0, %c0_i32, %c0_i32_0 : i32, i32, i32
  }
  func.func @transform_2(%arg0: i32, %arg1: i32) -> (i32, i32, i32) {
    %c0_i32 = arith.constant 0 : i32
    %c0_i32_0 = arith.constant 0 : i32
    return %arg0, %c0_i32, %arg1 : i32, i32, i32
  }
}

</mosaic_0001>

<bundles_post_ra>
// kernel: baseline_forward.6
= control target key start
LH: loop header
LB: loop body
LE: loop exit
PB: predicated region body
PF: predicated region fallthrough
CT: control target
= control target key end

     0   :  { %s460_s12 = smov 0   ;;  %s490_s0 = inlined_call_operand.vmem [shape: f32[4,8,8], index: 0, kind: input, shape index: {}]   ;;  %s491_s1 = inlined_call_operand.vmem [shape: f32[16,8], index: 1, kind: input, shape index: {}]   ;;  %s492_s2 = inlined_call_operand.vmem [shape: f32[8,16], index: 2, kind: input, shape index: {}]   ;;  %s493_s3 = inlined_call_operand.vmem [shape: f32[4,16,16], index: 3, kind: output, shape index: {}]  }
   0x1 LB: > { %s393_s13 = sadd.s32 4294967295, %s438_s12   ;;  %p397_p0 = scmp.ge.s32.totalorder %s438_s12, 1  ;;  %s438_s12 = sphi %s460_s12, %s13_s12  }
   0x2   : > { %p136_p1 = scmp.lt.s32.totalorder %s438_s12, 5 }
   0x4   : > { %p137_p2 = pnand %p397_p0, %p136_p1 }
   0x5   : > { %p159_p3 = scmp.lt.s32.totalorder (!%p137_p2), %s393_s13, 3 }
   0x6   : > { %140 = sbr.rel (%p137_p2) target bundleno = 409 (0x199), region = 32 }
   0xb   : > { %v168_v0 = vld [vmem:[%s491_s1] sm:$0xff]  ;;  %vm171_vm0 = vcmask 64512   ;;  %s495_s13 = smov (!%p159_p3, %s393_s13), 3  ;;  %v169_v2 = vld [vmem:[%s491_s1 + $0x8] sm:$0xff]  ;;  %vm335_vm1 = vcmask 130048  }
   0xc   : > { %416 = vmatprep.mubr.msk.f32.mxu0 %vm171_vm0, %v168_v0  ;;  %s398_s16 = sshll.u32 %s495_s13, 3  ;;  %v253_v3 = vld [vmem:[%s492_s2] sm:$0xff]  ;;  %s407_s24 = sshll.u32 %s495_s13, 4 }
   0xd   : > { %s162_s19 = scalar_lea.vmem %s490_s0, %s398_s16  ;;  %419 = vmatprep.subr.mxu1 %v253_v3  ;;  %s167_s27 = scalar_lea.vmem %s493_s3, %s407_s24 }
   0xe   : > { %v170_v1 = vld [vmem:[%s162_s19] sm:$0xff]  ;;  %420 = vmatpush3.msra.mxu1 %v253_v3 }
   0xf   : > { %414 = vmatprep.subr.mxu0 %v170_v1 }
  0x10   : > { %415 = vmatpush3.msra.mxu0 %v170_v1 }
  0x11   : > { %417 = vmatmul.mubr.msk.f32.vlgmr.msra.gmra.mxu0 %vm171_vm0, %v169_v2 }
  0xd1   : > { %v418_v4 = vpop.f32.mrf.mxu0 }
  0xd3   : > { %v244_v5 = vpop.f32.mrf.mxu0 }
  0xd4   : > { %421 = vmatprep.mubr.msk.f32.mxu1 %vm171_vm0, %v244_v5 }
  0xd5   : > { %422 = vmatmul.mubr.msk.f32.vlgmr.msra.gmra.mxu1 %vm171_vm0, %v418_v4 }
 0x195   : > { %v423_v6 = vpop.f32.mrf.mxu1 }
 0x196   : > { %337 = vst.msk [vmem:[%s167_s27 + $0x8] sm:$0xff] %vm335_vm1, %v423_v6 }
 0x197   : > { %v326_v7 = vpop.f32.mrf.mxu1 }
 0x198   : > { %336 = vst.msk [vmem:[%s167_s27] sm:$0xff] %vm335_vm1, %v326_v7 }
 0x199 PF: > { %s13_s12 = sadd.s32 1, %s438_s12  }
 0x19a   : > { %p10_p4 = scmp.ge.s32.totalorder %s13_s12, 6  }
 0x19c   :  { %12 = sbr.rel (!%p10_p4) target bundleno = 1 (0x1), region = 62 }

// kernel: baseline_forward.7
= control target key start
LH: loop header
LB: loop body
LE: loop exit
PB: predicated region body
PF: predicated region fallthrough
CT: control target
= control target key end

     0   :  { %s753_s9 = smov 0   ;;  %s755_s10 = smov 0   ;;  %s859_s0 = inlined_call_operand.vmem [shape: f32[2,2,256], index: 0, kind: input, shape index: {}]   ;;  %s860_s1 = inlined_call_operand.vmem [shape: bf16[2,64,16], index: 1, kind: input, shape index: {}]   ;;  %s861_s2 = inlined_call_operand.vmem [shape: f32[2,4,256], index: 2, kind: output, shape index: {}]  }
   0x1   :  { %s757_s11 = smov 0  }
   0x2 LB: > { %s24_s12 = sadd.s32 1, %s731_s10  ;;  %p655_p0 = scmp.ge.s32.totalorder %s735_s11, 1  ;;  %s735_s11 = sphi %s757_s11, %s12_s11   ;;  %s731_s10 = sphi %s755_s10, %s863_s10   ;;  %s727_s9 = sphi %s753_s9, %s862_s9  }
   0x3   : > { %p26_p1 = scmp.ge.s32.totalorder %s24_s12, 2  ;;  %p143_p2 = scmp.lt.s32.totalorder %s735_s11, 3 }
   0x5   : > { %s865_s12 = smov (%p26_p1, %s24_s12), 0  ;;  %p144_p3 = pnand %p655_p0, %p143_p2 }
   0x6   : > { %p179_p4 = scmp.lt.s32.totalorder (!%p144_p3), %s727_s9, 1 }
   0x7   : > { %147 = sbr.rel (%p144_p3) target bundleno = 277 (0x115), region = 28 }
   0xc   : > { %v737_v0 = vmov 0   ;;  %s867_s9 = smov (!%p179_p4, %s727_s9), 1  ;;  %v229_v7 = vlaneseq  ;;  %vm380_vm12 = vcmask 130048  }
   0xd   : > { %425 = vmatprep.mubr.bf16.mxu0 %v737_v0  ;;  %445 = vmatprep.mubr.bf16.mxu1 %v737_v0  ;;  %s675_s13 = sshll.u32 %s867_s9, 2  ;;  %s676_s14 = sshll.u32 %s867_s9, 5 }
   0xe   : > { %s186_s17 = scalar_lea.vmem %s859_s0, %s675_s13  ;;  %s783_s20 = scalar_lea.vmem %s860_s1, %s676_s14  ;;  %v785_v12 = vshrl.u32 %v229_v7, 7 }
   0xf   : > { %v204_v1 = vld [vmem:[%s186_s17] ss:$2 sm:$0x3]  ;;  %v662_v2 = vld [vmem:[%s186_s17 + $0x1] ss:$2 sm:$0x3] }
  0x10   : > { %v207_v3 = vadd.f32 1.0, %v204_v1  ;;  %v212_v4 = vadd.f32 1.0, %v662_v2  ;;  %v788_v17 = vsub.s32 1, %v785_v12  ;;  %v234_v18 = vsub.s32 0, %v785_v12  ;;  %v709_v59 = vld [vmem:[%s783_s20] sm:$0xff]   ;;  %v710_v60 = vld [vmem:[%s783_s20 + $0x10] sm:$0xff]  }
  0x11   : > { %v794_v24 = vadd.s32 8, %v785_v12  ;;  %v711_v63 = vld [vmem:[%s783_s20 + $0x8] sm:$0xff]   ;;  %v712_v1 = vld [vmem:[%s783_s20 + $0x18] sm:$0xff]   ;;  %s677_s21 = sshll.u32 %s867_s9, 3 }
  0x12   : > { %v208_v5 = vmul.f32 8.0, %v207_v3  ;;  %v213_v6 = vmul.f32 8.0, %v212_v4  ;;  %s201_s24 = scalar_lea.vmem %s861_s2, %s677_s21 }
  0x14   : > { %v663_v8 = vadd.f32 -0.5, %v208_v5  ;;  %v664_v9 = vadd.f32 -0.5, %v213_v6 }
  0x16   : > { %v210_v10 = vmax.f32 %v663_v8, 0.0  ;;  %v215_v11 = vmax.f32 %v664_v9, 0.0 }
  0x18   : > { %v211_v13 = vmin.f32 %v210_v10, 15.0  ;;  %v216_v14 = vmin.f32 %v215_v11, 15.0 }
  0x1a   : > { %v217_v15 = vfloor.f32 %v211_v13  ;;  %v218_v16 = vfloor.f32 %v216_v14 }
  0x1c   : > { %v219_v19 = vsub.f32 %v211_v13, %v217_v15  ;;  %v680_v20 = vtrunc.f32 %v217_v15  ;;  %v791_v21 = vsub.f32 %v216_v14, %v218_v16  ;;  %v682_v22 = vtrunc.f32 %v218_v16 }
  0x1e   : > { %v681_v23 = vcvt.f32.s32 %v680_v20  ;;  %v244_v25 = vsub.f32 1.0, %v219_v19  ;;  %v796_v26 = vcvt.f32.s32 %v682_v22  ;;  %v303_v27 = vsub.f32 1.0, %v791_v21 }
  0x1f   : > { %v800_v28 = vrot.slane %v791_v21, %v234_v18  ;;  %v280_v38 = vrot.slane %v219_v19, %v788_v17  ;;  %v276_v39 = vrot.slane %v219_v19, %v234_v18  ;;  %v339_v7 = vrot.slane %v791_v21, %v788_v17 }
  0x20   : > { %v223_v29 = vadd.s32 1, %v681_v23  ;;  %v239_v30 = vrot.slane %v681_v23, %v788_v17  ;;  %v253_v31 = vrot.slane %v244_v25, %v788_v17  ;;  %v235_v32 = vrot.slane %v681_v23, %v234_v18 }
  0x21   : > { %v249_v33 = vrot.slane %v244_v25, %v234_v18  ;;  %v226_v34 = vadd.s32 1, %v796_v26  ;;  %v294_v35 = vrot.slane %v796_v26, %v234_v18  ;;  %v308_v36 = vrot.slane %v303_v27, %v234_v18 }
  0x22   : > { %vm224_vm0 = vcmp.lt.s32.totalorder %v223_v29, 15  ;;  %vm241_vm1 = vcmp.eq.s32.totalorder %v785_v12, %v239_v30  ;;  %vm243_vm2 = vcmp.eq.s32.totalorder %v794_v24, %v239_v30  ;;  %vm240_vm3 = vcmp.eq.s32.totalorder %v785_v12, %v235_v32 }
  0x23   : > { %v225_v37 = vsel %vm224_vm0, %v223_v29, 15  ;;  %vm242_vm4 = vcmp.eq.s32.totalorder %v794_v24, %v235_v32  ;;  %v257_v40 = vsel %vm241_vm1, %v253_v31, 0.0  ;;  %v259_v41 = vsel %vm243_vm2, %v253_v31, 0.0 }
  0x24   : > { %v267_v42 = vrot.slane %v225_v37, %v788_v17  ;;  %v263_v43 = vrot.slane %v225_v37, %v234_v18  ;;  %v256_v44 = vsel %vm240_vm3, %v249_v33, 0.0  ;;  %v258_v45 = vsel %vm242_vm4, %v249_v33, 0.0 }
  0x25   : > { %vm227_vm5 = vcmp.lt.s32.totalorder %v226_v34, 15  ;;  %vm299_vm6 = vcmp.eq.s32.totalorder %v785_v12, %v294_v35  ;;  %vm301_vm13 = vcmp.eq.s32.totalorder %v794_v24, %v294_v35  ;;  %v298_v5 = vrot.slane %v796_v26, %v788_v17 }
  0x26   : > { %vm269_vm7 = vcmp.eq.s32.totalorder %v785_v12, %v267_v42  ;;  %vm271_vm8 = vcmp.eq.s32.totalorder %v794_v24, %v267_v42  ;;  %vm268_vm9 = vcmp.eq.s32.totalorder %v785_v12, %v263_v43  ;;  %vm270_vm10 = vcmp.eq.s32.totalorder %v794_v24, %v263_v43 }
  0x27   : > { %v284_v46 = vsel %vm269_vm7, %v280_v38, 0.0  ;;  %v286_v47 = vsel %vm271_vm8, %v280_v38, 0.0  ;;  %v283_v48 = vsel %vm268_vm9, %v276_v39, 0.0  ;;  %v285_v49 = vsel %vm270_vm10, %v276_v39, 0.0 }
  0x28   : > { %v288_v50 = vadd.f32 %v284_v46, %v257_v40  ;;  %v290_v51 = vadd.f32 %v286_v47, %v259_v41  ;;  %v287_v52 = vadd.f32 %v283_v48, %v256_v44  ;;  %v289_v53 = vadd.f32 %v285_v49, %v258_v45 }
  0x29   : > { %v228_v54 = vsel %vm227_vm5, %v226_v34, 15  ;;  %v315_v55 = vsel %vm299_vm6, %v308_v36, 0.0  ;;  %v317_v2 = vsel %vm301_vm13, %v308_v36, 0.0  ;;  %vm300_vm15 = vcmp.eq.s32.totalorder %v785_v12, %v298_v5 }
  0x2a   : > { %v359_v56 = vpack.c.bf16 %v290_v51, %v288_v50  ;;  %v358_v57 = vpack.c.bf16 %v289_v53, %v287_v52  ;;  %v322_v58 = vrot.slane %v228_v54, %v234_v18  ;;  %v326_v6 = vrot.slane %v228_v54, %v788_v17 }
  0x2b   : > { %vm302_vm1 = vcmp.eq.s32.totalorder %v794_v24, %v298_v5  ;;  %vm538_vm3 = vcmask 1040384   ;;  %vm541_vm4 = vcmask 1041408   ;;  %vm544_vm5 = vcmask 1042432  }
  0x2c   : > { %407 = vmatprep.subr.bf16.mxu0 %v359_v56  ;;  %678 = vmatprep.subr.bf16.mxu1 %v359_v56  ;;  %vm327_vm11 = vcmp.eq.s32.totalorder %v785_v12, %v322_v58  ;;  %vm329_vm14 = vcmp.eq.s32.totalorder %v794_v24, %v322_v58  ;;  %vm328_vm0 = vcmp.eq.s32.totalorder %v785_v12, %v326_v6 }
  0x2d   : > { %408 = vmatpush1.bf16.msra.mxu0 %v358_v57  ;;  %679 = vmatpush1.bf16.msra.mxu1 %v358_v57  ;;  %v342_v61 = vsel %vm327_vm11, %v800_v28, 0.0  ;;  %v344_v3 = vsel %vm329_vm14, %v800_v28, 0.0  ;;  %vm330_vm2 = vcmp.eq.s32.totalorder %v794_v24, %v326_v6  ;;  %v343_v9 = vsel %vm328_vm0, %v339_v7, 0.0 }
  0x2e   : > { %v346_v62 = vadd.f32 %v342_v61, %v315_v55  ;;  %v348_v4 = vadd.f32 %v344_v3, %v317_v2  ;;  %v345_v14 = vsel %vm330_vm2, %v339_v7, 0.0 }
  0x30   : > { %669 = vmatmul.mubr.msk.bf16.vlgmr.msra.gmra.mxu0 %vm380_vm12, %v709_v59  ;;  %671 = vmatmul.mubr.msk.bf16.vlgmr.msra.gmra.mxu1 %vm380_vm12, %v710_v60 }
  0x31   : > { %435 = vmatprep.mubr.bf16.mxu0 %v737_v0  ;;  %455 = vmatprep.mubr.bf16.mxu1 %v737_v0  ;;  %v312_v0 = vrot.slane %v303_v27, %v788_v17 }
  0x33   : > { %v316_v8 = vsel %vm300_vm15, %v312_v0, 0.0  ;;  %v318_v13 = vsel %vm302_vm1, %v312_v0, 0.0 }
  0x34   : > { %v347_v15 = vadd.f32 %v343_v9, %v316_v8  ;;  %v349_v19 = vadd.f32 %v345_v14, %v318_v13 }
  0x38   : > { %670 = vmatmul.mubr.msk.bf16.gmra.mxu0 %vm380_vm12, %v711_v63  ;;  %672 = vmatmul.mubr.msk.bf16.gmra.mxu1 %vm380_vm12, %v712_v1 }
  0xf0   : > { %v427_v10 = vpop.f32.mrf.mxu0  ;;  %v447_v11 = vpop.f32.mrf.mxu1 }
  0xf1   : > { %v466_v21 = vmul.f32 %v427_v10, %v346_v62  ;;  %v502_v22 = vmul.f32 %v447_v11, %v346_v62 }
  0xf2   : > { %v429_v16 = vpop.f32.mrf.mxu0  ;;  %v449_v18 = vpop.f32.mrf.mxu1 }
  0xf3   : > { %v467_v25 = vmul.f32 %v429_v16, %v347_v15  ;;  %v503_v26 = vmul.f32 %v449_v18, %v347_v15 }
  0xf4   : > { %v431_v20 = vpop.f32.mrf.mxu0  ;;  %v451_v17 = vpop.f32.mrf.mxu1 }
  0xf5   : > { %v468_v23 = vmul.f32 %v431_v20, %v348_v4  ;;  %v504_v12 = vmul.f32 %v451_v17, %v348_v4 }
  0xf6   : > { %v433_v27 = vpop.f32.mrf.mxu0  ;;  %v453_v24 = vpop.f32.mrf.mxu1 }
  0xf7   : > { %v470_v28 = vadd.f32 %v468_v23, %v466_v21  ;;  %v506_v29 = vadd.f32 %v504_v12, %v502_v22  ;;  %v469_v30 = vmul.f32 %v433_v27, %v349_v19  ;;  %v505_v31 = vmul.f32 %v453_v24, %v349_v19 }
  0xf8   : > { %v437_v32 = vpop.f32.mrf.mxu0  ;;  %v457_v33 = vpop.f32.mrf.mxu1 }
  0xf9   : > { %v471_v34 = vrot.slane %v470_v28, 4  ;;  %v507_v35 = vrot.slane %v506_v29, 4  ;;  %v477_v36 = vadd.f32 %v469_v30, %v467_v25  ;;  %v513_v37 = vadd.f32 %v505_v31, %v503_v26 }
  0xfa   : > { %v439_v38 = vpop.f32.mrf.mxu0  ;;  %v459_v39 = vpop.f32.mrf.mxu1  ;;  %v484_v47 = vmul.f32 %v437_v32, %v346_v62  ;;  %v520_v48 = vmul.f32 %v457_v33, %v346_v62 }
  0xfb   : > { %v472_v40 = vadd.f32 %v471_v34, %v470_v28  ;;  %v478_v41 = vrot.slane %v477_v36, 4  ;;  %v514_v42 = vrot.slane %v513_v37, 4  ;;  %v508_v45 = vadd.f32 %v507_v35, %v506_v29 }
  0xfc   : > { %v441_v43 = vpop.f32.mrf.mxu0  ;;  %v461_v44 = vpop.f32.mrf.mxu1  ;;  %v485_v55 = vmul.f32 %v439_v38, %v347_v15  ;;  %v521_v56 = vmul.f32 %v459_v39, %v347_v15 }
  0xfd   : > { %v479_v46 = vadd.f32 %v478_v41, %v477_v36  ;;  %v486_v49 = vmul.f32 %v441_v43, %v348_v4  ;;  %v522_v50 = vmul.f32 %v461_v44, %v348_v4  ;;  %v473_v53 = vrot.slane %v472_v40, 2 }
  0xfe   : > { %v443_v51 = vpop.f32.mrf.mxu0  ;;  %v463_v52 = vpop.f32.mrf.mxu1  ;;  %v515_v54 = vadd.f32 %v514_v42, %v513_v37  ;;  %v509_v61 = vrot.slane %v508_v45, 2 }
  0xff   : > { %v488_v57 = vadd.f32 %v486_v49, %v484_v47  ;;  %v524_v58 = vadd.f32 %v522_v50, %v520_v48  ;;  %v487_v59 = vmul.f32 %v443_v51, %v349_v19  ;;  %v523_v60 = vmul.f32 %v463_v52, %v349_v19 }
 0x100   : > { %v480_v63 = vrot.slane %v479_v46, 2  ;;  %v474_v6 = vadd.f32 %v473_v53, %v472_v40  ;;  %v516_v62 = vrot.slane %v515_v54, 2  ;;  %v510_v9 = vadd.f32 %v509_v61, %v508_v45 }
 0x101   : > { %v489_v1 = vrot.slane %v488_v57, 4  ;;  %v525_v2 = vrot.slane %v524_v58, 4  ;;  %v495_v3 = vadd.f32 %v487_v59, %v485_v55  ;;  %v531_v5 = vadd.f32 %v523_v60, %v521_v56 }
 0x102   : > { %v481_v10 = vadd.f32 %v480_v63, %v479_v46  ;;  %v475_v16 = vrot.slane %v474_v6, 1  ;;  %v517_v18 = vadd.f32 %v516_v62, %v515_v54  ;;  %v511_v22 = vrot.slane %v510_v9, 1 }
 0x103   : > { %v490_v0 = vadd.f32 %v489_v1, %v488_v57  ;;  %v526_v4 = vadd.f32 %v525_v2, %v524_v58  ;;  %v496_v7 = vrot.slane %v495_v3, 4  ;;  %v532_v8 = vrot.slane %v531_v5, 4 }
 0x104   : > { %v482_v23 = vrot.slane %v481_v10, 1  ;;  %v518_v24 = vrot.slane %v517_v18, 1  ;;  %v476_v28 = vadd.f32 %v475_v16, %v474_v6  ;;  %v512_v32 = vadd.f32 %v511_v22, %v510_v9 }
 0x105   : > { %v491_v11 = vrot.slane %v490_v0, 2  ;;  %v527_v13 = vrot.slane %v526_v4, 2  ;;  %v497_v14 = vadd.f32 %v496_v7, %v495_v3  ;;  %v533_v15 = vadd.f32 %v532_v8, %v531_v5 }
 0x106   : > { %v483_v33 = vadd.f32 %v482_v23, %v481_v10  ;;  %v519_v37 = vadd.f32 %v518_v24, %v517_v18 }
 0x107   : > { %v492_v19 = vadd.f32 %v491_v11, %v490_v0  ;;  %v528_v20 = vadd.f32 %v527_v13, %v526_v4  ;;  %v498_v17 = vrot.slane %v497_v14, 2  ;;  %v534_v21 = vrot.slane %v533_v15, 2 }
 0x109   : > { %v493_v12 = vrot.slane %v492_v19, 1  ;;  %v529_v25 = vrot.slane %v528_v20, 1  ;;  %v499_v26 = vadd.f32 %v498_v17, %v497_v14  ;;  %v535_v27 = vadd.f32 %v534_v21, %v533_v15 }
 0x10b   : > { %v494_v29 = vadd.f32 %v493_v12, %v492_v19  ;;  %v500_v30 = vrot.slane %v499_v26, 1  ;;  %v536_v31 = vrot.slane %v535_v27, 1  ;;  %v530_v35 = vadd.f32 %v529_v25, %v528_v20 }
 0x10d   : > { %v539_v34 = vsel %vm538_vm3, %v476_v28, %v494_v29  ;;  %v501_v36 = vadd.f32 %v500_v30, %v499_v26  ;;  %v537_v41 = vadd.f32 %v536_v31, %v535_v27 }
 0x10e   : > { %v542_v38 = vsel %vm541_vm4, %v539_v34, %v512_v32 }
 0x10f   : > { %v545_v39 = vsel %vm544_vm5, %v542_v38, %v530_v35  ;;  %v540_v40 = vsel %vm538_vm3, %v483_v33, %v501_v36 }
 0x110   : > { %v543_v42 = vsel %vm541_vm4, %v540_v40, %v519_v37 }
 0x111   : > { %v546_v43 = vsel %vm544_vm5, %v543_v42, %v537_v41 }
 0x112   : > { %v549_v44 = vcombine.low %v545_v39, %v546_v43 }
 0x114   : > { %551 = vst [vmem:[%s201_s24] sm:$0xff] %v549_v44 }
 0x115 PF: > { %s12_s11 = sadd.s32 1, %s735_s11   ;;  %s862_s9 = smov %s731_s10 }
 0x116   : > { %p9_p5 = scmp.ge.s32.totalorder %s12_s11, 4   ;;  %s863_s10 = smov %s865_s12 }
 0x118   :  { %11 = sbr.rel (!%p9_p5) target bundleno = 2 (0x2), region = 62 }

// kernel: baseline_forward.4
= control target key start
LH: loop header
LB: loop body
LE: loop exit
PB: predicated region body
PF: predicated region fallthrough
CT: control target
= control target key end

     0   :  { %s3700_s12 = smov 0   ;;  %s3702_s13 = smov 0   ;;  %s5331_s0 = inlined_call_operand.vmem [shape: bf16[4,4,4,9,9], index: 0, kind: input, shape index: {}]   ;;  %s5332_s1 = inlined_call_operand.vmem [shape: bf16[16,36], index: 1, kind: input, shape index: {}]   ;;  %s5333_s2 = inlined_call_operand.vmem [shape: f32[16,1], index: 2, kind: input, shape index: {}]   ;;  %s5334_s3 = inlined_call_operand.vmem [shape: bf16[4,16,8,8], index: 3, kind: output, shape index: {}]  }
   0x1   :  { %s3704_s14 = smov 0  }
   0x2 LB: > { %s25_s15 = sadd.s32 1, %s3668_s13  ;;  %p3351_p0 = scmp.ge.s32.totalorder %s3672_s14, 1  ;;  %s3672_s14 = sphi %s3704_s14, %s13_s14   ;;  %s3668_s13 = sphi %s3702_s13, %s5352_s13   ;;  %s3664_s12 = sphi %s3700_s12, %s5351_s12  }
   0x3   : > { %p27_p1 = scmp.ge.s32.totalorder %s25_s15, 4  ;;  %p151_p2 = scmp.lt.s32.totalorder %s3672_s14, 5 }
   0x5   : > { %s5354_s15 = smov (%p27_p1, %s25_s15), 0  ;;  %p152_p3 = pnand %p3351_p0, %p151_p2 }
   0x6   : > { %p178_p4 = scmp.lt.s32.totalorder (!%p152_p3), %s3664_s12, 3  ;;  %s3675_s20 = smov (!%p152_p3), 127  }
   0x7   : > { %155 = sbr.rel (%p152_p3) target bundleno = 520 (0x208), region = 32 }
   0xc   : > { %s5356_s12 = smov (!%p178_p4, %s3664_s12), 3  ;;  %vm251_vm0 = vcmask 1041409   ;;  %vm254_vm1 = vcmask 1042434   ;;  %vm257_vm2 = vcmask 1043459   ;;  %v3674_v0 = vmov 0.0  }
   0xd   : > { %s3479_s16 = sshll.u32 %s5356_s12, 7  ;;  %3513 = vmatprep.subr.bf16.mxu0 %v3674_v0  ;;  %3523 = vmatprep.subr.bf16.mxu1 %v3674_v0  ;;  %vm278_vm3 = vcmask 1045509   ;;  %vm281_vm4 = vcmask 1046534   ;;  %vm284_vm5 = vcmask 1047559   ;;  %vm366_vm6 = vcmask 1041408   ;;  %s3480_s27 = sshll.u32 %s5356_s12, 6 }
   0xe   : > { %s3724_s19 = scalar_lea.vmem %s5331_s0, %s3479_s16  ;;  %vm3676_vm7 = vmmov 0   ;;  %vm370_vm8 = vcmask 1043456   ;;  %vm373_vm9 = vcmask 1045504   ;;  %vm400_vm10 = vcmask 293888   ;;  %s4374_s30 = scalar_lea.vmem %s5334_s3, %s3480_s27 }
   0xf   : > { %v3625_v1 = vld [vmem:[%s3724_s19] ss:$0 sps:$4 sm:$0xff]   ;;  %v3626_v2 = vld [vmem:[%s3724_s19 + $0x8] ss:$0 sps:$4 sm:$0xff]   ;;  %v3627_v3 = vld [vmem:[%s3724_s19 + $0x10] ss:$0 sps:$4 sm:$0xff]   ;;  %3519 = vmatprep.mubr.msk.bf16.mxu0 %vm3676_vm7, %v3674_v0  ;;  %3529 = vmatprep.mubr.msk.bf16.mxu1 %vm3676_vm7, %v3674_v0 }
  0x10   : > { %v3628_v4 = vld [vmem:[%s3724_s19 + $0x18] ss:$0 sps:$4 sm:$0xff]   ;;  %v3732_v5 = vunpack.c.l.b16 %v3625_v1  ;;  %v3734_v6 = vunpack.c.l.b16 %v3626_v2  ;;  %v287_v7 = vunpack.c.h.b16 %v3625_v1  ;;  %v288_v8 = vunpack.c.h.b16 %v3626_v2  ;;  %v3741_v13 = vld [vmem:[%s3724_s19 + $0x40] ss:$0 sps:$4 sm:$0xff]   ;;  %v3744_v14 = vld [vmem:[%s3724_s19 + $0x48] ss:$0 sps:$4 sm:$0xff]  }
  0x11   : > { %v3736_v9 = vunpack.c.l.b16 %v3627_v3  ;;  %v3738_v10 = vunpack.c.l.b16 %v3628_v4  ;;  %v289_v11 = vunpack.c.h.b16 %v3627_v3  ;;  %v290_v12 = vunpack.c.h.b16 %v3628_v4  ;;  %v3747_v15 = vld [vmem:[%s3724_s19 + $0x50] ss:$0 sps:$4 sm:$0xff]   ;;  %v3751_v18 = vld [vmem:[%s3724_s19 + $0x58] ss:$0 sps:$4 sm:$0xff]  }
  0x12   : > { %v349_v16 = vrot.slane %v3732_v5, 1  ;;  %v291_v17 = vrot.slane %v288_v8, 7  ;;  %v729_v19 = vrot.slane %v3732_v5, 2  ;;  %v730_v20 = vrot.slane %v3734_v6, 1 }
  0x13   : > { %v351_v21 = vrot.slane %v3736_v9, 7  ;;  %v353_v22 = vrot.slane %v3738_v10, 6  ;;  %v293_v23 = vrot.slane %v289_v11, 6  ;;  %v295_v24 = vrot.slane %v290_v12, 5 }
  0x14   : > { %v350_v25 = vsel %vm251_vm0, %v3734_v6, %v349_v16  ;;  %v292_v26 = vsel %vm251_vm0, %v291_v17, %v287_v7  ;;  %v3761_v27 = vunpack.c.l.b16 %v3741_v13  ;;  %v3764_v28 = vunpack.c.l.b16 %v3744_v14 }
  0x15   : > { %v352_v29 = vsel %vm254_vm1, %v351_v21, %v350_v25  ;;  %v294_v30 = vsel %vm254_vm1, %v293_v23, %v292_v26  ;;  %v3769_v31 = vunpack.c.l.b16 %v3747_v15  ;;  %v3772_v32 = vunpack.c.l.b16 %v3751_v18 }
  0x16   : > { %v354_v33 = vsel %vm257_vm2, %v353_v22, %v352_v29  ;;  %v296_v34 = vsel %vm257_vm2, %v295_v24, %v294_v30  ;;  %v316_v35 = vrot.slane %v3761_v27, 4  ;;  %v317_v36 = vrot.slane %v3764_v28, 3 }
  0x17   : > { %v3778_v37 = vpack.c.b16 %v354_v33, %v354_v33  ;;  %v297_v38 = vpack.c.b16 %v296_v34, %v296_v34  ;;  %v319_v39 = vrot.slane %v3769_v31, 2  ;;  %v321_v40 = vrot.slane %v3772_v32, 1 }
  0x18   : > { %v318_v41 = vsel %vm278_vm3, %v317_v36, %v316_v35  ;;  %v731_v42 = vsel %vm251_vm0, %v730_v20, %v729_v19  ;;  %v733_v43 = vrot.slane %v3738_v10, 7  ;;  %v712_v44 = vrot.slane %v3761_v27, 5 }
  0x19   : > { %364 = vrot.lane.b32.xlu0 %v3778_v37, %s3675_s20  ;;  %298 = vrot.lane.b32.xlu1 %v297_v38, %s3675_s20  ;;  %v320_v45 = vsel %vm281_vm4, %v319_v39, %v318_v41  ;;  %v732_v46 = vsel %vm254_vm1, %v3736_v9, %v731_v42  ;;  %v713_v47 = vrot.slane %v3764_v28, 4  ;;  %v715_v48 = vrot.slane %v3769_v31, 3 }
  0x1a   : > { %v322_v49 = vsel %vm284_vm5, %v321_v40, %v320_v45  ;;  %v734_v50 = vsel %vm257_vm2, %v733_v43, %v732_v46  ;;  %v717_v51 = vrot.slane %v3772_v32, 2  ;;  %v1083_v52 = vrot.slane %v3732_v5, 3 }
  0x1b   : > { %v3798_v53 = vpack.c.b16 %v322_v49, %v322_v49  ;;  %v3800_v54 = vpack.c.b16 %v734_v50, %v734_v50  ;;  %v714_v55 = vsel %vm278_vm3, %v713_v47, %v712_v44  ;;  %v1084_v56 = vrot.slane %v3734_v6, 2 }
  0x1c   : > { %v716_v57 = vsel %vm281_vm4, %v715_v48, %v714_v55  ;;  %v1086_v58 = vrot.slane %v3736_v9, 1  ;;  %v1066_v59 = vrot.slane %v3761_v27, 6  ;;  %v1067_v60 = vrot.slane %v3764_v28, 5 }
  0x1d   : > { %347 = vrot.lane.b32.xlu0 %v3798_v53, %s3675_s20  ;;  %744 = vrot.lane.b32.xlu1 %v3800_v54, %s3675_s20  ;;  %v718_v61 = vsel %vm284_vm5, %v717_v51, %v716_v57  ;;  %v1085_v62 = vsel %vm251_vm0, %v1084_v56, %v1083_v52  ;;  %v1069_v63 = vrot.slane %v3769_v31, 4  ;;  %v1071_v1 = vrot.slane %v3772_v32, 3 }
  0x1e   : > { %v3816_v2 = vpack.c.b16 %v718_v61, %v718_v61  ;;  %v1087_v3 = vsel %vm254_vm1, %v1086_v58, %v1085_v62  ;;  %v1068_v4 = vsel %vm278_vm3, %v1067_v60, %v1066_v59  ;;  %v1438_v7 = vrot.slane %v3732_v5, 4 }
  0x1f   : > { %v1088_v8 = vsel %vm257_vm2, %v3738_v10, %v1087_v3  ;;  %v1070_v11 = vsel %vm281_vm4, %v1069_v63, %v1068_v4  ;;  %v1439_v12 = vrot.slane %v3734_v6, 3  ;;  %v1441_v16 = vrot.slane %v3736_v9, 2  ;;  %v3882_v3 = vld [vmem:[%s3724_s19 + $0x4] ss:$0 sps:$4 sm:$0x11]  }
  0x20   : > { %v3826_v17 = vpack.c.b16 %v1088_v8, %v1088_v8  ;;  %v1072_v19 = vsel %vm284_vm5, %v1071_v1, %v1070_v11  ;;  %v1443_v20 = vrot.slane %v3738_v10, 1  ;;  %v1421_v21 = vrot.slane %v3761_v27, 7 }
  0x21   : > { %727 = vrot.lane.b32.xlu0 %v3816_v2, %s3675_s20  ;;  %v3833_v22 = vpack.c.b16 %v1072_v19, %v1072_v19  ;;  %v1440_v23 = vsel %vm251_vm0, %v1439_v12, %v1438_v7  ;;  %v1422_v24 = vrot.slane %v3764_v28, 6  ;;  %v1424_v25 = vrot.slane %v3769_v31, 5  ;;  %v3892_v12 = vld [vmem:[%s3724_s19 + $0xc] ss:$0 sps:$4 sm:$0x11]  }
  0x22   : > { %1098 = vrot.lane.b32.xlu1 %v3826_v17, %s3675_s20  ;;  %v1442_v26 = vsel %vm254_vm1, %v1441_v16, %v1440_v23  ;;  %v1426_v29 = vrot.slane %v3772_v32, 4  ;;  %v1814_v30 = vrot.slane %v3732_v5, 5  ;;  %v1815_v33 = vrot.slane %v3734_v6, 4  ;;  %v3899_v23 = vld [vmem:[%s3724_s19 + $0x14] ss:$0 sps:$4 sm:$0x11]  }
  0x23   : > { %v1444_v34 = vsel %vm257_vm2, %v1443_v20, %v1442_v26  ;;  %v1423_v35 = vsel %vm278_vm3, %v1422_v24, %v1421_v21  ;;  %v1817_v36 = vrot.slane %v3736_v9, 3  ;;  %v1819_v38 = vrot.slane %v3738_v10, 2 }
  0x24   : > { %v3848_v39 = vpack.c.b16 %v1444_v34, %v1444_v34  ;;  %v1425_v40 = vsel %vm281_vm4, %v1424_v25, %v1423_v35  ;;  %v1816_v41 = vsel %vm251_vm0, %v1815_v33, %v1814_v30  ;;  %v1805_v42 = vrot.slane %v3764_v28, 7  ;;  %v3907_v30 = vld [vmem:[%s3724_s19 + $0x1c] ss:$0 sps:$4 sm:$0x11]  }
  0x25   : > { %1081 = vrot.lane.b32.xlu0 %v3833_v22, %s3675_s20  ;;  %v1427_v43 = vsel %vm284_vm5, %v1426_v29, %v1425_v40  ;;  %v1818_v44 = vsel %vm254_vm1, %v1817_v36, %v1816_v41  ;;  %v1807_v45 = vrot.slane %v3769_v31, 6  ;;  %v1809_v46 = vrot.slane %v3772_v32, 5 }
  0x26   : > { %1457 = vrot.lane.b32.xlu1 %v3848_v39, %s3675_s20  ;;  %v3861_v47 = vpack.c.b16 %v1427_v43, %v1427_v43  ;;  %v1820_v48 = vsel %vm257_vm2, %v1819_v38, %v1818_v44  ;;  %v1806_v49 = vsel %vm278_vm3, %v1805_v42, %v3761_v27  ;;  %v2170_v50 = vrot.slane %v3732_v5, 6 }
  0x27   : > { %v3867_v51 = vpack.c.b16 %v1820_v48, %v1820_v48  ;;  %v1808_v52 = vsel %vm281_vm4, %v1807_v45, %v1806_v49  ;;  %v2171_v55 = vrot.slane %v3734_v6, 5  ;;  %v2173_v56 = vrot.slane %v3736_v9, 4  ;;  %v3928_v48 = vld [vmem:[%s3724_s19 + $0x20] ss:$0 sps:$4 sm:$0xff]   ;;  %v3931_v49 = vld [vmem:[%s3724_s19 + $0x28] ss:$0 sps:$4 sm:$0xff]  }
  0x28   : > { %v1810_v57 = vsel %vm284_vm5, %v1809_v46, %v1808_v52  ;;  %v2175_v58 = vrot.slane %v3738_v10, 3  ;;  %v2153_v59 = vrot.slane %v3761_v27, 1  ;;  %v2155_v60 = vrot.slane %v3769_v31, 7 }
  0x29   : > { %1436 = vrot.lane.b32.xlu0 %v3861_v47, %s3675_s20  ;;  %v1811_v61 = vpack.c.b16 %v1810_v57, %v1810_v57  ;;  %v2172_v62 = vsel %vm251_vm0, %v2171_v55, %v2170_v50  ;;  %v2157_v63 = vrot.slane %v3772_v32, 6  ;;  %v2524_v1 = vrot.slane %v3732_v5, 7  ;;  %v3941_v57 = vld [vmem:[%s3724_s19 + $0x30] ss:$0 sps:$4 sm:$0xff]  }
  0x2a   : > { %1829 = vrot.lane.b32.xlu1 %v3867_v51, %s3675_s20  ;;  %v2174_v4 = vsel %vm254_vm1, %v2173_v56, %v2172_v62  ;;  %v2154_v7 = vsel %vm278_vm3, %v3764_v28, %v2153_v59  ;;  %v2525_v8 = vrot.slane %v3734_v6, 6  ;;  %v2527_v11 = vrot.slane %v3736_v9, 5 }
  0x2b   : > { %v2176_v16 = vsel %vm257_vm2, %v2175_v58, %v2174_v4  ;;  %v2156_v19 = vsel %vm281_vm4, %v2155_v60, %v2154_v7  ;;  %v2529_v20 = vrot.slane %v3738_v10, 4  ;;  %v2507_v21 = vrot.slane %v3761_v27, 2 }
  0x2c   : > { %v3901_v24 = vpack.c.b16 %v2176_v16, %v2176_v16  ;;  %v2158_v25 = vsel %vm284_vm5, %v2157_v63, %v2156_v19  ;;  %v2526_v26 = vsel %vm251_vm0, %v2525_v8, %v2524_v1  ;;  %v2508_v29 = vrot.slane %v3764_v28, 1 }
  0x2d   : > { %1812 = vrot.lane.b32.xlu0 %v1811_v61, %s3675_s20  ;;  %v3910_v33 = vpack.c.b16 %v2158_v25, %v2158_v25  ;;  %v2528_v34 = vsel %vm254_vm1, %v2527_v11, %v2526_v26  ;;  %v2511_v35 = vrot.slane %v3772_v32, 7  ;;  %v2926_v42 = vunpack.c.l.b16 %v3882_v3  ;;  %v3946_v61 = vld [vmem:[%s3724_s19 + $0x38] ss:$0 sps:$4 sm:$0xff]  }
  0x2e   : > { %2185 = vrot.lane.b32.xlu1 %v3901_v24, %s3675_s20  ;;  %v2530_v36 = vsel %vm257_vm2, %v2529_v20, %v2528_v34  ;;  %v2509_v38 = vsel %vm278_vm3, %v2508_v29, %v2507_v21  ;;  %v2927_v44 = vunpack.c.l.b16 %v3892_v12  ;;  %v2928_v45 = vunpack.c.l.b16 %v3899_v23 }
  0x2f   : > { %v3918_v40 = vpack.c.b16 %v2530_v36, %v2530_v36  ;;  %v2510_v41 = vsel %vm281_vm4, %v3769_v31, %v2509_v38  ;;  %v2929_v46 = vunpack.c.l.b16 %v3907_v30  ;;  %v2862_v52 = vrot.slane %v3761_v27, 3 }
  0x30   : > { %v2512_v43 = vsel %vm284_vm5, %v2511_v35, %v2510_v41  ;;  %v2863_v55 = vrot.slane %v3764_v28, 2  ;;  %v2865_v56 = vrot.slane %v3769_v31, 1  ;;  %v2930_v58 = vrot.slane %v2927_v44, 7 }
  0x31   : > { %2168 = vrot.lane.b32.xlu0 %v3910_v33, %s3675_s20  ;;  %v3935_v50 = vpack.c.b16 %v2512_v43, %v2512_v43  ;;  %v2932_v59 = vrot.slane %v2928_v45, 6  ;;  %v2934_v60 = vrot.slane %v2929_v46, 5  ;;  %v3952_v28 = vunpack.c.l.b16 %v3928_v48 }
  0x32   : > { %2539 = vrot.lane.b32.xlu1 %v3918_v40, %s3675_s20  ;;  %v2864_v62 = vsel %vm278_vm3, %v2863_v55, %v2862_v52  ;;  %v2931_v63 = vsel %vm251_vm0, %v2930_v58, %v2926_v42  ;;  %v3955_v31 = vunpack.c.l.b16 %v3931_v49  ;;  %v3963_v7 = vunpack.c.l.b16 %v3941_v57 }
  0x33   : > { %v2866_v27 = vsel %vm281_vm4, %v2865_v56, %v2864_v62  ;;  %v2933_v1 = vsel %vm254_vm1, %v2932_v59, %v2931_v63  ;;  %v250_v8 = vrot.slane %v3734_v6, 7  ;;  %v3970_v19 = vunpack.c.l.b16 %v3946_v61 }
  0x34   : > { %v2867_v4 = vsel %vm284_vm5, %v3772_v32, %v2866_v27  ;;  %v2935_v11 = vsel %vm257_vm2, %v2934_v60, %v2933_v1  ;;  %v253_v20 = vrot.slane %v3736_v9, 6  ;;  %v256_v25 = vrot.slane %v3738_v10, 5 }
  0x35   : > { %2522 = vrot.lane.b32.xlu0 %v3935_v50, %s3675_s20  ;;  %v3967_v16 = vpack.c.b16 %v2867_v4, %v2867_v4  ;;  %v2936_v21 = vpack.c.b16 %v2935_v11, %v2935_v11  ;;  %v276_v26 = vrot.slane %v3952_v28, 4  ;;  %v277_v32 = vrot.slane %v3955_v31, 3 }
  0x36   : > { %v280_v29 = vrot.slane %v3963_v7, 2  ;;  %v283_v6 = vrot.slane %v3970_v19, 1  ;;  %v252_v34 = vsel %vm251_vm0, %v250_v8, %v3732_v5  ;;  %v1786_v5 = vunpack.c.h.b16 %v3741_v13  ;;  %v3642_v8 = vld [vmem:[%s3724_s19 + $0x68] ss:$0 sps:$4 sm:$0xff]  }
  0x37   : > { %2937 = vrot.lane.b32.xlu1 %v2936_v21, %s3675_s20  ;;  %v279_v9 = vsel %vm278_vm3, %v277_v32, %v276_v26  ;;  %v255_v10 = vsel %vm254_vm1, %v253_v20, %v252_v34  ;;  %v1787_v44 = vunpack.c.h.b16 %v3744_v14  ;;  %v1788_v45 = vunpack.c.h.b16 %v3747_v15  ;;  %v3641_v21 = vld [vmem:[%s3724_s19 + $0x60] ss:$0 sps:$4 sm:$0xff]  }
  0x38   : > { %v282_v35 = vsel %vm281_vm4, %v280_v29, %v279_v9  ;;  %v258_v36 = vsel %vm257_vm2, %v256_v25, %v255_v10  ;;  %v1789_v46 = vunpack.c.h.b16 %v3751_v18  ;;  %v2892_v59 = vunpack.c.h.b16 %v3892_v12  ;;  %v232_v12 = vld [vmem:[%s5333_s2] sm:$0xff]  ;;  %v3643_v25 = vld [vmem:[%s3724_s19 + $0x70] ss:$0 sps:$4 sm:$0xff]   ;;  %v3644_v9 = vld [vmem:[%s3724_s19 + $0x78] ss:$0 sps:$4 sm:$0xff]  }
  0x39   : > { %2877 = vrot.lane.b32.xlu0 %v3967_v16, %s3675_s20  ;;  %v285_v38 = vsel %vm284_vm5, %v283_v6, %v282_v35  ;;  %v259_v41 = vpack.c.b16 %v258_v36, %v258_v36  ;;  %v1790_v52 = vrot.slane %v1787_v44, 7  ;;  %v1792_v55 = vrot.slane %v1788_v45, 6 }
  0x3a   : > { %v286_v42 = vpack.c.b16 %v285_v38, %v285_v38  ;;  %v1794_v56 = vrot.slane %v1789_v46, 5  ;;  %v2893_v60 = vunpack.c.h.b16 %v3899_v23  ;;  %v2894_v63 = vunpack.c.h.b16 %v3907_v30  ;;  %v233_v23 = vld [vmem:[%s5333_s2 + $0x8] sm:$0xff] }
  0x3b   : > { %v1791_v58 = vsel %vm278_vm3, %v1790_v52, %v1786_v5  ;;  %v2891_v14 = vunpack.c.h.b16 %v3882_v3  ;;  %v2895_v15 = vrot.slane %v2892_v59, 7  ;;  %v3677_v3 = vmov 0  }
  0x3c   : > { %v3989_v43 = vsel %vm366_vm6, %v259_v41, %v286_v42  ;;  %v1793_v62 = vsel %vm281_vm4, %v1792_v55, %v1791_v58  ;;  %v2897_v18 = vrot.slane %v2893_v60, 6  ;;  %v2899_v27 = vrot.slane %v2894_v63, 5  ;;  %3623 = vset.pattern.permute.xlu1 %v3677_v3  ;;  %3624 = vset.pattern.permute.xlu0 %v3677_v3 }
  0x3d   : > { %v4005_v13 = vsel %vm284_vm5, %v1794_v56, %v1793_v62  ;;  %v2896_v1 = vsel %vm251_vm0, %v2895_v15, %v2891_v14  ;;  %387 = vperm.xlu1 %3623, %v232_v12   ;;  %392 = vperm.xlu0 %3624, %v233_v23   ;;  %v356_v11 = vrot.slane %v3952_v28, 5  ;;  %v357_v20 = vrot.slane %v3955_v31, 4 }
  0x3e   : > { %v2898_v30 = vsel %vm254_vm1, %v2897_v18, %v2896_v1  ;;  %v4024_v26 = vunpack.c.l.b16 %v3642_v8  ;;  %v359_v32 = vrot.slane %v3963_v7, 3  ;;  %v736_v6 = vrot.slane %v3952_v28, 6 }
  0x3f   : > { %v4017_v4 = vsel %vm257_vm2, %v2899_v27, %v2898_v30  ;;  %v358_v29 = vsel %vm278_vm3, %v357_v20, %v356_v11  ;;  %v737_v34 = vrot.slane %v3955_v31, 5  ;;  %v4031_v10 = vunpack.c.l.b16 %v3641_v21 }
  0x40   : > { %v361_v35 = vrot.slane %v3970_v19, 2  ;;  %v4034_v36 = vunpack.c.l.b16 %v3643_v25  ;;  %v340_v38 = vrot.slane %v4024_v26, 7  ;;  %v360_v41 = vsel %vm281_vm4, %v359_v32, %v358_v29 }
  0x41   : > { %v739_v42 = vrot.slane %v3963_v7, 4  ;;  %v720_v5 = vrot.slane %v4031_v10, 1  ;;  %v738_v44 = vsel %vm278_vm3, %v737_v34, %v736_v6  ;;  %v1090_v45 = vrot.slane %v3952_v28, 7 }
  0x42   : > { %v1091_v46 = vrot.slane %v3955_v31, 6  ;;  %v4043_v52 = vunpack.c.l.b16 %v3644_v9  ;;  %v1779_v55 = vrot.slane %v3955_v31, 7  ;;  %v362_v56 = vsel %vm284_vm5, %v361_v35, %v360_v41 }
  0x43   : > { %v341_v58 = vsel %vm251_vm0, %v340_v38, %v4031_v10  ;;  %v342_v59 = vrot.slane %v4034_v36, 6  ;;  %v741_v60 = vrot.slane %v3970_v19, 3  ;;  %v740_v62 = vsel %vm281_vm4, %v739_v42, %v738_v44 }
  0x44   : > { %v721_v63 = vsel %vm251_vm0, %v4024_v26, %v720_v5  ;;  %v722_v14 = vrot.slane %v4034_v36, 7  ;;  %v1093_v15 = vrot.slane %v3963_v7, 5  ;;  %v1092_v18 = vsel %vm278_vm3, %v1091_v46, %v1090_v45 }
  0x45   : > { %v1074_v27 = vrot.slane %v4031_v10, 2  ;;  %v1075_v1 = vrot.slane %v4024_v26, 1  ;;  %v1781_v12 = vrot.slane %v3963_v7, 6  ;;  %v344_v23 = vrot.slane %v4043_v52, 5 }
  0x46   : > { %v1780_v30 = vsel %vm278_vm3, %v1779_v55, %v3952_v28  ;;  %v1429_v3 = vrot.slane %v4031_v10, 3  ;;  %v1430_v8 = vrot.slane %v4024_v26, 2  ;;  %v343_v11 = vsel %vm254_vm1, %v342_v59, %v341_v58 }
  0x47   : > { %v742_v20 = vsel %vm284_vm5, %v741_v60, %v740_v62  ;;  %v724_v21 = vrot.slane %v4043_v52, 6  ;;  %v1095_v25 = vrot.slane %v3970_v19, 4  ;;  %v723_v32 = vsel %vm254_vm1, %v722_v14, %v721_v63 }
  0x48   : > { %v1094_v29 = vsel %vm281_vm4, %v1093_v15, %v1092_v18  ;;  %v1783_v6 = vrot.slane %v3970_v19, 5  ;;  %v1447_v34 = vunpack.c.h.b16 %v3931_v49  ;;  %v1076_v9 = vsel %vm251_vm0, %v1075_v1, %v1074_v27 }
  0x49   : > { %v1782_v35 = vsel %vm281_vm4, %v1781_v12, %v1780_v30  ;;  %v1432_v38 = vrot.slane %v4034_v36, 1  ;;  %v363_v41 = vpack.c.b16 %v362_v56, %v362_v56  ;;  %v345_v42 = vsel %vm257_vm2, %v344_v23, %v343_v11 }
  0x4a   : > { %v4077_v5 = vpack.c.b16 %v742_v20, %v742_v20  ;;  %v1431_v44 = vsel %vm251_vm0, %v1430_v8, %v1429_v3  ;;  %v725_v45 = vsel %vm257_vm2, %v724_v21, %v723_v32  ;;  %v1096_v46 = vsel %vm284_vm5, %v1095_v25, %v1094_v29 }
  0x4b   : > { %v1078_v55 = vrot.slane %v4043_v52, 7  ;;  %v1448_v49 = vunpack.c.h.b16 %v3941_v57  ;;  %v1077_v56 = vsel %vm254_vm1, %v4034_v36, %v1076_v9  ;;  %v1784_v60 = vsel %vm284_vm5, %v1783_v6, %v1782_v35 }
  0x4c   : > { %v1446_v62 = vunpack.c.h.b16 %v3928_v48  ;;  %v1450_v63 = vrot.slane %v1447_v34, 7  ;;  %v346_v15 = vpack.c.b16 %v345_v42, %v345_v42  ;;  %v1433_v18 = vsel %vm254_vm1, %v1432_v38, %v1431_v44 }
  0x4d   : > { %v746_v57 = vsel %vm366_vm6, %v3778_v37, %v363_v41  ;;  %v4095_v27 = vpack.c.b16 %v1096_v46, %v1096_v46  ;;  %v1449_v1 = vunpack.c.h.b16 %v3946_v61  ;;  %v726_v48 = vpack.c.b16 %v725_v45, %v725_v45 }
  0x4e   : > { %v1079_v12 = vsel %vm257_vm2, %v1078_v55, %v1077_v56  ;;  %v1785_v23 = vpack.c.b16 %v1784_v60, %v1784_v60  ;;  %v1452_v30 = vrot.slane %v1448_v49, 6  ;;  %v4105_v11 = vsel %vm366_vm6, %v3800_v54, %v4077_v5 }
  0x4f   : > { %v4109_v20 = vsel %vm257_vm2, %v4043_v52, %v1433_v18  ;;  %v1451_v61 = vsel %vm278_vm3, %v1450_v63, %v1446_v62  ;;  %v1822_v21 = vrot.slane %v3952_v28, 1  ;;  %v1797_v29 = vrot.slane %v4031_v10, 4 }
  0x50   : > { %v1798_v6 = vrot.slane %v4024_v26, 3  ;;  %v4123_v9 = vsel %vm366_vm6, %v3826_v17, %v4095_v27  ;;  %v1080_v35 = vpack.c.b16 %v1079_v12, %v1079_v12  ;;  %v1454_v38 = vrot.slane %v1449_v1, 5  ;;  %v3647_v12 = vld [vmem:[%s3724_s19 + $0x2c] ss:$0 sps:$4 sm:$0x11]  }
  0x51   : > { %v1832_v44 = vsel %vm366_vm6, %v3848_v39, %v1785_v23  ;;  %v1453_v45 = vsel %vm281_vm4, %v1452_v30, %v1451_v61  ;;  %v1435_v49 = vpack.c.b16 %v4109_v20, %v4109_v20  ;;  %v1800_v56 = vrot.slane %v4034_v36, 2 }
  0x52   : > { %v2161_v63 = vrot.slane %v4024_v26, 4  ;;  %v4151_v18 = vsel %vm284_vm5, %v1454_v38, %v1453_v45  ;;  %v1826_v1 = vrot.slane %v3970_v19, 6  ;;  %v1796_v20 = vpack.c.b16 %v4005_v13, %v4005_v13 }
  0x53   : > { %v2915_v45 = vunpack.c.l.b16 %v3647_v12  ;;  %vm661_vm11 = vcmask 57344   ;;  %vm662_vm12 = vsmask.f32 256  ;;  %vm1016_vm14 = vsmask.f32 7938 }
  0x54   : > { %vm4388_vm13 = vmand %vm661_vm11, %vm662_vm12 }
  0x55   : > { %vm4527_vm15 = vmand %vm661_vm11, %vm1016_vm14  ;;  %vm2812_vm11 = vsmask.f32 3328 }
  0x8b   : > { %v4084_v58 = vpop.permute.xlu0 %364  ;;  %v299_v59 = vpop.permute.xlu1 %298 }
  0x8c   : > { %v405_v14 = vsel %vm366_vm6, %v4084_v58, 0  ;;  %v372_v46 = vsel %vm370_vm8, %v3989_v43, %v299_v59  ;;  %v1799_v43 = vsel %vm251_vm0, %v1798_v6, %v1797_v29  ;;  %v2160_v59 = vrot.slane %v4031_v10, 5  ;;  %v3648_v6 = vld [vmem:[%s3724_s19 + $0x34] ss:$0 sps:$4 sm:$0x11]  }
  0x8d   : > { %3514 = vmatpush3.bf16.msra.mxu0 %v405_v14  ;;  %v3646_v14 = vld [vmem:[%s3724_s19 + $0x24] ss:$0 sps:$4 sm:$0x11]   ;;  %v375_v23 = vsel %vm373_vm9, %v372_v46, %v3798_v53  ;;  %v747_v61 = vsel %vm370_vm8, %v746_v57, %v4084_v58  ;;  %v1456_v58 = vpack.c.b16 %v4151_v18, %v4151_v18  ;;  %v2916_v18 = vunpack.c.l.b16 %v3648_v6 }
  0x8e   : > { %3515 = vmatprep.subr.bf16.mxu0 %v3674_v0  ;;  %v2162_v57 = vsel %vm251_vm0, %v2161_v63, %v2160_v59  ;;  %v2870_v59 = vrot.slane %v4024_v26, 6  ;;  %v3649_v63 = vld [vmem:[%s3724_s19 + $0x3c] ss:$0 sps:$4 sm:$0x11]  }
  0x8f   : > { %v348_v3 = vpop.permute.xlu0 %347  ;;  %v4100_v8 = vpop.permute.xlu1 %744 }
  0x90   : > { %v379_v25 = vsel %vm366_vm6, %v346_v15, %v348_v3  ;;  %v760_v32 = vsel %vm366_vm6, %v4100_v8, 0  ;;  %v4163_v3 = vld [vmem:[%s5332_s1] sm:$0xff]  }
  0x91   : > { %v381_v34 = vsel %vm370_vm8, %v379_v25, %v3778_v37  ;;  %3524 = vmatpush3.bf16.msra.mxu1 %v760_v32  ;;  %v1824_v37 = vrot.slane %v3963_v7, 7  ;;  %v2163_v25 = vrot.slane %v4034_v36, 3 }
  0x92   : > { %v383_v42 = vsel %vm373_vm9, %v381_v34, %v363_v41  ;;  %3525 = vmatprep.subr.bf16.mxu1 %v3674_v0  ;;  %v4137_v41 = vsel %vm278_vm3, %v3955_v31, %v1822_v21  ;;  %v1801_v21 = vsel %vm254_vm1, %v1800_v56, %v1799_v43  ;;  %v2869_v43 = vrot.slane %v4031_v10, 7 }
  0x93   : > { %3516 = vmatpush3.bf16.msra.mxu0 %v383_v42  ;;  %v728_v55 = vpop.permute.xlu0 %727  ;;  %v2914_v42 = vunpack.c.l.b16 %v3646_v14 }
  0x94   : > { %v753_v60 = vsel %vm366_vm6, %v726_v48, %v728_v55  ;;  %3517 = vmatprep.subr.bf16.mxu0 %v3674_v0  ;;  %v4142_v62 = vpop.permute.xlu1 %1098  ;;  %v1802_v48 = vrot.slane %v4043_v52, 1  ;;  %v2165_v55 = vrot.slane %v4043_v52, 2 }
  0x95   : > { %v755_v15 = vsel %vm370_vm8, %v753_v60, %v3800_v54  ;;  %v2178_v54 = vrot.slane %v3952_v28, 2  ;;  %v1114_v32 = vsel %vm366_vm6, %v4142_v62, 0  ;;  %v2514_v60 = vrot.slane %v4031_v10, 6 }
  0x96   : > { %v757_v30 = vsel %vm373_vm9, %v755_v15, %v4077_v5  ;;  %v2179_v5 = vrot.slane %v3955_v31, 1  ;;  %v1803_v46 = vsel %vm257_vm2, %v1802_v48, %v1801_v21  ;;  %v2515_v10 = vrot.slane %v4024_v26, 5 }
  0x97   : > { %3518 = vmatpush3.bf16.msra.mxu0 %v375_v23  ;;  %3526 = vmatpush3.bf16.msra.mxu1 %v757_v30  ;;  %v1082_v53 = vpop.permute.xlu0 %1081  ;;  %v2918_v12 = vrot.slane %v2914_v42, 4  ;;  %v2919_v23 = vrot.slane %v2915_v45, 3  ;;  %v2871_v21 = vsel %vm251_vm0, %v2870_v59, %v2869_v43  ;;  %v1460_v6 = vsel %vm370_vm8, %v4123_v9, %v4142_v62 }
  0x98   : > { %3527 = vmatprep.subr.bf16.mxu1 %v3674_v0  ;;  %3533 = vmatprep.subr.bf16.mxu0 %v3674_v0  ;;  %v1107_v13 = vsel %vm366_vm6, %v1080_v35, %v1082_v53  ;;  %v1458_v29 = vpop.permute.xlu1 %1457  ;;  %v749_v35 = vsel %vm373_vm9, %v747_v61, %v3816_v2  ;;  %v2180_v30 = vsel %vm278_vm3, %v2179_v5, %v2178_v54  ;;  %v2519_v42 = vrot.slane %v4043_v52, 3 }
  0x99   : > { %v1109_v34 = vsel %vm370_vm8, %v1107_v13, %v3826_v17  ;;  %v1833_v38 = vsel %vm370_vm8, %v1832_v44, %v1458_v29  ;;  %v2164_v44 = vsel %vm254_vm1, %v2163_v25, %v2162_v57  ;;  %v1473_v2 = vsel %vm366_vm6, %v1458_v29, 0 }
  0x9a   : > { %3520 = vmatmul.mubr.msk.bf16.vlgmr.msra.gmra.mxu0 %vm400_vm10, %v4163_v3  ;;  %v4192_v56 = vsel %vm373_vm9, %v1833_v38, %v1796_v20  ;;  %v1111_v15 = vsel %vm373_vm9, %v1109_v34, %v4095_v27  ;;  %v1804_v27 = vpack.c.b16 %v1803_v46, %v1803_v46  ;;  %v1101_v20 = vsel %vm370_vm8, %v4105_v11, %v4100_v8 }
  0x9b   : > { %3528 = vmatpush3.bf16.msra.mxu1 %v749_v35  ;;  %3534 = vmatpush3.bf16.msra.mxu0 %v1114_v32  ;;  %v1437_v17 = vpop.permute.xlu0 %1436  ;;  %v2166_v53 = vsel %vm257_vm2, %v2165_v55, %v2164_v44  ;;  %v2917_v25 = vunpack.c.l.b16 %v3649_v63  ;;  %v2517_v8 = vrot.slane %v4034_v36, 4  ;;  %v2921_v11 = vrot.slane %v2916_v18, 2 }
  0x9c   : > { %3535 = vmatprep.subr.bf16.mxu0 %v3674_v0  ;;  %3543 = vmatprep.subr.bf16.mxu1 %v3674_v0  ;;  %v1466_v14 = vsel %vm366_vm6, %v1435_v49, %v1437_v17  ;;  %v1825_v49 = vsel %vm281_vm4, %v1824_v37, %v4137_v41  ;;  %v4221_v26 = vpop.permute.xlu1 %1829  ;;  %v2182_v41 = vrot.slane %v3970_v19, 7  ;;  %v2181_v54 = vsel %vm281_vm4, %v3963_v7, %v2180_v30 }
  0x9d   : > { %v1468_v48 = vsel %vm370_vm8, %v1466_v14, %v3848_v39  ;;  %3539 = vmatprep.mubr.msk.bf16.mxu0 %vm3676_vm7, %v3674_v0  ;;  %v2872_v39 = vrot.slane %v4034_v36, 5  ;;  %v2516_v5 = vsel %vm251_vm0, %v2515_v10, %v2514_v60  ;;  %v2874_v32 = vrot.slane %v4043_v52, 4 }
  0x9e   : > { %3530 = vmatmul.mubr.msk.bf16.vlgmr.msra.gmra.mxu1 %vm400_vm10, %v4163_v3  ;;  %v1470_v37 = vsel %vm373_vm9, %v1468_v48, %v1456_v58  ;;  %v2920_v13 = vsel %vm278_vm3, %v2919_v23, %v2918_v12  ;;  %v1103_v29 = vsel %vm373_vm9, %v1101_v20, %v3833_v22  ;;  %v2167_v57 = vpack.c.b16 %v2166_v53, %v2166_v53 }
  0x9f   : > { %3536 = vmatpush3.bf16.msra.mxu0 %v1111_v15  ;;  %3544 = vmatpush3.bf16.msra.mxu1 %v1473_v2  ;;  %v1813_v61 = vpop.permute.xlu0 %1812  ;;  %v2873_v36 = vsel %vm254_vm1, %v2872_v39, %v2871_v21  ;;  %v1827_v34 = vsel %vm284_vm5, %v1826_v1, %v1825_v49  ;;  %v2923_v45 = vrot.slane %v2917_v25, 1  ;;  %v1846_v22 = vsel %vm366_vm6, %v4221_v26, 0 }
  0xa0   : > { %3537 = vmatprep.subr.bf16.mxu0 %v3674_v0  ;;  %3545 = vmatprep.subr.bf16.mxu1 %v3674_v0  ;;  %v1839_v58 = vsel %vm366_vm6, %v1804_v27, %v1813_v61  ;;  %v2183_v35 = vsel %vm284_vm5, %v2182_v41, %v2181_v54  ;;  %v2518_v9 = vsel %vm254_vm1, %v2517_v8, %v2516_v5  ;;  %v4257_v46 = vpop.permute.xlu1 %2185  ;;  %v2532_v52 = vrot.slane %v3952_v28, 3 }
  0xa1   : > { %3549 = vmatprep.mubr.msk.bf16.mxu1 %vm3676_vm7, %v3674_v0  ;;  %v2922_v62 = vsel %vm281_vm4, %v2921_v11, %v2920_v13  ;;  %v1841_v1 = vsel %vm370_vm8, %v1839_v58, %v3867_v51  ;;  %v2533_v55 = vrot.slane %v3955_v31, 2  ;;  %v2875_v17 = vsel %vm257_vm2, %v2874_v32, %v2873_v36 }
  0xa2   : > { %v1828_v44 = vpack.c.b16 %v1827_v34, %v1827_v34  ;;  %v1462_v60 = vsel %vm373_vm9, %v1460_v6, %v3861_v47  ;;  %v2184_v59 = vpack.c.b16 %v2183_v35, %v2183_v35  ;;  %v2520_v63 = vsel %vm257_vm2, %v2519_v42, %v2518_v9 }
  0xa3   : > { %3538 = vmatpush3.bf16.msra.mxu0 %v1103_v29  ;;  %3546 = vmatpush3.bf16.msra.mxu1 %v1470_v37  ;;  %v2169_v38 = vpop.permute.xlu0 %2168  ;;  %v2924_v28 = vsel %vm284_vm5, %v2923_v45, %v2922_v62  ;;  %v2201_v31 = vsel %vm366_vm6, %v4257_v46, 0  ;;  %v2535_v47 = vrot.slane %v3963_v7, 1  ;;  %v2876_v15 = vpack.c.b16 %v2875_v17, %v2875_v17 }
  0xa4   : > { %3547 = vmatprep.subr.bf16.mxu1 %v3674_v0  ;;  %3553 = vmatprep.subr.bf16.mxu0 %v3674_v0  ;;  %v2194_v43 = vsel %vm366_vm6, %v2167_v57, %v2169_v38  ;;  %v1843_v14 = vsel %vm373_vm9, %v1841_v1, %v1828_v44  ;;  %v2534_v48 = vsel %vm278_vm3, %v2533_v55, %v2532_v52  ;;  %v2540_v49 = vpop.permute.xlu1 %2539  ;;  %v3678_v32 = vmov 1966171168  }
  0xa5   : > { %v2196_v18 = vsel %vm370_vm8, %v2194_v43, %v3901_v24  ;;  %v2901_v10 = vpack.c.b16 %v4017_v4, %v4017_v4  ;;  %v2521_v12 = vpack.c.b16 %v2520_v63, %v2520_v63  ;;  %v2925_v23 = vpack.c.b16 %v2924_v28, %v2924_v28 }
  0xa6   : > { %3540 = vmatmul.mubr.msk.bf16.vlgmr.msra.gmra.mxu0 %vm400_vm10, %v4163_v3  ;;  %v2187_v7 = vsel %vm366_vm6, %v3867_v51, %v1828_v44  ;;  %v2198_v30 = vsel %vm373_vm9, %v2196_v18, %v2184_v59  ;;  %v2536_v4 = vsel %vm281_vm4, %v2535_v47, %v2534_v48  ;;  %v2555_v25 = vsel %vm366_vm6, %v2540_v49, 0 }
  0xa7   : > { %3548 = vmatpush3.bf16.msra.mxu1 %v1462_v60  ;;  %3554 = vmatpush3.bf16.msra.mxu0 %v1846_v22  ;;  %v2523_v2 = vpop.permute.xlu0 %2522  ;;  %v2188_v53 = vsel %vm370_vm8, %v2187_v7, %v4221_v26  ;;  %v2537_v21 = vsel %vm284_vm5, %v3970_v19, %v2536_v4  ;;  %v2541_v19 = vsel %vm366_vm6, %v3901_v24, %v2184_v59  ;;  %v454_v13 = vunpack.c.l.s4 %v3678_v32 }
  0xa8   : > { %3555 = vmatprep.subr.bf16.mxu0 %v3674_v0  ;;  %3563 = vmatprep.subr.bf16.mxu1 %v3674_v0  ;;  %v2548_v51 = vsel %vm366_vm6, %v2521_v12, %v2523_v2  ;;  %v2538_v8 = vpack.c.b16 %v2537_v21, %v2537_v21  ;;  %v456_v29 = vlaneseq  ;;  %v3679_v42 = vmov 286326784  }
  0xa9   : > { %3559 = vmatprep.mubr.msk.bf16.mxu0 %vm3676_vm7, %v3674_v0  ;;  %v2550_v37 = vsel %vm370_vm8, %v2548_v51, %v3918_v40  ;;  %v2938_v41 = vpop.permute.xlu1 %2937  ;;  %v455_v6 = vunpack.c.0.s8 %v454_v13  ;;  %vm1370_vm0 = vcmask 58369   ;;  %vm1371_vm1 = vsmask.f32 1280 }
  0xaa   : > { %3550 = vmatmul.mubr.msk.bf16.vlgmr.msra.gmra.mxu1 %vm400_vm10, %v4163_v3  ;;  %v2953_v26 = vsel %vm366_vm6, %v2938_v41, 0  ;;  %v2552_v11 = vsel %vm373_vm9, %v2550_v37, %v2538_v8  ;;  %v2939_v24 = vsel %vm366_vm6, %v3918_v40, %v2538_v8  ;;  %v457_v34 = vshrl.u32 %v456_v29, 7  ;;  %vm4672_vm2 = vmand %vm1370_vm0, %vm1371_vm1 }
  0xab   : > { %3556 = vmatpush3.bf16.msra.mxu0 %v1843_v14  ;;  %3564 = vmatpush3.bf16.msra.mxu1 %v2201_v31  ;;  %v2878_v27 = vpop.permute.xlu0 %2877  ;;  %v2940_v5 = vsel %vm370_vm8, %v2939_v24, %v2540_v49  ;;  %vm1729_vm3 = vsmask.f32 7942  ;;  %vm2102_vm5 = vcmask 59394  }
  0xac   : > { %3557 = vmatprep.subr.bf16.mxu0 %v3674_v0  ;;  %3565 = vmatprep.subr.bf16.mxu1 %v3674_v0  ;;  %v2946_v39 = vsel %vm366_vm6, %v2876_v15, %v2878_v27  ;;  %v2942_v40 = vsel %vm373_vm9, %v2940_v5, %v3967_v16  ;;  %v534_v16 = vunpack.c.l.s4 %v3679_v42  ;;  %vm4779_vm4 = vmand %vm1370_vm0, %vm1729_vm3  ;;  %vm2103_vm6 = vsmask.f32 2304 }
  0xad   : > { %3569 = vmatprep.mubr.msk.bf16.mxu1 %vm3676_vm7, %v3674_v0  ;;  %v2948_v20 = vsel %vm370_vm8, %v2946_v39, %v2901_v10 }
  0xae   : > { %v2950_v61 = vsel %vm373_vm9, %v2948_v20, %v2925_v23  ;;  %v535_v52 = vunpack.c.0.s8 %v534_v16 }
  0xaf   : > { %3558 = vmatpush3.bf16.msra.mxu0 %v4192_v56  ;;  %3566 = vmatpush3.bf16.msra.mxu1 %v2198_v30  ;;  %v2190_v56 = vsel %vm373_vm9, %v2188_v53, %v3910_v33  ;;  %v2542_v33 = vsel %vm370_vm8, %v2541_v19, %v4257_v46  ;;  %v4345_v46 = vsub.s32 %v455_v6, %v457_v34  ;;  %vm2457_vm8 = vsmask.f32 7946 }
  0xb0   : > { %3567 = vmatprep.subr.bf16.mxu1 %v3674_v0  ;;  %3573 = vmatprep.subr.bf16.mxu0 %v3674_v0  ;;  %v2544_v54 = vsel %vm373_vm9, %v2542_v33, %v3935_v50  ;;  %v4352_v31 = vsub.s32 %v535_v52, %v457_v34  ;;  %vm5025_vm9 = vmand %vm2102_vm5, %vm2457_vm8 }
  0xb2   : > { %3560 = vmatmul.mubr.msk.bf16.vlgmr.msra.gmra.mxu0 %vm400_vm10, %v4163_v3 }
  0xb3   : > { %3568 = vmatpush3.bf16.msra.mxu1 %v2190_v56  ;;  %3574 = vmatpush3.bf16.msra.mxu0 %v2555_v25 }
  0xb4   : > { %3575 = vmatprep.subr.bf16.mxu0 %v3674_v0  ;;  %3583 = vmatprep.subr.bf16.mxu1 %v3674_v0 }
  0xb5   : > { %3579 = vmatprep.mubr.msk.bf16.mxu0 %vm3676_vm7, %v3674_v0 }
  0xb6   : > { %3570 = vmatmul.mubr.msk.bf16.vlgmr.msra.gmra.mxu1 %vm400_vm10, %v4163_v3 }
  0xb7   : > { %3576 = vmatpush3.bf16.msra.mxu0 %v2552_v11  ;;  %3584 = vmatpush3.bf16.msra.mxu1 %v2953_v26 }
  0xb8   : > { %3577 = vmatprep.subr.bf16.mxu0 %v3674_v0  ;;  %3585 = vmatprep.subr.bf16.mxu1 %v3674_v0  ;;  %v4338_v58 = vpop.permute.xlu1 %387  ;;  %v4340_v36 = vpop.permute.xlu0 %392 }
  0xb9   : > { %3589 = vmatprep.mubr.msk.bf16.mxu1 %vm3676_vm7, %v3674_v0  ;;  %vm4909_vm7 = vmand %vm2102_vm5, %vm2103_vm6 }
  0xbb   : > { %3578 = vmatpush3.bf16.msra.mxu0 %v2544_v54  ;;  %3586 = vmatpush3.bf16.msra.mxu1 %v2950_v61 }
  0xbc   : > { %3587 = vmatprep.subr.bf16.mxu1 %v3674_v0 }
  0xbe   : > { %3580 = vmatmul.mubr.msk.bf16.vlgmr.msra.gmra.mxu0 %vm400_vm10, %v4163_v3 }
  0xbf   : > { %3588 = vmatpush3.bf16.msra.mxu1 %v2942_v40 }
  0xc2   : > { %3590 = vmatmul.mubr.msk.bf16.vlgmr.msra.gmra.mxu1 %vm400_vm10, %v4163_v3  ;;  %vm2811_vm10 = vcmask 60419  }
  0xc3   : > { %vm5137_vm12 = vmand %vm2811_vm10, %vm2812_vm11 }
 0x15a   : > { %v441_v50 = vpop.f32.mrf.mxu0 }
 0x15b   : > { %v442_v0 = vadd.f32 %v441_v50, %v4338_v58 }
 0x15c   : > { %v3521_v57 = vpop.f32.mrf.mxu0 }
 0x15d   : > { %v448_v62 = vmax.f32 %v442_v0, 0.0 }
 0x15e   : > { %v444_v38 = vpop.f32.mrf.mxu0  ;;  %v796_v45 = vpop.f32.mrf.mxu1 }
 0x15f   : > { %v445_v22 = vadd.f32 %v444_v38, %v4340_v36  ;;  %v797_v3 = vadd.f32 %v796_v45, %v4338_v58 }
 0x160   : > { %v3522_v35 = vpop.f32.mrf.mxu0  ;;  %v3531_v9 = vpop.f32.mrf.mxu1 }
 0x161   : > { %v449_v1 = vmax.f32 %v445_v22, 0.0  ;;  %v803_v43 = vmax.f32 %v797_v3, 0.0  ;;  %v664_v9 = vld [vmem:[%s4374_s30] sm:$0x1] }
 0x162   : > { %v799_v55 = vpop.f32.mrf.mxu1 }
 0x163   : > { %v450_v17 = vpack.c.bf16 %v449_v1, %v448_v62  ;;  %v3390_v44 = vpack.c.bf16 %v449_v1, %v449_v1  ;;  %v800_v60 = vadd.f32 %v799_v55, %v4340_v36 }
 0x164   : > { %v3532_v59 = vpop.f32.mrf.mxu1 }
 0x165   : > { %v459_v63 = vrot.slane %v450_v17, %v4345_v46  ;;  %v466_v2 = vrot.slane %v3390_v44, %v4345_v46  ;;  %v4350_v28 = vmax.f32 %v800_v60, 0.0  ;;  %v667_v44 = vld [vmem:[%s4374_s30 + $0x4] sm:$0x1]  ;;  %v670_v60 = vld [vmem:[%s4374_s30 + $0x8] sm:$0x1] }
 0x166   : > { %v1150_v14 = vpop.f32.mrf.mxu0  ;;  %v688_v59 = vld [vmem:[%s4374_s30 + $0x20] sm:$0x1] }
 0x167   : > { %v467_v47 = vcombine.high %v459_v63, %v459_v63  ;;  %v468_v15 = vcombine.high %v466_v2, %v466_v2  ;;  %v475_v18 = vrot.slane %v459_v63, %v4345_v46  ;;  %v482_v48 = vrot.slane %v466_v2, %v4345_v46 }
 0x168   : > { %v4357_v10 = vpack.c.bf16 %v4350_v28, %v803_v43  ;;  %v3400_v12 = vpack.c.bf16 %v4350_v28, %v4350_v28  ;;  %v4362_v23 = vadd.f32 %v1150_v14, %v4338_v58  ;;  %v3541_v7 = vpop.f32.mrf.mxu0  ;;  %v676_v43 = vld [vmem:[%s4374_s30 + $0x10] sm:$0x1] }
 0x169   : > { %v489_v49 = vrot.slane %v467_v47, %v4345_v46  ;;  %v496_v27 = vrot.slane %v468_v15, %v4345_v46  ;;  %v497_v30 = vcombine.high %v475_v18, %v475_v18  ;;  %v498_v4 = vcombine.high %v482_v48, %v482_v48  ;;  %v673_v15 = vld [vmem:[%s4374_s30 + $0xc] sm:$0x1] }
 0x16a   : > { %v502_v39 = vunpack.i.h.s16 %v475_v18  ;;  %v510_v20 = vunpack.i.h.s16 %v482_v48  ;;  %v3391_v51 = vpack.i.b16 %v475_v18, %v475_v18  ;;  %v3395_v61 = vpack.i.b16 %v482_v48, %v482_v48  ;;  %v4367_v53 = vpop.f32.mrf.mxu0  ;;  %v4369_v21 = vpop.f32.mrf.mxu1  ;;  %v679_v18 = vld [vmem:[%s4374_s30 + $0x14] sm:$0x1]  ;;  %v682_v48 = vld [vmem:[%s4374_s30 + $0x18] sm:$0x1] }
 0x16b   : > { %v499_v25 = vcombine.high %v489_v49, %v489_v49  ;;  %v500_v37 = vcombine.high %v496_v27, %v496_v27  ;;  %v504_v41 = vunpack.i.h.s16 %v489_v49  ;;  %v506_v8 = vunpack.i.h.s16 %v497_v30 }
 0x16c   : > { %v512_v56 = vunpack.i.h.s16 %v496_v27  ;;  %v514_v19 = vunpack.i.h.s16 %v498_v4  ;;  %v518_v26 = vpack.i.b16 %v502_v39, %v502_v39  ;;  %v3392_v11 = vpack.i.b16 %v489_v49, %v489_v49  ;;  %v3542_v33 = vpop.f32.mrf.mxu0  ;;  %v3551_v24 = vpop.f32.mrf.mxu1  ;;  %v685_v39 = vld [vmem:[%s4374_s30 + $0x1c] sm:$0x1] }
 0x16d   : > { %v508_v54 = vunpack.i.h.s16 %v499_v25  ;;  %v516_v5 = vunpack.i.h.s16 %v500_v37  ;;  %v520_v40 = vpack.i.b16 %v504_v41, %v504_v41  ;;  %v3393_v32 = vpack.i.b16 %v497_v30, %v497_v30 }
 0x16e   : > { %v522_v13 = vpack.i.b16 %v506_v8, %v506_v8  ;;  %v3394_v29 = vpack.i.b16 %v499_v25, %v499_v25  ;;  %v526_v50 = vpack.i.b16 %v510_v20, %v510_v20  ;;  %v3396_v57 = vpack.i.b16 %v496_v27, %v496_v27  ;;  %v4376_v0 = vpop.f32.mrf.mxu1  ;;  %v691_v20 = vld [vmem:[%s4374_s30 + $0x24] sm:$0x1]  ;;  %v697_v8 = vld [vmem:[%s4374_s30 + $0x2c] sm:$0x1] }
 0x16f   : > { %v524_v6 = vpack.i.b16 %v508_v54, %v508_v54  ;;  %v4378_v34 = vpack.i.b16 %v512_v56, %v512_v56  ;;  %v3397_v38 = vpack.i.b16 %v498_v4, %v498_v4  ;;  %v4380_v42 = vpack.i.b16 %v514_v19, %v514_v19  ;;  %v700_v56 = vld [vmem:[%s4374_s30 + $0x30] sm:$0x1]  ;;  %v703_v19 = vld [vmem:[%s4374_s30 + $0x34] sm:$0x1] }
 0x170   : > { %v3398_v16 = vpack.i.b16 %v500_v37, %v500_v37  ;;  %v4382_v45 = vpack.i.b16 %v516_v5, %v516_v5  ;;  %v539_v22 = vrot.slane %v3391_v51, %v4352_v31  ;;  %v546_v3 = vrot.slane %v518_v26, %v4352_v31  ;;  %v3552_v62 = vpop.f32.mrf.mxu1  ;;  %v694_v51 = vld [vmem:[%s4374_s30 + $0x28] sm:$0x1]  ;;  %v706_v5 = vld [vmem:[%s4374_s30 + $0x38] sm:$0x1] }
 0x171   : > { %v553_v1 = vrot.slane %v3392_v11, %v4352_v31  ;;  %v560_v52 = vrot.slane %v520_v40, %v4352_v31  ;;  %v567_v55 = vrot.slane %v3393_v32, %v4352_v31  ;;  %v574_v17 = vrot.slane %v522_v13, %v4352_v31  ;;  %v709_v40 = vld [vmem:[%s4374_s30 + $0x3c] sm:$0x1] }
 0x172   : > { %v581_v63 = vrot.slane %v3394_v29, %v4352_v31  ;;  %v588_v2 = vrot.slane %v524_v6, %v4352_v31  ;;  %v595_v14 = vrot.slane %v3395_v61, %v4352_v31  ;;  %v602_v47 = vrot.slane %v526_v50, %v4352_v31  ;;  %v4408_v7 = vpop.f32.mrf.mxu0 }
 0x173   : > { %v609_v49 = vrot.slane %v3396_v57, %v4352_v31  ;;  %v616_v27 = vrot.slane %v4378_v34, %v4352_v31  ;;  %v623_v30 = vrot.slane %v3397_v38, %v4352_v31  ;;  %v630_v4 = vrot.slane %v4380_v42, %v4352_v31 }
 0x174   : > { %v637_v61 = vrot.slane %v3398_v16, %v4352_v31  ;;  %v644_v25 = vrot.slane %v4382_v45, %v4352_v31  ;;  %v665_v37 = vsel %vm4388_vm13, %v539_v22, %v664_v9  ;;  %v668_v41 = vsel %vm4388_vm13, %v546_v3, %v667_v44  ;;  %v3561_v26 = vpop.f32.mrf.mxu0 }
 0x175   : > { %666 = vst [vmem:[%s4374_s30] sm:$0x1] %v665_v37  ;;  %669 = vst [vmem:[%s4374_s30 + $0x4] sm:$0x1] %v668_v41  ;;  %v671_v11 = vsel %vm4388_vm13, %v553_v1, %v670_v60  ;;  %v674_v33 = vsel %vm4388_vm13, %v560_v52, %v673_v15  ;;  %v677_v24 = vsel %vm4388_vm13, %v567_v55, %v676_v43  ;;  %v1157_v52 = vmax.f32 %v4362_v23, 0.0 }
 0x176   : > { %v680_v54 = vsel %vm4388_vm13, %v574_v17, %v679_v18  ;;  %672 = vst [vmem:[%s4374_s30 + $0x8] sm:$0x1] %v671_v11  ;;  %675 = vst [vmem:[%s4374_s30 + $0xc] sm:$0x1] %v674_v33  ;;  %v683_v32 = vsel %vm4388_vm13, %v581_v63, %v682_v48  ;;  %v686_v13 = vsel %vm4388_vm13, %v588_v2, %v685_v39  ;;  %v4453_v57 = vpop.f32.mrf.mxu0  ;;  %v4455_v6 = vpop.f32.mrf.mxu1 }
 0x177   : > { %678 = vst [vmem:[%s4374_s30 + $0x10] sm:$0x1] %v677_v24  ;;  %681 = vst [vmem:[%s4374_s30 + $0x14] sm:$0x1] %v680_v54  ;;  %v689_v29 = vsel %vm4388_vm13, %v595_v14, %v688_v59  ;;  %v692_v50 = vsel %vm4388_vm13, %v602_v47, %v691_v20  ;;  %v695_v34 = vsel %vm4388_vm13, %v609_v49, %v694_v51 }
 0x178   : > { %684 = vst [vmem:[%s4374_s30 + $0x18] sm:$0x1] %v683_v32  ;;  %687 = vst [vmem:[%s4374_s30 + $0x1c] sm:$0x1] %v686_v13  ;;  %v698_v38 = vsel %vm4388_vm13, %v616_v27, %v697_v8  ;;  %v701_v42 = vsel %vm4388_vm13, %v623_v30, %v700_v56  ;;  %v704_v16 = vsel %vm4388_vm13, %v630_v4, %v703_v19  ;;  %v3562_v62 = vpop.f32.mrf.mxu0  ;;  %v3571_v1 = vpop.f32.mrf.mxu1 }
 0x179   : > { %690 = vst [vmem:[%s4374_s30 + $0x20] sm:$0x1] %v689_v29  ;;  %693 = vst [vmem:[%s4374_s30 + $0x24] sm:$0x1] %v692_v50  ;;  %v707_v45 = vsel %vm4388_vm13, %v637_v61, %v706_v5  ;;  %v710_v22 = vsel %vm4388_vm13, %v644_v25, %v709_v40  ;;  %v814_v3 = vrot.slane %v4357_v10, %v4345_v46  ;;  %vm3209_vm13 = vsmask.f32 7950 }
 0x17a   : > { %696 = vst [vmem:[%s4374_s30 + $0x28] sm:$0x1] %v695_v34  ;;  %699 = vst [vmem:[%s4374_s30 + $0x2c] sm:$0x1] %v698_v38  ;;  %v821_v9 = vrot.slane %v3400_v12, %v4345_v46  ;;  %v1154_v55 = vadd.f32 %v4367_v53, %v4340_v36  ;;  %v4490_v35 = vadd.f32 %v4369_v21, %v4338_v58  ;;  %v4496_v60 = vpop.f32.mrf.mxu1 }
 0x17b   : > { %702 = vst [vmem:[%s4374_s30 + $0x30] sm:$0x1] %v701_v42  ;;  %705 = vst [vmem:[%s4374_s30 + $0x34] sm:$0x1] %v704_v16  ;;  %v1513_v10 = vadd.f32 %v4376_v0, %v4340_v36  ;;  %v822_v17 = vcombine.high %v814_v3, %v814_v3  ;;  %v830_v12 = vrot.slane %v814_v3, %v4345_v46 }
 0x17c   : > { %708 = vst [vmem:[%s4374_s30 + $0x38] sm:$0x1] %v707_v45  ;;  %711 = vst [vmem:[%s4374_s30 + $0x3c] sm:$0x1] %v710_v22  ;;  %v823_v28 = vcombine.high %v821_v9, %v821_v9  ;;  %v837_v44 = vrot.slane %v821_v9, %v4345_v46  ;;  %v4498_v43 = vmax.f32 %v1154_v55, 0.0  ;;  %v1516_v59 = vmax.f32 %v4490_v35, 0.0  ;;  %v3572_v47 = vpop.f32.mrf.mxu1 }
 0x17d   : > { %v4501_v53 = vmax.f32 %v1513_v10, 0.0  ;;  %v4505_v21 = vadd.f32 %v4408_v7, %v4338_v58  ;;  %v844_v0 = vrot.slane %v822_v17, %v4345_v46  ;;  %v852_v2 = vcombine.high %v830_v12, %v830_v12  ;;  %v1018_v45 = vld [vmem:[%s4374_s30] sm:$0x1]  ;;  %v1021_v22 = vld [vmem:[%s4374_s30 + $0x4] sm:$0x1]  ;;  %vm5236_vm14 = vmand %vm2811_vm10, %vm3209_vm13 }
 0x17e   : > { %v851_v63 = vrot.slane %v823_v28, %v4345_v46  ;;  %v853_v14 = vcombine.high %v837_v44, %v837_v44  ;;  %v857_v15 = vunpack.i.h.s16 %v830_v12  ;;  %v865_v18 = vunpack.i.h.s16 %v837_v44  ;;  %v4509_v20 = vpop.f32.mrf.mxu0  ;;  %v1024_v55 = vld [vmem:[%s4374_s30 + $0x8] sm:$0x1]  ;;  %v1027_v10 = vld [vmem:[%s4374_s30 + $0xc] sm:$0x1]  ;;  %v1030_v17 = vld [vmem:[%s4374_s30 + $0x10] sm:$0x1] }
 0x17f   : > { %v3401_v48 = vpack.i.b16 %v830_v12, %v830_v12  ;;  %v3405_v49 = vpack.i.b16 %v837_v44, %v837_v44  ;;  %v854_v27 = vcombine.high %v844_v0, %v844_v0  ;;  %v859_v4 = vunpack.i.h.s16 %v844_v0  ;;  %v1036_v47 = vld [vmem:[%s4374_s30 + $0x18] sm:$0x1] }
 0x180   : > { %v855_v30 = vcombine.high %v851_v63, %v851_v63  ;;  %v861_v39 = vunpack.i.h.s16 %v852_v2  ;;  %v867_v51 = vunpack.i.h.s16 %v851_v63  ;;  %v869_v7 = vunpack.i.h.s16 %v853_v14  ;;  %v3581_v19 = vpop.f32.mrf.mxu0 }
 0x181   : > { %v873_v61 = vpack.i.b16 %v857_v15, %v857_v15  ;;  %v3402_v25 = vpack.i.b16 %v844_v0, %v844_v0  ;;  %v863_v37 = vunpack.i.h.s16 %v854_v27  ;;  %v875_v8 = vpack.i.b16 %v859_v4, %v859_v4  ;;  %v1039_v15 = vld [vmem:[%s4374_s30 + $0x1c] sm:$0x1]  ;;  %v1045_v4 = vld [vmem:[%s4374_s30 + $0x24] sm:$0x1] }
 0x182   : > { %v871_v41 = vunpack.i.h.s16 %v855_v30  ;;  %v3403_v56 = vpack.i.b16 %v852_v2, %v852_v2  ;;  %v877_v26 = vpack.i.b16 %v861_v39, %v861_v39  ;;  %v3404_v11 = vpack.i.b16 %v854_v27, %v854_v27  ;;  %v4517_v13 = vpop.f32.mrf.mxu0  ;;  %v4519_v29 = vpop.f32.mrf.mxu1  ;;  %v1048_v39 = vld [vmem:[%s4374_s30 + $0x28] sm:$0x1] }
 0x183   : > { %v4511_v33 = vpack.i.b16 %v865_v18, %v865_v18  ;;  %v3406_v24 = vpack.i.b16 %v851_v63, %v851_v63  ;;  %v879_v54 = vpack.i.b16 %v863_v37, %v863_v37  ;;  %v4513_v5 = vpack.i.b16 %v867_v51, %v867_v51 }
 0x184   : > { %v3407_v40 = vpack.i.b16 %v853_v14, %v853_v14  ;;  %v4515_v32 = vpack.i.b16 %v869_v7, %v869_v7  ;;  %v3408_v50 = vpack.i.b16 %v855_v30, %v855_v30  ;;  %v4521_v34 = vpack.i.b16 %v871_v41, %v871_v41  ;;  %v3582_v28 = vpop.f32.mrf.mxu0  ;;  %v3591_v12 = vpop.f32.mrf.mxu1  ;;  %v1033_v14 = vld [vmem:[%s4374_s30 + $0x14] sm:$0x1]  ;;  %v1042_v30 = vld [vmem:[%s4374_s30 + $0x20] sm:$0x1]  ;;  %v1051_v41 = vld [vmem:[%s4374_s30 + $0x2c] sm:$0x1] }
 0x185   : > { %v894_v38 = vrot.slane %v3401_v48, %v4352_v31  ;;  %v901_v42 = vrot.slane %v873_v61, %v4352_v31  ;;  %v908_v3 = vrot.slane %v3402_v25, %v4352_v31  ;;  %v915_v9 = vrot.slane %v875_v8, %v4352_v31  ;;  %v1054_v8 = vld [vmem:[%s4374_s30 + $0x30] sm:$0x1] }
 0x186   : > { %v922_v62 = vrot.slane %v3403_v56, %v4352_v31  ;;  %v929_v1 = vrot.slane %v877_v26, %v4352_v31  ;;  %v936_v44 = vrot.slane %v3404_v11, %v4352_v31  ;;  %v943_v0 = vrot.slane %v879_v54, %v4352_v31  ;;  %v4557_v51 = vpop.f32.mrf.mxu1  ;;  %v1057_v56 = vld [vmem:[%s4374_s30 + $0x34] sm:$0x1]  ;;  %v1063_v54 = vld [vmem:[%s4374_s30 + $0x3c] sm:$0x1] }
 0x187   : > { %v950_v63 = vrot.slane %v3405_v49, %v4352_v31  ;;  %v957_v2 = vrot.slane %v4511_v33, %v4352_v31  ;;  %v964_v18 = vrot.slane %v3406_v24, %v4352_v31  ;;  %v971_v48 = vrot.slane %v4513_v5, %v4352_v31  ;;  %v1060_v24 = vld [vmem:[%s4374_s30 + $0x38] sm:$0x1] }
 0x188   : > { %v978_v27 = vrot.slane %v3407_v40, %v4352_v31  ;;  %v985_v49 = vrot.slane %v4515_v32, %v4352_v31  ;;  %v992_v7 = vrot.slane %v3408_v50, %v4352_v31  ;;  %v999_v61 = vrot.slane %v4521_v34, %v4352_v31  ;;  %v3592_v5 = vpop.f32.mrf.mxu1 }
 0x189   : > { %v1019_v25 = vsel %vm4527_vm15, %v894_v38, %v1018_v45  ;;  %v1022_v37 = vsel %vm4527_vm15, %v901_v42, %v1021_v22  ;;  %v1025_v19 = vsel %vm4527_vm15, %v908_v3, %v1024_v55  ;;  %v1028_v26 = vsel %vm4527_vm15, %v915_v9, %v1027_v10 }
 0x18a   : > { %1020 = vst [vmem:[%s4374_s30] sm:$0x1] %v1019_v25  ;;  %1023 = vst [vmem:[%s4374_s30 + $0x4] sm:$0x1] %v1022_v37  ;;  %v1031_v11 = vsel %vm4527_vm15, %v922_v62, %v1030_v17  ;;  %v1034_v33 = vsel %vm4527_vm15, %v929_v1, %v1033_v14  ;;  %v1037_v40 = vsel %vm4527_vm15, %v936_v44, %v1036_v47  ;;  %v1889_v17 = vmax.f32 %v4505_v21, 0.0 }
 0x18b   : > { %1026 = vst [vmem:[%s4374_s30 + $0x8] sm:$0x1] %v1025_v19  ;;  %1029 = vst [vmem:[%s4374_s30 + $0xc] sm:$0x1] %v1028_v26  ;;  %v1040_v32 = vsel %vm4527_vm15, %v943_v0, %v1039_v15  ;;  %v1043_v50 = vsel %vm4527_vm15, %v950_v63, %v1042_v30  ;;  %v1046_v34 = vsel %vm4527_vm15, %v957_v2, %v1045_v4 }
 0x18c   : > { %1032 = vst [vmem:[%s4374_s30 + $0x10] sm:$0x1] %v1031_v11  ;;  %1035 = vst [vmem:[%s4374_s30 + $0x14] sm:$0x1] %v1034_v33  ;;  %v1049_v38 = vsel %vm4527_vm15, %v964_v18, %v1048_v39  ;;  %v1052_v42 = vsel %vm4527_vm15, %v971_v48, %v1051_v41  ;;  %v1055_v45 = vsel %vm4527_vm15, %v978_v27, %v1054_v8 }
 0x18d   : > { %1038 = vst [vmem:[%s4374_s30 + $0x18] sm:$0x1] %v1037_v40  ;;  %1041 = vst [vmem:[%s4374_s30 + $0x1c] sm:$0x1] %v1040_v32  ;;  %v1058_v22 = vsel %vm4527_vm15, %v985_v49, %v1057_v56  ;;  %v1061_v3 = vsel %vm4527_vm15, %v992_v7, %v1060_v24  ;;  %v1064_v9 = vsel %vm4527_vm15, %v999_v61, %v1063_v54 }
 0x18e   : > { %1044 = vst [vmem:[%s4374_s30 + $0x20] sm:$0x1] %v1043_v50  ;;  %1047 = vst [vmem:[%s4374_s30 + $0x24] sm:$0x1] %v1046_v34  ;;  %v1159_v62 = vpack.c.bf16 %v4498_v43, %v1157_v52  ;;  %v3410_v1 = vpack.c.bf16 %v4498_v43, %v4498_v43  ;;  %v1518_v55 = vpack.c.bf16 %v4501_v53, %v1516_v59 }
 0x18f   : > { %1050 = vst [vmem:[%s4374_s30 + $0x28] sm:$0x1] %v1049_v38  ;;  %1053 = vst [vmem:[%s4374_s30 + $0x2c] sm:$0x1] %v1052_v42  ;;  %v3420_v10 = vpack.c.bf16 %v4501_v53, %v4501_v53  ;;  %v1886_v16 = vadd.f32 %v4453_v57, %v4340_v36  ;;  %v4632_v43 = vadd.f32 %v4455_v6, %v4338_v58 }
 0x190   : > { %1056 = vst [vmem:[%s4374_s30 + $0x30] sm:$0x1] %v1055_v45  ;;  %1059 = vst [vmem:[%s4374_s30 + $0x34] sm:$0x1] %v1058_v22  ;;  %v1168_v23 = vrot.slane %v1159_v62, %v4345_v46  ;;  %v1175_v52 = vrot.slane %v3410_v1, %v4345_v46  ;;  %v4636_v35 = vadd.f32 %v4496_v60, %v4340_v36 }
 0x191   : > { %1062 = vst [vmem:[%s4374_s30 + $0x38] sm:$0x1] %v1061_v3  ;;  %1065 = vst [vmem:[%s4374_s30 + $0x3c] sm:$0x1] %v1064_v9  ;;  %v4639_v59 = vrot.slane %v1518_v55, %v4345_v46  ;;  %v4642_v53 = vrot.slane %v3420_v10, %v4345_v46  ;;  %v4644_v57 = vmax.f32 %v1886_v16, 0.0  ;;  %v4648_v28 = vadd.f32 %v4509_v20, %v4338_v58 }
 0x192   : > { %v1176_v12 = vcombine.high %v1168_v23, %v1168_v23  ;;  %v1177_v44 = vcombine.high %v1175_v52, %v1175_v52  ;;  %v1184_v6 = vrot.slane %v1168_v23, %v4345_v46  ;;  %v1191_v0 = vrot.slane %v1175_v52, %v4345_v46  ;;  %v1373_v9 = vld [vmem:[%s4374_s30] sm:$0x2]  ;;  %v1376_v16 = vld [vmem:[%s4374_s30 + $0x4] sm:$0x2]  ;;  %v1379_v23 = vld [vmem:[%s4374_s30 + $0x8] sm:$0x2] }
 0x193   : > { %v1535_v60 = vcombine.high %v4639_v59, %v4639_v59  ;;  %v1536_v63 = vcombine.high %v4642_v53, %v4642_v53  ;;  %v4658_v2 = vrot.slane %v4639_v59, %v4345_v46  ;;  %v4662_v20 = vrot.slane %v4642_v53, %v4345_v46  ;;  %v1385_v52 = vld [vmem:[%s4374_s30 + $0x10] sm:$0x2] }
 0x194   : > { %v1198_v14 = vrot.slane %v1176_v12, %v4345_v46  ;;  %v1205_v47 = vrot.slane %v1177_v44, %v4345_v46  ;;  %v1206_v15 = vcombine.high %v1184_v6, %v1184_v6  ;;  %v1207_v18 = vcombine.high %v1191_v0, %v1191_v0  ;;  %v1397_v12 = vld [vmem:[%s4374_s30 + $0x20] sm:$0x2] }
 0x195   : > { %v1211_v48 = vunpack.i.h.s16 %v1184_v6  ;;  %v1219_v27 = vunpack.i.h.s16 %v1191_v0  ;;  %v3411_v49 = vpack.i.b16 %v1184_v6, %v1184_v6  ;;  %v3415_v30 = vpack.i.b16 %v1191_v0, %v1191_v0 }
 0x196   : > { %v1208_v4 = vcombine.high %v1198_v14, %v1198_v14  ;;  %v1209_v39 = vcombine.high %v1205_v47, %v1205_v47  ;;  %v1213_v7 = vunpack.i.h.s16 %v1198_v14  ;;  %v1215_v61 = vunpack.i.h.s16 %v1206_v15 }
 0x197   : > { %v1221_v25 = vunpack.i.h.s16 %v1205_v47  ;;  %v1223_v37 = vunpack.i.h.s16 %v1207_v18  ;;  %v1227_v41 = vpack.i.b16 %v1211_v48, %v1211_v48  ;;  %v3412_v8 = vpack.i.b16 %v1198_v14, %v1198_v14 }
 0x198   : > { %v1217_v56 = vunpack.i.h.s16 %v1208_v4  ;;  %v1225_v19 = vunpack.i.h.s16 %v1209_v39  ;;  %v1229_v26 = vpack.i.b16 %v1213_v7, %v1213_v7  ;;  %v3413_v11 = vpack.i.b16 %v1206_v15, %v1206_v15  ;;  %v1388_v15 = vld [vmem:[%s4374_s30 + $0x14] sm:$0x2]  ;;  %v1403_v7 = vld [vmem:[%s4374_s30 + $0x28] sm:$0x2] }
 0x199   : > { %v1231_v33 = vpack.i.b16 %v1215_v61, %v1215_v61  ;;  %v3414_v24 = vpack.i.b16 %v1208_v4, %v1208_v4  ;;  %v1235_v54 = vpack.i.b16 %v1219_v27, %v1219_v27  ;;  %v3416_v5 = vpack.i.b16 %v1205_v47, %v1205_v47  ;;  %v1382_v47 = vld [vmem:[%s4374_s30 + $0xc] sm:$0x2] }
 0x19a   : > { %v1233_v40 = vpack.i.b16 %v1217_v56, %v1217_v56  ;;  %v1237_v32 = vpack.i.b16 %v1221_v25, %v1221_v25  ;;  %v3417_v50 = vpack.i.b16 %v1207_v18, %v1207_v18  ;;  %v1239_v34 = vpack.i.b16 %v1223_v37, %v1223_v37  ;;  %v1391_v18 = vld [vmem:[%s4374_s30 + $0x18] sm:$0x2]  ;;  %v1409_v56 = vld [vmem:[%s4374_s30 + $0x30] sm:$0x2] }
 0x19b   : > { %v3418_v38 = vpack.i.b16 %v1209_v39, %v1209_v39  ;;  %v4666_v42 = vpack.i.b16 %v1225_v19, %v1225_v19  ;;  %v1248_v45 = vrot.slane %v3411_v49, %v4352_v31  ;;  %v1255_v22 = vrot.slane %v1227_v41, %v4352_v31  ;;  %v1394_v39 = vld [vmem:[%s4374_s30 + $0x1c] sm:$0x2]  ;;  %v1412_v19 = vld [vmem:[%s4374_s30 + $0x34] sm:$0x2] }
 0x19c   : > { %v1262_v62 = vrot.slane %v3412_v8, %v4352_v31  ;;  %v1269_v1 = vrot.slane %v1229_v26, %v4352_v31  ;;  %v1276_v55 = vrot.slane %v3413_v11, %v4352_v31  ;;  %v1283_v10 = vrot.slane %v1231_v33, %v4352_v31  ;;  %v1406_v8 = vld [vmem:[%s4374_s30 + $0x2c] sm:$0x2] }
 0x19d   : > { %v1290_v44 = vrot.slane %v3414_v24, %v4352_v31  ;;  %v1297_v6 = vrot.slane %v1233_v40, %v4352_v31  ;;  %v1304_v0 = vrot.slane %v3415_v30, %v4352_v31  ;;  %v1311_v14 = vrot.slane %v1235_v54, %v4352_v31  ;;  %v1400_v30 = vld [vmem:[%s4374_s30 + $0x24] sm:$0x2]  ;;  %v1415_v54 = vld [vmem:[%s4374_s30 + $0x38] sm:$0x2] }
 0x19e   : > { %v1318_v48 = vrot.slane %v3416_v5, %v4352_v31  ;;  %v1325_v27 = vrot.slane %v1237_v32, %v4352_v31  ;;  %v1332_v49 = vrot.slane %v3417_v50, %v4352_v31  ;;  %v1339_v4 = vrot.slane %v1239_v34, %v4352_v31  ;;  %v1418_v5 = vld [vmem:[%s4374_s30 + $0x3c] sm:$0x2] }
 0x19f   : > { %v1346_v61 = vrot.slane %v3418_v38, %v4352_v31  ;;  %v1353_v25 = vrot.slane %v4666_v42, %v4352_v31  ;;  %v1374_v37 = vsel %vm4672_vm2, %v1248_v45, %v1373_v9  ;;  %v1377_v41 = vsel %vm4672_vm2, %v1255_v22, %v1376_v16 }
 0x1a0   : > { %1375 = vst [vmem:[%s4374_s30] sm:$0x2] %v1374_v37  ;;  %1378 = vst [vmem:[%s4374_s30 + $0x4] sm:$0x2] %v1377_v41  ;;  %v1380_v26 = vsel %vm4672_vm2, %v1262_v62, %v1379_v23  ;;  %v1383_v11 = vsel %vm4672_vm2, %v1269_v1, %v1382_v47  ;;  %v1386_v33 = vsel %vm4672_vm2, %v1276_v55, %v1385_v52  ;;  %v1570_v3 = vunpack.i.h.s16 %v4658_v2 }
 0x1a1   : > { %v1389_v24 = vsel %vm4672_vm2, %v1283_v10, %v1388_v15  ;;  %1381 = vst [vmem:[%s4374_s30 + $0x8] sm:$0x2] %v1380_v26  ;;  %1384 = vst [vmem:[%s4374_s30 + $0xc] sm:$0x2] %v1383_v11  ;;  %v1392_v40 = vsel %vm4672_vm2, %v1290_v44, %v1391_v18  ;;  %v1395_v32 = vsel %vm4672_vm2, %v1297_v6, %v1394_v39  ;;  %v1578_v23 = vunpack.i.h.s16 %v4662_v20 }
 0x1a2   : > { %1387 = vst [vmem:[%s4374_s30 + $0x10] sm:$0x2] %v1386_v33  ;;  %1390 = vst [vmem:[%s4374_s30 + $0x14] sm:$0x2] %v1389_v24  ;;  %v1398_v50 = vsel %vm4672_vm2, %v1304_v0, %v1397_v12  ;;  %v1401_v34 = vsel %vm4672_vm2, %v1311_v14, %v1400_v30  ;;  %v1404_v38 = vsel %vm4672_vm2, %v1318_v48, %v1403_v7 }
 0x1a3   : > { %1393 = vst [vmem:[%s4374_s30 + $0x18] sm:$0x2] %v1392_v40  ;;  %1396 = vst [vmem:[%s4374_s30 + $0x1c] sm:$0x2] %v1395_v32  ;;  %v1407_v42 = vsel %vm4672_vm2, %v1325_v27, %v1406_v8  ;;  %v1410_v45 = vsel %vm4672_vm2, %v1332_v49, %v1409_v56  ;;  %v1413_v22 = vsel %vm4672_vm2, %v1339_v4, %v1412_v19 }
 0x1a4   : > { %1399 = vst [vmem:[%s4374_s30 + $0x20] sm:$0x2] %v1398_v50  ;;  %1402 = vst [vmem:[%s4374_s30 + $0x24] sm:$0x2] %v1401_v34  ;;  %v1416_v9 = vsel %vm4672_vm2, %v1346_v61, %v1415_v54  ;;  %v1419_v62 = vsel %vm4672_vm2, %v1353_v25, %v1418_v5  ;;  %v1557_v1 = vrot.slane %v1535_v60, %v4345_v46 }
 0x1a5   : > { %1405 = vst [vmem:[%s4374_s30 + $0x28] sm:$0x2] %v1404_v38  ;;  %1408 = vst [vmem:[%s4374_s30 + $0x2c] sm:$0x2] %v1407_v42  ;;  %v1564_v55 = vrot.slane %v1536_v63, %v4345_v46  ;;  %v1565_v10 = vcombine.high %v4658_v2, %v4658_v2  ;;  %v1566_v16 = vcombine.high %v4662_v20, %v4662_v20 }
 0x1a6   : > { %1411 = vst [vmem:[%s4374_s30 + $0x30] sm:$0x2] %v1410_v45  ;;  %1414 = vst [vmem:[%s4374_s30 + $0x34] sm:$0x2] %v1413_v22  ;;  %v1567_v52 = vcombine.high %v1557_v1, %v1557_v1  ;;  %v1572_v60 = vunpack.i.h.s16 %v1557_v1  ;;  %v3421_v53 = vpack.i.b16 %v4658_v2, %v4658_v2  ;;  %v1586_v63 = vpack.i.b16 %v1570_v3, %v1570_v3 }
 0x1a7   : > { %1417 = vst [vmem:[%s4374_s30 + $0x38] sm:$0x2] %v1416_v9  ;;  %1420 = vst [vmem:[%s4374_s30 + $0x3c] sm:$0x2] %v1419_v62  ;;  %v1568_v59 = vcombine.high %v1564_v55, %v1564_v55  ;;  %v1580_v12 = vunpack.i.h.s16 %v1564_v55  ;;  %v1574_v44 = vunpack.i.h.s16 %v1565_v10  ;;  %v1582_v6 = vunpack.i.h.s16 %v1566_v16  ;;  %v1734_v11 = vld [vmem:[%s4374_s30 + $0x4] sm:$0x2] }
 0x1a8   : > { %v1576_v0 = vunpack.i.h.s16 %v1567_v52  ;;  %v3422_v47 = vpack.i.b16 %v1557_v1, %v1557_v1  ;;  %v1588_v15 = vpack.i.b16 %v1572_v60, %v1572_v60  ;;  %v3423_v18 = vpack.i.b16 %v1565_v10, %v1565_v10  ;;  %v1737_v33 = vld [vmem:[%s4374_s30 + $0x8] sm:$0x2]  ;;  %v1740_v24 = vld [vmem:[%s4374_s30 + $0xc] sm:$0x2] }
 0x1a9   : > { %v1584_v14 = vunpack.i.h.s16 %v1568_v59  ;;  %v1590_v48 = vpack.i.b16 %v1574_v44, %v1574_v44  ;;  %v3424_v27 = vpack.i.b16 %v1567_v52, %v1567_v52  ;;  %v3425_v49 = vpack.i.b16 %v4662_v20, %v4662_v20  ;;  %v1731_v20 = vld [vmem:[%s4374_s30] sm:$0x2]  ;;  %v1743_v50 = vld [vmem:[%s4374_s30 + $0x10] sm:$0x2]  ;;  %v1746_v34 = vld [vmem:[%s4374_s30 + $0x14] sm:$0x2] }
 0x1aa   : > { %v1592_v4 = vpack.i.b16 %v1576_v0, %v1576_v0  ;;  %v1594_v39 = vpack.i.b16 %v1578_v23, %v1578_v23  ;;  %v3426_v30 = vpack.i.b16 %v1564_v55, %v1564_v55  ;;  %v1596_v7 = vpack.i.b16 %v1580_v12, %v1580_v12  ;;  %v1749_v38 = vld [vmem:[%s4374_s30 + $0x18] sm:$0x2]  ;;  %v1752_v62 = vld [vmem:[%s4374_s30 + $0x1c] sm:$0x2] }
 0x1ab   : > { %v3427_v2 = vpack.i.b16 %v1566_v16, %v1566_v16  ;;  %v4773_v61 = vpack.i.b16 %v1582_v6, %v1582_v6  ;;  %v3428_v25 = vpack.i.b16 %v1568_v59, %v1568_v59  ;;  %v4775_v37 = vpack.i.b16 %v1584_v14, %v1584_v14  ;;  %v1755_v1 = vld [vmem:[%s4374_s30 + $0x20] sm:$0x2]  ;;  %v1758_v55 = vld [vmem:[%s4374_s30 + $0x24] sm:$0x2] }
 0x1ac   : > { %v1607_v8 = vrot.slane %v3421_v53, %v4352_v31  ;;  %v1614_v56 = vrot.slane %v1586_v63, %v4352_v31  ;;  %v1621_v19 = vrot.slane %v3422_v47, %v4352_v31  ;;  %v1628_v26 = vrot.slane %v1588_v15, %v4352_v31  ;;  %v1761_v52 = vld [vmem:[%s4374_s30 + $0x28] sm:$0x2]  ;;  %v1764_v59 = vld [vmem:[%s4374_s30 + $0x2c] sm:$0x2] }
 0x1ad   : > { %v1635_v54 = vrot.slane %v3423_v18, %v4352_v31  ;;  %v1642_v5 = vrot.slane %v1590_v48, %v4352_v31  ;;  %v1649_v40 = vrot.slane %v3424_v27, %v4352_v31  ;;  %v1656_v32 = vrot.slane %v1592_v4, %v4352_v31  ;;  %v1767_v60 = vld [vmem:[%s4374_s30 + $0x30] sm:$0x2]  ;;  %v1770_v63 = vld [vmem:[%s4374_s30 + $0x34] sm:$0x2] }
 0x1ae   : > { %v1663_v42 = vrot.slane %v3425_v49, %v4352_v31  ;;  %v1670_v45 = vrot.slane %v1594_v39, %v4352_v31  ;;  %v1677_v22 = vrot.slane %v3426_v30, %v4352_v31  ;;  %v1684_v9 = vrot.slane %v1596_v7, %v4352_v31  ;;  %v1773_v0 = vld [vmem:[%s4374_s30 + $0x38] sm:$0x2]  ;;  %v1776_v14 = vld [vmem:[%s4374_s30 + $0x3c] sm:$0x2] }
 0x1af   : > { %v1691_v10 = vrot.slane %v3427_v2, %v4352_v31  ;;  %v1698_v16 = vrot.slane %v4773_v61, %v4352_v31  ;;  %v1705_v3 = vrot.slane %v3428_v25, %v4352_v31  ;;  %v1712_v23 = vrot.slane %v4775_v37, %v4352_v31 }
 0x1b0   : > { %v1732_v12 = vsel %vm4779_vm4, %v1607_v8, %v1731_v20  ;;  %v1735_v44 = vsel %vm4779_vm4, %v1614_v56, %v1734_v11  ;;  %v1738_v6 = vsel %vm4779_vm4, %v1621_v19, %v1737_v33  ;;  %v1741_v53 = vsel %vm4779_vm4, %v1628_v26, %v1740_v24 }
 0x1b1   : > { %1733 = vst [vmem:[%s4374_s30] sm:$0x2] %v1732_v12  ;;  %1736 = vst [vmem:[%s4374_s30 + $0x4] sm:$0x2] %v1735_v44  ;;  %v1744_v47 = vsel %vm4779_vm4, %v1635_v54, %v1743_v50  ;;  %v1747_v15 = vsel %vm4779_vm4, %v1642_v5, %v1746_v34  ;;  %v1750_v18 = vsel %vm4779_vm4, %v1649_v40, %v1749_v38  ;;  %v2244_v20 = vmax.f32 %v4632_v43, 0.0 }
 0x1b2   : > { %1739 = vst [vmem:[%s4374_s30 + $0x8] sm:$0x2] %v1738_v6  ;;  %1742 = vst [vmem:[%s4374_s30 + $0xc] sm:$0x2] %v1741_v53  ;;  %v1753_v48 = vsel %vm4779_vm4, %v1656_v32, %v1752_v62  ;;  %v1756_v27 = vsel %vm4779_vm4, %v1663_v42, %v1755_v1  ;;  %v1759_v49 = vsel %vm4779_vm4, %v1670_v45, %v1758_v55  ;;  %v2245_v8 = vmax.f32 %v4636_v35, 0.0 }
 0x1b3   : > { %1745 = vst [vmem:[%s4374_s30 + $0x10] sm:$0x2] %v1744_v47  ;;  %1748 = vst [vmem:[%s4374_s30 + $0x14] sm:$0x2] %v1747_v15  ;;  %v1762_v4 = vsel %vm4779_vm4, %v1677_v22, %v1761_v52  ;;  %v1765_v39 = vsel %vm4779_vm4, %v1684_v9, %v1764_v59  ;;  %v1768_v30 = vsel %vm4779_vm4, %v1691_v10, %v1767_v60  ;;  %v2598_v35 = vmax.f32 %v4648_v28, 0.0 }
 0x1b4   : > { %1751 = vst [vmem:[%s4374_s30 + $0x18] sm:$0x2] %v1750_v18  ;;  %1754 = vst [vmem:[%s4374_s30 + $0x1c] sm:$0x2] %v1753_v48  ;;  %v1771_v7 = vsel %vm4779_vm4, %v1698_v16, %v1770_v63  ;;  %v1774_v2 = vsel %vm4779_vm4, %v1705_v3, %v1773_v0  ;;  %v1777_v61 = vsel %vm4779_vm4, %v1712_v23, %v1776_v14 }
 0x1b5   : > { %1757 = vst [vmem:[%s4374_s30 + $0x20] sm:$0x2] %v1756_v27  ;;  %1760 = vst [vmem:[%s4374_s30 + $0x24] sm:$0x2] %v1759_v49  ;;  %v1891_v25 = vpack.c.bf16 %v4644_v57, %v1889_v17  ;;  %v3430_v37 = vpack.c.bf16 %v4644_v57, %v4644_v57  ;;  %v2595_v56 = vadd.f32 %v4517_v13, %v4340_v36 }
 0x1b6   : > { %1763 = vst [vmem:[%s4374_s30 + $0x28] sm:$0x2] %v1762_v4  ;;  %1766 = vst [vmem:[%s4374_s30 + $0x2c] sm:$0x2] %v1765_v39  ;;  %v4876_v41 = vadd.f32 %v4519_v29, %v4338_v58  ;;  %v2993_v19 = vadd.f32 %v4557_v51, %v4340_v36  ;;  %v2246_v57 = vpack.c.bf16 %v2245_v8, %v2244_v20  ;;  %v2105_v4 = vld [vmem:[%s4374_s30] sm:$0x4] }
 0x1b7   : > { %1769 = vst [vmem:[%s4374_s30 + $0x30] sm:$0x2] %v1768_v30  ;;  %1772 = vst [vmem:[%s4374_s30 + $0x34] sm:$0x2] %v1771_v7  ;;  %v1900_v21 = vrot.slane %v1891_v25, %v4345_v46  ;;  %v1907_v17 = vrot.slane %v3430_v37, %v4345_v46  ;;  %v3440_v43 = vpack.c.bf16 %v2245_v8, %v2245_v8  ;;  %v4883_v26 = vmax.f32 %v2595_v56, 0.0 }
 0x1b8   : > { %1775 = vst [vmem:[%s4374_s30 + $0x38] sm:$0x2] %v1774_v2  ;;  %1778 = vst [vmem:[%s4374_s30 + $0x3c] sm:$0x2] %v1777_v61  ;;  %v2996_v13 = vmax.f32 %v4876_v41, 0.0  ;;  %v4886_v11 = vmax.f32 %v2993_v19, 0.0  ;;  %v4891_v33 = vrot.slane %v2246_v57, %v4345_v46 }
 0x1b9   : > { %v1908_v58 = vcombine.high %v1900_v21, %v1900_v21  ;;  %v1909_v29 = vcombine.high %v1907_v17, %v1907_v17  ;;  %v1916_v36 = vrot.slane %v1900_v21, %v4345_v46  ;;  %v1923_v51 = vrot.slane %v1907_v17, %v4345_v46  ;;  %v2108_v61 = vld [vmem:[%s4374_s30 + $0x4] sm:$0x4]  ;;  %v2111_v25 = vld [vmem:[%s4374_s30 + $0x8] sm:$0x4]  ;;  %v2117_v37 = vld [vmem:[%s4374_s30 + $0x10] sm:$0x4] }
 0x1ba   : > { %v4894_v24 = vrot.slane %v3440_v43, %v4345_v46  ;;  %v4897_v28 = vpack.c.bf16 %v4883_v26, %v2598_v35  ;;  %v3450_v54 = vpack.c.bf16 %v4883_v26, %v4883_v26  ;;  %v2129_v20 = vld [vmem:[%s4374_s30 + $0x20] sm:$0x4]  ;;  %v2114_v17 = vld [vmem:[%s4374_s30 + $0xc] sm:$0x4]  ;;  %v2120_v57 = vld [vmem:[%s4374_s30 + $0x14] sm:$0x4] }
 0x1bb   : > { %v1930_v5 = vrot.slane %v1908_v58, %v4345_v46  ;;  %v1937_v40 = vrot.slane %v1909_v29, %v4345_v46  ;;  %v1938_v32 = vcombine.high %v1916_v36, %v1916_v36  ;;  %v1939_v50 = vcombine.high %v1923_v51, %v1923_v51  ;;  %v2123_v43 = vld [vmem:[%s4374_s30 + $0x18] sm:$0x4] }
 0x1bc   : > { %v1943_v34 = vunpack.i.h.s16 %v1916_v36  ;;  %v1951_v38 = vunpack.i.h.s16 %v1923_v51  ;;  %v3431_v42 = vpack.i.b16 %v1916_v36, %v1916_v36  ;;  %v3435_v45 = vpack.i.b16 %v1923_v51, %v1923_v51  ;;  %v2126_v51 = vld [vmem:[%s4374_s30 + $0x1c] sm:$0x4] }
 0x1bd   : > { %v1940_v22 = vcombine.high %v1930_v5, %v1930_v5  ;;  %v1941_v9 = vcombine.high %v1937_v40, %v1937_v40  ;;  %v1945_v62 = vunpack.i.h.s16 %v1930_v5  ;;  %v1947_v1 = vunpack.i.h.s16 %v1938_v32 }
 0x1be   : > { %v1953_v55 = vunpack.i.h.s16 %v1937_v40  ;;  %v1955_v10 = vunpack.i.h.s16 %v1939_v50  ;;  %v1959_v16 = vpack.i.b16 %v1943_v34, %v1943_v34  ;;  %v3432_v3 = vpack.i.b16 %v1930_v5, %v1930_v5  ;;  %v2132_v5 = vld [vmem:[%s4374_s30 + $0x24] sm:$0x4] }
 0x1bf   : > { %v1949_v23 = vunpack.i.h.s16 %v1940_v22  ;;  %v1957_v52 = vunpack.i.h.s16 %v1941_v9  ;;  %v1961_v59 = vpack.i.b16 %v1945_v62, %v1945_v62  ;;  %v3433_v60 = vpack.i.b16 %v1938_v32, %v1938_v32 }
 0x1c0   : > { %v1963_v12 = vpack.i.b16 %v1947_v1, %v1947_v1  ;;  %v3434_v44 = vpack.i.b16 %v1940_v22, %v1940_v22  ;;  %v1967_v6 = vpack.i.b16 %v1951_v38, %v1951_v38  ;;  %v3436_v53 = vpack.i.b16 %v1937_v40, %v1937_v40  ;;  %v2135_v40 = vld [vmem:[%s4374_s30 + $0x28] sm:$0x4]  ;;  %v2144_v22 = vld [vmem:[%s4374_s30 + $0x34] sm:$0x4] }
 0x1c1   : > { %v1965_v63 = vpack.i.b16 %v1949_v23, %v1949_v23  ;;  %v1969_v0 = vpack.i.b16 %v1953_v55, %v1953_v55  ;;  %v3437_v14 = vpack.i.b16 %v1939_v50, %v1939_v50  ;;  %v1971_v47 = vpack.i.b16 %v1955_v10, %v1955_v10  ;;  %v2147_v10 = vld [vmem:[%s4374_s30 + $0x38] sm:$0x4] }
 0x1c2   : > { %v3438_v15 = vpack.i.b16 %v1941_v9, %v1941_v9  ;;  %v4903_v18 = vpack.i.b16 %v1957_v52, %v1957_v52  ;;  %v1980_v48 = vrot.slane %v3431_v42, %v4352_v31  ;;  %v1987_v27 = vrot.slane %v1959_v16, %v4352_v31  ;;  %v2138_v42 = vld [vmem:[%s4374_s30 + $0x2c] sm:$0x4]  ;;  %v2150_v16 = vld [vmem:[%s4374_s30 + $0x3c] sm:$0x4] }
 0x1c3   : > { %v1994_v39 = vrot.slane %v3432_v3, %v4352_v31  ;;  %v2001_v30 = vrot.slane %v1961_v59, %v4352_v31  ;;  %v2008_v7 = vrot.slane %v3433_v60, %v4352_v31  ;;  %v2015_v2 = vrot.slane %v1963_v12, %v4352_v31 }
 0x1c4   : > { %v2022_v8 = vrot.slane %v3434_v44, %v4352_v31  ;;  %v2029_v56 = vrot.slane %v1965_v63, %v4352_v31  ;;  %v2036_v19 = vrot.slane %v3435_v45, %v4352_v31  ;;  %v2043_v21 = vrot.slane %v1967_v6, %v4352_v31  ;;  %v2141_v45 = vld [vmem:[%s4374_s30 + $0x30] sm:$0x4] }
 0x1c5   : > { %v2050_v35 = vrot.slane %v3436_v53, %v4352_v31  ;;  %v2057_v58 = vrot.slane %v1969_v0, %v4352_v31  ;;  %v2064_v29 = vrot.slane %v3437_v14, %v4352_v31  ;;  %v2071_v36 = vrot.slane %v1971_v47, %v4352_v31 }
 0x1c6   : > { %v2078_v32 = vrot.slane %v3438_v15, %v4352_v31  ;;  %v2085_v50 = vrot.slane %v4903_v18, %v4352_v31  ;;  %v2106_v34 = vsel %vm4909_vm7, %v1980_v48, %v2105_v4  ;;  %v2109_v38 = vsel %vm4909_vm7, %v1987_v27, %v2108_v61 }
 0x1c7   : > { %2107 = vst [vmem:[%s4374_s30] sm:$0x4] %v2106_v34  ;;  %2110 = vst [vmem:[%s4374_s30 + $0x4] sm:$0x4] %v2109_v38  ;;  %v2112_v9 = vsel %vm4909_vm7, %v1994_v39, %v2111_v25  ;;  %v2115_v62 = vsel %vm4909_vm7, %v2001_v30, %v2114_v17  ;;  %v2118_v1 = vsel %vm4909_vm7, %v2008_v7, %v2117_v37 }
 0x1c8   : > { %v2121_v55 = vsel %vm4909_vm7, %v2015_v2, %v2120_v57  ;;  %2113 = vst [vmem:[%s4374_s30 + $0x8] sm:$0x4] %v2112_v9  ;;  %2116 = vst [vmem:[%s4374_s30 + $0xc] sm:$0x4] %v2115_v62  ;;  %v2124_v3 = vsel %vm4909_vm7, %v2022_v8, %v2123_v43  ;;  %v2127_v23 = vsel %vm4909_vm7, %v2029_v56, %v2126_v51 }
 0x1c9   : > { %2119 = vst [vmem:[%s4374_s30 + $0x10] sm:$0x4] %v2118_v1  ;;  %2122 = vst [vmem:[%s4374_s30 + $0x14] sm:$0x4] %v2121_v55  ;;  %v2130_v52 = vsel %vm4909_vm7, %v2036_v19, %v2129_v20  ;;  %v2133_v59 = vsel %vm4909_vm7, %v2043_v21, %v2132_v5  ;;  %v2136_v60 = vsel %vm4909_vm7, %v2050_v35, %v2135_v40 }
 0x1ca   : > { %2125 = vst [vmem:[%s4374_s30 + $0x18] sm:$0x4] %v2124_v3  ;;  %2128 = vst [vmem:[%s4374_s30 + $0x1c] sm:$0x4] %v2127_v23  ;;  %v2139_v12 = vsel %vm4909_vm7, %v2057_v58, %v2138_v42  ;;  %v2142_v44 = vsel %vm4909_vm7, %v2064_v29, %v2141_v45  ;;  %v2145_v6 = vsel %vm4909_vm7, %v2071_v36, %v2144_v22 }
 0x1cb   : > { %2131 = vst [vmem:[%s4374_s30 + $0x20] sm:$0x4] %v2130_v52  ;;  %2134 = vst [vmem:[%s4374_s30 + $0x24] sm:$0x4] %v2133_v59  ;;  %v2148_v53 = vsel %vm4909_vm7, %v2078_v32, %v2147_v10  ;;  %v2151_v63 = vsel %vm4909_vm7, %v2085_v50, %v2150_v16  ;;  %v2263_v0 = vcombine.high %v4891_v33, %v4891_v33 }
 0x1cc   : > { %2137 = vst [vmem:[%s4374_s30 + $0x28] sm:$0x4] %v2136_v60  ;;  %2140 = vst [vmem:[%s4374_s30 + $0x2c] sm:$0x4] %v2139_v12  ;;  %v2264_v14 = vcombine.high %v4894_v24, %v4894_v24  ;;  %v2271_v47 = vrot.slane %v4891_v33, %v4345_v46  ;;  %v2278_v15 = vrot.slane %v4894_v24, %v4345_v46 }
 0x1cd   : > { %2143 = vst [vmem:[%s4374_s30 + $0x30] sm:$0x4] %v2142_v44  ;;  %2146 = vst [vmem:[%s4374_s30 + $0x34] sm:$0x4] %v2145_v6  ;;  %v5002_v18 = vrot.slane %v4897_v28, %v4345_v46  ;;  %v5008_v48 = vrot.slane %v3450_v54, %v4345_v46  ;;  %v2285_v27 = vrot.slane %v2263_v0, %v4345_v46 }
 0x1ce   : > { %2149 = vst [vmem:[%s4374_s30 + $0x38] sm:$0x4] %v2148_v53  ;;  %2152 = vst [vmem:[%s4374_s30 + $0x3c] sm:$0x4] %v2151_v63  ;;  %v2292_v49 = vrot.slane %v2264_v14, %v4345_v46  ;;  %v5015_v33 = vpack.c.bf16 %v4886_v11, %v2996_v13  ;;  %v3468_v24 = vpack.c.bf16 %v4886_v11, %v4886_v11  ;;  %v2298_v39 = vunpack.i.h.s16 %v2271_v47  ;;  %v2459_v50 = vld [vmem:[%s4374_s30] sm:$0x4] }
 0x1cf   : > { %v2293_v28 = vcombine.high %v2271_v47, %v2271_v47  ;;  %v2294_v4 = vcombine.high %v2278_v15, %v2278_v15  ;;  %v2306_v30 = vunpack.i.h.s16 %v2278_v15  ;;  %v2295_v7 = vcombine.high %v2285_v27, %v2285_v27  ;;  %v2462_v22 = vld [vmem:[%s4374_s30 + $0x4] sm:$0x4]  ;;  %v2465_v9 = vld [vmem:[%s4374_s30 + $0x8] sm:$0x4]  ;;  %v2468_v62 = vld [vmem:[%s4374_s30 + $0xc] sm:$0x4] }
 0x1d0   : > { %v2296_v26 = vcombine.high %v2292_v49, %v2292_v49  ;;  %v2300_v54 = vunpack.i.h.s16 %v2285_v27  ;;  %v2308_v2 = vunpack.i.h.s16 %v2292_v49  ;;  %v3441_v37 = vpack.i.b16 %v2271_v47, %v2271_v47  ;;  %v2471_v3 = vld [vmem:[%s4374_s30 + $0x10] sm:$0x4]  ;;  %v2474_v23 = vld [vmem:[%s4374_s30 + $0x14] sm:$0x4] }
 0x1d1   : > { %v2302_v61 = vunpack.i.h.s16 %v2293_v28  ;;  %v2310_v25 = vunpack.i.h.s16 %v2294_v4  ;;  %v2314_v20 = vpack.i.b16 %v2298_v39, %v2298_v39  ;;  %v2304_v8 = vunpack.i.h.s16 %v2295_v7  ;;  %v2477_v52 = vld [vmem:[%s4374_s30 + $0x18] sm:$0x4]  ;;  %v2480_v6 = vld [vmem:[%s4374_s30 + $0x1c] sm:$0x4] }
 0x1d2   : > { %v2312_v41 = vunpack.i.h.s16 %v2296_v26  ;;  %v3442_v13 = vpack.i.b16 %v2285_v27, %v2285_v27  ;;  %v2316_v56 = vpack.i.b16 %v2300_v54, %v2300_v54  ;;  %v3443_v19 = vpack.i.b16 %v2293_v28, %v2293_v28  ;;  %v2483_v53 = vld [vmem:[%s4374_s30 + $0x20] sm:$0x4]  ;;  %v2486_v63 = vld [vmem:[%s4374_s30 + $0x24] sm:$0x4] }
 0x1d3   : > { %v2318_v21 = vpack.i.b16 %v2302_v61, %v2302_v61  ;;  %v3444_v17 = vpack.i.b16 %v2295_v7, %v2295_v7  ;;  %v3445_v57 = vpack.i.b16 %v2278_v15, %v2278_v15  ;;  %v2320_v43 = vpack.i.b16 %v2304_v8, %v2304_v8  ;;  %v2489_v27 = vld [vmem:[%s4374_s30 + $0x28] sm:$0x4] }
 0x1d4   : > { %v2322_v35 = vpack.i.b16 %v2306_v30, %v2306_v30  ;;  %v3446_v58 = vpack.i.b16 %v2292_v49, %v2292_v49  ;;  %v2324_v29 = vpack.i.b16 %v2308_v2, %v2308_v2  ;;  %v3447_v36 = vpack.i.b16 %v2294_v4, %v2294_v4  ;;  %v2492_v49 = vld [vmem:[%s4374_s30 + $0x2c] sm:$0x4]  ;;  %v2495_v28 = vld [vmem:[%s4374_s30 + $0x30] sm:$0x4] }
 0x1d5   : > { %v5019_v51 = vpack.i.b16 %v2310_v25, %v2310_v25  ;;  %v3448_v5 = vpack.i.b16 %v2296_v26, %v2296_v26  ;;  %v5021_v40 = vpack.i.b16 %v2312_v41, %v2312_v41  ;;  %v2335_v34 = vrot.slane %v3441_v37, %v4352_v31  ;;  %v2498_v26 = vld [vmem:[%s4374_s30 + $0x34] sm:$0x4]  ;;  %v2501_v54 = vld [vmem:[%s4374_s30 + $0x38] sm:$0x4]  ;;  %v2504_v2 = vld [vmem:[%s4374_s30 + $0x3c] sm:$0x4] }
 0x1d6   : > { %v2342_v38 = vrot.slane %v2314_v20, %v4352_v31  ;;  %v2349_v42 = vrot.slane %v3442_v13, %v4352_v31  ;;  %v2356_v45 = vrot.slane %v2316_v56, %v4352_v31  ;;  %v2363_v1 = vrot.slane %v3443_v19, %v4352_v31 }
 0x1d7   : > { %v2370_v55 = vrot.slane %v2318_v21, %v4352_v31  ;;  %v2377_v10 = vrot.slane %v3444_v17, %v4352_v31  ;;  %v2384_v16 = vrot.slane %v2320_v43, %v4352_v31  ;;  %v2391_v59 = vrot.slane %v3445_v57, %v4352_v31 }
 0x1d8   : > { %v2398_v60 = vrot.slane %v2322_v35, %v4352_v31  ;;  %v2405_v12 = vrot.slane %v3446_v58, %v4352_v31  ;;  %v2412_v44 = vrot.slane %v2324_v29, %v4352_v31  ;;  %v2419_v0 = vrot.slane %v3447_v36, %v4352_v31 }
 0x1d9   : > { %v2426_v14 = vrot.slane %v5019_v51, %v4352_v31  ;;  %v2433_v47 = vrot.slane %v3448_v5, %v4352_v31  ;;  %v2440_v15 = vrot.slane %v5021_v40, %v4352_v31  ;;  %v2460_v4 = vsel %vm5025_vm9, %v2335_v34, %v2459_v50 }
 0x1da   : > { %v2463_v39 = vsel %vm5025_vm9, %v2342_v38, %v2462_v22  ;;  %v2466_v30 = vsel %vm5025_vm9, %v2349_v42, %v2465_v9  ;;  %v2469_v7 = vsel %vm5025_vm9, %v2356_v45, %v2468_v62  ;;  %2461 = vst [vmem:[%s4374_s30] sm:$0x4] %v2460_v4  ;;  %v2472_v61 = vsel %vm5025_vm9, %v2363_v1, %v2471_v3 }
 0x1db   : > { %2464 = vst [vmem:[%s4374_s30 + $0x4] sm:$0x4] %v2463_v39  ;;  %2467 = vst [vmem:[%s4374_s30 + $0x8] sm:$0x4] %v2466_v30  ;;  %v2475_v25 = vsel %vm5025_vm9, %v2370_v55, %v2474_v23  ;;  %v2478_v37 = vsel %vm5025_vm9, %v2377_v10, %v2477_v52  ;;  %v2481_v20 = vsel %vm5025_vm9, %v2384_v16, %v2480_v6  ;;  %v2817_v39 = vld [vmem:[%s4374_s30 + $0x4] sm:$0x8] }
 0x1dc   : > { %2470 = vst [vmem:[%s4374_s30 + $0xc] sm:$0x4] %v2469_v7  ;;  %2473 = vst [vmem:[%s4374_s30 + $0x10] sm:$0x4] %v2472_v61  ;;  %v2484_v8 = vsel %vm5025_vm9, %v2391_v59, %v2483_v53  ;;  %v2487_v41 = vsel %vm5025_vm9, %v2398_v60, %v2486_v63  ;;  %v2490_v13 = vsel %vm5025_vm9, %v2405_v12, %v2489_v27  ;;  %v2820_v30 = vld [vmem:[%s4374_s30 + $0x8] sm:$0x8] }
 0x1dd   : > { %2476 = vst [vmem:[%s4374_s30 + $0x14] sm:$0x4] %v2475_v25  ;;  %2479 = vst [vmem:[%s4374_s30 + $0x18] sm:$0x4] %v2478_v37  ;;  %v2493_v56 = vsel %vm5025_vm9, %v2412_v44, %v2492_v49  ;;  %v2496_v19 = vsel %vm5025_vm9, %v2419_v0, %v2495_v28  ;;  %v2499_v21 = vsel %vm5025_vm9, %v2426_v14, %v2498_v26  ;;  %v2823_v7 = vld [vmem:[%s4374_s30 + $0xc] sm:$0x8] }
 0x1de   : > { %2482 = vst [vmem:[%s4374_s30 + $0x1c] sm:$0x4] %v2481_v20  ;;  %2485 = vst [vmem:[%s4374_s30 + $0x20] sm:$0x4] %v2484_v8  ;;  %v2502_v17 = vsel %vm5025_vm9, %v2433_v47, %v2501_v54  ;;  %v2505_v57 = vsel %vm5025_vm9, %v2440_v15, %v2504_v2  ;;  %v2617_v43 = vcombine.high %v5002_v18, %v5002_v18  ;;  %v2814_v15 = vld [vmem:[%s4374_s30] sm:$0x8] }
 0x1df   : > { %2488 = vst [vmem:[%s4374_s30 + $0x24] sm:$0x4] %v2487_v41  ;;  %2491 = vst [vmem:[%s4374_s30 + $0x28] sm:$0x4] %v2490_v13  ;;  %v2618_v35 = vcombine.high %v5008_v48, %v5008_v48  ;;  %v2625_v58 = vrot.slane %v5002_v18, %v4345_v46  ;;  %v2632_v29 = vrot.slane %v5008_v48, %v4345_v46  ;;  %v2838_v26 = vld [vmem:[%s4374_s30 + $0x20] sm:$0x8] }
 0x1e0   : > { %2494 = vst [vmem:[%s4374_s30 + $0x2c] sm:$0x4] %v2493_v56  ;;  %2497 = vst [vmem:[%s4374_s30 + $0x30] sm:$0x4] %v2496_v19  ;;  %v5121_v36 = vrot.slane %v5015_v33, %v4345_v46  ;;  %v5127_v51 = vrot.slane %v3468_v24, %v4345_v46  ;;  %v2639_v5 = vrot.slane %v2617_v43, %v4345_v46  ;;  %v2826_v37 = vld [vmem:[%s4374_s30 + $0x10] sm:$0x8] }
 0x1e1   : > { %2500 = vst [vmem:[%s4374_s30 + $0x34] sm:$0x4] %v2499_v21  ;;  %2503 = vst [vmem:[%s4374_s30 + $0x38] sm:$0x4] %v2502_v17  ;;  %v2646_v40 = vrot.slane %v2618_v35, %v4345_v46  ;;  %v2647_v18 = vcombine.high %v2625_v58, %v2625_v58  ;;  %v2648_v32 = vcombine.high %v2632_v29, %v2632_v29  ;;  %v2652_v50 = vunpack.i.h.s16 %v2625_v58  ;;  %v2829_v20 = vld [vmem:[%s4374_s30 + $0x14] sm:$0x8] }
 0x1e2   : > { %2506 = vst [vmem:[%s4374_s30 + $0x3c] sm:$0x4] %v2505_v57  ;;  %v2660_v48 = vunpack.i.h.s16 %v2632_v29  ;;  %v3451_v34 = vpack.i.b16 %v2625_v58, %v2625_v58  ;;  %v3455_v38 = vpack.i.b16 %v2632_v29, %v2632_v29  ;;  %v2649_v42 = vcombine.high %v2639_v5, %v2639_v5  ;;  %v2832_v8 = vld [vmem:[%s4374_s30 + $0x18] sm:$0x8]  ;;  %v2835_v21 = vld [vmem:[%s4374_s30 + $0x1c] sm:$0x8] }
 0x1e3   : > { %v2650_v45 = vcombine.high %v2646_v40, %v2646_v40  ;;  %v2654_v33 = vunpack.i.h.s16 %v2639_v5  ;;  %v2656_v22 = vunpack.i.h.s16 %v2647_v18  ;;  %v2662_v9 = vunpack.i.h.s16 %v2646_v40  ;;  %v2841_v17 = vld [vmem:[%s4374_s30 + $0x24] sm:$0x8]  ;;  %v2844_v57 = vld [vmem:[%s4374_s30 + $0x28] sm:$0x8] }
 0x1e4   : > { %v2664_v62 = vunpack.i.h.s16 %v2648_v32  ;;  %v2668_v1 = vpack.i.b16 %v2652_v50, %v2652_v50  ;;  %v3452_v11 = vpack.i.b16 %v2639_v5, %v2639_v5  ;;  %v2658_v24 = vunpack.i.h.s16 %v2649_v42  ;;  %v2847_v5 = vld [vmem:[%s4374_s30 + $0x2c] sm:$0x8] }
 0x1e5   : > { %v2666_v55 = vunpack.i.h.s16 %v2650_v45  ;;  %v2670_v10 = vpack.i.b16 %v2654_v33, %v2654_v33  ;;  %v3453_v16 = vpack.i.b16 %v2647_v18, %v2647_v18  ;;  %v2672_v3 = vpack.i.b16 %v2656_v22, %v2656_v22  ;;  %v2853_v18 = vld [vmem:[%s4374_s30 + $0x34] sm:$0x8] }
 0x1e6   : > { %v3454_v23 = vpack.i.b16 %v2649_v42, %v2649_v42  ;;  %v2676_v52 = vpack.i.b16 %v2660_v48, %v2660_v48  ;;  %v3456_v59 = vpack.i.b16 %v2646_v40, %v2646_v40  ;;  %v2674_v60 = vpack.i.b16 %v2658_v24, %v2658_v24  ;;  %v2850_v40 = vld [vmem:[%s4374_s30 + $0x30] sm:$0x8]  ;;  %v2859_v42 = vld [vmem:[%s4374_s30 + $0x3c] sm:$0x8] }
 0x1e7   : > { %v2678_v12 = vpack.i.b16 %v2662_v9, %v2662_v9  ;;  %v3457_v44 = vpack.i.b16 %v2648_v32, %v2648_v32  ;;  %v2680_v6 = vpack.i.b16 %v2664_v62, %v2664_v62  ;;  %v3458_v53 = vpack.i.b16 %v2650_v45, %v2650_v45 }
 0x1e8   : > { %v5131_v63 = vpack.i.b16 %v2666_v55, %v2666_v55  ;;  %v2689_v0 = vrot.slane %v3451_v34, %v4352_v31  ;;  %v2696_v14 = vrot.slane %v2668_v1, %v4352_v31  ;;  %v2703_v27 = vrot.slane %v3452_v11, %v4352_v31 }
 0x1e9   : > { %v2710_v49 = vrot.slane %v2670_v10, %v4352_v31  ;;  %v2717_v28 = vrot.slane %v3453_v16, %v4352_v31  ;;  %v2724_v4 = vrot.slane %v2672_v3, %v4352_v31  ;;  %v2731_v54 = vrot.slane %v3454_v23, %v4352_v31 }
 0x1ea   : > { %v2738_v2 = vrot.slane %v2674_v60, %v4352_v31  ;;  %v2745_v61 = vrot.slane %v3455_v38, %v4352_v31  ;;  %v2752_v25 = vrot.slane %v2676_v52, %v4352_v31  ;;  %v2759_v41 = vrot.slane %v3456_v59, %v4352_v31  ;;  %v2856_v38 = vld [vmem:[%s4374_s30 + $0x38] sm:$0x8] }
 0x1eb   : > { %v2766_v13 = vrot.slane %v2678_v12, %v4352_v31  ;;  %v2773_v56 = vrot.slane %v3457_v44, %v4352_v31  ;;  %v2780_v19 = vrot.slane %v2680_v6, %v4352_v31  ;;  %v2787_v43 = vrot.slane %v3458_v53, %v4352_v31 }
 0x1ec   : > { %v2794_v35 = vrot.slane %v5131_v63, %v4352_v31  ;;  %v2815_v58 = vsel %vm5137_vm12, %v2689_v0, %v2814_v15  ;;  %v2818_v29 = vsel %vm5137_vm12, %v2696_v14, %v2817_v39  ;;  %v2821_v32 = vsel %vm5137_vm12, %v2703_v27, %v2820_v30 }
 0x1ed   : > { %2816 = vst [vmem:[%s4374_s30] sm:$0x8] %v2815_v58  ;;  %2819 = vst [vmem:[%s4374_s30 + $0x4] sm:$0x8] %v2818_v29  ;;  %v2824_v50 = vsel %vm5137_vm12, %v2710_v49, %v2823_v7  ;;  %v2827_v48 = vsel %vm5137_vm12, %v2717_v28, %v2826_v37  ;;  %v2830_v34 = vsel %vm5137_vm12, %v2724_v4, %v2829_v20 }
 0x1ee   : > { %2822 = vst [vmem:[%s4374_s30 + $0x8] sm:$0x8] %v2821_v32  ;;  %2825 = vst [vmem:[%s4374_s30 + $0xc] sm:$0x8] %v2824_v50  ;;  %v2833_v45 = vsel %vm5137_vm12, %v2731_v54, %v2832_v8  ;;  %v2836_v33 = vsel %vm5137_vm12, %v2738_v2, %v2835_v21  ;;  %v2839_v22 = vsel %vm5137_vm12, %v2745_v61, %v2838_v26 }
 0x1ef   : > { %2828 = vst [vmem:[%s4374_s30 + $0x10] sm:$0x8] %v2827_v48  ;;  %2831 = vst [vmem:[%s4374_s30 + $0x14] sm:$0x8] %v2830_v34  ;;  %v2842_v9 = vsel %vm5137_vm12, %v2752_v25, %v2841_v17  ;;  %v2845_v62 = vsel %vm5137_vm12, %v2759_v41, %v2844_v57  ;;  %v2848_v1 = vsel %vm5137_vm12, %v2766_v13, %v2847_v5 }
 0x1f0   : > { %2834 = vst [vmem:[%s4374_s30 + $0x18] sm:$0x8] %v2833_v45  ;;  %2837 = vst [vmem:[%s4374_s30 + $0x1c] sm:$0x8] %v2836_v33  ;;  %v2851_v11 = vsel %vm5137_vm12, %v2773_v56, %v2850_v40  ;;  %v2854_v24 = vsel %vm5137_vm12, %v2780_v19, %v2853_v18  ;;  %v2857_v55 = vsel %vm5137_vm12, %v2787_v43, %v2856_v38 }
 0x1f1   : > { %2840 = vst [vmem:[%s4374_s30 + $0x20] sm:$0x8] %v2839_v22  ;;  %2843 = vst [vmem:[%s4374_s30 + $0x24] sm:$0x8] %v2842_v9  ;;  %v2860_v10 = vsel %vm5137_vm12, %v2794_v35, %v2859_v42  ;;  %v3015_v16 = vcombine.high %v5121_v36, %v5121_v36  ;;  %v3016_v3 = vcombine.high %v5127_v51, %v5127_v51 }
 0x1f2   : > { %2846 = vst [vmem:[%s4374_s30 + $0x28] sm:$0x8] %v2845_v62  ;;  %2849 = vst [vmem:[%s4374_s30 + $0x2c] sm:$0x8] %v2848_v1  ;;  %v3023_v23 = vrot.slane %v5121_v36, %v4345_v46  ;;  %v3030_v52 = vrot.slane %v5127_v51, %v4345_v46 }
 0x1f3   : > { %2852 = vst [vmem:[%s4374_s30 + $0x30] sm:$0x8] %v2851_v11  ;;  %2855 = vst [vmem:[%s4374_s30 + $0x34] sm:$0x8] %v2854_v24  ;;  %v3037_v59 = vrot.slane %v3015_v16, %v4345_v46  ;;  %v3044_v60 = vrot.slane %v3016_v3, %v4345_v46 }
 0x1f4   : > { %2858 = vst [vmem:[%s4374_s30 + $0x38] sm:$0x8] %v2857_v55  ;;  %2861 = vst [vmem:[%s4374_s30 + $0x3c] sm:$0x8] %v2860_v10  ;;  %v3045_v12 = vcombine.high %v3023_v23, %v3023_v23  ;;  %v3046_v44 = vcombine.high %v3030_v52, %v3030_v52  ;;  %v3050_v6 = vunpack.i.h.s16 %v3023_v23  ;;  %v3058_v53 = vunpack.i.h.s16 %v3030_v52  ;;  %v3211_v56 = vld [vmem:[%s4374_s30] sm:$0x8] }
 0x1f5   : > { %v3047_v63 = vcombine.high %v3037_v59, %v3037_v59  ;;  %v3048_v0 = vcombine.high %v3044_v60, %v3044_v60  ;;  %v3052_v14 = vunpack.i.h.s16 %v3037_v59  ;;  %v3060_v47 = vunpack.i.h.s16 %v3044_v60  ;;  %v3214_v43 = vld [vmem:[%s4374_s30 + $0x4] sm:$0x8]  ;;  %v3217_v35 = vld [vmem:[%s4374_s30 + $0x8] sm:$0x8]  ;;  %v3220_v58 = vld [vmem:[%s4374_s30 + $0xc] sm:$0x8] }
 0x1f6   : > { %v3054_v15 = vunpack.i.h.s16 %v3045_v12  ;;  %v3062_v27 = vunpack.i.h.s16 %v3046_v44  ;;  %v3469_v49 = vpack.i.b16 %v3023_v23, %v3023_v23  ;;  %v3066_v36 = vpack.i.b16 %v3050_v6, %v3050_v6  ;;  %v3223_v32 = vld [vmem:[%s4374_s30 + $0x10] sm:$0x8]  ;;  %v3226_v50 = vld [vmem:[%s4374_s30 + $0x14] sm:$0x8] }
 0x1f7   : > { %v3056_v28 = vunpack.i.h.s16 %v3047_v63  ;;  %v3064_v4 = vunpack.i.h.s16 %v3048_v0  ;;  %v3470_v51 = vpack.i.b16 %v3037_v59, %v3037_v59  ;;  %v3068_v39 = vpack.i.b16 %v3052_v14, %v3052_v14  ;;  %v3229_v48 = vld [vmem:[%s4374_s30 + $0x18] sm:$0x8]  ;;  %v3232_v33 = vld [vmem:[%s4374_s30 + $0x1c] sm:$0x8] }
 0x1f8   : > { %v3471_v30 = vpack.i.b16 %v3045_v12, %v3045_v12  ;;  %v3070_v46 = vpack.i.b16 %v3054_v15, %v3054_v15  ;;  %v3472_v7 = vpack.i.b16 %v3047_v63, %v3047_v63  ;;  %v3473_v26 = vpack.i.b16 %v3030_v52, %v3030_v52  ;;  %v3235_v22 = vld [vmem:[%s4374_s30 + $0x20] sm:$0x8]  ;;  %v3238_v9 = vld [vmem:[%s4374_s30 + $0x24] sm:$0x8] }
 0x1f9   : > { %v3072_v54 = vpack.i.b16 %v3056_v28, %v3056_v28  ;;  %v3074_v2 = vpack.i.b16 %v3058_v53, %v3058_v53  ;;  %v3474_v61 = vpack.i.b16 %v3044_v60, %v3044_v60  ;;  %v3076_v25 = vpack.i.b16 %v3060_v47, %v3060_v47  ;;  %v3241_v55 = vld [vmem:[%s4374_s30 + $0x28] sm:$0x8]  ;;  %v3244_v10 = vld [vmem:[%s4374_s30 + $0x2c] sm:$0x8] }
 0x1fa   : > { %v3475_v37 = vpack.i.b16 %v3046_v44, %v3046_v44  ;;  %v5230_v20 = vpack.i.b16 %v3062_v27, %v3062_v27  ;;  %v3476_v8 = vpack.i.b16 %v3048_v0, %v3048_v0  ;;  %v5232_v41 = vpack.i.b16 %v3064_v4, %v3064_v4  ;;  %v3247_v16 = vld [vmem:[%s4374_s30 + $0x30] sm:$0x8] }
 0x1fb   : > { %v3087_v19 = vrot.slane %v3469_v49, %v4352_v31  ;;  %v3094_v21 = vrot.slane %v3066_v36, %v4352_v31  ;;  %v3101_v17 = vrot.slane %v3470_v51, %v4352_v31  ;;  %v3108_v57 = vrot.slane %v3068_v39, %v4352_v31  ;;  %v3253_v60 = vld [vmem:[%s4374_s30 + $0x38] sm:$0x8]  ;;  %v3256_v12 = vld [vmem:[%s4374_s30 + $0x3c] sm:$0x8] }
 0x1fc   : > { %v3115_v29 = vrot.slane %v3471_v30, %v4352_v31  ;;  %v3122_v5 = vrot.slane %v3070_v46, %v4352_v31  ;;  %v3129_v40 = vrot.slane %v3472_v7, %v4352_v31  ;;  %v3136_v18 = vrot.slane %v3072_v54, %v4352_v31 }
 0x1fd   : > { %v3143_v34 = vrot.slane %v3473_v26, %v4352_v31  ;;  %v3150_v38 = vrot.slane %v3074_v2, %v4352_v31  ;;  %v3157_v42 = vrot.slane %v3474_v61, %v4352_v31  ;;  %v3164_v45 = vrot.slane %v3076_v25, %v4352_v31 }
 0x1fe   : > { %v3171_v62 = vrot.slane %v3475_v37, %v4352_v31  ;;  %v3178_v1 = vrot.slane %v5230_v20, %v4352_v31  ;;  %v3185_v11 = vrot.slane %v3476_v8, %v4352_v31  ;;  %v3192_v24 = vrot.slane %v5232_v41, %v4352_v31  ;;  %v3250_v31 = vld [vmem:[%s4374_s30 + $0x34] sm:$0x8] }
 0x1ff   : > { %v3212_v3 = vsel %vm5236_vm14, %v3087_v19, %v3211_v56  ;;  %v3215_v23 = vsel %vm5236_vm14, %v3094_v21, %v3214_v43  ;;  %v3218_v52 = vsel %vm5236_vm14, %v3101_v17, %v3217_v35  ;;  %v3221_v59 = vsel %vm5236_vm14, %v3108_v57, %v3220_v58 }
 0x200   : > { %3213 = vst [vmem:[%s4374_s30] sm:$0x8] %v3212_v3  ;;  %3216 = vst [vmem:[%s4374_s30 + $0x4] sm:$0x8] %v3215_v23  ;;  %v3224_v44 = vsel %vm5236_vm14, %v3115_v29, %v3223_v32  ;;  %v3227_v6 = vsel %vm5236_vm14, %v3122_v5, %v3226_v50  ;;  %v3230_v53 = vsel %vm5236_vm14, %v3129_v40, %v3229_v48 }
 0x201   : > { %3219 = vst [vmem:[%s4374_s30 + $0x8] sm:$0x8] %v3218_v52  ;;  %3222 = vst [vmem:[%s4374_s30 + $0xc] sm:$0x8] %v3221_v59  ;;  %v3233_v63 = vsel %vm5236_vm14, %v3136_v18, %v3232_v33  ;;  %v3236_v0 = vsel %vm5236_vm14, %v3143_v34, %v3235_v22  ;;  %v3239_v14 = vsel %vm5236_vm14, %v3150_v38, %v3238_v9 }
 0x202   : > { %3225 = vst [vmem:[%s4374_s30 + $0x10] sm:$0x8] %v3224_v44  ;;  %3228 = vst [vmem:[%s4374_s30 + $0x14] sm:$0x8] %v3227_v6  ;;  %v3242_v47 = vsel %vm5236_vm14, %v3157_v42, %v3241_v55  ;;  %v3245_v15 = vsel %vm5236_vm14, %v3164_v45, %v3244_v10  ;;  %v3248_v27 = vsel %vm5236_vm14, %v3171_v62, %v3247_v16 }
 0x203   : > { %3231 = vst [vmem:[%s4374_s30 + $0x18] sm:$0x8] %v3230_v53  ;;  %3234 = vst [vmem:[%s4374_s30 + $0x1c] sm:$0x8] %v3233_v63  ;;  %v3251_v49 = vsel %vm5236_vm14, %v3178_v1, %v3250_v31  ;;  %v3254_v36 = vsel %vm5236_vm14, %v3185_v11, %v3253_v60  ;;  %v3257_v28 = vsel %vm5236_vm14, %v3192_v24, %v3256_v12 }
 0x204   : > { %3237 = vst [vmem:[%s4374_s30 + $0x20] sm:$0x8] %v3236_v0  ;;  %3240 = vst [vmem:[%s4374_s30 + $0x24] sm:$0x8] %v3239_v14 }
 0x205   : > { %3243 = vst [vmem:[%s4374_s30 + $0x28] sm:$0x8] %v3242_v47  ;;  %3246 = vst [vmem:[%s4374_s30 + $0x2c] sm:$0x8] %v3245_v15 }
 0x206   : > { %3249 = vst [vmem:[%s4374_s30 + $0x30] sm:$0x8] %v3248_v27  ;;  %3252 = vst [vmem:[%s4374_s30 + $0x34] sm:$0x8] %v3251_v49 }
 0x207   : > { %3255 = vst [vmem:[%s4374_s30 + $0x38] sm:$0x8] %v3254_v36  ;;  %3258 = vst [vmem:[%s4374_s30 + $0x3c] sm:$0x8] %v3257_v28 }
 0x208 PF: > { %s13_s14 = sadd.s32 1, %s3672_s14   ;;  %s5351_s12 = smov %s3668_s13 }
 0x209   : > { %p10_p5 = scmp.ge.s32.totalorder %s13_s14, 6   ;;  %s5352_s13 = smov %s5354_s15 }
 0x20b   :  { %12 = sbr.rel (!%p10_p5) target bundleno = 2 (0x2), region = 66 }

// kernel: baseline_forward.5
= control target key start
LH: loop header
LB: loop body
LE: loop exit
PB: predicated region body
PF: predicated region fallthrough
CT: control target
= control target key end

     0   :  { %s3092_s15 = smov 0   ;;  %s3094_s16 = smov 0   ;;  %s4561_s0 = inlined_call_operand.vmem [shape: bf16[4,1,16,10,10], index: 0, kind: input, shape index: {}, may-alias: {0,1}]   ;;  %s4562_s1 = inlined_call_operand.vmem [shape: bf16[4,1,16,10,10], index: 1, kind: input, shape index: {}, may-alias: {0,1}]   ;;  %s4563_s2 = inlined_call_operand.vmem [shape: bf16[8,288], index: 2, kind: input, shape index: {}]   ;;  %s4564_s3 = inlined_call_operand.vmem [shape: f32[8,1], index: 3, kind: input, shape index: {}]   ;;  %s4565_s4 = inlined_call_operand.vmem [shape: f32[2,8,8,8], index: 4, kind: output, shape index: {}]  }
   0x1   :  { %s3096_s17 = smov 0  }
   0x2 LB: > { %s26_s18 = sadd.s32 1, %s3055_s16  ;;  %p2588_p0 = scmp.ge.s32.totalorder %s3059_s17, 1  ;;  %s3059_s17 = sphi %s3096_s17, %s14_s17   ;;  %s3055_s16 = sphi %s3094_s16, %s4683_s16   ;;  %s3051_s15 = sphi %s3092_s15, %s4682_s15  }
   0x3   : > { %p28_p1 = scmp.ge.s32.totalorder %s26_s18, 2  ;;  %p190_p2 = scmp.lt.s32.totalorder %s3059_s17, 3 }
   0x5   : > { %s4685_s18 = smov (%p28_p1, %s26_s18), 0  ;;  %p191_p3 = pnand %p2588_p0, %p190_p2 }
   0x7   : > { %194 = sbr.rel (%p191_p3) target bundleno = 557 (0x22d), region = 36 }
   0xc   : > { %s230_s19 = sadd.s32 2, %s3051_s15  ;;  %p225_p5 = scmp.lt.s32.totalorder %s3051_s15, 3  ;;  %vm385_vm0 = vcmask 1041409   ;;  %vm388_vm1 = vcmask 1042434   ;;  %vm391_vm2 = vcmask 1043459   ;;  %vm394_vm3 = vcmask 1044484  }
   0xd   : > { %p231_p4 = scmp.lt.s32.totalorder %s230_s19, 3  ;;  %vm397_vm4 = vcmask 1045509   ;;  %vm400_vm5 = vcmask 1046534   ;;  %vm403_vm6 = vcmask 1047559   ;;  %s3061_s29 = smov 126   ;;  %vm3064_vm7 = vmmov 0  }
   0xe   : > { %s3115_s20 = scalar_select %p225_p5, %s3051_s15, 3  ;;  %vm686_vm8 = vcmask 261120   ;;  %vm828_vm9 = vcmask 57344  }
   0xf   : > { %s4687_s19 = smov (!%p231_p4, %s230_s19), 3  ;;  %s3062_s30 = smov 127  }
  0x10   : > { %s2673_s21 = sshll.u32 %s4687_s19, 7  ;;  %s2672_s25 = sshll.u32 %s3115_s20, 7 }
  0x11   : > { %s3120_s24 = scalar_lea.vmem %s4562_s1, %s2673_s21  ;;  %s3167_s28 = scalar_lea.vmem %s4561_s0, %s2672_s25 }
  0x12   : > { %v2970_v0 = vld [vmem:[%s3120_s24] ss:$0 sps:$4 sm:$0xff]   ;;  %v2971_v1 = vld [vmem:[%s3120_s24 + $0x8] ss:$0 sps:$4 sm:$0xff]   ;;  %v2972_v2 = vld [vmem:[%s3120_s24 + $0x10] ss:$0 sps:$4 sm:$0xff]  }
  0x13   : > { %v2973_v3 = vld [vmem:[%s3120_s24 + $0x18] ss:$0 sps:$4 sm:$0xff]   ;;  %v2974_v4 = vld [vmem:[%s3120_s24 + $0x20] ss:$0 sps:$4 sm:$0xff]   ;;  %v2975_v5 = vld [vmem:[%s3120_s24 + $0x28] ss:$0 sps:$4 sm:$0xff]   ;;  %v3131_v8 = vunpack.c.l.b16 %v2970_v0  ;;  %v3133_v9 = vunpack.c.l.b16 %v2971_v1  ;;  %v3145_v18 = vunpack.c.l.b16 %v2972_v2 }
  0x14   : > { %v2976_v6 = vld [vmem:[%s3120_s24 + $0x30] ss:$0 sps:$4 sm:$0xff]   ;;  %v2977_v7 = vld [vmem:[%s3120_s24 + $0x38] ss:$0 sps:$4 sm:$0xff]   ;;  %v2978_v10 = vld [vmem:[%s3120_s24 + $0x40] ss:$0 sps:$4 sm:$0xff]   ;;  %v3138_v13 = vunpack.c.l.b16 %v2973_v3  ;;  %v3140_v14 = vunpack.c.l.b16 %v2974_v4  ;;  %v3147_v19 = vunpack.c.l.b16 %v2975_v5 }
  0x15   : > { %v2979_v11 = vld [vmem:[%s3120_s24 + $0x48] ss:$0 sps:$4 sm:$0xff]   ;;  %v2980_v12 = vld [vmem:[%s3120_s24 + $0x50] ss:$0 sps:$4 sm:$0xff]   ;;  %v2981_v15 = vld [vmem:[%s3120_s24 + $0x58] ss:$0 sps:$4 sm:$0xff]   ;;  %v3149_v20 = vunpack.c.l.b16 %v2976_v6  ;;  %v3151_v21 = vunpack.c.l.b16 %v2977_v7  ;;  %v3155_v24 = vunpack.c.l.b16 %v2978_v10 }
  0x16   : > { %v2982_v16 = vld [vmem:[%s3120_s24 + $0x60] ss:$0 sps:$4 sm:$0xff]   ;;  %v2983_v17 = vld [vmem:[%s3120_s24 + $0x68] ss:$0 sps:$4 sm:$0xff]   ;;  %v2984_v22 = vld [vmem:[%s3120_s24 + $0x70] ss:$0 sps:$4 sm:$0xff]   ;;  %v3157_v25 = vunpack.c.l.b16 %v2979_v11  ;;  %v3159_v26 = vunpack.c.l.b16 %v2980_v12  ;;  %v3169_v28 = vunpack.c.l.b16 %v2981_v15 }
  0x17   : > { %v2985_v23 = vld [vmem:[%s3120_s24 + $0x78] ss:$0 sps:$4 sm:$0xff]   ;;  %v629_v27 = vrot.slane %v3131_v8, 2  ;;  %v3171_v29 = vunpack.c.l.b16 %v2982_v16  ;;  %v3173_v30 = vunpack.c.l.b16 %v2983_v17  ;;  %v630_v31 = vrot.slane %v3133_v9, 1  ;;  %v2986_v57 = vld [vmem:[%s3167_s28] ss:$0 sps:$4 sm:$0xff]  }
  0x18   : > { %v3176_v32 = vunpack.c.l.b16 %v2984_v22  ;;  %v3178_v33 = vunpack.c.l.b16 %v2985_v23  ;;  %v633_v34 = vrot.slane %v3138_v13, 7  ;;  %v635_v35 = vrot.slane %v3140_v14, 6  ;;  %v2987_v58 = vld [vmem:[%s3167_s28 + $0x8] ss:$0 sps:$4 sm:$0xff]   ;;  %v2988_v61 = vld [vmem:[%s3167_s28 + $0x10] ss:$0 sps:$4 sm:$0xff]  }
  0x19   : > { %v631_v36 = vsel %vm385_vm0, %v630_v31, %v629_v27  ;;  %v637_v37 = vrot.slane %v3147_v19, 5  ;;  %v639_v38 = vrot.slane %v3149_v20, 4  ;;  %v641_v39 = vrot.slane %v3151_v21, 3  ;;  %v2989_v62 = vld [vmem:[%s3167_s28 + $0x18] ss:$0 sps:$4 sm:$0xff]   ;;  %p237_p6 = scmp.lt.s32.totalorder %s3051_s15, 1 }
  0x1a   : > { %v632_v40 = vsel %vm388_vm1, %v3145_v18, %v631_v36  ;;  %v643_v41 = vrot.slane %v3155_v24, 2  ;;  %v644_v42 = vrot.slane %v3157_v25, 1  ;;  %v647_v43 = vrot.slane %v3169_v28, 7  ;;  %v2990_v63 = vld [vmem:[%s3167_s28 + $0x20] ss:$0 sps:$4 sm:$0xff]  }
  0x1b   : > { %v634_v44 = vsel %vm391_vm2, %v633_v34, %v632_v40  ;;  %v649_v45 = vrot.slane %v3171_v29, 6  ;;  %v651_v46 = vrot.slane %v3173_v30, 5  ;;  %v653_v47 = vrot.slane %v3176_v32, 4  ;;  %v2991_v1 = vld [vmem:[%s3167_s28 + $0x28] ss:$0 sps:$4 sm:$0xff]   ;;  %s4689_s15 = smov (!%p237_p6, %s3051_s15), 1 }
  0x1c   : > { %v636_v48 = vsel %vm394_vm3, %v635_v35, %v634_v44  ;;  %v645_v49 = vsel %vm385_vm0, %v644_v42, %v643_v41  ;;  %v655_v50 = vrot.slane %v3178_v33, 3  ;;  %v867_v51 = vrot.slane %v3131_v8, 3  ;;  %v2992_v2 = vld [vmem:[%s3167_s28 + $0x30] ss:$0 sps:$4 sm:$0xff]   ;;  %v2993_v3 = vld [vmem:[%s3167_s28 + $0x38] ss:$0 sps:$4 sm:$0xff]  }
  0x1d   : > { %v638_v52 = vsel %vm397_vm4, %v637_v37, %v636_v48  ;;  %v646_v53 = vsel %vm388_vm1, %v3159_v26, %v645_v49  ;;  %v3216_v4 = vunpack.c.l.b16 %v2986_v57  ;;  %v3218_v5 = vunpack.c.l.b16 %v2987_v58  ;;  %v2994_v7 = vld [vmem:[%s3167_s28 + $0x40] ss:$0 sps:$4 sm:$0xff]   ;;  %v2995_v10 = vld [vmem:[%s3167_s28 + $0x48] ss:$0 sps:$4 sm:$0xff]   ;;  %v2996_v11 = vld [vmem:[%s3167_s28 + $0x50] ss:$0 sps:$4 sm:$0xff]  }
  0x1e   : > { %v640_v54 = vsel %vm400_vm5, %v639_v38, %v638_v52  ;;  %v648_v55 = vsel %vm391_vm2, %v647_v43, %v646_v53  ;;  %v3224_v12 = vunpack.c.l.b16 %v2988_v61  ;;  %v3226_v15 = vunpack.c.l.b16 %v2989_v62  ;;  %v2997_v22 = vld [vmem:[%s3167_s28 + $0x58] ss:$0 sps:$4 sm:$0xff]   ;;  %v2998_v23 = vld [vmem:[%s3167_s28 + $0x60] ss:$0 sps:$4 sm:$0xff]   ;;  %v2999_v27 = vld [vmem:[%s3167_s28 + $0x68] ss:$0 sps:$4 sm:$0xff]  }
  0x1f   : > { %v650_v56 = vsel %vm394_vm3, %v649_v45, %v648_v55  ;;  %v642_v59 = vsel %vm403_vm6, %v641_v39, %v640_v54  ;;  %v3228_v16 = vunpack.c.l.b16 %v2990_v63  ;;  %v3235_v31 = vunpack.c.l.b16 %v2991_v1  ;;  %v3000_v36 = vld [vmem:[%s3167_s28 + $0x70] ss:$0 sps:$4 sm:$0xff]   ;;  %v3001_v37 = vld [vmem:[%s3167_s28 + $0x78] ss:$0 sps:$4 sm:$0xff]   ;;  %s2674_s11 = sshll.u32 %s4689_s15, 6 }
  0x20   : > { %v652_v60 = vsel %vm397_vm4, %v651_v46, %v650_v56  ;;  %v3237_v34 = vunpack.c.l.b16 %v2992_v2  ;;  %v3239_v35 = vunpack.c.l.b16 %v2993_v3  ;;  %v3243_v38 = vunpack.c.l.b16 %v2994_v7  ;;  %s4368_s14 = scalar_lea.vmem %s4565_s4, %s2674_s11 }
  0x21   : > { %v654_v0 = vsel %vm400_vm5, %v653_v47, %v652_v60  ;;  %v3245_v39 = vunpack.c.l.b16 %v2995_v10  ;;  %v3247_v40 = vunpack.c.l.b16 %v2996_v11  ;;  %v599_v41 = vrot.slane %v3216_v4, 2 }
  0x22   : > { %v656_v6 = vsel %vm403_vm6, %v655_v50, %v654_v0  ;;  %v3254_v42 = vunpack.c.l.b16 %v2997_v22  ;;  %v3256_v43 = vunpack.c.l.b16 %v2998_v23  ;;  %v3258_v44 = vunpack.c.l.b16 %v2999_v27 }
  0x23   : > { %v3230_v17 = vpack.c.b16 %v656_v6, %v642_v59  ;;  %v600_v45 = vrot.slane %v3218_v5, 1  ;;  %v3261_v46 = vunpack.c.l.b16 %v3000_v36  ;;  %v3263_v47 = vunpack.c.l.b16 %v3001_v37 }
  0x24   : > { %v603_v48 = vrot.slane %v3226_v15, 7  ;;  %v605_v49 = vrot.slane %v3228_v16, 6  ;;  %v607_v52 = vrot.slane %v3235_v31, 5  ;;  %v609_v53 = vrot.slane %v3237_v34, 4 }
  0x25   : > { %667 = vrot.lane.b32.xlu0 %v3230_v17, %s3061_s29  ;;  %662 = vrot.lane.b32.xlu1 %v3230_v17, %s3062_s30  ;;  %v601_v50 = vsel %vm385_vm0, %v600_v45, %v599_v41  ;;  %v611_v54 = vrot.slane %v3239_v35, 3  ;;  %v613_v56 = vrot.slane %v3243_v38, 2  ;;  %v614_v57 = vrot.slane %v3245_v39, 1 }
  0x26   : > { %v602_v55 = vsel %vm388_vm1, %v3224_v12, %v601_v50  ;;  %v617_v58 = vrot.slane %v3254_v42, 7  ;;  %v619_v60 = vrot.slane %v3256_v43, 6  ;;  %v621_v61 = vrot.slane %v3258_v44, 5 }
  0x27   : > { %v604_v59 = vsel %vm391_vm2, %v603_v48, %v602_v55  ;;  %v623_v62 = vrot.slane %v3261_v46, 4  ;;  %v615_v0 = vsel %vm385_vm0, %v614_v57, %v613_v56  ;;  %v625_v1 = vrot.slane %v3263_v47, 3 }
  0x28   : > { %v606_v63 = vsel %vm394_vm3, %v605_v49, %v604_v59  ;;  %v868_v2 = vrot.slane %v3133_v9, 2  ;;  %v616_v6 = vsel %vm388_vm1, %v3247_v40, %v615_v0  ;;  %v870_v7 = vrot.slane %v3145_v18, 1 }
  0x29   : > { %v608_v3 = vsel %vm397_vm4, %v607_v52, %v606_v63  ;;  %v873_v10 = vrot.slane %v3140_v14, 7  ;;  %v618_v22 = vsel %vm391_vm2, %v617_v58, %v616_v6  ;;  %v875_v27 = vrot.slane %v3147_v19, 6 }
  0x2a   : > { %v610_v11 = vsel %vm400_vm5, %v609_v53, %v608_v3  ;;  %v869_v23 = vsel %vm385_vm0, %v868_v2, %v867_v51  ;;  %v620_v37 = vsel %vm394_vm3, %v619_v60, %v618_v22  ;;  %v877_v45 = vrot.slane %v3149_v20, 5 }
  0x2b   : > { %v612_v36 = vsel %vm403_vm6, %v611_v54, %v610_v11  ;;  %v871_v41 = vsel %vm388_vm1, %v870_v7, %v869_v23  ;;  %v622_v48 = vsel %vm397_vm4, %v621_v61, %v620_v37  ;;  %v879_v50 = vrot.slane %v3151_v21, 4 }
  0x2c   : > { %v872_v49 = vsel %vm391_vm2, %v3138_v13, %v871_v41  ;;  %v881_v52 = vrot.slane %v3155_v24, 3  ;;  %v624_v51 = vsel %vm400_vm5, %v623_v62, %v622_v48  ;;  %v882_v54 = vrot.slane %v3157_v25, 2 }
  0x2d   : > { %v874_v53 = vsel %vm394_vm3, %v873_v10, %v872_v49  ;;  %v884_v55 = vrot.slane %v3159_v26, 1  ;;  %v626_v56 = vsel %vm403_vm6, %v625_v1, %v624_v51  ;;  %v887_v58 = vrot.slane %v3171_v29, 7 }
  0x2e   : > { %v876_v57 = vsel %vm397_vm4, %v875_v27, %v874_v53  ;;  %v889_v59 = vrot.slane %v3173_v30, 6  ;;  %v3312_v60 = vpack.c.b16 %v626_v56, %v612_v36  ;;  %v883_v62 = vsel %vm385_vm0, %v882_v54, %v881_v52 }
  0x2f   : > { %v878_v61 = vsel %vm400_vm5, %v877_v45, %v876_v57  ;;  %v891_v63 = vrot.slane %v3176_v32, 5  ;;  %v885_v2 = vsel %vm388_vm1, %v884_v55, %v883_v62  ;;  %v893_v1 = vrot.slane %v3178_v33, 4 }
  0x30   : > { %v880_v0 = vsel %vm403_vm6, %v879_v50, %v878_v61  ;;  %v837_v3 = vrot.slane %v3216_v4, 3  ;;  %665 = vrot.lane.b32.xlu0 %v3312_v60, %s3061_s29  ;;  %v886_v6 = vsel %vm391_vm2, %v3169_v28, %v885_v2  ;;  %v838_v7 = vrot.slane %v3218_v5, 2 }
  0x31   : > { %v840_v10 = vrot.slane %v3224_v12, 1  ;;  %v843_v11 = vrot.slane %v3228_v16, 7  ;;  %v888_v22 = vsel %vm394_vm3, %v887_v58, %v886_v6  ;;  %v845_v23 = vrot.slane %v3235_v31, 6 }
  0x32   : > { %v847_v27 = vrot.slane %v3237_v34, 5  ;;  %v849_v36 = vrot.slane %v3239_v35, 4  ;;  %v890_v37 = vsel %vm397_vm4, %v889_v59, %v888_v22  ;;  %v839_v41 = vsel %vm385_vm0, %v838_v7, %v837_v3 }
  0x33   : > { %v851_v45 = vrot.slane %v3243_v38, 3  ;;  %v852_v48 = vrot.slane %v3245_v39, 2  ;;  %v892_v49 = vsel %vm400_vm5, %v891_v63, %v890_v37  ;;  %v841_v50 = vsel %vm388_vm1, %v840_v10, %v839_v41 }
  0x34   : > { %v854_v52 = vrot.slane %v3247_v40, 1  ;;  %v857_v51 = vrot.slane %v3256_v43, 7  ;;  %v894_v53 = vsel %vm403_vm6, %v893_v1, %v892_v49  ;;  %659 = vrot.lane.b32.xlu0 %v3312_v60, %s3062_s30  ;;  %v842_v54 = vsel %vm391_vm2, %v3226_v15, %v841_v50 }
  0x35   : > { %v853_v55 = vsel %vm385_vm0, %v852_v48, %v851_v45  ;;  %v859_v56 = vrot.slane %v3258_v44, 6  ;;  %v3347_v57 = vpack.c.b16 %v894_v53, %v880_v0  ;;  %v844_v58 = vsel %vm394_vm3, %v843_v11, %v842_v54 }
  0x36   : > { %v855_v59 = vsel %vm388_vm1, %v854_v52, %v853_v55  ;;  %v861_v61 = vrot.slane %v3261_v46, 5  ;;  %v846_v62 = vsel %vm397_vm4, %v845_v23, %v844_v58  ;;  %v863_v2 = vrot.slane %v3263_v47, 4 }
  0x37   : > { %v856_v63 = vsel %vm391_vm2, %v3254_v42, %v855_v59  ;;  %v485_v1 = vrot.slane %v3133_v9, 7  ;;  %900 = vrot.lane.b32.xlu1 %v3347_v57, %s3062_s30  ;;  %v848_v0 = vsel %vm400_vm5, %v847_v27, %v846_v62  ;;  %v487_v6 = vrot.slane %v3145_v18, 6 }
  0x38   : > { %v858_v3 = vsel %vm394_vm3, %v857_v51, %v856_v63  ;;  %v489_v7 = vrot.slane %v3138_v13, 5  ;;  %v850_v10 = vsel %vm403_vm6, %v849_v36, %v848_v0  ;;  %v491_v23 = vrot.slane %v3140_v14, 4 }
  0x39   : > { %v860_v11 = vsel %vm397_vm4, %v859_v56, %v858_v3  ;;  %v486_v22 = vsel %vm385_vm0, %v485_v1, %v3131_v8  ;;  %v493_v27 = vrot.slane %v3147_v19, 3  ;;  %v495_v45 = vrot.slane %v3149_v20, 2 }
  0x3a   : > { %v862_v37 = vsel %vm400_vm5, %v861_v61, %v860_v11  ;;  %v488_v41 = vsel %vm388_vm1, %v487_v6, %v486_v22  ;;  %v497_v36 = vrot.slane %v3151_v21, 1  ;;  %v499_v50 = vrot.slane %v3157_v25, 7 }
  0x3b   : > { %v864_v48 = vsel %vm403_vm6, %v863_v2, %v862_v37  ;;  %v490_v49 = vsel %vm391_vm2, %v489_v7, %v488_v41  ;;  %v501_v53 = vrot.slane %v3159_v26, 6  ;;  %v503_v54 = vrot.slane %v3169_v28, 5 }
  0x3c   : > { %v3376_v52 = vpack.c.b16 %v864_v48, %v850_v10  ;;  %v492_v51 = vsel %vm394_vm3, %v491_v23, %v490_v49  ;;  %v500_v56 = vsel %vm385_vm0, %v499_v50, %v3155_v24  ;;  %v505_v58 = vrot.slane %v3171_v29, 4 }
  0x3d   : > { %v494_v55 = vsel %vm397_vm4, %v493_v27, %v492_v51  ;;  %v507_v59 = vrot.slane %v3173_v30, 3  ;;  %v502_v62 = vsel %vm388_vm1, %v501_v53, %v500_v56  ;;  %v509_v63 = vrot.slane %v3176_v32, 2 }
  0x3e   : > { %897 = vrot.lane.b32.xlu1 %v3376_v52, %s3062_s30  ;;  %v496_v61 = vsel %vm400_vm5, %v495_v45, %v494_v55  ;;  %v511_v2 = vrot.slane %v3178_v33, 1  ;;  %v504_v0 = vsel %vm391_vm2, %v503_v54, %v502_v62  ;;  %v557_v3 = vrot.slane %v3131_v8, 1 }
  0x3f   : > { %v498_v1 = vsel %vm403_vm6, %v497_v36, %v496_v61  ;;  %v559_v6 = vrot.slane %v3145_v18, 7  ;;  %v506_v7 = vsel %vm394_vm3, %v505_v58, %v504_v0  ;;  %v561_v10 = vrot.slane %v3138_v13, 6 }
  0x40   : > { %v563_v11 = vrot.slane %v3140_v14, 5  ;;  %v565_v22 = vrot.slane %v3147_v19, 4  ;;  %v508_v23 = vsel %vm397_vm4, %v507_v59, %v506_v7  ;;  %v558_v37 = vsel %vm385_vm0, %v3133_v9, %v557_v3 }
  0x41   : > { %v567_v41 = vrot.slane %v3149_v20, 3  ;;  %v569_v27 = vrot.slane %v3151_v21, 2  ;;  %v510_v45 = vsel %vm400_vm5, %v509_v63, %v508_v23  ;;  %v560_v48 = vsel %vm388_vm1, %v559_v6, %v558_v37 }
  0x42   : > { %v571_v49 = vrot.slane %v3155_v24, 1  ;;  %v573_v36 = vrot.slane %v3159_v26, 7  ;;  %v512_v50 = vsel %vm403_vm6, %v511_v2, %v510_v45  ;;  %v562_v51 = vsel %vm391_vm2, %v561_v10, %v560_v48 }
  0x43   : > { %v575_v53 = vrot.slane %v3169_v28, 6  ;;  %v577_v54 = vrot.slane %v3171_v29, 5  ;;  %v3413_v55 = vpack.c.b16 %v512_v50, %v498_v1  ;;  %v564_v56 = vsel %vm394_vm3, %v563_v11, %v562_v51 }
  0x44   : > { %v572_v58 = vsel %vm385_vm0, %v3157_v25, %v571_v49  ;;  %v579_v59 = vrot.slane %v3173_v30, 4  ;;  %v566_v61 = vsel %vm397_vm4, %v565_v22, %v564_v56  ;;  %v581_v63 = vrot.slane %v3176_v32, 3 }
  0x45   : > { %4609 = vst [vmem:[#allocation2_spill] sm:$0xff] %v3413_v55  ;;  %v574_v62 = vsel %vm388_vm1, %v573_v36, %v572_v58  ;;  %v583_v2 = vrot.slane %v3178_v33, 2  ;;  %524 = vrot.lane.b32.xlu0 %v3413_v55, %s3061_s29  ;;  %v568_v1 = vsel %vm400_vm5, %v567_v41, %v566_v61  ;;  %v384_v3 = vrot.slane %v3218_v5, 7 }
  0x46   : > { %v576_v0 = vsel %vm391_vm2, %v575_v53, %v574_v62  ;;  %v387_v6 = vrot.slane %v3224_v12, 6  ;;  %v570_v7 = vsel %vm403_vm6, %v569_v27, %v568_v1  ;;  %v390_v11 = vrot.slane %v3226_v15, 5 }
  0x47   : > { %v578_v10 = vsel %vm394_vm3, %v577_v54, %v576_v0  ;;  %v393_v22 = vrot.slane %v3228_v16, 4  ;;  %v386_v37 = vsel %vm385_vm0, %v384_v3, %v3216_v4  ;;  %v396_v41 = vrot.slane %v3235_v31, 3 }
  0x48   : > { %v580_v23 = vsel %vm397_vm4, %v579_v59, %v578_v10  ;;  %v399_v45 = vrot.slane %v3237_v34, 2  ;;  %v389_v49 = vsel %vm388_vm1, %v387_v6, %v386_v37  ;;  %v402_v27 = vrot.slane %v3239_v35, 1 }
  0x49   : > { %v582_v48 = vsel %vm400_vm5, %v581_v63, %v580_v23  ;;  %v405_v36 = vrot.slane %v3245_v39, 7  ;;  %v392_v51 = vsel %vm391_vm2, %v390_v11, %v389_v49  ;;  %v407_v53 = vrot.slane %v3247_v40, 6 }
  0x4a   : > { %v584_v50 = vsel %vm403_vm6, %v583_v2, %v582_v48  ;;  %v409_v54 = vrot.slane %v3254_v42, 5  ;;  %v395_v58 = vsel %vm394_vm3, %v393_v22, %v392_v51  ;;  %v411_v61 = vrot.slane %v3256_v43, 4 }
  0x4b   : > { %v3446_v56 = vpack.c.b16 %v584_v50, %v570_v7  ;;  %v406_v59 = vsel %vm385_vm0, %v405_v36, %v3243_v38  ;;  %v398_v62 = vsel %vm397_vm4, %v396_v41, %v395_v58  ;;  %v413_v2 = vrot.slane %v3258_v44, 3 }
  0x4c   : > { %v408_v63 = vsel %vm388_vm1, %v407_v53, %v406_v59  ;;  %v415_v1 = vrot.slane %v3261_v46, 2  ;;  %v401_v0 = vsel %vm400_vm5, %v399_v45, %v398_v62  ;;  %v417_v6 = vrot.slane %v3263_v47, 1 }
  0x4d   : > { %4610 = vst [vmem:[#allocation3_spill] sm:$0xff] %v3446_v56  ;;  %596 = vrot.lane.b32.xlu1 %v3446_v56, %s3061_s29  ;;  %v410_v3 = vsel %vm391_vm2, %v409_v54, %v408_v63  ;;  %v527_v7 = vrot.slane %v3216_v4, 1  ;;  %v404_v10 = vsel %vm403_vm6, %v402_v27, %v401_v0  ;;  %v529_v22 = vrot.slane %v3224_v12, 7 }
  0x4e   : > { %v412_v11 = vsel %vm394_vm3, %v411_v61, %v410_v3  ;;  %v531_v23 = vrot.slane %v3226_v15, 6  ;;  %v533_v45 = vrot.slane %v3228_v16, 5  ;;  %v535_v48 = vrot.slane %v3235_v31, 4 }
  0x4f   : > { %v414_v37 = vsel %vm397_vm4, %v413_v2, %v412_v11  ;;  %v528_v41 = vsel %vm385_vm0, %v3218_v5, %v527_v7  ;;  %v537_v27 = vrot.slane %v3237_v34, 3  ;;  %v539_v50 = vrot.slane %v3239_v35, 2 }
  0x50   : > { %v416_v49 = vsel %vm400_vm5, %v415_v1, %v414_v37  ;;  %v530_v36 = vsel %vm388_vm1, %v529_v22, %v528_v41  ;;  %v541_v54 = vrot.slane %v3243_v38, 1  ;;  %v543_v58 = vrot.slane %v3247_v40, 7 }
  0x51   : > { %v418_v51 = vsel %vm403_vm6, %v417_v6, %v416_v49  ;;  %v532_v53 = vsel %vm391_vm2, %v531_v23, %v530_v36  ;;  %v545_v62 = vrot.slane %v3254_v42, 6  ;;  %v547_v63 = vrot.slane %v3256_v43, 5 }
  0x52   : > { %v3479_v59 = vpack.c.b16 %v418_v51, %v404_v10  ;;  %v534_v61 = vsel %vm394_vm3, %v533_v45, %v532_v53  ;;  %v542_v1 = vsel %vm385_vm0, %v3245_v39, %v541_v54  ;;  %v549_v0 = vrot.slane %v3258_v44, 4 }
  0x53   : > { %v536_v2 = vsel %vm397_vm4, %v535_v48, %v534_v61  ;;  %v551_v3 = vrot.slane %v3261_v46, 3  ;;  %v544_v7 = vsel %vm388_vm1, %v543_v58, %v542_v1  ;;  %v553_v10 = vrot.slane %v3263_v47, 2 }
  0x54   : > { %4611 = vst [vmem:[#allocation4_spill] sm:$0xff] %v3479_v59  ;;  %521 = vrot.lane.b32.xlu0 %v3479_v59, %s3061_s29  ;;  %v538_v6 = vsel %vm400_vm5, %v537_v27, %v536_v2  ;;  %v1085_v11 = vrot.slane %v3131_v8, 4  ;;  %v546_v23 = vsel %vm391_vm2, %v545_v62, %v544_v7  ;;  %v1086_v37 = vrot.slane %v3133_v9, 3 }
  0x55   : > { %v540_v22 = vsel %vm403_vm6, %v539_v50, %v538_v6  ;;  %v1088_v41 = vrot.slane %v3145_v18, 2  ;;  %v548_v45 = vsel %vm394_vm3, %v547_v63, %v546_v23  ;;  %v1090_v48 = vrot.slane %v3138_v13, 1 }
  0x56   : > { %v1093_v49 = vrot.slane %v3147_v19, 7  ;;  %v1095_v36 = vrot.slane %v3149_v20, 6  ;;  %v550_v27 = vsel %vm397_vm4, %v549_v0, %v548_v45  ;;  %v1087_v51 = vsel %vm385_vm0, %v1086_v37, %v1085_v11 }
  0x57   : > { %v1097_v50 = vrot.slane %v3151_v21, 5  ;;  %v1099_v53 = vrot.slane %v3155_v24, 4  ;;  %v552_v54 = vsel %vm400_vm5, %v551_v3, %v550_v27  ;;  %v1089_v58 = vsel %vm388_vm1, %v1088_v41, %v1087_v51 }
  0x58   : > { %518 = vrot.lane.b32.xlu0 %v3413_v55, %s3062_s30  ;;  %v1100_v61 = vrot.slane %v3157_v25, 3  ;;  %v1102_v62 = vrot.slane %v3159_v26, 2  ;;  %v554_v63 = vsel %vm403_vm6, %v553_v10, %v552_v54  ;;  %v1091_v2 = vsel %vm391_vm2, %v1090_v48, %v1089_v58 }
  0x59   : > { %v1104_v1 = vrot.slane %v3169_v28, 1  ;;  %v1107_v0 = vrot.slane %v3173_v30, 7  ;;  %v3517_v6 = vpack.c.b16 %v554_v63, %v540_v22  ;;  %v1092_v3 = vsel %vm394_vm3, %v3140_v14, %v1091_v2 }
  0x5a   : > { %v1101_v7 = vsel %vm385_vm0, %v1100_v61, %v1099_v53  ;;  %v1109_v11 = vrot.slane %v3176_v32, 6  ;;  %v1094_v23 = vsel %vm397_vm4, %v1093_v49, %v1092_v3  ;;  %v1111_v10 = vrot.slane %v3178_v33, 5 }
  0x5b   : > { %v1103_v37 = vsel %vm388_vm1, %v1102_v62, %v1101_v7  ;;  %v1055_v41 = vrot.slane %v3216_v4, 4  ;;  %593 = vrot.lane.b32.xlu1 %v3517_v6, %s3061_s29  ;;  %v1096_v22 = vsel %vm400_vm5, %v1095_v36, %v1094_v23  ;;  %v1056_v48 = vrot.slane %v3218_v5, 3 }
  0x5c   : > { %515 = vrot.lane.b32.xlu0 %v3479_v59, %s3062_s30  ;;  %v1105_v45 = vsel %vm391_vm2, %v1104_v1, %v1103_v37  ;;  %v1058_v49 = vrot.slane %v3224_v12, 2  ;;  %v1098_v27 = vsel %vm403_vm6, %v1097_v50, %v1096_v22  ;;  %v1060_v53 = vrot.slane %v3226_v15, 1 }
  0x5d   : > { %v1106_v51 = vsel %vm394_vm3, %v3171_v29, %v1105_v45  ;;  %v1063_v54 = vrot.slane %v3235_v31, 7  ;;  %v1057_v61 = vsel %vm385_vm0, %v1056_v48, %v1055_v41  ;;  %v1065_v36 = vrot.slane %v3237_v34, 6 }
  0x5e   : > { %v1108_v58 = vsel %vm397_vm4, %v1107_v0, %v1106_v51  ;;  %v1067_v62 = vrot.slane %v3239_v35, 5  ;;  %v1059_v2 = vsel %vm388_vm1, %v1058_v49, %v1057_v61  ;;  %v1069_v50 = vrot.slane %v3243_v38, 4 }
  0x5f   : > { %v1110_v63 = vsel %vm400_vm5, %v1109_v11, %v1108_v58  ;;  %v1070_v1 = vrot.slane %v3245_v39, 3  ;;  %590 = vrot.lane.b32.xlu1 %v3446_v56, %s3062_s30  ;;  %v1061_v3 = vsel %vm391_vm2, %v1060_v53, %v1059_v2  ;;  %v1072_v7 = vrot.slane %v3247_v40, 2 }
  0x60   : > { %905 = vrot.lane.b32.xlu0 %v3347_v57, %s3061_s29  ;;  %v1112_v0 = vsel %vm403_vm6, %v1111_v10, %v1110_v63  ;;  %v1074_v11 = vrot.slane %v3254_v42, 1  ;;  %v1062_v37 = vsel %vm394_vm3, %v3228_v16, %v1061_v3  ;;  %v1077_v22 = vrot.slane %v3258_v44, 7 }
  0x61   : > { %v3556_v23 = vpack.c.b16 %v1112_v0, %v1098_v27  ;;  %v1071_v41 = vsel %vm385_vm0, %v1070_v1, %v1069_v50  ;;  %v1064_v45 = vsel %vm397_vm4, %v1063_v54, %v1062_v37  ;;  %v1079_v10 = vrot.slane %v3261_v46, 6 }
  0x62   : > { %v1073_v48 = vsel %vm388_vm1, %v1072_v7, %v1071_v41  ;;  %v1081_v49 = vrot.slane %v3263_v47, 5  ;;  %v1066_v51 = vsel %vm400_vm5, %v1065_v36, %v1064_v45  ;;  %v1303_v53 = vrot.slane %v3131_v8, 5 }
  0x63   : > { %4612 = vst [vmem:[#allocation5_spill] sm:$0xff] %v3556_v23  ;;  %v1075_v27 = vsel %vm391_vm2, %v1074_v11, %v1073_v48  ;;  %v1304_v58 = vrot.slane %v3133_v9, 4  ;;  %587 = vrot.lane.b32.xlu1 %v3517_v6, %s3062_s30  ;;  %v1068_v54 = vsel %vm403_vm6, %v1067_v62, %v1066_v51  ;;  %v1306_v63 = vrot.slane %v3145_v18, 3 }
  0x64   : > { %903 = vrot.lane.b32.xlu0 %v3376_v52, %s3061_s29  ;;  %v1076_v61 = vsel %vm394_vm3, %v3256_v43, %v1075_v27  ;;  %v1308_v36 = vrot.slane %v3138_v13, 2  ;;  %v1310_v1 = vrot.slane %v3140_v14, 1  ;;  %v1313_v0 = vrot.slane %v3149_v20, 7 }
  0x65   : > { %v1078_v2 = vsel %vm397_vm4, %v1077_v22, %v1076_v61  ;;  %v1305_v50 = vsel %vm385_vm0, %v1304_v58, %v1303_v53  ;;  %v1315_v62 = vrot.slane %v3151_v21, 6  ;;  %v1317_v11 = vrot.slane %v3155_v24, 5 }
  0x66   : > { %v1080_v3 = vsel %vm400_vm5, %v1079_v10, %v1078_v2  ;;  %v1307_v7 = vsel %vm388_vm1, %v1306_v63, %v1305_v50  ;;  %v1318_v22 = vrot.slane %v3157_v25, 4  ;;  %v1320_v45 = vrot.slane %v3159_v26, 3 }
  0x67   : > { %v1082_v37 = vsel %vm403_vm6, %v1081_v49, %v1080_v3  ;;  %v1309_v41 = vsel %vm391_vm2, %v1308_v36, %v1307_v7  ;;  %1123 = vrot.lane.b32.xlu1 %v3556_v23, %s3061_s29  ;;  %v1322_v51 = vrot.slane %v3169_v28, 2  ;;  %v1324_v49 = vrot.slane %v3171_v29, 1 }
  0x68   : > { %v3593_v48 = vpack.c.b16 %v1082_v37, %v1068_v54  ;;  %1118 = vrot.lane.b32.xlu0 %v3556_v23, %s3062_s30  ;;  %v1311_v10 = vsel %vm394_vm3, %v1310_v1, %v1309_v41  ;;  %v1319_v53 = vsel %vm385_vm0, %v1318_v22, %v1317_v11  ;;  %v1327_v58 = vrot.slane %v3176_v32, 7 }
  0x69   : > { %v1312_v27 = vsel %vm397_vm4, %v3147_v19, %v1311_v10  ;;  %v1329_v61 = vrot.slane %v3178_v33, 6  ;;  %v1321_v63 = vsel %vm388_vm1, %v1320_v45, %v1319_v53  ;;  %v1273_v36 = vrot.slane %v3216_v4, 5 }
  0x6a   : > { %4613 = vst [vmem:[#allocation6_spill] sm:$0xff] %v3593_v48  ;;  %v1314_v54 = vsel %vm400_vm5, %v1313_v0, %v1312_v27  ;;  %v1274_v2 = vrot.slane %v3218_v5, 4  ;;  %v1323_v1 = vsel %vm391_vm2, %v1322_v51, %v1321_v63  ;;  %v1276_v3 = vrot.slane %v3224_v12, 3 }
  0x6b   : > { %v1316_v50 = vsel %vm403_vm6, %v1315_v62, %v1314_v54  ;;  %v1278_v7 = vrot.slane %v3226_v15, 2  ;;  %1121 = vrot.lane.b32.xlu1 %v3593_v48, %s3061_s29  ;;  %v1325_v11 = vsel %vm394_vm3, %v1324_v49, %v1323_v1  ;;  %v1280_v37 = vrot.slane %v3228_v16, 1 }
  0x6c   : > { %1115 = vrot.lane.b32.xlu0 %v3593_v48, %s3062_s30  ;;  %v1275_v0 = vsel %vm385_vm0, %v1274_v2, %v1273_v36  ;;  %v1283_v62 = vrot.slane %v3237_v34, 7  ;;  %v1326_v41 = vsel %vm397_vm4, %v3173_v30, %v1325_v11  ;;  %v1285_v45 = vrot.slane %v3239_v35, 6 }
  0x6d   : > { %v1277_v22 = vsel %vm388_vm1, %v1276_v3, %v1275_v0  ;;  %v1287_v10 = vrot.slane %v3243_v38, 5  ;;  %v1328_v51 = vsel %vm400_vm5, %v1327_v58, %v1326_v41  ;;  %v1288_v27 = vrot.slane %v3245_v39, 4 }
  0x6e   : > { %v1279_v49 = vsel %vm391_vm2, %v1278_v7, %v1277_v22  ;;  %v1290_v53 = vrot.slane %v3247_v40, 3  ;;  %v1330_v54 = vsel %vm403_vm6, %v1329_v61, %v1328_v51  ;;  %v1292_v36 = vrot.slane %v3254_v42, 2 }
  0x6f   : > { %v1281_v63 = vsel %vm394_vm3, %v1280_v37, %v1279_v49  ;;  %v1294_v2 = vrot.slane %v3256_v43, 1  ;;  %v3634_v1 = vpack.c.b16 %v1330_v54, %v1316_v50  ;;  %v1289_v58 = vsel %vm385_vm0, %v1288_v27, %v1287_v10 }
  0x70   : > { %v1282_v3 = vsel %vm397_vm4, %v3235_v31, %v1281_v63  ;;  %v1297_v7 = vrot.slane %v3261_v46, 7  ;;  %v1291_v0 = vsel %vm388_vm1, %v1290_v53, %v1289_v58  ;;  %v1299_v61 = vrot.slane %v3263_v47, 6 }
  0x71   : > { %4614 = vst [vmem:[#allocation7_spill] sm:$0xff] %v3634_v1  ;;  %v1284_v11 = vsel %vm400_vm5, %v1283_v62, %v1282_v3  ;;  %v1521_v37 = vrot.slane %v3131_v8, 6  ;;  %1336 = vrot.lane.b32.xlu1 %v3634_v1, %s3062_s30  ;;  %v1293_v41 = vsel %vm391_vm2, %v1292_v36, %v1291_v0  ;;  %1341 = vrot.lane.b32.xlu0 %v3634_v1, %s3061_s29  ;;  %v1522_v22 = vrot.slane %v3133_v9, 5 }
  0x72   : > { %v1286_v50 = vsel %vm403_vm6, %v1285_v45, %v1284_v11  ;;  %v1524_v62 = vrot.slane %v3145_v18, 4  ;;  %v1295_v10 = vsel %vm394_vm3, %v1294_v2, %v1293_v41  ;;  %v1526_v51 = vrot.slane %v3138_v13, 3 }
  0x73   : > { %v1528_v49 = vrot.slane %v3140_v14, 2  ;;  %v1530_v27 = vrot.slane %v3147_v19, 1  ;;  %v1296_v45 = vsel %vm397_vm4, %v3258_v44, %v1295_v10  ;;  %v1523_v53 = vsel %vm385_vm0, %v1522_v22, %v1521_v37 }
  0x74   : > { %v1533_v54 = vrot.slane %v3151_v21, 7  ;;  %v1535_v63 = vrot.slane %v3155_v24, 6  ;;  %v1298_v36 = vsel %vm400_vm5, %v1297_v7, %v1296_v45  ;;  %v1525_v3 = vsel %vm388_vm1, %v1524_v62, %v1523_v53 }
  0x75   : > { %v1536_v2 = vrot.slane %v3157_v25, 5  ;;  %v1538_v58 = vrot.slane %v3159_v26, 4  ;;  %v1300_v11 = vsel %vm403_vm6, %v1299_v61, %v1298_v36  ;;  %v1527_v0 = vsel %vm391_vm2, %v1526_v51, %v1525_v3 }
  0x76   : > { %v1540_v41 = vrot.slane %v3169_v28, 3  ;;  %v1542_v37 = vrot.slane %v3171_v29, 2  ;;  %v3669_v22 = vpack.c.b16 %v1300_v11, %v1286_v50  ;;  %v1529_v10 = vsel %vm394_vm3, %v1528_v49, %v1527_v0 }
  0x77   : > { %v1537_v7 = vsel %vm385_vm0, %v1536_v2, %v1535_v63  ;;  %v1544_v62 = vrot.slane %v3173_v30, 1  ;;  %v1531_v45 = vsel %vm397_vm4, %v1530_v27, %v1529_v10  ;;  %v1547_v61 = vrot.slane %v3178_v33, 7 }
  0x78   : > { %4615 = vst [vmem:[#allocation8_spill] sm:$0xff] %v3669_v22  ;;  %v1539_v53 = vsel %vm388_vm1, %v1538_v58, %v1537_v7  ;;  %v1491_v51 = vrot.slane %v3216_v4, 6  ;;  %1333 = vrot.lane.b32.xlu1 %v3669_v22, %s3062_s30  ;;  %v1532_v50 = vsel %vm400_vm5, %v3149_v20, %v1531_v45  ;;  %1339 = vrot.lane.b32.xlu0 %v3669_v22, %s3061_s29  ;;  %v1492_v63 = vrot.slane %v3218_v5, 5 }
  0x79   : > { %v1541_v49 = vsel %vm391_vm2, %v1540_v41, %v1539_v53  ;;  %v1494_v27 = vrot.slane %v3224_v12, 4  ;;  %v1534_v36 = vsel %vm403_vm6, %v1533_v54, %v1532_v50  ;;  %v1496_v2 = vrot.slane %v3226_v15, 3 }
  0x7a   : > { %v1543_v3 = vsel %vm394_vm3, %v1542_v37, %v1541_v49  ;;  %v1498_v58 = vrot.slane %v3228_v16, 2  ;;  %v1493_v0 = vsel %vm385_vm0, %v1492_v63, %v1491_v51  ;;  %v1500_v41 = vrot.slane %v3235_v31, 1 }
  0x7b   : > { %v1545_v11 = vsel %vm397_vm4, %v1544_v62, %v1543_v3  ;;  %v1503_v10 = vrot.slane %v3239_v35, 7  ;;  %v1495_v45 = vsel %vm388_vm1, %v1494_v27, %v1493_v0  ;;  %v1505_v54 = vrot.slane %v3243_v38, 6 }
  0x7c   : > { %v1546_v7 = vsel %vm400_vm5, %v3176_v32, %v1545_v11  ;;  %v1506_v37 = vrot.slane %v3245_v39, 5  ;;  %v1497_v50 = vsel %vm391_vm2, %v1496_v2, %v1495_v45  ;;  %v1508_v62 = vrot.slane %v3247_v40, 4 }
  0x7d   : > { %v1548_v53 = vsel %vm403_vm6, %v1547_v61, %v1546_v7  ;;  %v1510_v51 = vrot.slane %v3254_v42, 3  ;;  %v1499_v63 = vsel %vm394_vm3, %v1498_v58, %v1497_v50  ;;  %v1512_v27 = vrot.slane %v3256_v43, 2 }
  0x7e   : > { %v3704_v49 = vpack.c.b16 %v1548_v53, %v1534_v36  ;;  %v1507_v3 = vsel %vm385_vm0, %v1506_v37, %v1505_v54  ;;  %v1501_v11 = vsel %vm397_vm4, %v1500_v41, %v1499_v63  ;;  %v1514_v61 = vrot.slane %v3258_v44, 1 }
  0x7f   : > { %v1509_v0 = vsel %vm388_vm1, %v1508_v62, %v1507_v3  ;;  %v1517_v2 = vrot.slane %v3263_v47, 7  ;;  %v1502_v36 = vsel %vm400_vm5, %v3237_v34, %v1501_v11  ;;  %v1739_v7 = vrot.slane %v3131_v8, 7 }
  0x80   : > { %4616 = vst [vmem:[#allocation9_spill] sm:$0xff] %v3704_v49  ;;  %1559 = vrot.lane.b32.xlu1 %v3704_v49, %s3061_s29  ;;  %v1511_v58 = vsel %vm391_vm2, %v1510_v51, %v1509_v0  ;;  %1554 = vrot.lane.b32.xlu0 %v3704_v49, %s3062_s30  ;;  %v1740_v41 = vrot.slane %v3133_v9, 6  ;;  %v1504_v45 = vsel %vm403_vm6, %v1503_v10, %v1502_v36  ;;  %v1742_v37 = vrot.slane %v3145_v18, 5 }
  0x81   : > { %v1513_v54 = vsel %vm394_vm3, %v1512_v27, %v1511_v58  ;;  %v1744_v53 = vrot.slane %v3138_v13, 4  ;;  %v1746_v51 = vrot.slane %v3140_v14, 3  ;;  %v1748_v63 = vrot.slane %v3147_v19, 2 }
  0x82   : > { %v1515_v50 = vsel %vm397_vm4, %v1514_v61, %v1513_v54  ;;  %v1741_v62 = vsel %vm385_vm0, %v1740_v41, %v1739_v7  ;;  %v1750_v10 = vrot.slane %v3149_v20, 1  ;;  %v1753_v3 = vrot.slane %v3155_v24, 7  ;;  %v3766_v54 = vld [vmem:[%s3120_s24 + $0x4] ss:$0 sps:$4 sm:$0x11]  }
  0x83   : > { %v1516_v8 = vsel %vm400_vm5, %v3261_v46, %v1515_v50  ;;  %v1743_v9 = vsel %vm388_vm1, %v1742_v37, %v1741_v62  ;;  %v1754_v27 = vrot.slane %v3157_v25, 6  ;;  %v1756_v11 = vrot.slane %v3159_v26, 5  ;;  %v3776_v50 = vld [vmem:[%s3120_s24 + $0x14] ss:$0 sps:$4 sm:$0x11]  }
  0x84   : > { %v1518_v18 = vsel %vm403_vm6, %v1517_v2, %v1516_v8  ;;  %v1745_v13 = vsel %vm391_vm2, %v1744_v53, %v1743_v9  ;;  %v1758_v0 = vrot.slane %v3169_v28, 4  ;;  %v1760_v61 = vrot.slane %v3171_v29, 3  ;;  %v3773_v53 = vld [vmem:[%s3120_s24 + $0xc] ss:$0 sps:$4 sm:$0x11]  }
  0x85   : > { %v3739_v14 = vpack.c.b16 %v1518_v18, %v1504_v45  ;;  %v1747_v19 = vsel %vm394_vm3, %v1746_v51, %v1745_v13  ;;  %v1755_v24 = vsel %vm385_vm0, %v1754_v27, %v1753_v3  ;;  %v1762_v2 = vrot.slane %v3173_v30, 2  ;;  %v3789_v8 = vld [vmem:[%s3120_s24 + $0x2c] ss:$0 sps:$4 sm:$0x11]  }
  0x86   : > { %v1749_v20 = vsel %vm397_vm4, %v1748_v63, %v1747_v19  ;;  %v1764_v36 = vrot.slane %v3176_v32, 1  ;;  %v1757_v26 = vsel %vm388_vm1, %v1756_v11, %v1755_v24  ;;  %v1709_v28 = vrot.slane %v3216_v4, 7  ;;  %v3800_v13 = vld [vmem:[%s3120_s24 + $0x3c] ss:$0 sps:$4 sm:$0x11]  }
  0x87   : > { %4617 = vst [vmem:[#allocation10_spill] sm:$0xff] %v3739_v14  ;;  %1557 = vrot.lane.b32.xlu1 %v3739_v14, %s3061_s29  ;;  %v1751_v25 = vsel %vm400_vm5, %v1750_v10, %v1749_v20  ;;  %1551 = vrot.lane.b32.xlu0 %v3739_v14, %s3062_s30  ;;  %v1710_v29 = vrot.slane %v3218_v5, 6  ;;  %v1759_v32 = vsel %vm391_vm2, %v1758_v0, %v1757_v26  ;;  %v1712_v58 = vrot.slane %v3224_v12, 5  ;;  %v3811_v19 = vld [vmem:[%s3120_s24 + $0x4c] ss:$0 sps:$4 sm:$0x11]  }
  0x88   : > { %v1752_v30 = vsel %vm403_vm6, %v3151_v21, %v1751_v25  ;;  %v1714_v7 = vrot.slane %v3226_v15, 4  ;;  %v1761_v41 = vsel %vm394_vm3, %v1760_v61, %v1759_v32  ;;  %v1716_v4 = vrot.slane %v3228_v16, 3  ;;  %v3779_v16 = vld [vmem:[%s3120_s24 + $0x1c] ss:$0 sps:$4 sm:$0x11]  }
  0x89   : > { %v1711_v45 = vsel %vm385_vm0, %v1710_v29, %v1709_v28  ;;  %v1718_v5 = vrot.slane %v3235_v31, 2  ;;  %v1763_v21 = vsel %vm397_vm4, %v1762_v2, %v1761_v41  ;;  %v1720_v12 = vrot.slane %v3237_v34, 1  ;;  %v3786_v34 = vld [vmem:[%s3120_s24 + $0x24] ss:$0 sps:$4 sm:$0x11]  }
  0x8a   : > { %v1713_v37 = vsel %vm388_vm1, %v1712_v58, %v1711_v45  ;;  %v1723_v15 = vrot.slane %v3243_v38, 7  ;;  %v1765_v31 = vsel %vm400_vm5, %v1764_v36, %v1763_v21  ;;  %v1724_v51 = vrot.slane %v3245_v39, 6  ;;  %v3792_v38 = vld [vmem:[%s3120_s24 + $0x34] ss:$0 sps:$4 sm:$0x11]  }
  0x8b   : > { %v1715_v62 = vsel %vm391_vm2, %v1714_v7, %v1713_v37  ;;  %v1726_v63 = vrot.slane %v3247_v40, 5  ;;  %v1766_v9 = vsel %vm403_vm6, %v3178_v33, %v1765_v31  ;;  %v1728_v3 = vrot.slane %v3254_v42, 4  ;;  %v3803_v39 = vld [vmem:[%s3120_s24 + $0x44] ss:$0 sps:$4 sm:$0x11]  }
  0x8c   : > { %v1717_v10 = vsel %vm394_vm3, %v1716_v4, %v1715_v62  ;;  %v1730_v18 = vrot.slane %v3256_v43, 3  ;;  %v3805_v40 = vpack.c.b16 %v1766_v9, %v1752_v30  ;;  %v1725_v11 = vsel %vm385_vm0, %v1724_v51, %v1723_v15  ;;  %v3817_v61 = vld [vmem:[%s3120_s24 + $0x54] ss:$0 sps:$4 sm:$0x11]  }
  0x8d   : > { %v1719_v27 = vsel %vm397_vm4, %v1718_v5, %v1717_v10  ;;  %v1732_v33 = vrot.slane %v3258_v44, 2  ;;  %v1727_v43 = vsel %vm388_vm1, %v1726_v63, %v1725_v11  ;;  %v1734_v0 = vrot.slane %v3261_v46, 1  ;;  %v3826_v2 = vld [vmem:[%s3120_s24 + $0x5c] ss:$0 sps:$4 sm:$0x11]  }
  0x8e   : > { %4618 = vst [vmem:[#allocation11_spill] sm:$0xff] %v3805_v40  ;;  %v1721_v42 = vsel %vm400_vm5, %v1720_v12, %v1719_v27  ;;  %1772 = vrot.lane.b32.xlu1 %v3805_v40, %s3062_s30  ;;  %v1729_v44 = vsel %vm391_vm2, %v1728_v3, %v1727_v43  ;;  %v4581_v24 = vmov 0.0   ;;  %v3829_v36 = vld [vmem:[%s3120_s24 + $0x64] ss:$0 sps:$4 sm:$0x11]   ;;  %v4579_v46 = vunpack.c.l.b16 %v3766_v54  ;;  %1777 = vrot.lane.b32.xlu0 %v3805_v40, %s3061_s29 }
  0x8f   : > { %v1722_v20 = vsel %vm403_vm6, %v3239_v35, %v1721_v42  ;;  %2875 = vmatprep.subr.bf16.mxu1 %v4581_v24  ;;  %v1731_v25 = vsel %vm394_vm3, %v1730_v18, %v1729_v44  ;;  %v3836_v26 = vld [vmem:[%s3120_s24 + $0x6c] ss:$0 sps:$4 sm:$0x11]   ;;  %v3839_v28 = vld [vmem:[%s3120_s24 + $0x74] ss:$0 sps:$4 sm:$0x11]   ;;  %v4569_v35 = vunpack.c.l.b16 %v3773_v53  ;;  %v4572_v29 = vunpack.c.l.b16 %v3776_v50  ;;  %2879 = vmatprep.mubr.msk.bf16.mxu1 %vm3064_vm7, %v4581_v24 }
  0x90   : > { %v4571_v30 = vunpack.c.l.b16 %v3779_v16  ;;  %v1733_v32 = vsel %vm397_vm4, %v1732_v33, %v1731_v25  ;;  %v3846_v58 = vld [vmem:[%s3120_s24 + $0x7c] ss:$0 sps:$4 sm:$0x11]   ;;  %v4570_v7 = vunpack.c.l.b16 %v3786_v34  ;;  %v4566_v41 = vunpack.c.l.b16 %v3789_v8  ;;  %v3867_v3 = vld [vmem:[%s3167_s28 + $0x4] ss:$0 sps:$4 sm:$0x11]  }
  0x91   : > { %v4567_v45 = vunpack.c.l.b16 %v3792_v38  ;;  %v1735_v4 = vsel %vm400_vm5, %v1734_v0, %v1733_v32  ;;  %v4578_v5 = vunpack.c.l.b16 %v3800_v13  ;;  %v4576_v21 = vunpack.c.l.b16 %v3803_v39  ;;  %v3881_v43 = vld [vmem:[%s3167_s28 + $0xc] ss:$0 sps:$4 sm:$0x11]   ;;  %v3884_v0 = vld [vmem:[%s3167_s28 + $0x14] ss:$0 sps:$4 sm:$0x11]  }
  0x92   : > { %v4568_v37 = vunpack.c.l.b16 %v3811_v19  ;;  %v1736_v12 = vsel %vm403_vm6, %v3263_v47, %v1735_v4  ;;  %v4575_v15 = vunpack.c.l.b16 %v3817_v61  ;;  %v4573_v31 = vunpack.c.l.b16 %v3826_v2  ;;  %v3899_v4 = vld [vmem:[%s3167_s28 + $0x1c] ss:$0 sps:$4 sm:$0x11]  }
  0x93   : > { %v4574_v62 = vunpack.c.l.b16 %v3829_v36  ;;  %v3860_v51 = vpack.c.b16 %v1736_v12, %v1722_v20  ;;  %v4577_v63 = vunpack.c.l.b16 %v3836_v26  ;;  %v4583_v9 = vunpack.c.l.b16 %v3839_v28  ;;  %v3902_v12 = vld [vmem:[%s3167_s28 + $0x24] ss:$0 sps:$4 sm:$0x11]  }
  0x94   : > { %v2085_v10 = vrot.slane %v4569_v35, 7  ;;  %v4580_v27 = vunpack.c.l.b16 %v3846_v58  ;;  %v2087_v11 = vrot.slane %v4572_v29, 6  ;;  %v2089_v33 = vrot.slane %v4571_v30, 5  ;;  %v3914_v35 = vld [vmem:[%s3167_s28 + $0x2c] ss:$0 sps:$4 sm:$0x11]  }
  0x95   : > { %4619 = vst [vmem:[#allocation12_spill] sm:$0xff] %v3860_v51  ;;  %v2091_v42 = vrot.slane %v4570_v7, 4  ;;  %1769 = vrot.lane.b32.xlu1 %v3860_v51, %s3062_s30  ;;  %v2093_v44 = vrot.slane %v4566_v41, 3  ;;  %v2095_v25 = vrot.slane %v4567_v45, 2  ;;  %v2099_v32 = vrot.slane %v4568_v37, 7  ;;  %1775 = vrot.lane.b32.xlu0 %v3860_v51, %s3061_s29 }
  0x96   : > { %v2086_v20 = vsel %vm385_vm0, %v2085_v10, %v4579_v46  ;;  %v2101_v41 = vrot.slane %v4575_v15, 6  ;;  %v2103_v45 = vrot.slane %v4573_v31, 5  ;;  %v2105_v37 = vrot.slane %v4574_v62, 4  ;;  %v3917_v7 = vld [vmem:[%s3167_s28 + $0x34] ss:$0 sps:$4 sm:$0x11]  }
  0x97   : > { %v3869_v47 = vpop.permute.xlu0 %667  ;;  %v3871_v18 = vpop.permute.xlu1 %662  ;;  %v2088_v10 = vsel %vm388_vm1, %v2087_v11, %v2086_v20  ;;  %v3920_v30 = vld [vmem:[%s3167_s28 + $0x3c] ss:$0 sps:$4 sm:$0x11]   ;;  %v2097_v11 = vrot.slane %v4578_v5, 1  ;;  %v2100_v20 = vsel %vm385_vm0, %v2099_v32, %v4576_v21  ;;  %v2107_v31 = vrot.slane %v4577_v63, 3 }
  0x98   : > { %4620 = vst [vmem:[#allocation13_spill] sm:$0xff] %v3871_v18  ;;  %2876 = vmatpush3.bf16.msra.mxu1 %v3869_v47  ;;  %2675 = vmatprep.subr.bf16.mxu0 %v3871_v18  ;;  %v2090_v29 = vsel %vm391_vm2, %v2089_v33, %v2088_v10  ;;  %v3934_v62 = vld [vmem:[%s3167_s28 + $0x44] ss:$0 sps:$4 sm:$0x11]   ;;  %v2102_v15 = vsel %vm388_vm1, %v2101_v41, %v2100_v20  ;;  %v2109_v32 = vrot.slane %v4583_v9, 2  ;;  %v2111_v46 = vrot.slane %v4580_v27, 1 }
  0x99   : > { %2877 = vmatprep.subr.bf16.mxu1 %v4581_v24  ;;  %2676 = vmatpush3.bf16.msra.mxu0 %v3446_v56  ;;  %v3937_v33 = vld [vmem:[%s3167_s28 + $0x4c] ss:$0 sps:$4 sm:$0x11]   ;;  %v2092_v10 = vsel %vm394_vm3, %v2091_v42, %v2090_v29  ;;  %v3944_v21 = vld [vmem:[%s3167_s28 + $0x54] ss:$0 sps:$4 sm:$0x11]   ;;  %v2104_v5 = vsel %vm391_vm2, %v2103_v45, %v2102_v15  ;;  %v4625_v15 = vunpack.c.l.b16 %v3917_v7  ;;  %v4633_v1 = vunpack.c.l.b16 %v3934_v62 }
  0x9a   : > { %v2094_v63 = vsel %vm397_vm4, %v2093_v44, %v2092_v10  ;;  %v3953_v29 = vld [vmem:[%s3167_s28 + $0x5c] ss:$0 sps:$4 sm:$0x11]   ;;  %v2106_v20 = vsel %vm394_vm3, %v2105_v37, %v2104_v5  ;;  %v3959_v44 = vld [vmem:[%s3167_s28 + $0x64] ss:$0 sps:$4 sm:$0x11]   ;;  %v4627_v5 = vunpack.c.l.b16 %v3920_v30  ;;  %v4637_v18 = vunpack.c.l.b16 %v3776_v50 }
  0x9b   : > { %v2096_v42 = vsel %vm400_vm5, %v2095_v25, %v2094_v63  ;;  %v3962_v10 = vld [vmem:[%s3167_s28 + $0x6c] ss:$0 sps:$4 sm:$0x11]   ;;  %v2108_v24 = vsel %vm397_vm4, %v2107_v31, %v2106_v20  ;;  %v3969_v9 = vld [vmem:[%s3167_s28 + $0x74] ss:$0 sps:$4 sm:$0x11]   ;;  %v4586_v63 = vunpack.c.l.b16 %v3899_v4  ;;  %v4591_v25 = vunpack.c.l.b16 %v3914_v35 }
  0x9c   : > { %v2098_v27 = vsel %vm403_vm6, %v2097_v11, %v2096_v42  ;;  %v3972_v41 = vld [vmem:[%s3167_s28 + $0x7c] ss:$0 sps:$4 sm:$0x11]   ;;  %v2110_v37 = vsel %vm400_vm5, %v2109_v32, %v2108_v24  ;;  %v4623_v31 = vunpack.c.l.b16 %v3884_v0  ;;  %v2001_v32 = vrot.slane %v4625_v15, 2  ;;  %v4021_v15 = vld [vmem:[%s4563_s2 + $0x8] ss:$0 sps:$4 sm:$0xff]  }
  0x9d   : > { %v2112_v11 = vsel %vm403_vm6, %v2111_v46, %v2110_v37  ;;  %v4622_v46 = vunpack.c.l.b16 %v3881_v43  ;;  %v1999_v45 = vrot.slane %v4591_v25, 3  ;;  %v2003_v20 = vrot.slane %v4627_v5, 1 }
  0x9e   : > { %v3984_v51 = vpack.c.b16 %v2112_v11, %v2098_v27  ;;  %v1993_v42 = vrot.slane %v4623_v31, 6  ;;  %v1995_v27 = vrot.slane %v4586_v63, 5  ;;  %v4624_v11 = vunpack.c.l.b16 %v3902_v12 }
  0x9f   : > { %v1991_v37 = vrot.slane %v4622_v46, 7  ;;  %v4626_v31 = vunpack.c.l.b16 %v3867_v3  ;;  %v4628_v63 = vunpack.c.l.b16 %v3937_v33  ;;  %v4631_v5 = vunpack.c.l.b16 %v3959_v44 }
  0xa0   : > { %4621 = vst [vmem:[#allocation14_spill] sm:$0xff] %v3984_v51  ;;  %2123 = vrot.lane.b32.xlu1 %v3984_v51, %s3061_s29  ;;  %v1997_v24 = vrot.slane %v4624_v11, 4  ;;  %2118 = vrot.lane.b32.xlu0 %v3984_v51, %s3062_s30  ;;  %v4629_v11 = vunpack.c.l.b16 %v3944_v21  ;;  %v4634_v23 = vunpack.c.l.b16 %v3969_v9  ;;  %v4639_v55 = vunpack.c.l.b16 %v3786_v34 }
  0xa1   : > { %v1992_v46 = vsel %vm385_vm0, %v1991_v37, %v4626_v31  ;;  %v2005_v40 = vrot.slane %v4628_v63, 7  ;;  %v4630_v37 = vunpack.c.l.b16 %v3953_v29  ;;  %v2011_v49 = vrot.slane %v4631_v5, 4 }
  0xa2   : > { %v2007_v14 = vrot.slane %v4629_v11, 6  ;;  %v4016_v25 = vpop.permute.xlu0 %665  ;;  %v1994_v51 = vsel %vm388_vm1, %v1993_v42, %v1992_v46  ;;  %v4632_v63 = vunpack.c.l.b16 %v3962_v10  ;;  %v2015_v42 = vrot.slane %v4634_v23, 2 }
  0xa3   : > { %v2009_v31 = vrot.slane %v4630_v37, 5  ;;  %2878 = vmatpush3.bf16.msra.mxu1 %v4016_v25  ;;  %v1996_v11 = vsel %vm391_vm2, %v1995_v27, %v1994_v51  ;;  %v2006_v48 = vsel %vm385_vm0, %v2005_v40, %v4633_v1  ;;  %v4635_v46 = vunpack.c.l.b16 %v3972_v41 }
  0xa4   : > { %v2013_v22 = vrot.slane %v4632_v63, 3  ;;  %v1998_v56 = vsel %vm394_vm3, %v1997_v24, %v1996_v11  ;;  %v2008_v5 = vsel %vm388_vm1, %v2007_v14, %v2006_v48  ;;  %v4636_v63 = vunpack.c.l.b16 %v3766_v54 }
  0xa5   : > { %v2017_v37 = vrot.slane %v4635_v46, 1  ;;  %v2305_v51 = vrot.slane %v4637_v18, 7  ;;  %v2000_v27 = vsel %vm397_vm4, %v1999_v45, %v1998_v56  ;;  %v2010_v1 = vsel %vm391_vm2, %v2009_v31, %v2008_v5 }
  0xa6   : > { %v2303_v59 = vrot.slane %v4636_v63, 1  ;;  %v4638_v40 = vunpack.c.l.b16 %v3779_v16  ;;  %v2309_v46 = vrot.slane %v4639_v55, 5  ;;  %2880 = vmatmul.mubr.msk.bf16.vlgmr.msra.gmra.mxu1 %vm686_vm8, %v4021_v15  ;;  %v4053_v48 = vpop.permute.xlu0 %659  ;;  %v2002_v14 = vsel %vm400_vm5, %v2001_v32, %v2000_v27 }
  0xa7   : > { %v2012_v54 = vsel %vm394_vm3, %v2011_v49, %v2010_v1  ;;  %v4640_v50 = vunpack.c.l.b16 %v3773_v53  ;;  %v4641_v18 = vunpack.c.l.b16 %v3789_v8  ;;  %2677 = vmatprep.subr.bf16.mxu0 %v4053_v48  ;;  %v2004_v55 = vsel %vm403_vm6, %v2003_v20, %v2002_v14 }
  0xa8   : > { %v2307_v23 = vrot.slane %v4638_v40, 6  ;;  %v2014_v34 = vsel %vm397_vm4, %v2013_v22, %v2012_v54  ;;  %v4642_v24 = vunpack.c.l.b16 %v3792_v38  ;;  %2678 = vmatpush3.bf16.msra.mxu0 %v3517_v6  ;;  %v4643_v53 = vunpack.c.l.b16 %v3800_v13 }
  0xa9   : > { %v2304_v56 = vsel %vm385_vm0, %v4640_v50, %v2303_v59  ;;  %v2311_v16 = vrot.slane %v4641_v18, 4  ;;  %v2016_v49 = vsel %vm400_vm5, %v2015_v42, %v2014_v34  ;;  %v4644_v31 = vunpack.c.l.b16 %v3803_v39  ;;  %v4075_v20 = vpop.permute.xlu1 %900  ;;  %2679 = vmatprep.subr.bf16.mxu0 %v3230_v17 }
  0xaa   : > { %v2306_v45 = vsel %vm388_vm1, %v2305_v51, %v2304_v56  ;;  %v2313_v32 = vrot.slane %v4642_v24, 3  ;;  %v2315_v8 = vrot.slane %v4643_v53, 2  ;;  %v2018_v22 = vsel %vm403_vm6, %v2017_v37, %v2016_v49  ;;  %2700 = vmatprep.subr.bf16.mxu1 %v4075_v20 }
  0xab   : > { %v2308_v59 = vsel %vm391_vm2, %v2307_v23, %v2306_v45  ;;  %v2317_v11 = vrot.slane %v4644_v31, 1  ;;  %v4645_v38 = vunpack.c.l.b16 %v3817_v61  ;;  %v4646_v42 = vunpack.c.l.b16 %v3826_v2  ;;  %2701 = vmatpush3.bf16.msra.mxu1 %v3230_v17 }
  0xac   : > { %v2310_v5 = vsel %vm394_vm3, %v2309_v46, %v2308_v59  ;;  %v4085_v13 = vpack.c.b16 %v2018_v22, %v2004_v55  ;;  %v4647_v27 = vunpack.c.l.b16 %v3811_v19  ;;  %v4648_v1 = vunpack.c.l.b16 %v3829_v36 }
  0xad   : > { %v2319_v63 = vrot.slane %v4645_v38, 7  ;;  %v2321_v51 = vrot.slane %v4646_v42, 6  ;;  %v2312_v39 = vsel %vm397_vm4, %v2311_v16, %v2310_v5  ;;  %v4649_v23 = vunpack.c.l.b16 %v3836_v26 }
  0xae   : > { %v2318_v37 = vsel %vm385_vm0, %v4647_v27, %v2317_v11  ;;  %v2323_v40 = vrot.slane %v4648_v1, 5  ;;  %v2314_v61 = vsel %vm400_vm5, %v2313_v32, %v2312_v39  ;;  %v4650_v14 = vunpack.c.l.b16 %v3839_v28  ;;  %2121 = vrot.lane.b32.xlu1 %v4085_v13, %s3061_s29  ;;  %2115 = vrot.lane.b32.xlu0 %v4085_v13, %s3062_s30 }
  0xaf   : > { %v2320_v2 = vsel %vm388_vm1, %v2319_v63, %v2318_v37  ;;  %v2325_v46 = vrot.slane %v4649_v23, 4  ;;  %v2316_v19 = vsel %vm403_vm6, %v2315_v8, %v2314_v61  ;;  %v4651_v50 = vunpack.c.l.b16 %v3846_v58 }
  0xb0   : > { %v2327_v54 = vrot.slane %v4650_v14, 3  ;;  %v2322_v36 = vsel %vm391_vm2, %v2321_v51, %v2320_v2  ;;  %v4652_v18 = vunpack.c.l.b16 %v3867_v3  ;;  %v4653_v28 = vunpack.c.l.b16 %v3884_v0  ;;  %v4125_v0 = vpop.permute.xlu1 %897 }
  0xb1   : > { %v2329_v56 = vrot.slane %v4651_v50, 2  ;;  %v2324_v16 = vsel %vm394_vm3, %v2323_v40, %v2322_v36  ;;  %v4654_v34 = vunpack.c.l.b16 %v3899_v4  ;;  %v4655_v24 = vunpack.c.l.b16 %v3902_v12  ;;  %2702 = vmatprep.subr.bf16.mxu1 %v4125_v0 }
  0xb2   : > { %v2273_v26 = vrot.slane %v4652_v18, 1  ;;  %v2275_v55 = vrot.slane %v4653_v28, 7  ;;  %v2326_v58 = vsel %vm397_vm4, %v2325_v46, %v2324_v16  ;;  %v4656_v49 = vunpack.c.l.b16 %v3881_v43  ;;  %2703 = vmatpush3.bf16.msra.mxu1 %v3312_v60 }
  0xb3   : > { %v2277_v45 = vrot.slane %v4654_v34, 6  ;;  %v2279_v32 = vrot.slane %v4655_v24, 5  ;;  %v4657_v3 = vunpack.c.l.b16 %v3914_v35  ;;  %v4658_v8 = vunpack.c.l.b16 %v3917_v7  ;;  %2704 = vmatprep.subr.bf16.mxu1 %v3347_v57 }
  0xb4   : > { %v2274_v59 = vsel %vm385_vm0, %v4656_v49, %v2273_v26  ;;  %v2328_v4 = vsel %vm400_vm5, %v2327_v54, %v2326_v58  ;;  %v4659_v12 = vunpack.c.l.b16 %v3920_v30  ;;  %v4660_v5 = vunpack.c.l.b16 %v3934_v62  ;;  %v317_v30 = vld [vmem:[%s4563_s2] sm:$0xff] }
  0xb5   : > { %v2281_v53 = vrot.slane %v4657_v3, 4  ;;  %v2283_v31 = vrot.slane %v4658_v8, 3  ;;  %v2276_v11 = vsel %vm388_vm1, %v2275_v55, %v2274_v59  ;;  %v2330_v35 = vsel %vm403_vm6, %v2329_v56, %v2328_v4  ;;  %v4668_v49 = vld [vmem:[#allocation2_spill] sm:$0xff]  ;;  %v4669_v8 = vld [vmem:[#allocation13_spill] sm:$0xff] }
  0xb6   : > { %v2285_v22 = vrot.slane %v4659_v12, 2  ;;  %v2287_v43 = vrot.slane %v4660_v5, 1  ;;  %v2278_v38 = vsel %vm391_vm2, %v2277_v45, %v2276_v11  ;;  %v4661_v7 = vunpack.c.l.b16 %v3944_v21  ;;  %v4672_v12 = vld [vmem:[#allocation3_spill] sm:$0xff] }
  0xb7   : > { %v4662_v42 = vunpack.c.l.b16 %v3953_v29  ;;  %v4144_v62 = vpack.c.b16 %v2330_v35, %v2316_v19  ;;  %v2280_v39 = vsel %vm394_vm3, %v2279_v32, %v2278_v38  ;;  %v4663_v27 = vunpack.c.l.b16 %v3937_v33  ;;  %v525_v18 = vpop.permute.xlu0 %524  ;;  %v4673_v35 = vld [vmem:[#allocation5_spill] sm:$0xff] }
  0xb8   : > { %v2289_v63 = vrot.slane %v4661_v7, 7  ;;  %v4664_v21 = vunpack.c.l.b16 %v3959_v44  ;;  %v2282_v29 = vsel %vm397_vm4, %v2281_v53, %v2280_v39  ;;  %v4665_v61 = vunpack.c.l.b16 %v3962_v10  ;;  %2680 = vmatpush3.bf16.msra.mxu0 %v525_v18  ;;  %v4674_v7 = vld [vmem:[#allocation6_spill] sm:$0xff]  ;;  %v4680_v39 = vld [vmem:[#allocation12_spill] sm:$0xff] }
  0xb9   : > { %v2291_v51 = vrot.slane %v4662_v42, 6  ;;  %v2288_v37 = vsel %vm385_vm0, %v4663_v27, %v2287_v43  ;;  %v4666_v23 = vunpack.c.l.b16 %v3969_v9  ;;  %2336 = vrot.lane.b32.xlu1 %v4144_v62, %s3062_s30  ;;  %v2284_v33 = vsel %vm400_vm5, %v2283_v31, %v2282_v29  ;;  %2341 = vrot.lane.b32.xlu0 %v4144_v62, %s3061_s29  ;;  %v319_v9 = vld [vmem:[%s4564_s3] sm:$0xff]  ;;  %v4670_v31 = vld [vmem:[#allocation4_spill] sm:$0xff] }
  0xba   : > { %v2293_v1 = vrot.slane %v4664_v21, 5  ;;  %v2290_v40 = vsel %vm388_vm1, %v2289_v63, %v2288_v37  ;;  %v2295_v2 = vrot.slane %v4665_v61, 4  ;;  %v4667_v14 = vunpack.c.l.b16 %v3972_v41  ;;  %2681 = vmatprep.subr.bf16.mxu0 %v3312_v60  ;;  %v4675_v63 = vld [vmem:[#allocation7_spill] sm:$0xff]  ;;  %v4676_v42 = vld [vmem:[#allocation8_spill] sm:$0xff] }
  0xbb   : > { %v2297_v46 = vrot.slane %v4666_v23, 3  ;;  %v2292_v44 = vsel %vm391_vm2, %v2291_v51, %v2290_v40  ;;  %v4165_v19 = vcombine.high %v317_v30, %v317_v30  ;;  %v2286_v36 = vsel %vm403_vm6, %v2285_v22, %v2284_v33  ;;  %v4681_v23 = vld [vmem:[#allocation14_spill] sm:$0xff] }
  0xbc   : > { %v2299_v54 = vrot.slane %v4667_v14, 2  ;;  %v2294_v10 = vsel %vm394_vm3, %v2293_v1, %v2292_v44  ;;  %v3065_v56 = vmov 0   ;;  %v4190_v53 = vcombine.low %v317_v30, %v317_v30  ;;  %v4679_v30 = vld [vmem:[#allocation11_spill] sm:$0xff] }
  0xbd   : > { %v2296_v50 = vsel %vm397_vm4, %v2295_v2, %v2294_v10  ;;  %722 = vmatprep.mubr.bf16.mxu0 %v4165_v19  ;;  %941 = vmatprep.mubr.bf16.mxu1 %v4165_v19  ;;  %v4671_v4 = vmov 0.0   ;;  %v775_v10 = vlaneseq }
  0xbe   : > { %v2298_v41 = vsel %vm400_vm5, %v2297_v46, %v2296_v50  ;;  %2969 = vset.pattern.permute.xlu0 %v3065_v56 }
  0xbf   : > { %v2300_v26 = vsel %vm403_vm6, %v2299_v54, %v2298_v41  ;;  %673 = vperm.xlu0 %2969, %v319_v9   ;;  %v597_v28 = vpop.permute.xlu1 %596  ;;  %v3066_v54 = vmov 1966171168   ;;  %v776_v50 = vshrl.u32 %v775_v10, 7 }
  0xc0   : > { %v4179_v16 = vpack.c.b16 %v2300_v26, %v2286_v36  ;;  %2705 = vmatpush3.bf16.msra.mxu1 %v597_v28 }
  0xc1   : > { %2706 = vmatprep.subr.bf16.mxu1 %v3376_v52 }
  0xc2   : > { %2333 = vrot.lane.b32.xlu1 %v4179_v16, %s3062_s30 }
  0xc6   : > { %2339 = vrot.lane.b32.xlu1 %v4179_v16, %s3061_s29  ;;  %v522_v55 = vpop.permute.xlu0 %521 }
  0xc7   : > { %2682 = vmatpush3.bf16.msra.mxu0 %v522_v55 }
  0xc8   : > { %2683 = vmatprep.subr.bf16.mxu0 %v597_v28 }
  0xca   : > { %v519_v34 = vpop.permute.xlu0 %518 }
  0xcb   : > { %2684 = vmatpush3.bf16.msra.mxu0 %v519_v34 }
  0xcd   : > { %v594_v45 = vpop.permute.xlu1 %593 }
  0xce   : > { %v516_v24 = vpop.permute.xlu0 %515  ;;  %2707 = vmatpush3.bf16.msra.mxu1 %v594_v45  ;;  %2685 = vmatprep.subr.bf16.mxu0 %v594_v45 }
  0xcf   : > { %2708 = vmatprep.subr.bf16.mxu1 %v3869_v47  ;;  %2686 = vmatpush3.bf16.msra.mxu0 %v516_v24 }
  0xd1   : > { %v591_v32 = vpop.permute.xlu1 %590 }
  0xd2   : > { %v906_v58 = vpop.permute.xlu0 %905  ;;  %2709 = vmatpush3.bf16.msra.mxu1 %v591_v32  ;;  %2687 = vmatprep.subr.bf16.mxu0 %v591_v32 }
  0xd3   : > { %2710 = vmatprep.subr.bf16.mxu1 %v4016_v25  ;;  %2688 = vmatpush3.bf16.msra.mxu0 %v4668_v49 }
  0xd5   : > { %v588_v59 = vpop.permute.xlu1 %587 }
  0xd6   : > { %v904_v3 = vpop.permute.xlu0 %903  ;;  %2711 = vmatpush3.bf16.msra.mxu1 %v588_v59  ;;  %2689 = vmatprep.subr.bf16.mxu0 %v588_v59 }
  0xd7   : > { %2712 = vmatprep.subr.bf16.mxu1 %v4669_v8  ;;  %2690 = vmatpush3.bf16.msra.mxu0 %v4670_v31 }
  0xd8   : > { %2883 = vmatprep.subr.bf16.mxu0 %v4671_v4 }
  0xd9   : > { %v4195_v11 = vpop.permute.xlu1 %1123 }
  0xda   : > { %2713 = vmatpush3.bf16.msra.mxu1 %v4672_v12  ;;  %723 = vmatmul.mubr.bf16.vlgmr.msra.gmra.mxu0 %v4190_v53  ;;  %v4200_v22 = vpop.permute.xlu0 %1118 }
  0xdb   : > { %2714 = vmatprep.subr.bf16.mxu1 %v4053_v48  ;;  %2884 = vmatpush3.bf16.msra.mxu0 %v906_v58 }
  0xdc   : > { %2885 = vmatprep.subr.bf16.mxu0 %v4671_v4  ;;  %2887 = vmatprep.mubr.msk.bf16.mxu0 %vm3064_vm7, %v4671_v4 }
  0xdd   : > { %v4206_v5 = vpop.permute.xlu1 %1121 }
  0xde   : > { %2715 = vmatpush3.bf16.msra.mxu1 %v3517_v6  ;;  %v4211_v43 = vpop.permute.xlu0 %1115 }
  0xdf   : > { %2891 = vmatprep.subr.bf16.mxu1 %v4671_v4  ;;  %2886 = vmatpush3.bf16.msra.mxu0 %v904_v3 }
  0xe0   : > { %2725 = vmatprep.subr.bf16.mxu0 %v4200_v22 }
  0xe1   : > { %942 = vmatmul.mubr.bf16.vlgmr.msra.gmra.mxu1 %v4190_v53 }
  0xe2   : > { %2892 = vmatpush3.bf16.msra.mxu1 %v4195_v11  ;;  %2888 = vmatmul.mubr.msk.bf16.vlgmr.msra.gmra.mxu0 %vm686_vm8, %v4021_v15 }
  0xe3   : > { %2893 = vmatprep.subr.bf16.mxu1 %v4671_v4  ;;  %2726 = vmatpush3.bf16.msra.mxu0 %v3347_v57  ;;  %v4220_v6 = vpop.permute.xlu1 %1336 }
  0xe4   : > { %2895 = vmatprep.mubr.msk.bf16.mxu1 %vm3064_vm7, %v4671_v4  ;;  %2727 = vmatprep.subr.bf16.mxu0 %v4211_v43 }
  0xe5   : > { %1159 = vmatprep.mubr.bf16.mxu0 %v4165_v19 }
  0xe6   : > { %2894 = vmatpush3.bf16.msra.mxu1 %v4206_v5 }
  0xe7   : > { %2750 = vmatprep.subr.bf16.mxu1 %v4220_v6  ;;  %2728 = vmatpush3.bf16.msra.mxu0 %v3376_v52 }
  0xe8   : > { %2729 = vmatprep.subr.bf16.mxu0 %v4673_v35 }
  0xe9   : > { %2896 = vmatmul.mubr.msk.bf16.vlgmr.msra.gmra.mxu1 %vm686_vm8, %v4021_v15 }
  0xea   : > { %2751 = vmatpush3.bf16.msra.mxu1 %v4673_v35  ;;  %v4231_v38 = vpop.permute.xlu1 %1333  ;;  %1377 = vmatprep.mubr.bf16.mxu1 %v4165_v19 }
  0xeb   : > { %2752 = vmatprep.subr.bf16.mxu1 %v4231_v38  ;;  %2730 = vmatpush3.bf16.msra.mxu0 %v3869_v47  ;;  %v1342_v47 = vpop.permute.xlu0 %1341 }
  0xec   : > { %2731 = vmatprep.subr.bf16.mxu0 %v4674_v7 }
  0xee   : > { %2753 = vmatpush3.bf16.msra.mxu1 %v4674_v7 }
  0xef   : > { %2754 = vmatprep.subr.bf16.mxu1 %v4675_v63  ;;  %2732 = vmatpush3.bf16.msra.mxu0 %v4016_v25  ;;  %v1340_v25 = vpop.permute.xlu0 %1339 }
  0xf0   : > { %2733 = vmatprep.subr.bf16.mxu0 %v906_v58 }
  0xf2   : > { %2755 = vmatpush3.bf16.msra.mxu1 %v906_v58  ;;  %v4250_v51 = vpop.permute.xlu1 %1559 }
  0xf3   : > { %2756 = vmatprep.subr.bf16.mxu1 %v4676_v42  ;;  %2734 = vmatpush3.bf16.msra.mxu0 %v4669_v8 }
  0xf4   : > { %2735 = vmatprep.subr.bf16.mxu0 %v904_v3 }
  0xf6   : > { %2757 = vmatpush3.bf16.msra.mxu1 %v904_v3 }
  0xf7   : > { %2758 = vmatprep.subr.bf16.mxu1 %v4195_v11  ;;  %2736 = vmatpush3.bf16.msra.mxu0 %v4053_v48 }
  0xf8   : > { %2737 = vmatprep.subr.bf16.mxu0 %v4075_v20 }
  0xf9   : > { %v4261_v48 = vpop.permute.xlu1 %1557 }
  0xfa   : > { %2759 = vmatpush3.bf16.msra.mxu1 %v4075_v20  ;;  %v4677_v20 = vld [vmem:[#allocation9_spill] sm:$0xff] }
  0xfb   : > { %2760 = vmatprep.subr.bf16.mxu1 %v4206_v5  ;;  %2738 = vmatpush3.bf16.msra.mxu0 %v3230_v17  ;;  %v4258_v17 = vpop.permute.xlu0 %1554 }
  0xfc   : > { %2739 = vmatprep.subr.bf16.mxu0 %v4125_v0 }
  0xfe   : > { %2761 = vmatpush3.bf16.msra.mxu1 %v4125_v0  ;;  %v4678_v0 = vld [vmem:[#allocation10_spill] sm:$0xff] }
  0xff   : > { %2762 = vmatprep.subr.bf16.mxu1 %v4200_v22  ;;  %2740 = vmatpush3.bf16.msra.mxu0 %v3312_v60  ;;  %v4269_v60 = vpop.permute.xlu0 %1551 }
 0x100   : > { %2899 = vmatprep.subr.bf16.mxu0 %v4671_v4 }
 0x102   : > { %2763 = vmatpush3.bf16.msra.mxu1 %v3347_v57  ;;  %1160 = vmatmul.mubr.bf16.vlgmr.msra.gmra.mxu0 %v4190_v53  ;;  %v4274_v57 = vpop.permute.xlu1 %1772 }
 0x103   : > { %2764 = vmatprep.subr.bf16.mxu1 %v4211_v43  ;;  %2900 = vmatpush3.bf16.msra.mxu0 %v1342_v47  ;;  %v1778_v27 = vpop.permute.xlu0 %1777 }
 0x104   : > { %2901 = vmatprep.subr.bf16.mxu0 %v4671_v4  ;;  %2903 = vmatprep.mubr.msk.bf16.mxu0 %vm3064_vm7, %v4671_v4 }
 0x106   : > { %2765 = vmatpush3.bf16.msra.mxu1 %v3376_v52 }
 0x107   : > { %2907 = vmatprep.subr.bf16.mxu1 %v4671_v4  ;;  %2902 = vmatpush3.bf16.msra.mxu0 %v1340_v25  ;;  %v4285_v52 = vpop.permute.xlu1 %1769  ;;  %v1776_v37 = vpop.permute.xlu0 %1775 }
 0x108   : > { %2775 = vmatprep.subr.bf16.mxu0 %v4258_v17 }
 0x109   : > { %1378 = vmatmul.mubr.bf16.vlgmr.msra.gmra.mxu1 %v4190_v53 }
 0x10a   : > { %2908 = vmatpush3.bf16.msra.mxu1 %v4250_v51  ;;  %2904 = vmatmul.mubr.msk.bf16.vlgmr.msra.gmra.mxu0 %vm686_vm8, %v4021_v15 }
 0x10b   : > { %2909 = vmatprep.subr.bf16.mxu1 %v4671_v4  ;;  %2776 = vmatpush3.bf16.msra.mxu0 %v4675_v63 }
 0x10c   : > { %2911 = vmatprep.mubr.msk.bf16.mxu1 %vm3064_vm7, %v4671_v4  ;;  %2777 = vmatprep.subr.bf16.mxu0 %v4269_v60 }
 0x10d   : > { %1595 = vmatprep.mubr.bf16.mxu0 %v4165_v19 }
 0x10e   : > { %2910 = vmatpush3.bf16.msra.mxu1 %v4261_v48 }
 0x10f   : > { %2800 = vmatprep.subr.bf16.mxu1 %v4274_v57  ;;  %2778 = vmatpush3.bf16.msra.mxu0 %v4676_v42 }
 0x110   : > { %2779 = vmatprep.subr.bf16.mxu0 %v4677_v20 }
 0x111   : > { %2912 = vmatmul.mubr.msk.bf16.vlgmr.msra.gmra.mxu1 %vm686_vm8, %v4021_v15 }
 0x112   : > { %2801 = vmatpush3.bf16.msra.mxu1 %v4677_v20  ;;  %1813 = vmatprep.mubr.bf16.mxu1 %v4165_v19  ;;  %v2124_v21 = vpop.permute.xlu1 %2123  ;;  %v2119_v1 = vpop.permute.xlu0 %2118 }
 0x113   : > { %2802 = vmatprep.subr.bf16.mxu1 %v4285_v52  ;;  %2780 = vmatpush3.bf16.msra.mxu0 %v4195_v11 }
 0x114   : > { %2781 = vmatprep.subr.bf16.mxu0 %v4678_v0 }
 0x116   : > { %2803 = vmatpush3.bf16.msra.mxu1 %v4678_v0 }
 0x117   : > { %2804 = vmatprep.subr.bf16.mxu1 %v4679_v30  ;;  %2782 = vmatpush3.bf16.msra.mxu0 %v4206_v5 }
 0x118   : > { %2783 = vmatprep.subr.bf16.mxu0 %v1342_v47 }
 0x11a   : > { %2805 = vmatpush3.bf16.msra.mxu1 %v1342_v47 }
 0x11b   : > { %2806 = vmatprep.subr.bf16.mxu1 %v4680_v39  ;;  %2784 = vmatpush3.bf16.msra.mxu0 %v4200_v22 }
 0x11c   : > { %2785 = vmatprep.subr.bf16.mxu0 %v1340_v25 }
 0x11e   : > { %2807 = vmatpush3.bf16.msra.mxu1 %v1340_v25 }
 0x11f   : > { %2808 = vmatprep.subr.bf16.mxu1 %v4250_v51  ;;  %2786 = vmatpush3.bf16.msra.mxu0 %v4211_v43 }
 0x120   : > { %2787 = vmatprep.subr.bf16.mxu0 %v4220_v6  ;;  %v2122_v29 = vpop.permute.xlu1 %2121  ;;  %v2116_v40 = vpop.permute.xlu0 %2115 }
 0x122   : > { %2809 = vmatpush3.bf16.msra.mxu1 %v4220_v6 }
 0x123   : > { %2810 = vmatprep.subr.bf16.mxu1 %v4261_v48  ;;  %2788 = vmatpush3.bf16.msra.mxu0 %v4673_v35 }
 0x124   : > { %2789 = vmatprep.subr.bf16.mxu0 %v4231_v38 }
 0x126   : > { %2811 = vmatpush3.bf16.msra.mxu1 %v4231_v38 }
 0x127   : > { %2812 = vmatprep.subr.bf16.mxu1 %v4258_v17  ;;  %2790 = vmatpush3.bf16.msra.mxu0 %v4674_v7 }
 0x128   : > { %2915 = vmatprep.subr.bf16.mxu0 %v4671_v4 }
 0x12a   : > { %2813 = vmatpush3.bf16.msra.mxu1 %v4675_v63  ;;  %1596 = vmatmul.mubr.bf16.vlgmr.msra.gmra.mxu0 %v4190_v53 }
 0x12b   : > { %2814 = vmatprep.subr.bf16.mxu1 %v4269_v60  ;;  %2916 = vmatpush3.bf16.msra.mxu0 %v1778_v27  ;;  %v2337_v61 = vpop.permute.xlu1 %2336 }
 0x12c   : > { %2917 = vmatprep.subr.bf16.mxu0 %v4671_v4  ;;  %2919 = vmatprep.mubr.msk.bf16.mxu0 %vm3064_vm7, %v4671_v4 }
 0x12e   : > { %2815 = vmatpush3.bf16.msra.mxu1 %v4676_v42 }
 0x12f   : > { %2923 = vmatprep.subr.bf16.mxu1 %v4671_v4  ;;  %2918 = vmatpush3.bf16.msra.mxu0 %v1776_v37 }
 0x130   : > { %2825 = vmatprep.subr.bf16.mxu0 %v2119_v1 }
 0x131   : > { %1814 = vmatmul.mubr.bf16.vlgmr.msra.gmra.mxu1 %v4190_v53 }
 0x132   : > { %2924 = vmatpush3.bf16.msra.mxu1 %v2124_v21  ;;  %2920 = vmatmul.mubr.msk.bf16.vlgmr.msra.gmra.mxu0 %vm686_vm8, %v4021_v15 }
 0x133   : > { %2925 = vmatprep.subr.bf16.mxu1 %v4671_v4  ;;  %2826 = vmatpush3.bf16.msra.mxu0 %v4679_v30 }
 0x134   : > { %2927 = vmatprep.mubr.msk.bf16.mxu1 %vm3064_vm7, %v4671_v4  ;;  %2827 = vmatprep.subr.bf16.mxu0 %v2116_v40  ;;  %v2334_v2 = vpop.permute.xlu1 %2333 }
 0x135   : > { %2159 = vmatprep.mubr.bf16.mxu0 %v4165_v19 }
 0x136   : > { %2926 = vmatpush3.bf16.msra.mxu1 %v2122_v29 }
 0x137   : > { %2850 = vmatprep.subr.bf16.mxu1 %v2337_v61  ;;  %2828 = vmatpush3.bf16.msra.mxu0 %v4680_v39 }
 0x138   : > { %2829 = vmatprep.subr.bf16.mxu0 %v4681_v23 }
 0x139   : > { %2928 = vmatmul.mubr.msk.bf16.vlgmr.msra.gmra.mxu1 %vm686_vm8, %v4021_v15 }
 0x13a   : > { %2851 = vmatpush3.bf16.msra.mxu1 %v4681_v23  ;;  %2377 = vmatprep.mubr.bf16.mxu1 %v4165_v19  ;;  %v773_v19 = vunpack.c.l.s4 %v3066_v54 }
 0x13b   : > { %2852 = vmatprep.subr.bf16.mxu1 %v2334_v2  ;;  %2830 = vmatpush3.bf16.msra.mxu0 %v4250_v51 }
 0x13c   : > { %2831 = vmatprep.subr.bf16.mxu0 %v4085_v13  ;;  %v774_v36 = vunpack.c.0.s8 %v773_v19 }
 0x13e   : > { %2853 = vmatpush3.bf16.msra.mxu1 %v4085_v13  ;;  %v2342_v13 = vpop.permute.xlu0 %2341 }
 0x13f   : > { %2854 = vmatprep.subr.bf16.mxu1 %v4144_v62  ;;  %2832 = vmatpush3.bf16.msra.mxu0 %v4261_v48  ;;  %v2340_v62 = vpop.permute.xlu1 %2339 }
 0x140   : > { %2833 = vmatprep.subr.bf16.mxu0 %v1778_v27 }
 0x142   : > { %2855 = vmatpush3.bf16.msra.mxu1 %v1778_v27  ;;  %v4358_v56 = vpop.permute.xlu0 %673 }
 0x143   : > { %2856 = vmatprep.subr.bf16.mxu1 %v4179_v16  ;;  %2834 = vmatpush3.bf16.msra.mxu0 %v4258_v17  ;;  %v4361_v16 = vsub.s32 %v774_v36, %v776_v50 }
 0x144   : > { %2835 = vmatprep.subr.bf16.mxu0 %v1776_v37 }
 0x146   : > { %2857 = vmatpush3.bf16.msra.mxu1 %v1776_v37 }
 0x147   : > { %2858 = vmatprep.subr.bf16.mxu1 %v2124_v21  ;;  %2836 = vmatpush3.bf16.msra.mxu0 %v4269_v60 }
 0x148   : > { %2837 = vmatprep.subr.bf16.mxu0 %v4274_v57 }
 0x14a   : > { %2859 = vmatpush3.bf16.msra.mxu1 %v4274_v57 }
 0x14b   : > { %2860 = vmatprep.subr.bf16.mxu1 %v2122_v29  ;;  %2838 = vmatpush3.bf16.msra.mxu0 %v4677_v20 }
 0x14c   : > { %2839 = vmatprep.subr.bf16.mxu0 %v4285_v52 }
 0x14e   : > { %2861 = vmatpush3.bf16.msra.mxu1 %v4285_v52 }
 0x14f   : > { %2862 = vmatprep.subr.bf16.mxu1 %v2119_v1  ;;  %2840 = vmatpush3.bf16.msra.mxu0 %v4678_v0 }
 0x150   : > { %2931 = vmatprep.subr.bf16.mxu0 %v4671_v4 }
 0x152   : > { %2863 = vmatpush3.bf16.msra.mxu1 %v4679_v30  ;;  %2160 = vmatmul.mubr.bf16.vlgmr.msra.gmra.mxu0 %v4190_v53 }
 0x153   : > { %2864 = vmatprep.subr.bf16.mxu1 %v2116_v40  ;;  %2932 = vmatpush3.bf16.msra.mxu0 %v2342_v13 }
 0x154   : > { %2933 = vmatprep.subr.bf16.mxu0 %v4671_v4  ;;  %2935 = vmatprep.mubr.msk.bf16.mxu0 %vm3064_vm7, %v4671_v4 }
 0x156   : > { %2865 = vmatpush3.bf16.msra.mxu1 %v4680_v39 }
 0x157   : > { %2934 = vmatpush3.bf16.msra.mxu0 %v2340_v62 }
 0x159   : > { %2378 = vmatmul.mubr.bf16.vlgmr.msra.gmra.mxu1 %v4190_v53 }
 0x15a   : > { %2936 = vmatmul.mubr.msk.bf16.vlgmr.msra.gmra.mxu0 %vm686_vm8, %v4021_v15 }
 0x166   : > { %v764_v46 = vpop.f32.mrf.mxu1 }
 0x168   : > { %v2881_v33 = vpop.f32.mrf.mxu1 }
 0x16a   : > { %v767_v44 = vpop.f32.mrf.mxu1 }
 0x16c   : > { %v2882_v14 = vpop.f32.mrf.mxu1 }
 0x19a   : > { %v2691_v9 = vpop.f32.mrf.mxu0 }
 0x19c   : > { %v2692_v41 = vpop.f32.mrf.mxu0 }
 0x19d   : > { %v2693_v18 = vadd.f32 %v2692_v41, %v2691_v9 }
 0x19e   : > { %v2694_v26 = vpop.f32.mrf.mxu0 }
 0x19f   : > { %v725_v15 = vadd.f32 %v2693_v18, %v4358_v56 }
 0x1a0   : > { %v2695_v28 = vpop.f32.mrf.mxu0 }
 0x1a1   : > { %v2716_v55 = vpop.f32.mrf.mxu1  ;;  %v765_v34 = vadd.f32 %v764_v46, %v725_v15 }
 0x1a2   : > { %v983_v45 = vpop.f32.mrf.mxu0 }
 0x1a3   : > { %v771_v24 = vcombine.high %v765_v34, %v765_v34  ;;  %v778_v32 = vrot.slane %v765_v34, %v4361_v16  ;;  %v2717_v58 = vpop.f32.mrf.mxu1 }
 0x1a4   : > { %v2718_v49 = vadd.f32 %v2717_v58, %v2716_v55  ;;  %v2889_v59 = vpop.f32.mrf.mxu0 }
 0x1a5   : > { %v785_v3 = vrot.slane %v771_v24, %v4361_v16  ;;  %v786_v53 = vcombine.high %v778_v32, %v778_v32  ;;  %v794_v8 = vrot.slane %v778_v32, %v4361_v16  ;;  %v2719_v31 = vpop.f32.mrf.mxu1 }
 0x1a6   : > { %v944_v4 = vadd.f32 %v2718_v49, %v4358_v56  ;;  %v986_v11 = vpop.f32.mrf.mxu0 }
 0x1a7   : > { %v787_v12 = vcombine.high %v785_v3, %v785_v3  ;;  %v801_v22 = vrot.slane %v785_v3, %v4361_v16  ;;  %v808_v5 = vrot.slane %v786_v53, %v4361_v16  ;;  %v816_v43 = vcombine.high %v794_v8, %v794_v8  ;;  %829 = vst.msk [vmem:[%s4368_s14] sm:$0x1] %vm828_vm9, %v794_v8  ;;  %v2720_v6 = vpop.f32.mrf.mxu1 }
 0x1a8   : > { %v984_v35 = vadd.f32 %v983_v45, %v944_v4  ;;  %v2890_v38 = vpop.f32.mrf.mxu0 }
 0x1a9   : > { %v815_v7 = vrot.slane %v787_v12, %v4361_v16  ;;  %v817_v63 = vcombine.high %v801_v22, %v801_v22  ;;  %v818_v42 = vcombine.high %v808_v5, %v808_v5  ;;  %830 = vst.msk [vmem:[%s4368_s14 + $0x8] sm:$0x1] %vm828_vm9, %v808_v5  ;;  %831 = vst.msk [vmem:[%s4368_s14 + $0x10] sm:$0x1] %vm828_vm9, %v816_v43  ;;  %v1201_v47 = vpop.f32.mrf.mxu1 }
 0x1aa   : > { %833 = vst.msk [vmem:[%s4368_s14 + $0x20] sm:$0x1] %vm828_vm9, %v801_v22  ;;  %v990_v25 = vcombine.high %v984_v35, %v984_v35  ;;  %v997_v51 = vrot.slane %v984_v35, %v4361_v16 }
 0x1ab   : > { %v819_v17 = vcombine.high %v815_v7, %v815_v7  ;;  %832 = vst.msk [vmem:[%s4368_s14 + $0x18] sm:$0x1] %vm828_vm9, %v818_v42  ;;  %834 = vst.msk [vmem:[%s4368_s14 + $0x28] sm:$0x1] %vm828_vm9, %v815_v7  ;;  %v2897_v48 = vpop.f32.mrf.mxu1 }
 0x1ac   : > { %835 = vst.msk [vmem:[%s4368_s14 + $0x30] sm:$0x1] %vm828_vm9, %v817_v63  ;;  %v1004_v60 = vrot.slane %v990_v25, %v4361_v16  ;;  %v1005_v57 = vcombine.high %v997_v51, %v997_v51  ;;  %v1013_v52 = vrot.slane %v997_v51, %v4361_v16 }
 0x1ad   : > { %836 = vst.msk [vmem:[%s4368_s14 + $0x38] sm:$0x1] %vm828_vm9, %v819_v17  ;;  %v1204_v20 = vpop.f32.mrf.mxu1 }
 0x1ae   : > { %v1006_v0 = vcombine.high %v1004_v60, %v1004_v60  ;;  %v1020_v30 = vrot.slane %v1004_v60, %v4361_v16  ;;  %v1027_v39 = vrot.slane %v1005_v57, %v4361_v16  ;;  %v1035_v27 = vcombine.high %v1013_v52, %v1013_v52  ;;  %1047 = vst.msk [vmem:[%s4368_s14 + $0x1] sm:$0x1] %vm828_vm9, %v1013_v52 }
 0x1af   : > { %v2898_v37 = vpop.f32.mrf.mxu1 }
 0x1b0   : > { %v1034_v21 = vrot.slane %v1006_v0, %v4361_v16  ;;  %v1036_v1 = vcombine.high %v1020_v30, %v1020_v30  ;;  %v1037_v29 = vcombine.high %v1027_v39, %v1027_v39  ;;  %1048 = vst.msk [vmem:[%s4368_s14 + $0x9] sm:$0x1] %vm828_vm9, %v1027_v39  ;;  %1049 = vst.msk [vmem:[%s4368_s14 + $0x11] sm:$0x1] %vm828_vm9, %v1035_v27 }
 0x1b1   : > { %1051 = vst.msk [vmem:[%s4368_s14 + $0x21] sm:$0x1] %vm828_vm9, %v1020_v30 }
 0x1b2   : > { %v1038_v40 = vcombine.high %v1034_v21, %v1034_v21  ;;  %1050 = vst.msk [vmem:[%s4368_s14 + $0x19] sm:$0x1] %vm828_vm9, %v1037_v29  ;;  %1052 = vst.msk [vmem:[%s4368_s14 + $0x29] sm:$0x1] %vm828_vm9, %v1034_v21 }
 0x1b3   : > { %1053 = vst.msk [vmem:[%s4368_s14 + $0x31] sm:$0x1] %vm828_vm9, %v1036_v1 }
 0x1b4   : > { %1054 = vst.msk [vmem:[%s4368_s14 + $0x39] sm:$0x1] %vm828_vm9, %v1038_v40 }
 0x1c2   : > { %v2741_v61 = vpop.f32.mrf.mxu0 }
 0x1c4   : > { %v2742_v2 = vpop.f32.mrf.mxu0 }
 0x1c5   : > { %v2743_v23 = vadd.f32 %v2742_v2, %v2741_v61 }
 0x1c6   : > { %v2744_v13 = vpop.f32.mrf.mxu0 }
 0x1c7   : > { %v1162_v62 = vadd.f32 %v2743_v23, %v4358_v56 }
 0x1c8   : > { %v2745_v46 = vpop.f32.mrf.mxu0 }
 0x1c9   : > { %v1202_v33 = vadd.f32 %v1201_v47, %v1162_v62  ;;  %v2766_v44 = vpop.f32.mrf.mxu1 }
 0x1ca   : > { %v1419_v14 = vpop.f32.mrf.mxu0 }
 0x1cb   : > { %v1208_v54 = vcombine.high %v1202_v33, %v1202_v33  ;;  %v1215_v19 = vrot.slane %v1202_v33, %v4361_v16  ;;  %v2767_v10 = vpop.f32.mrf.mxu1 }
 0x1cc   : > { %v2768_v9 = vadd.f32 %v2767_v10, %v2766_v44  ;;  %v2905_v36 = vpop.f32.mrf.mxu0 }
 0x1cd   : > { %v1222_v50 = vrot.slane %v1208_v54, %v4361_v16  ;;  %v1223_v41 = vcombine.high %v1215_v19, %v1215_v19  ;;  %v1231_v18 = vrot.slane %v1215_v19, %v4361_v16  ;;  %v2769_v26 = vpop.f32.mrf.mxu1 }
 0x1ce   : > { %v1380_v15 = vadd.f32 %v2768_v9, %v4358_v56  ;;  %v1422_v28 = vpop.f32.mrf.mxu0 }
 0x1cf   : > { %v1224_v55 = vcombine.high %v1222_v50, %v1222_v50  ;;  %v1238_v34 = vrot.slane %v1222_v50, %v4361_v16  ;;  %v1245_v45 = vrot.slane %v1223_v41, %v4361_v16  ;;  %v1253_v24 = vcombine.high %v1231_v18, %v1231_v18  ;;  %1265 = vst.msk [vmem:[%s4368_s14 + $0x2] sm:$0x1] %vm828_vm9, %v1231_v18  ;;  %v2770_v32 = vpop.f32.mrf.mxu1 }
 0x1d0   : > { %v1420_v58 = vadd.f32 %v1419_v14, %v1380_v15  ;;  %v2906_v49 = vpop.f32.mrf.mxu0 }
 0x1d1   : > { %v1252_v59 = vrot.slane %v1224_v55, %v4361_v16  ;;  %v1254_v3 = vcombine.high %v1238_v34, %v1238_v34  ;;  %v1255_v53 = vcombine.high %v1245_v45, %v1245_v45  ;;  %1266 = vst.msk [vmem:[%s4368_s14 + $0xa] sm:$0x1] %vm828_vm9, %v1245_v45  ;;  %1267 = vst.msk [vmem:[%s4368_s14 + $0x12] sm:$0x1] %vm828_vm9, %v1253_v24  ;;  %v1637_v8 = vpop.f32.mrf.mxu1 }
 0x1d2   : > { %1269 = vst.msk [vmem:[%s4368_s14 + $0x22] sm:$0x1] %vm828_vm9, %v1238_v34  ;;  %v1426_v31 = vcombine.high %v1420_v58, %v1420_v58  ;;  %v1433_v4 = vrot.slane %v1420_v58, %v4361_v16 }
 0x1d3   : > { %v1256_v11 = vcombine.high %v1252_v59, %v1252_v59  ;;  %1268 = vst.msk [vmem:[%s4368_s14 + $0x1a] sm:$0x1] %vm828_vm9, %v1255_v53  ;;  %1270 = vst.msk [vmem:[%s4368_s14 + $0x2a] sm:$0x1] %vm828_vm9, %v1252_v59  ;;  %v2913_v12 = vpop.f32.mrf.mxu1 }
 0x1d4   : > { %1271 = vst.msk [vmem:[%s4368_s14 + $0x32] sm:$0x1] %vm828_vm9, %v1254_v3  ;;  %v1440_v22 = vrot.slane %v1426_v31, %v4361_v16  ;;  %v1441_v5 = vcombine.high %v1433_v4, %v1433_v4  ;;  %v1449_v43 = vrot.slane %v1433_v4, %v4361_v16 }
 0x1d5   : > { %1272 = vst.msk [vmem:[%s4368_s14 + $0x3a] sm:$0x1] %vm828_vm9, %v1256_v11  ;;  %v1640_v6 = vpop.f32.mrf.mxu1 }
 0x1d6   : > { %v1442_v35 = vcombine.high %v1440_v22, %v1440_v22  ;;  %v1456_v38 = vrot.slane %v1440_v22, %v4361_v16  ;;  %v1463_v7 = vrot.slane %v1441_v5, %v4361_v16  ;;  %v1471_v63 = vcombine.high %v1449_v43, %v1449_v43  ;;  %1483 = vst.msk [vmem:[%s4368_s14 + $0x3] sm:$0x1] %vm828_vm9, %v1449_v43 }
 0x1d7   : > { %v2914_v42 = vpop.f32.mrf.mxu1 }
 0x1d8   : > { %v1470_v47 = vrot.slane %v1442_v35, %v4361_v16  ;;  %v1472_v25 = vcombine.high %v1456_v38, %v1456_v38  ;;  %v1473_v51 = vcombine.high %v1463_v7, %v1463_v7  ;;  %1484 = vst.msk [vmem:[%s4368_s14 + $0xb] sm:$0x1] %vm828_vm9, %v1463_v7  ;;  %1485 = vst.msk [vmem:[%s4368_s14 + $0x13] sm:$0x1] %vm828_vm9, %v1471_v63 }
 0x1d9   : > { %1487 = vst.msk [vmem:[%s4368_s14 + $0x23] sm:$0x1] %vm828_vm9, %v1456_v38 }
 0x1da   : > { %v1474_v17 = vcombine.high %v1470_v47, %v1470_v47  ;;  %1486 = vst.msk [vmem:[%s4368_s14 + $0x1b] sm:$0x1] %vm828_vm9, %v1473_v51  ;;  %1488 = vst.msk [vmem:[%s4368_s14 + $0x2b] sm:$0x1] %vm828_vm9, %v1470_v47 }
 0x1db   : > { %1489 = vst.msk [vmem:[%s4368_s14 + $0x33] sm:$0x1] %vm828_vm9, %v1472_v25 }
 0x1dc   : > { %1490 = vst.msk [vmem:[%s4368_s14 + $0x3b] sm:$0x1] %vm828_vm9, %v1474_v17 }
 0x1ea   : > { %v2791_v48 = vpop.f32.mrf.mxu0 }
 0x1ec   : > { %v2792_v60 = vpop.f32.mrf.mxu0 }
 0x1ed   : > { %v2793_v57 = vadd.f32 %v2792_v60, %v2791_v48 }
 0x1ee   : > { %v2794_v52 = vpop.f32.mrf.mxu0 }
 0x1ef   : > { %v1598_v20 = vadd.f32 %v2793_v57, %v4358_v56 }
 0x1f0   : > { %v2795_v0 = vpop.f32.mrf.mxu0 }
 0x1f1   : > { %v1638_v30 = vadd.f32 %v1637_v8, %v1598_v20  ;;  %v2816_v39 = vpop.f32.mrf.mxu1 }
 0x1f2   : > { %v1855_v27 = vpop.f32.mrf.mxu0 }
 0x1f3   : > { %v1644_v37 = vcombine.high %v1638_v30, %v1638_v30  ;;  %v1651_v21 = vrot.slane %v1638_v30, %v4361_v16  ;;  %v2817_v1 = vpop.f32.mrf.mxu1 }
 0x1f4   : > { %v2818_v29 = vadd.f32 %v2817_v1, %v2816_v39  ;;  %v2921_v40 = vpop.f32.mrf.mxu0 }
 0x1f5   : > { %v1658_v61 = vrot.slane %v1644_v37, %v4361_v16  ;;  %v1659_v2 = vcombine.high %v1651_v21, %v1651_v21  ;;  %v1667_v23 = vrot.slane %v1651_v21, %v4361_v16  ;;  %v2819_v13 = vpop.f32.mrf.mxu1 }
 0x1f6   : > { %v1816_v62 = vadd.f32 %v2818_v29, %v4358_v56  ;;  %v1858_v46 = vpop.f32.mrf.mxu0 }
 0x1f7   : > { %v1660_v33 = vcombine.high %v1658_v61, %v1658_v61  ;;  %v1674_v44 = vrot.slane %v1658_v61, %v4361_v16  ;;  %v1681_v14 = vrot.slane %v1659_v2, %v4361_v16  ;;  %v1689_v54 = vcombine.high %v1667_v23, %v1667_v23  ;;  %1701 = vst.msk [vmem:[%s4368_s14 + $0x4] sm:$0x1] %vm828_vm9, %v1667_v23  ;;  %v2820_v19 = vpop.f32.mrf.mxu1 }
 0x1f8   : > { %v1856_v10 = vadd.f32 %v1855_v27, %v1816_v62  ;;  %v2922_v9 = vpop.f32.mrf.mxu0 }
 0x1f9   : > { %v1688_v36 = vrot.slane %v1660_v33, %v4361_v16  ;;  %v1690_v50 = vcombine.high %v1674_v44, %v1674_v44  ;;  %v1691_v41 = vcombine.high %v1681_v14, %v1681_v14  ;;  %1702 = vst.msk [vmem:[%s4368_s14 + $0xc] sm:$0x1] %vm828_vm9, %v1681_v14  ;;  %1703 = vst.msk [vmem:[%s4368_s14 + $0x14] sm:$0x1] %vm828_vm9, %v1689_v54  ;;  %v2201_v18 = vpop.f32.mrf.mxu1 }
 0x1fa   : > { %1705 = vst.msk [vmem:[%s4368_s14 + $0x24] sm:$0x1] %vm828_vm9, %v1674_v44  ;;  %v1862_v26 = vcombine.high %v1856_v10, %v1856_v10  ;;  %v1869_v15 = vrot.slane %v1856_v10, %v4361_v16 }
 0x1fb   : > { %v1692_v28 = vcombine.high %v1688_v36, %v1688_v36  ;;  %1704 = vst.msk [vmem:[%s4368_s14 + $0x1c] sm:$0x1] %vm828_vm9, %v1691_v41  ;;  %1706 = vst.msk [vmem:[%s4368_s14 + $0x2c] sm:$0x1] %vm828_vm9, %v1688_v36  ;;  %v2929_v55 = vpop.f32.mrf.mxu1 }
 0x1fc   : > { %1707 = vst.msk [vmem:[%s4368_s14 + $0x34] sm:$0x1] %vm828_vm9, %v1690_v50  ;;  %v1876_v34 = vrot.slane %v1862_v26, %v4361_v16  ;;  %v1877_v45 = vcombine.high %v1869_v15, %v1869_v15  ;;  %v1885_v24 = vrot.slane %v1869_v15, %v4361_v16 }
 0x1fd   : > { %1708 = vst.msk [vmem:[%s4368_s14 + $0x3c] sm:$0x1] %vm828_vm9, %v1692_v28  ;;  %v2204_v32 = vpop.f32.mrf.mxu1 }
 0x1fe   : > { %v1878_v58 = vcombine.high %v1876_v34, %v1876_v34  ;;  %v1892_v49 = vrot.slane %v1876_v34, %v4361_v16  ;;  %v1899_v59 = vrot.slane %v1877_v45, %v4361_v16  ;;  %v1907_v3 = vcombine.high %v1885_v24, %v1885_v24  ;;  %1919 = vst.msk [vmem:[%s4368_s14 + $0x5] sm:$0x1] %vm828_vm9, %v1885_v24 }
 0x1ff   : > { %v2930_v53 = vpop.f32.mrf.mxu1 }
 0x200   : > { %v1906_v8 = vrot.slane %v1878_v58, %v4361_v16  ;;  %v1908_v31 = vcombine.high %v1892_v49, %v1892_v49  ;;  %v1909_v4 = vcombine.high %v1899_v59, %v1899_v59  ;;  %1920 = vst.msk [vmem:[%s4368_s14 + $0xd] sm:$0x1] %vm828_vm9, %v1899_v59  ;;  %1921 = vst.msk [vmem:[%s4368_s14 + $0x15] sm:$0x1] %vm828_vm9, %v1907_v3 }
 0x201   : > { %1923 = vst.msk [vmem:[%s4368_s14 + $0x25] sm:$0x1] %vm828_vm9, %v1892_v49 }
 0x202   : > { %v1910_v11 = vcombine.high %v1906_v8, %v1906_v8  ;;  %1922 = vst.msk [vmem:[%s4368_s14 + $0x1d] sm:$0x1] %vm828_vm9, %v1909_v4  ;;  %1924 = vst.msk [vmem:[%s4368_s14 + $0x2d] sm:$0x1] %vm828_vm9, %v1906_v8 }
 0x203   : > { %1925 = vst.msk [vmem:[%s4368_s14 + $0x35] sm:$0x1] %vm828_vm9, %v1908_v31 }
 0x204   : > { %1926 = vst.msk [vmem:[%s4368_s14 + $0x3d] sm:$0x1] %vm828_vm9, %v1910_v11 }
 0x212   : > { %v2841_v12 = vpop.f32.mrf.mxu0 }
 0x214   : > { %v2842_v22 = vpop.f32.mrf.mxu0 }
 0x215   : > { %v2843_v5 = vadd.f32 %v2842_v22, %v2841_v12 }
 0x216   : > { %v2844_v43 = vpop.f32.mrf.mxu0 }
 0x217   : > { %v2162_v6 = vadd.f32 %v2843_v5, %v4358_v56 }
 0x218   : > { %v2845_v35 = vpop.f32.mrf.mxu0 }
 0x219   : > { %v2202_v38 = vadd.f32 %v2201_v18, %v2162_v6  ;;  %v2866_v7 = vpop.f32.mrf.mxu1 }
 0x21a   : > { %v2419_v63 = vpop.f32.mrf.mxu0 }
 0x21b   : > { %v2208_v42 = vcombine.high %v2202_v38, %v2202_v38  ;;  %v2215_v47 = vrot.slane %v2202_v38, %v4361_v16  ;;  %v2867_v25 = vpop.f32.mrf.mxu1 }
 0x21c   : > { %v2868_v51 = vadd.f32 %v2867_v25, %v2866_v7  ;;  %v2937_v17 = vpop.f32.mrf.mxu0 }
 0x21d   : > { %v2222_v48 = vrot.slane %v2208_v42, %v4361_v16  ;;  %v2223_v60 = vcombine.high %v2215_v47, %v2215_v47  ;;  %v2231_v57 = vrot.slane %v2215_v47, %v4361_v16  ;;  %v2869_v52 = vpop.f32.mrf.mxu1 }
 0x21e   : > { %v2380_v20 = vadd.f32 %v2868_v51, %v4358_v56  ;;  %v2422_v0 = vpop.f32.mrf.mxu0 }
 0x21f   : > { %v2224_v30 = vcombine.high %v2222_v48, %v2222_v48  ;;  %v2238_v39 = vrot.slane %v2222_v48, %v4361_v16  ;;  %v2245_v27 = vrot.slane %v2223_v60, %v4361_v16  ;;  %v2253_v37 = vcombine.high %v2231_v57, %v2231_v57  ;;  %2265 = vst.msk [vmem:[%s4368_s14 + $0x6] sm:$0x1] %vm828_vm9, %v2231_v57  ;;  %v2870_v21 = vpop.f32.mrf.mxu1 }
 0x220   : > { %v2420_v1 = vadd.f32 %v2419_v63, %v2380_v20  ;;  %v2938_v29 = vpop.f32.mrf.mxu0 }
 0x221   : > { %v2252_v40 = vrot.slane %v2224_v30, %v4361_v16  ;;  %v2254_v61 = vcombine.high %v2238_v39, %v2238_v39  ;;  %v2255_v56 = vcombine.high %v2245_v27, %v2245_v27  ;;  %2266 = vst.msk [vmem:[%s4368_s14 + $0xe] sm:$0x1] %vm828_vm9, %v2245_v27  ;;  %2267 = vst.msk [vmem:[%s4368_s14 + $0x16] sm:$0x1] %vm828_vm9, %v2253_v37 }
 0x222   : > { %2269 = vst.msk [vmem:[%s4368_s14 + $0x26] sm:$0x1] %vm828_vm9, %v2238_v39  ;;  %v2426_v2 = vcombine.high %v2420_v1, %v2420_v1  ;;  %v2433_v23 = vrot.slane %v2420_v1, %v4361_v16 }
 0x223   : > { %v2256_v13 = vcombine.high %v2252_v40, %v2252_v40  ;;  %2268 = vst.msk [vmem:[%s4368_s14 + $0x1e] sm:$0x1] %vm828_vm9, %v2255_v56  ;;  %2270 = vst.msk [vmem:[%s4368_s14 + $0x2e] sm:$0x1] %vm828_vm9, %v2252_v40 }
 0x224   : > { %2271 = vst.msk [vmem:[%s4368_s14 + $0x36] sm:$0x1] %vm828_vm9, %v2254_v61  ;;  %v2440_v62 = vrot.slane %v2426_v2, %v4361_v16  ;;  %v2441_v46 = vcombine.high %v2433_v23, %v2433_v23  ;;  %v2449_v33 = vrot.slane %v2433_v23, %v4361_v16 }
 0x225   : > { %2272 = vst.msk [vmem:[%s4368_s14 + $0x3e] sm:$0x1] %vm828_vm9, %v2256_v13 }
 0x226   : > { %v2442_v44 = vcombine.high %v2440_v62, %v2440_v62  ;;  %v2456_v14 = vrot.slane %v2440_v62, %v4361_v16  ;;  %v2463_v54 = vrot.slane %v2441_v46, %v4361_v16  ;;  %v2471_v19 = vcombine.high %v2449_v33, %v2449_v33  ;;  %2483 = vst.msk [vmem:[%s4368_s14 + $0x7] sm:$0x1] %vm828_vm9, %v2449_v33 }
 0x228   : > { %v2470_v10 = vrot.slane %v2442_v44, %v4361_v16  ;;  %v2472_v9 = vcombine.high %v2456_v14, %v2456_v14  ;;  %v2473_v36 = vcombine.high %v2463_v54, %v2463_v54  ;;  %2484 = vst.msk [vmem:[%s4368_s14 + $0xf] sm:$0x1] %vm828_vm9, %v2463_v54  ;;  %2485 = vst.msk [vmem:[%s4368_s14 + $0x17] sm:$0x1] %vm828_vm9, %v2471_v19 }
 0x229   : > { %2487 = vst.msk [vmem:[%s4368_s14 + $0x27] sm:$0x1] %vm828_vm9, %v2456_v14 }
 0x22a   : > { %v2474_v50 = vcombine.high %v2470_v10, %v2470_v10  ;;  %2486 = vst.msk [vmem:[%s4368_s14 + $0x1f] sm:$0x1] %vm828_vm9, %v2473_v36  ;;  %2488 = vst.msk [vmem:[%s4368_s14 + $0x2f] sm:$0x1] %vm828_vm9, %v2470_v10 }
 0x22b   : > { %2489 = vst.msk [vmem:[%s4368_s14 + $0x37] sm:$0x1] %vm828_vm9, %v2472_v9 }
 0x22c   : > { %2490 = vst.msk [vmem:[%s4368_s14 + $0x3f] sm:$0x1] %vm828_vm9, %v2474_v50 }
 0x22d PF: > { %s14_s17 = sadd.s32 1, %s3059_s17   ;;  %s4682_s15 = smov %s3055_s16 }
 0x22e   : > { %p11_p7 = scmp.ge.s32.totalorder %s14_s17, 4   ;;  %s4683_s16 = smov %s4685_s18 }
 0x230   :  { %13 = sbr.rel (!%p11_p7) target bundleno = 2 (0x2), region = 71 }

</bundles_post_ra>
